<compile_context>
chip_gen: v7x
topology: tpu7x:2x2x1
jax: 0.10.0
libtpu: 0.0.40
codegen_flags: <defaults>
</compile_context>

<pallas_src>
import functools

import jax
import jax.numpy as jnp
import numpy as np
from jax.experimental import pallas as pl
from jax.experimental.pallas import tpu as pltpu


# ------------------------------------------------------------------
# One fused kernel per batch element:
#   conv pyramid (per-tap matmuls, VMEM-resident) -> m (P,1)
#   -> L2-norm(x) -> soft-assign softmax -> CRN reweighting
#   -> NetVLAD residual aggregation -> normalizations
# ------------------------------------------------------------------
def _crn_fused_kernel(x_ref, wA_ref, bA_ref, wB_ref, bB_ref, w33_ref, b33_ref,
                      wacc1_ref, wacc2_ref, wacc3_ref, bacc_ref,
                      wassign_ref, cent_ref,
                      out_ref, padx_ref, padh_ref, *, H, W, C, K):
    P = H * W
    mmdt = wA_ref.dtype            # matmul-operand dtype (f32 or bf16)

    # --- zero ONLY the 4 halo border strips; interiors are overwritten
    #     before every read.  Done every grid step so megacore partitioning
    #     (v7x) cannot leave a core with an un-initialized border.
    def zero_border(pad_ref, cp):
        z_row = jnp.zeros((2, W + 4, cp), pad_ref.dtype)
        z_col = jnp.zeros((H, 2, cp), pad_ref.dtype)
        pad_ref[0:2, :, :] = z_row
        pad_ref[H + 2:H + 4, :, :] = z_row
        pad_ref[2:H + 2, 0:2, :] = z_col
        pad_ref[2:H + 2, W + 2:W + 4, :] = z_col

    zero_border(padx_ref, C)
    zero_border(padh_ref, 64)

    def conv_dil2(pad_ref, src, w_ref, b_row, cin, cout):
        # 'same' 3x3 conv, dilation=2, padding=2, fused bias + ReLU.
        # Per-tap accumulation: only one (P,cin) tap + the (P,cout) f32
        # accumulator are live at a time (no (P, 9*cin) im2col concat).
        pad_ref[2:H + 2, 2:W + 2, 0:cin] = (
            src.reshape(H, W, cin).astype(pad_ref.dtype))
        acc = None
        for kh in range(3):
            for kw in range(3):
                tap = pad_ref[kh * 2:kh * 2 + H, kw * 2:kw * 2 + W, 0:cin]
                d = jnp.dot(tap.reshape(P, cin), w_ref[kh * 3 + kw],
                            preferred_element_type=jnp.float32)
                acc = d if acc is None else acc + d
        return jnp.maximum(acc + b_row, 0.0)                       # (P, cout) f32

    x = x_ref[0]                                                   # (P, C) f32

    # ---- conv pyramid (all intermediates stay in VMEM) -------------------
    # layer 1: conv3_1 | conv2_1 | conv1 fused (shared input) -> (P, 96)
    l1 = conv_dil2(padx_ref, x, wA_ref, bA_ref[...], C, 96)
    # layer 2: conv3_2 | conv2_2 fused (block-diag (9,64,64) weight) -> (P, 64)
    l2 = conv_dil2(padh_ref, l1[:, 0:64], wB_ref, bB_ref[...], 64, 64)
    # layer 3: conv3_3 (reuses the first 32 channels of the 64-ch halo scratch)
    o3 = conv_dil2(padh_ref, l2[:, 0:32], w33_ref, b33_ref[...], 32, 20)
    o1 = l1[:, 64:96]
    o2 = l2[:, 32:64]

    # accumulate 1x1 conv: w_acc split in the wrapper -> no (P,84) feat concat
    m = (jnp.dot(o1, wacc1_ref[...], preferred_element_type=jnp.float32)
         + jnp.dot(o2, wacc2_ref[...], preferred_element_type=jnp.float32)
         + jnp.dot(o3, wacc3_ref[...], preferred_element_type=jnp.float32)
         + bacc_ref[...])                                          # (P, 1)

    # F.normalize(x, p=2, dim=1): rsqrt-based, eps equivalent to 1e-12 on norm
    xn = x * jax.lax.rsqrt(jnp.maximum(jnp.sum(x * x, axis=1, keepdims=True),
                                       1e-24))

    # soft-assignment 1x1 conv (no bias) + softmax over clusters + CRN weight
    s = jnp.dot(xn.astype(mmdt), wassign_ref[...],
                preferred_element_type=jnp.float32)                # (P, K)
    s = s - jnp.max(s, axis=1, keepdims=True)
    e = jnp.exp(s)
    a = e / jnp.sum(e, axis=1, keepdims=True)                      # exact denom
    a = a * m                                                      # (P, K)

    # NetVLAD: agg[k,c] = sum_p a[p,k]*xn[p,c] ; asum[k] = sum_p a[p,k]
    tn = (((0,), (0,)), ((), ()))        # contract the pixel dim of both
    agg = jax.lax.dot_general(a.astype(mmdt), xn.astype(mmdt), tn,
                              preferred_element_type=jnp.float32)  # (K, C)
    asum = jax.lax.dot_general(a, jnp.ones((P, 1), jnp.float32), tn,
                               preferred_element_type=jnp.float32)  # (K, 1)
    vlad = agg - cent_ref[...] * asum                              # (K, C)

    # intra-cluster L2 norm, then global L2 norm of the flattened vector
    vlad = vlad * jax.lax.rsqrt(
        jnp.maximum(jnp.sum(vlad * vlad, axis=1, keepdims=True), 1e-24))
    vlad = vlad * jax.lax.rsqrt(jnp.maximum(jnp.sum(vlad * vlad), 1e-24))
    out_ref[0] = vlad


# ------------------------------------------------------------------
# VMEM budget estimate for the per-step working set (review item: set an
# explicit vmem_limit_bytes; matters on v5e's 16 MiB scoped default).
# ------------------------------------------------------------------
def _vmem_limit_bytes(P, Cf, K, H, W, mm_itemsize):
    f32 = 4
    pad = (H + 4) * (W + 4)
    est = (
        2 * P * Cf * f32                                     # dbl-buffered input
        + 2 * K * Cf * f32                                   # dbl-buffered output
        + 2 * (9 * Cf * 96 + 9 * 64 * 64 + 9 * 32 * 20 + Cf * K) * mm_itemsize
        + 2 * (96 + 64 + 20 + 84 + 1 + K * Cf) * f32         # biases/w_acc/centroids
        + pad * (Cf + 64) * mm_itemsize                      # halo scratch
        + P * (96 + 64 + 20 + 2 * Cf + 3 * K + 64) * f32     # live activations
    )
    return int(min(60 * 2 ** 20, max(32 * 2 ** 20, 2 * est)))


# ------------------------------------------------------------------
# Wrapper: reorder/fuse weights, launch one fused kernel (grid over batch)
# ------------------------------------------------------------------
def crn_layer_forward(x, p, matmul_dtype=jnp.float32):
    # x: (N, H, W, Cf) NHWC.  matmul_dtype=jnp.bfloat16 is the v6e/v7x
    # production lever (MXU-operand cast only; VPU math stays f32).
    N, H, W, Cf = x.shape
    P = H * W
    K = p['w_assign'].shape[-1]

    # layer 1: [conv3_1 | conv2_1 | conv1] so the 64 channels feeding the
    # fused second layer land at lane offset 0.
    wA = jnp.concatenate([p['w3_1'], p['w2_1'], p['w1']],
                         axis=-1).reshape(9, Cf, 96).astype(matmul_dtype)
    bA = jnp.concatenate([p['b3_1'], p['b2_1'], p['b1']]).reshape(1, 96)

    # layer 2: block-diagonal fusion of conv3_2 (cols 0:32) and conv2_2 (32:64)
    wB = jnp.zeros((3, 3, 64, 64), jnp.float32)
    wB = wB.at[:, :, 0:32, 0:32].set(p['w3_2'])
    wB = wB.at[:, :, 32:64, 32:64].set(p['w2_2'])
    wB = wB.reshape(9, 64, 64).astype(matmul_dtype)
    bB = jnp.concatenate([p['b3_2'], p['b2_2']]).reshape(1, 64)

    w33 = p['w3_3'].reshape(9, 32, 20).astype(matmul_dtype)
    b33 = p['b3_3'].reshape(1, 20)

    # split accumulate weight (torch concat order: o1 | o2 | o3)
    wacc1 = p['w_acc'][0:32]
    wacc2 = p['w_acc'][32:64]
    wacc3 = p['w_acc'][64:84]
    bacc = p['b_acc']
    wassign = p['w_assign'].astype(matmul_dtype)
    cent = p['centroids']

    kern = functools.partial(_crn_fused_kernel, H=H, W=W, C=Cf, K=K)

    def rep(*shape):  # full-array block, replicated across the batch grid
        return pl.BlockSpec(shape, lambda n, _l=len(shape): (0,) * _l)

    out = pl.pallas_call(
        kern,
        out_shape=jax.ShapeDtypeStruct((N, K, Cf), jnp.float32),
        grid=(N,),
        in_specs=[
            pl.BlockSpec((1, P, Cf), lambda n: (n, 0, 0)),
            rep(9, Cf, 96), rep(1, 96),
            rep(9, 64, 64), rep(1, 64),
            rep(9, 32, 20), rep(1, 20),
            rep(32, 1), rep(32, 1), rep(20, 1), rep(1, 1),
            rep(Cf, K), rep(K, Cf),
        ],
        out_specs=pl.BlockSpec((1, K, Cf), lambda n: (n, 0, 0)),
        scratch_shapes=[
            pltpu.VMEM((H + 4, W + 4, Cf), matmul_dtype),   # halo pad for x
            pltpu.VMEM((H + 4, W + 4, 64), matmul_dtype),   # shared 64-ch halo pad
        ],
        compiler_params=pltpu.CompilerParams(
            dimension_semantics=("parallel",),
            vmem_limit_bytes=_vmem_limit_bytes(
                P, Cf, K, H, W, jnp.dtype(matmul_dtype).itemsize)),
    )(x.reshape(N, P, Cf), wA, bA, wB, bB, w33, b33,
      wacc1, wacc2, wacc3, bacc, wassign, cent)
    return out.reshape(N, K * Cf)


# ------------------------------------------------------------------
# Pure-JAX reference (for correctness check)
# ------------------------------------------------------------------
def reference_forward(x, p):
    def conv(h, w, b):
        y = jax.lax.conv_general_dilated(
            h, w, window_strides=(1, 1), padding=((2, 2), (2, 2)),
            rhs_dilation=(2, 2), dimension_numbers=('NHWC', 'HWIO', 'NHWC'))
        return jax.nn.relu(y + b)

    N, H, W, Cf = x.shape
    o1 = conv(x, p['w1'], p['b1'])
    o2 = conv(conv(x, p['w2_1'], p['b2_1']), p['w2_2'], p['b2_2'])
    o3 = conv(conv(conv(x, p['w3_1'], p['b3_1']), p['w3_2'], p['b3_2']),
              p['w3_3'], p['b3_3'])
    feat = jnp.concatenate([o1, o2, o3], axis=-1).reshape(N, H * W, 84)
    m = feat @ p['w_acc'] + p['b_acc']                       # (N, P, 1)
    xf = x.reshape(N, H * W, Cf)
    xn = xf / jnp.maximum(jnp.linalg.norm(xf, axis=-1, keepdims=True), 1e-12)
    s = jax.nn.softmax(xn @ p['w_assign'], axis=-1)          # (N, P, K)
    a = s * m
    agg = jnp.einsum('npk,npc->nkc', a, xn)
    asum = jnp.sum(a, axis=1)                                # (N, K)
    vlad = agg - p['centroids'][None] * asum[:, :, None]
    vlad = vlad / jnp.maximum(jnp.linalg.norm(vlad, axis=-1, keepdims=True), 1e-12)
    flat = vlad.reshape(N, -1)
    return flat / jnp.maximum(jnp.linalg.norm(flat, axis=-1, keepdims=True), 1e-12)


# ------------------------------------------------------------------
# Deterministic parameter init (synthetic, matches nn.Module shapes)
# ------------------------------------------------------------------
def init_params(key, Cf, K):
    ks = jax.random.split(key, 16)
    w = lambda k, s: jax.random.normal(k, s, jnp.float32) * 0.1
    p = {
        'w1':   w(ks[0], (3, 3, Cf, 32)),  'b1':   w(ks[1], (32,)),
        'w2_1': w(ks[2], (3, 3, Cf, 32)),  'b2_1': w(ks[3], (32,)),
        'w2_2': w(ks[4], (3, 3, 32, 32)),  'b2_2': w(ks[5], (32,)),
        'w3_1': w(ks[6], (3, 3, Cf, 32)),  'b3_1': w(ks[7], (32,)),
        'w3_2': w(ks[8], (3, 3, 32, 32)),  'b3_2': w(ks[9], (32,)),
        'w3_3': w(ks[10], (3, 3, 32, 20)), 'b3_3': w(ks[11], (20,)),
        'w_acc': w(ks[12], (84, 1)),
        'b_acc': w(ks[13], (1,)).reshape(1, 1),
        'w_assign': w(ks[14], (Cf, K)),                      # 1x1 conv, no bias
        'centroids': jax.random.uniform(ks[15], (K, Cf), jnp.float32),  # torch.rand
    }
    return p


if __name__ == "__main__":
    key = jax.random.PRNGKey(0)
    kx, kp = jax.random.split(key)
    N, H, W, Cf, K = 2, 16, 16, 4, 8   # features_dim=4, netvlad_n_clusters=8
    x = jax.random.normal(kx, (N, H, W, Cf), jnp.float32)
    params = init_params(kp, Cf, K)

    fwd = jax.jit(crn_layer_forward)
    out = jax.block_until_ready(fwd(x, params))              # (N, K*Cf)
    ref = jax.block_until_ready(reference_forward(x, params))
    # exact softmax denominator now (no approx reciprocal) -> tighter tolerance;
    # remaining diff is f32 accumulation-order noise (per-tap vs lax.conv).
    np.testing.assert_allclose(np.asarray(out), np.asarray(ref),
                               rtol=1e-3, atol=1e-5)
    print("KERNEL_OK")
</pallas_src>

<mosaic_0001>
module attributes {stable_mosaic.version = 11 : i64} {
  func.func @_crn_fused_kernel(%arg0: i32, %arg1: memref<1x256x4xf32, #tpu.memory_space<vmem>>, %arg2: memref<9x4x96xf32, #tpu.memory_space<vmem>>, %arg3: memref<1x96xf32, #tpu.memory_space<vmem>>, %arg4: memref<9x64x64xf32, #tpu.memory_space<vmem>>, %arg5: memref<1x64xf32, #tpu.memory_space<vmem>>, %arg6: memref<9x32x20xf32, #tpu.memory_space<vmem>>, %arg7: memref<1x20xf32, #tpu.memory_space<vmem>>, %arg8: memref<32x1xf32, #tpu.memory_space<vmem>>, %arg9: memref<32x1xf32, #tpu.memory_space<vmem>>, %arg10: memref<20x1xf32, #tpu.memory_space<vmem>>, %arg11: memref<1x1xf32, #tpu.memory_space<vmem>>, %arg12: memref<4x8xf32, #tpu.memory_space<vmem>>, %arg13: memref<8x4xf32, #tpu.memory_space<vmem>>, %arg14: memref<1x8x4xf32, #tpu.memory_space<vmem>>, %arg15: memref<20x20x4xf32, #tpu.memory_space<vmem>>, %arg16: memref<20x20x64xf32, #tpu.memory_space<vmem>>) attributes {dimension_semantics = [#tpu.dimension_semantics<parallel>], iteration_bounds = array<i64: 2>, scalar_prefetch = 0 : i64, scratch_operands = 2 : i64, tpu.core_type = #tpu.core_type<tc>, window_params = [{transform_indices = @transform_0, window_bounds = array<i64: 1, 256, 4>}, {pipeline_mode = #tpu.pipeline_mode<synchronous>, transform_indices = @transform_1, window_bounds = array<i64: 9, 4, 96>}, {pipeline_mode = #tpu.pipeline_mode<synchronous>, transform_indices = @transform_2, window_bounds = array<i64: 1, 96>}, {pipeline_mode = #tpu.pipeline_mode<synchronous>, transform_indices = @transform_3, window_bounds = array<i64: 9, 64, 64>}, {pipeline_mode = #tpu.pipeline_mode<synchronous>, transform_indices = @transform_4, window_bounds = array<i64: 1, 64>}, {pipeline_mode = #tpu.pipeline_mode<synchronous>, transform_indices = @transform_5, window_bounds = array<i64: 9, 32, 20>}, {pipeline_mode = #tpu.pipeline_mode<synchronous>, transform_indices = @transform_6, window_bounds = array<i64: 1, 20>}, {pipeline_mode = #tpu.pipeline_mode<synchronous>, transform_indices = @transform_7, window_bounds = array<i64: 32, 1>}, {pipeline_mode = #tpu.pipeline_mode<synchronous>, transform_indices = @transform_8, window_bounds = array<i64: 32, 1>}, {pipeline_mode = #tpu.pipeline_mode<synchronous>, transform_indices = @transform_9, window_bounds = array<i64: 20, 1>}, {pipeline_mode = #tpu.pipeline_mode<synchronous>, transform_indices = @transform_10, window_bounds = array<i64: 1, 1>}, {pipeline_mode = #tpu.pipeline_mode<synchronous>, transform_indices = @transform_11, window_bounds = array<i64: 4, 8>}, {pipeline_mode = #tpu.pipeline_mode<synchronous>, transform_indices = @transform_12, window_bounds = array<i64: 8, 4>}, {transform_indices = @transform_13, window_bounds = array<i64: 1, 8, 4>}]} {
    %cst = arith.constant 0.000000e+00 : f32
    %0 = vector.broadcast %cst : f32 to vector<2x20x4xf32>
    %cst_0 = arith.constant 0.000000e+00 : f32
    %1 = vector.broadcast %cst_0 : f32 to vector<16x2x4xf32>
    %c0 = arith.constant 0 : index
    %c0_1 = arith.constant 0 : index
    %c0_2 = arith.constant 0 : index
    %2 = vector.load %arg15[%c0, %c0_1, %c0_2] : memref<20x20x4xf32, #tpu.memory_space<vmem>>, vector<2x20x4xf32>
    tpu.vector_store %arg15[%c0, %c0_1, %c0_2], %0 {strides = array<i32>} : memref<20x20x4xf32, #tpu.memory_space<vmem>>, vector<2x20x4xf32>,
    %c18 = arith.constant 18 : index
    %c0_3 = arith.constant 0 : index
    %c0_4 = arith.constant 0 : index
    %3 = vector.load %arg15[%c18, %c0_3, %c0_4] : memref<20x20x4xf32, #tpu.memory_space<vmem>>, vector<2x20x4xf32>
    tpu.vector_store %arg15[%c18, %c0_3, %c0_4], %0 {strides = array<i32>} : memref<20x20x4xf32, #tpu.memory_space<vmem>>, vector<2x20x4xf32>,
    %c2 = arith.constant 2 : index
    %c0_5 = arith.constant 0 : index
    %c0_6 = arith.constant 0 : index
    %4 = vector.load %arg15[%c2, %c0_5, %c0_6] : memref<20x20x4xf32, #tpu.memory_space<vmem>>, vector<16x2x4xf32>
    tpu.vector_store %arg15[%c2, %c0_5, %c0_6], %1 {strides = array<i32>} : memref<20x20x4xf32, #tpu.memory_space<vmem>>, vector<16x2x4xf32>,
    %c2_7 = arith.constant 2 : index
    %c18_8 = arith.constant 18 : index
    %c0_9 = arith.constant 0 : index
    %5 = vector.load %arg15[%c2_7, %c18_8, %c0_9] : memref<20x20x4xf32, #tpu.memory_space<vmem>>, vector<16x2x4xf32>
    tpu.vector_store %arg15[%c2_7, %c18_8, %c0_9], %1 {strides = array<i32>} : memref<20x20x4xf32, #tpu.memory_space<vmem>>, vector<16x2x4xf32>,
    %cst_10 = arith.constant 0.000000e+00 : f32
    %6 = vector.broadcast %cst_10 : f32 to vector<2x20x64xf32>
    %cst_11 = arith.constant 0.000000e+00 : f32
    %7 = vector.broadcast %cst_11 : f32 to vector<16x2x64xf32>
    %c0_12 = arith.constant 0 : index
    %c0_13 = arith.constant 0 : index
    %c0_14 = arith.constant 0 : index
    %8 = vector.load %arg16[%c0_12, %c0_13, %c0_14] : memref<20x20x64xf32, #tpu.memory_space<vmem>>, vector<2x20x64xf32>
    tpu.vector_store %arg16[%c0_12, %c0_13, %c0_14], %6 {strides = array<i32>} : memref<20x20x64xf32, #tpu.memory_space<vmem>>, vector<2x20x64xf32>,
    %c18_15 = arith.constant 18 : index
    %c0_16 = arith.constant 0 : index
    %c0_17 = arith.constant 0 : index
    %9 = vector.load %arg16[%c18_15, %c0_16, %c0_17] : memref<20x20x64xf32, #tpu.memory_space<vmem>>, vector<2x20x64xf32>
    tpu.vector_store %arg16[%c18_15, %c0_16, %c0_17], %6 {strides = array<i32>} : memref<20x20x64xf32, #tpu.memory_space<vmem>>, vector<2x20x64xf32>,
    %c2_18 = arith.constant 2 : index
    %c0_19 = arith.constant 0 : index
    %c0_20 = arith.constant 0 : index
    %10 = vector.load %arg16[%c2_18, %c0_19, %c0_20] : memref<20x20x64xf32, #tpu.memory_space<vmem>>, vector<16x2x64xf32>
    tpu.vector_store %arg16[%c2_18, %c0_19, %c0_20], %7 {strides = array<i32>} : memref<20x20x64xf32, #tpu.memory_space<vmem>>, vector<16x2x64xf32>,
    %c2_21 = arith.constant 2 : index
    %c18_22 = arith.constant 18 : index
    %c0_23 = arith.constant 0 : index
    %11 = vector.load %arg16[%c2_21, %c18_22, %c0_23] : memref<20x20x64xf32, #tpu.memory_space<vmem>>, vector<16x2x64xf32>
    tpu.vector_store %arg16[%c2_21, %c18_22, %c0_23], %7 {strides = array<i32>} : memref<20x20x64xf32, #tpu.memory_space<vmem>>, vector<16x2x64xf32>,
    %c0_24 = arith.constant 0 : index
    %c0_25 = arith.constant 0 : index
    %c0_26 = arith.constant 0 : index
    %12 = vector.load %arg1[%c0_24, %c0_25, %c0_26] : memref<1x256x4xf32, #tpu.memory_space<vmem>>, vector<1x256x4xf32>
    %13 = vector.shape_cast %12 : vector<1x256x4xf32> to vector<256x4xf32>
    %c0_27 = arith.constant 0 : index
    %c0_28 = arith.constant 0 : index
    %14 = vector.load %arg3[%c0_27, %c0_28] : memref<1x96xf32, #tpu.memory_space<vmem>>, vector<1x96xf32>
    %15 = vector.shape_cast %13 : vector<256x4xf32> to vector<16x16x4xf32>
    %c2_29 = arith.constant 2 : index
    %c2_30 = arith.constant 2 : index
    %c0_31 = arith.constant 0 : index
    %16 = vector.load %arg15[%c2_29, %c2_30, %c0_31] : memref<20x20x4xf32, #tpu.memory_space<vmem>>, vector<16x16x4xf32>
    tpu.vector_store %arg15[%c2_29, %c2_30, %c0_31], %15 {strides = array<i32>} : memref<20x20x4xf32, #tpu.memory_space<vmem>>, vector<16x16x4xf32>,
    %c0_32 = arith.constant 0 : index
    %c0_33 = arith.constant 0 : index
    %c0_34 = arith.constant 0 : index
    %17 = vector.load %arg15[%c0_32, %c0_33, %c0_34] : memref<20x20x4xf32, #tpu.memory_space<vmem>>, vector<16x16x4xf32>
    %18 = vector.shape_cast %17 : vector<16x16x4xf32> to vector<256x4xf32>
    %c0_35 = arith.constant 0 : index
    %c0_36 = arith.constant 0 : index
    %c0_37 = arith.constant 0 : index
    %19 = vector.load %arg2[%c0_35, %c0_36, %c0_37] : memref<9x4x96xf32, #tpu.memory_space<vmem>>, vector<1x4x96xf32>
    %20 = vector.shape_cast %19 : vector<1x4x96xf32> to vector<4x96xf32>
    %cst_38 = arith.constant dense<0.000000e+00> : vector<256x96xf32>
    %21 = tpu.matmul %18, %20, %cst_38 {dimension_numbers = #tpu.dot_dimension_numbers<[1], [0], [0], [1], [0, 0, 1, 1], [], []>} : vector<256x4xf32>, vector<4x96xf32>, vector<256x96xf32> -> vector<256x96xf32>
    %c0_39 = arith.constant 0 : index
    %c2_40 = arith.constant 2 : index
    %c0_41 = arith.constant 0 : index
    %22 = vector.load %arg15[%c0_39, %c2_40, %c0_41] : memref<20x20x4xf32, #tpu.memory_space<vmem>>, vector<16x16x4xf32>
    %23 = vector.shape_cast %22 : vector<16x16x4xf32> to vector<256x4xf32>
    %c1 = arith.constant 1 : index
    %c0_42 = arith.constant 0 : index
    %c0_43 = arith.constant 0 : index
    %24 = vector.load %arg2[%c1, %c0_42, %c0_43] : memref<9x4x96xf32, #tpu.memory_space<vmem>>, vector<1x4x96xf32>
    %25 = vector.shape_cast %24 : vector<1x4x96xf32> to vector<4x96xf32>
    %cst_44 = arith.constant dense<0.000000e+00> : vector<256x96xf32>
    %26 = tpu.matmul %23, %25, %cst_44 {dimension_numbers = #tpu.dot_dimension_numbers<[1], [0], [0], [1], [0, 0, 1, 1], [], []>} : vector<256x4xf32>, vector<4x96xf32>, vector<256x96xf32> -> vector<256x96xf32>
    %27 = arith.addf %21, %26 : vector<256x96xf32>
    %c0_45 = arith.constant 0 : index
    %c4 = arith.constant 4 : index
    %c0_46 = arith.constant 0 : index
    %28 = vector.load %arg15[%c0_45, %c4, %c0_46] : memref<20x20x4xf32, #tpu.memory_space<vmem>>, vector<16x16x4xf32>
    %29 = vector.shape_cast %28 : vector<16x16x4xf32> to vector<256x4xf32>
    %c2_47 = arith.constant 2 : index
    %c0_48 = arith.constant 0 : index
    %c0_49 = arith.constant 0 : index
    %30 = vector.load %arg2[%c2_47, %c0_48, %c0_49] : memref<9x4x96xf32, #tpu.memory_space<vmem>>, vector<1x4x96xf32>
    %31 = vector.shape_cast %30 : vector<1x4x96xf32> to vector<4x96xf32>
    %cst_50 = arith.constant dense<0.000000e+00> : vector<256x96xf32>
    %32 = tpu.matmul %29, %31, %cst_50 {dimension_numbers = #tpu.dot_dimension_numbers<[1], [0], [0], [1], [0, 0, 1, 1], [], []>} : vector<256x4xf32>, vector<4x96xf32>, vector<256x96xf32> -> vector<256x96xf32>
    %33 = arith.addf %27, %32 : vector<256x96xf32>
    %c2_51 = arith.constant 2 : index
    %c0_52 = arith.constant 0 : index
    %c0_53 = arith.constant 0 : index
    %34 = vector.load %arg15[%c2_51, %c0_52, %c0_53] : memref<20x20x4xf32, #tpu.memory_space<vmem>>, vector<16x16x4xf32>
    %35 = vector.shape_cast %34 : vector<16x16x4xf32> to vector<256x4xf32>
    %c3 = arith.constant 3 : index
    %c0_54 = arith.constant 0 : index
    %c0_55 = arith.constant 0 : index
    %36 = vector.load %arg2[%c3, %c0_54, %c0_55] : memref<9x4x96xf32, #tpu.memory_space<vmem>>, vector<1x4x96xf32>
    %37 = vector.shape_cast %36 : vector<1x4x96xf32> to vector<4x96xf32>
    %cst_56 = arith.constant dense<0.000000e+00> : vector<256x96xf32>
    %38 = tpu.matmul %35, %37, %cst_56 {dimension_numbers = #tpu.dot_dimension_numbers<[1], [0], [0], [1], [0, 0, 1, 1], [], []>} : vector<256x4xf32>, vector<4x96xf32>, vector<256x96xf32> -> vector<256x96xf32>
    %39 = arith.addf %33, %38 : vector<256x96xf32>
    %c2_57 = arith.constant 2 : index
    %c2_58 = arith.constant 2 : index
    %c0_59 = arith.constant 0 : index
    %40 = vector.load %arg15[%c2_57, %c2_58, %c0_59] : memref<20x20x4xf32, #tpu.memory_space<vmem>>, vector<16x16x4xf32>
    %41 = vector.shape_cast %40 : vector<16x16x4xf32> to vector<256x4xf32>
    %c4_60 = arith.constant 4 : index
    %c0_61 = arith.constant 0 : index
    %c0_62 = arith.constant 0 : index
    %42 = vector.load %arg2[%c4_60, %c0_61, %c0_62] : memref<9x4x96xf32, #tpu.memory_space<vmem>>, vector<1x4x96xf32>
    %43 = vector.shape_cast %42 : vector<1x4x96xf32> to vector<4x96xf32>
    %cst_63 = arith.constant dense<0.000000e+00> : vector<256x96xf32>
    %44 = tpu.matmul %41, %43, %cst_63 {dimension_numbers = #tpu.dot_dimension_numbers<[1], [0], [0], [1], [0, 0, 1, 1], [], []>} : vector<256x4xf32>, vector<4x96xf32>, vector<256x96xf32> -> vector<256x96xf32>
    %45 = arith.addf %39, %44 : vector<256x96xf32>
    %c2_64 = arith.constant 2 : index
    %c4_65 = arith.constant 4 : index
    %c0_66 = arith.constant 0 : index
    %46 = vector.load %arg15[%c2_64, %c4_65, %c0_66] : memref<20x20x4xf32, #tpu.memory_space<vmem>>, vector<16x16x4xf32>
    %47 = vector.shape_cast %46 : vector<16x16x4xf32> to vector<256x4xf32>
    %c5 = arith.constant 5 : index
    %c0_67 = arith.constant 0 : index
    %c0_68 = arith.constant 0 : index
    %48 = vector.load %arg2[%c5, %c0_67, %c0_68] : memref<9x4x96xf32, #tpu.memory_space<vmem>>, vector<1x4x96xf32>
    %49 = vector.shape_cast %48 : vector<1x4x96xf32> to vector<4x96xf32>
    %cst_69 = arith.constant dense<0.000000e+00> : vector<256x96xf32>
    %50 = tpu.matmul %47, %49, %cst_69 {dimension_numbers = #tpu.dot_dimension_numbers<[1], [0], [0], [1], [0, 0, 1, 1], [], []>} : vector<256x4xf32>, vector<4x96xf32>, vector<256x96xf32> -> vector<256x96xf32>
    %51 = arith.addf %45, %50 : vector<256x96xf32>
    %c4_70 = arith.constant 4 : index
    %c0_71 = arith.constant 0 : index
    %c0_72 = arith.constant 0 : index
    %52 = vector.load %arg15[%c4_70, %c0_71, %c0_72] : memref<20x20x4xf32, #tpu.memory_space<vmem>>, vector<16x16x4xf32>
    %53 = vector.shape_cast %52 : vector<16x16x4xf32> to vector<256x4xf32>
    %c6 = arith.constant 6 : index
    %c0_73 = arith.constant 0 : index
    %c0_74 = arith.constant 0 : index
    %54 = vector.load %arg2[%c6, %c0_73, %c0_74] : memref<9x4x96xf32, #tpu.memory_space<vmem>>, vector<1x4x96xf32>
    %55 = vector.shape_cast %54 : vector<1x4x96xf32> to vector<4x96xf32>
    %cst_75 = arith.constant dense<0.000000e+00> : vector<256x96xf32>
    %56 = tpu.matmul %53, %55, %cst_75 {dimension_numbers = #tpu.dot_dimension_numbers<[1], [0], [0], [1], [0, 0, 1, 1], [], []>} : vector<256x4xf32>, vector<4x96xf32>, vector<256x96xf32> -> vector<256x96xf32>
    %57 = arith.addf %51, %56 : vector<256x96xf32>
    %c4_76 = arith.constant 4 : index
    %c2_77 = arith.constant 2 : index
    %c0_78 = arith.constant 0 : index
    %58 = vector.load %arg15[%c4_76, %c2_77, %c0_78] : memref<20x20x4xf32, #tpu.memory_space<vmem>>, vector<16x16x4xf32>
    %59 = vector.shape_cast %58 : vector<16x16x4xf32> to vector<256x4xf32>
    %c7 = arith.constant 7 : index
    %c0_79 = arith.constant 0 : index
    %c0_80 = arith.constant 0 : index
    %60 = vector.load %arg2[%c7, %c0_79, %c0_80] : memref<9x4x96xf32, #tpu.memory_space<vmem>>, vector<1x4x96xf32>
    %61 = vector.shape_cast %60 : vector<1x4x96xf32> to vector<4x96xf32>
    %cst_81 = arith.constant dense<0.000000e+00> : vector<256x96xf32>
    %62 = tpu.matmul %59, %61, %cst_81 {dimension_numbers = #tpu.dot_dimension_numbers<[1], [0], [0], [1], [0, 0, 1, 1], [], []>} : vector<256x4xf32>, vector<4x96xf32>, vector<256x96xf32> -> vector<256x96xf32>
    %63 = arith.addf %57, %62 : vector<256x96xf32>
    %c4_82 = arith.constant 4 : index
    %c4_83 = arith.constant 4 : index
    %c0_84 = arith.constant 0 : index
    %64 = vector.load %arg15[%c4_82, %c4_83, %c0_84] : memref<20x20x4xf32, #tpu.memory_space<vmem>>, vector<16x16x4xf32>
    %65 = vector.shape_cast %64 : vector<16x16x4xf32> to vector<256x4xf32>
    %c8 = arith.constant 8 : index
    %c0_85 = arith.constant 0 : index
    %c0_86 = arith.constant 0 : index
    %66 = vector.load %arg2[%c8, %c0_85, %c0_86] : memref<9x4x96xf32, #tpu.memory_space<vmem>>, vector<1x4x96xf32>
    %67 = vector.shape_cast %66 : vector<1x4x96xf32> to vector<4x96xf32>
    %cst_87 = arith.constant dense<0.000000e+00> : vector<256x96xf32>
    %68 = tpu.matmul %65, %67, %cst_87 {dimension_numbers = #tpu.dot_dimension_numbers<[1], [0], [0], [1], [0, 0, 1, 1], [], []>} : vector<256x4xf32>, vector<4x96xf32>, vector<256x96xf32> -> vector<256x96xf32>
    %69 = arith.addf %63, %68 : vector<256x96xf32>
    %70 = vector.broadcast %14 : vector<1x96xf32> to vector<256x96xf32>
    %71 = arith.addf %69, %70 : vector<256x96xf32>
    %cst_88 = arith.constant 0.000000e+00 : f32
    %72 = vector.broadcast %cst_88 : f32 to vector<256x96xf32>
    %73 = arith.maximumf %71, %72 : vector<256x96xf32>
    %74 = vector.extract_strided_slice %73 {offsets = [0, 0], sizes = [256, 64], strides = [1, 1]} : vector<256x96xf32> to vector<256x64xf32>
    %c0_89 = arith.constant 0 : index
    %c0_90 = arith.constant 0 : index
    %75 = vector.load %arg5[%c0_89, %c0_90] : memref<1x64xf32, #tpu.memory_space<vmem>>, vector<1x64xf32>
    %76 = vector.shape_cast %74 : vector<256x64xf32> to vector<16x16x64xf32>
    %c2_91 = arith.constant 2 : index
    %c2_92 = arith.constant 2 : index
    %c0_93 = arith.constant 0 : index
    %77 = vector.load %arg16[%c2_91, %c2_92, %c0_93] : memref<20x20x64xf32, #tpu.memory_space<vmem>>, vector<16x16x64xf32>
    tpu.vector_store %arg16[%c2_91, %c2_92, %c0_93], %76 {strides = array<i32>} : memref<20x20x64xf32, #tpu.memory_space<vmem>>, vector<16x16x64xf32>,
    %c0_94 = arith.constant 0 : index
    %c0_95 = arith.constant 0 : index
    %c0_96 = arith.constant 0 : index
    %78 = vector.load %arg16[%c0_94, %c0_95, %c0_96] : memref<20x20x64xf32, #tpu.memory_space<vmem>>, vector<16x16x64xf32>
    %79 = vector.shape_cast %78 : vector<16x16x64xf32> to vector<256x64xf32>
    %c0_97 = arith.constant 0 : index
    %c0_98 = arith.constant 0 : index
    %c0_99 = arith.constant 0 : index
    %80 = vector.load %arg4[%c0_97, %c0_98, %c0_99] : memref<9x64x64xf32, #tpu.memory_space<vmem>>, vector<1x64x64xf32>
    %81 = vector.shape_cast %80 : vector<1x64x64xf32> to vector<64x64xf32>
    %cst_100 = arith.constant dense<0.000000e+00> : vector<256x64xf32>
    %82 = tpu.matmul %79, %81, %cst_100 {dimension_numbers = #tpu.dot_dimension_numbers<[1], [0], [0], [1], [0, 0, 1, 1], [], []>} : vector<256x64xf32>, vector<64x64xf32>, vector<256x64xf32> -> vector<256x64xf32>
    %c0_101 = arith.constant 0 : index
    %c2_102 = arith.constant 2 : index
    %c0_103 = arith.constant 0 : index
    %83 = vector.load %arg16[%c0_101, %c2_102, %c0_103] : memref<20x20x64xf32, #tpu.memory_space<vmem>>, vector<16x16x64xf32>
    %84 = vector.shape_cast %83 : vector<16x16x64xf32> to vector<256x64xf32>
    %c1_104 = arith.constant 1 : index
    %c0_105 = arith.constant 0 : index
    %c0_106 = arith.constant 0 : index
    %85 = vector.load %arg4[%c1_104, %c0_105, %c0_106] : memref<9x64x64xf32, #tpu.memory_space<vmem>>, vector<1x64x64xf32>
    %86 = vector.shape_cast %85 : vector<1x64x64xf32> to vector<64x64xf32>
    %cst_107 = arith.constant dense<0.000000e+00> : vector<256x64xf32>
    %87 = tpu.matmul %84, %86, %cst_107 {dimension_numbers = #tpu.dot_dimension_numbers<[1], [0], [0], [1], [0, 0, 1, 1], [], []>} : vector<256x64xf32>, vector<64x64xf32>, vector<256x64xf32> -> vector<256x64xf32>
    %88 = arith.addf %82, %87 : vector<256x64xf32>
    %c0_108 = arith.constant 0 : index
    %c4_109 = arith.constant 4 : index
    %c0_110 = arith.constant 0 : index
    %89 = vector.load %arg16[%c0_108, %c4_109, %c0_110] : memref<20x20x64xf32, #tpu.memory_space<vmem>>, vector<16x16x64xf32>
    %90 = vector.shape_cast %89 : vector<16x16x64xf32> to vector<256x64xf32>
    %c2_111 = arith.constant 2 : index
    %c0_112 = arith.constant 0 : index
    %c0_113 = arith.constant 0 : index
    %91 = vector.load %arg4[%c2_111, %c0_112, %c0_113] : memref<9x64x64xf32, #tpu.memory_space<vmem>>, vector<1x64x64xf32>
    %92 = vector.shape_cast %91 : vector<1x64x64xf32> to vector<64x64xf32>
    %cst_114 = arith.constant dense<0.000000e+00> : vector<256x64xf32>
    %93 = tpu.matmul %90, %92, %cst_114 {dimension_numbers = #tpu.dot_dimension_numbers<[1], [0], [0], [1], [0, 0, 1, 1], [], []>} : vector<256x64xf32>, vector<64x64xf32>, vector<256x64xf32> -> vector<256x64xf32>
    %94 = arith.addf %88, %93 : vector<256x64xf32>
    %c2_115 = arith.constant 2 : index
    %c0_116 = arith.constant 0 : index
    %c0_117 = arith.constant 0 : index
    %95 = vector.load %arg16[%c2_115, %c0_116, %c0_117] : memref<20x20x64xf32, #tpu.memory_space<vmem>>, vector<16x16x64xf32>
    %96 = vector.shape_cast %95 : vector<16x16x64xf32> to vector<256x64xf32>
    %c3_118 = arith.constant 3 : index
    %c0_119 = arith.constant 0 : index
    %c0_120 = arith.constant 0 : index
    %97 = vector.load %arg4[%c3_118, %c0_119, %c0_120] : memref<9x64x64xf32, #tpu.memory_space<vmem>>, vector<1x64x64xf32>
    %98 = vector.shape_cast %97 : vector<1x64x64xf32> to vector<64x64xf32>
    %cst_121 = arith.constant dense<0.000000e+00> : vector<256x64xf32>
    %99 = tpu.matmul %96, %98, %cst_121 {dimension_numbers = #tpu.dot_dimension_numbers<[1], [0], [0], [1], [0, 0, 1, 1], [], []>} : vector<256x64xf32>, vector<64x64xf32>, vector<256x64xf32> -> vector<256x64xf32>
    %100 = arith.addf %94, %99 : vector<256x64xf32>
    %c2_122 = arith.constant 2 : index
    %c2_123 = arith.constant 2 : index
    %c0_124 = arith.constant 0 : index
    %101 = vector.load %arg16[%c2_122, %c2_123, %c0_124] : memref<20x20x64xf32, #tpu.memory_space<vmem>>, vector<16x16x64xf32>
    %102 = vector.shape_cast %101 : vector<16x16x64xf32> to vector<256x64xf32>
    %c4_125 = arith.constant 4 : index
    %c0_126 = arith.constant 0 : index
    %c0_127 = arith.constant 0 : index
    %103 = vector.load %arg4[%c4_125, %c0_126, %c0_127] : memref<9x64x64xf32, #tpu.memory_space<vmem>>, vector<1x64x64xf32>
    %104 = vector.shape_cast %103 : vector<1x64x64xf32> to vector<64x64xf32>
    %cst_128 = arith.constant dense<0.000000e+00> : vector<256x64xf32>
    %105 = tpu.matmul %102, %104, %cst_128 {dimension_numbers = #tpu.dot_dimension_numbers<[1], [0], [0], [1], [0, 0, 1, 1], [], []>} : vector<256x64xf32>, vector<64x64xf32>, vector<256x64xf32> -> vector<256x64xf32>
    %106 = arith.addf %100, %105 : vector<256x64xf32>
    %c2_129 = arith.constant 2 : index
    %c4_130 = arith.constant 4 : index
    %c0_131 = arith.constant 0 : index
    %107 = vector.load %arg16[%c2_129, %c4_130, %c0_131] : memref<20x20x64xf32, #tpu.memory_space<vmem>>, vector<16x16x64xf32>
    %108 = vector.shape_cast %107 : vector<16x16x64xf32> to vector<256x64xf32>
    %c5_132 = arith.constant 5 : index
    %c0_133 = arith.constant 0 : index
    %c0_134 = arith.constant 0 : index
    %109 = vector.load %arg4[%c5_132, %c0_133, %c0_134] : memref<9x64x64xf32, #tpu.memory_space<vmem>>, vector<1x64x64xf32>
    %110 = vector.shape_cast %109 : vector<1x64x64xf32> to vector<64x64xf32>
    %cst_135 = arith.constant dense<0.000000e+00> : vector<256x64xf32>
    %111 = tpu.matmul %108, %110, %cst_135 {dimension_numbers = #tpu.dot_dimension_numbers<[1], [0], [0], [1], [0, 0, 1, 1], [], []>} : vector<256x64xf32>, vector<64x64xf32>, vector<256x64xf32> -> vector<256x64xf32>
    %112 = arith.addf %106, %111 : vector<256x64xf32>
    %c4_136 = arith.constant 4 : index
    %c0_137 = arith.constant 0 : index
    %c0_138 = arith.constant 0 : index
    %113 = vector.load %arg16[%c4_136, %c0_137, %c0_138] : memref<20x20x64xf32, #tpu.memory_space<vmem>>, vector<16x16x64xf32>
    %114 = vector.shape_cast %113 : vector<16x16x64xf32> to vector<256x64xf32>
    %c6_139 = arith.constant 6 : index
    %c0_140 = arith.constant 0 : index
    %c0_141 = arith.constant 0 : index
    %115 = vector.load %arg4[%c6_139, %c0_140, %c0_141] : memref<9x64x64xf32, #tpu.memory_space<vmem>>, vector<1x64x64xf32>
    %116 = vector.shape_cast %115 : vector<1x64x64xf32> to vector<64x64xf32>
    %cst_142 = arith.constant dense<0.000000e+00> : vector<256x64xf32>
    %117 = tpu.matmul %114, %116, %cst_142 {dimension_numbers = #tpu.dot_dimension_numbers<[1], [0], [0], [1], [0, 0, 1, 1], [], []>} : vector<256x64xf32>, vector<64x64xf32>, vector<256x64xf32> -> vector<256x64xf32>
    %118 = arith.addf %112, %117 : vector<256x64xf32>
    %c4_143 = arith.constant 4 : index
    %c2_144 = arith.constant 2 : index
    %c0_145 = arith.constant 0 : index
    %119 = vector.load %arg16[%c4_143, %c2_144, %c0_145] : memref<20x20x64xf32, #tpu.memory_space<vmem>>, vector<16x16x64xf32>
    %120 = vector.shape_cast %119 : vector<16x16x64xf32> to vector<256x64xf32>
    %c7_146 = arith.constant 7 : index
    %c0_147 = arith.constant 0 : index
    %c0_148 = arith.constant 0 : index
    %121 = vector.load %arg4[%c7_146, %c0_147, %c0_148] : memref<9x64x64xf32, #tpu.memory_space<vmem>>, vector<1x64x64xf32>
    %122 = vector.shape_cast %121 : vector<1x64x64xf32> to vector<64x64xf32>
    %cst_149 = arith.constant dense<0.000000e+00> : vector<256x64xf32>
    %123 = tpu.matmul %120, %122, %cst_149 {dimension_numbers = #tpu.dot_dimension_numbers<[1], [0], [0], [1], [0, 0, 1, 1], [], []>} : vector<256x64xf32>, vector<64x64xf32>, vector<256x64xf32> -> vector<256x64xf32>
    %124 = arith.addf %118, %123 : vector<256x64xf32>
    %c4_150 = arith.constant 4 : index
    %c4_151 = arith.constant 4 : index
    %c0_152 = arith.constant 0 : index
    %125 = vector.load %arg16[%c4_150, %c4_151, %c0_152] : memref<20x20x64xf32, #tpu.memory_space<vmem>>, vector<16x16x64xf32>
    %126 = vector.shape_cast %125 : vector<16x16x64xf32> to vector<256x64xf32>
    %c8_153 = arith.constant 8 : index
    %c0_154 = arith.constant 0 : index
    %c0_155 = arith.constant 0 : index
    %127 = vector.load %arg4[%c8_153, %c0_154, %c0_155] : memref<9x64x64xf32, #tpu.memory_space<vmem>>, vector<1x64x64xf32>
    %128 = vector.shape_cast %127 : vector<1x64x64xf32> to vector<64x64xf32>
    %cst_156 = arith.constant dense<0.000000e+00> : vector<256x64xf32>
    %129 = tpu.matmul %126, %128, %cst_156 {dimension_numbers = #tpu.dot_dimension_numbers<[1], [0], [0], [1], [0, 0, 1, 1], [], []>} : vector<256x64xf32>, vector<64x64xf32>, vector<256x64xf32> -> vector<256x64xf32>
    %130 = arith.addf %124, %129 : vector<256x64xf32>
    %131 = vector.broadcast %75 : vector<1x64xf32> to vector<256x64xf32>
    %132 = arith.addf %130, %131 : vector<256x64xf32>
    %cst_157 = arith.constant 0.000000e+00 : f32
    %133 = vector.broadcast %cst_157 : f32 to vector<256x64xf32>
    %134 = arith.maximumf %132, %133 : vector<256x64xf32>
    %135 = vector.extract_strided_slice %134 {offsets = [0, 0], sizes = [256, 32], strides = [1, 1]} : vector<256x64xf32> to vector<256x32xf32>
    %c0_158 = arith.constant 0 : index
    %c0_159 = arith.constant 0 : index
    %136 = vector.load %arg7[%c0_158, %c0_159] : memref<1x20xf32, #tpu.memory_space<vmem>>, vector<1x20xf32>
    %137 = vector.shape_cast %135 : vector<256x32xf32> to vector<16x16x32xf32>
    %c2_160 = arith.constant 2 : index
    %c2_161 = arith.constant 2 : index
    %c0_162 = arith.constant 0 : index
    %138 = vector.load %arg16[%c2_160, %c2_161, %c0_162] : memref<20x20x64xf32, #tpu.memory_space<vmem>>, vector<16x16x32xf32>
    tpu.vector_store %arg16[%c2_160, %c2_161, %c0_162], %137 {strides = array<i32>} : memref<20x20x64xf32, #tpu.memory_space<vmem>>, vector<16x16x32xf32>,
    %c0_163 = arith.constant 0 : index
    %c0_164 = arith.constant 0 : index
    %c0_165 = arith.constant 0 : index
    %139 = vector.load %arg16[%c0_163, %c0_164, %c0_165] : memref<20x20x64xf32, #tpu.memory_space<vmem>>, vector<16x16x32xf32>
    %140 = vector.shape_cast %139 : vector<16x16x32xf32> to vector<256x32xf32>
    %c0_166 = arith.constant 0 : index
    %c0_167 = arith.constant 0 : index
    %c0_168 = arith.constant 0 : index
    %141 = vector.load %arg6[%c0_166, %c0_167, %c0_168] : memref<9x32x20xf32, #tpu.memory_space<vmem>>, vector<1x32x20xf32>
    %142 = vector.shape_cast %141 : vector<1x32x20xf32> to vector<32x20xf32>
    %cst_169 = arith.constant dense<0.000000e+00> : vector<256x20xf32>
    %143 = tpu.matmul %140, %142, %cst_169 {dimension_numbers = #tpu.dot_dimension_numbers<[1], [0], [0], [1], [0, 0, 1, 1], [], []>} : vector<256x32xf32>, vector<32x20xf32>, vector<256x20xf32> -> vector<256x20xf32>
    %c0_170 = arith.constant 0 : index
    %c2_171 = arith.constant 2 : index
    %c0_172 = arith.constant 0 : index
    %144 = vector.load %arg16[%c0_170, %c2_171, %c0_172] : memref<20x20x64xf32, #tpu.memory_space<vmem>>, vector<16x16x32xf32>
    %145 = vector.shape_cast %144 : vector<16x16x32xf32> to vector<256x32xf32>
    %c1_173 = arith.constant 1 : index
    %c0_174 = arith.constant 0 : index
    %c0_175 = arith.constant 0 : index
    %146 = vector.load %arg6[%c1_173, %c0_174, %c0_175] : memref<9x32x20xf32, #tpu.memory_space<vmem>>, vector<1x32x20xf32>
    %147 = vector.shape_cast %146 : vector<1x32x20xf32> to vector<32x20xf32>
    %cst_176 = arith.constant dense<0.000000e+00> : vector<256x20xf32>
    %148 = tpu.matmul %145, %147, %cst_176 {dimension_numbers = #tpu.dot_dimension_numbers<[1], [0], [0], [1], [0, 0, 1, 1], [], []>} : vector<256x32xf32>, vector<32x20xf32>, vector<256x20xf32> -> vector<256x20xf32>
    %149 = arith.addf %143, %148 : vector<256x20xf32>
    %c0_177 = arith.constant 0 : index
    %c4_178 = arith.constant 4 : index
    %c0_179 = arith.constant 0 : index
    %150 = vector.load %arg16[%c0_177, %c4_178, %c0_179] : memref<20x20x64xf32, #tpu.memory_space<vmem>>, vector<16x16x32xf32>
    %151 = vector.shape_cast %150 : vector<16x16x32xf32> to vector<256x32xf32>
    %c2_180 = arith.constant 2 : index
    %c0_181 = arith.constant 0 : index
    %c0_182 = arith.constant 0 : index
    %152 = vector.load %arg6[%c2_180, %c0_181, %c0_182] : memref<9x32x20xf32, #tpu.memory_space<vmem>>, vector<1x32x20xf32>
    %153 = vector.shape_cast %152 : vector<1x32x20xf32> to vector<32x20xf32>
    %cst_183 = arith.constant dense<0.000000e+00> : vector<256x20xf32>
    %154 = tpu.matmul %151, %153, %cst_183 {dimension_numbers = #tpu.dot_dimension_numbers<[1], [0], [0], [1], [0, 0, 1, 1], [], []>} : vector<256x32xf32>, vector<32x20xf32>, vector<256x20xf32> -> vector<256x20xf32>
    %155 = arith.addf %149, %154 : vector<256x20xf32>
    %c2_184 = arith.constant 2 : index
    %c0_185 = arith.constant 0 : index
    %c0_186 = arith.constant 0 : index
    %156 = vector.load %arg16[%c2_184, %c0_185, %c0_186] : memref<20x20x64xf32, #tpu.memory_space<vmem>>, vector<16x16x32xf32>
    %157 = vector.shape_cast %156 : vector<16x16x32xf32> to vector<256x32xf32>
    %c3_187 = arith.constant 3 : index
    %c0_188 = arith.constant 0 : index
    %c0_189 = arith.constant 0 : index
    %158 = vector.load %arg6[%c3_187, %c0_188, %c0_189] : memref<9x32x20xf32, #tpu.memory_space<vmem>>, vector<1x32x20xf32>
    %159 = vector.shape_cast %158 : vector<1x32x20xf32> to vector<32x20xf32>
    %cst_190 = arith.constant dense<0.000000e+00> : vector<256x20xf32>
    %160 = tpu.matmul %157, %159, %cst_190 {dimension_numbers = #tpu.dot_dimension_numbers<[1], [0], [0], [1], [0, 0, 1, 1], [], []>} : vector<256x32xf32>, vector<32x20xf32>, vector<256x20xf32> -> vector<256x20xf32>
    %161 = arith.addf %155, %160 : vector<256x20xf32>
    %c2_191 = arith.constant 2 : index
    %c2_192 = arith.constant 2 : index
    %c0_193 = arith.constant 0 : index
    %162 = vector.load %arg16[%c2_191, %c2_192, %c0_193] : memref<20x20x64xf32, #tpu.memory_space<vmem>>, vector<16x16x32xf32>
    %163 = vector.shape_cast %162 : vector<16x16x32xf32> to vector<256x32xf32>
    %c4_194 = arith.constant 4 : index
    %c0_195 = arith.constant 0 : index
    %c0_196 = arith.constant 0 : index
    %164 = vector.load %arg6[%c4_194, %c0_195, %c0_196] : memref<9x32x20xf32, #tpu.memory_space<vmem>>, vector<1x32x20xf32>
    %165 = vector.shape_cast %164 : vector<1x32x20xf32> to vector<32x20xf32>
    %cst_197 = arith.constant dense<0.000000e+00> : vector<256x20xf32>
    %166 = tpu.matmul %163, %165, %cst_197 {dimension_numbers = #tpu.dot_dimension_numbers<[1], [0], [0], [1], [0, 0, 1, 1], [], []>} : vector<256x32xf32>, vector<32x20xf32>, vector<256x20xf32> -> vector<256x20xf32>
    %167 = arith.addf %161, %166 : vector<256x20xf32>
    %c2_198 = arith.constant 2 : index
    %c4_199 = arith.constant 4 : index
    %c0_200 = arith.constant 0 : index
    %168 = vector.load %arg16[%c2_198, %c4_199, %c0_200] : memref<20x20x64xf32, #tpu.memory_space<vmem>>, vector<16x16x32xf32>
    %169 = vector.shape_cast %168 : vector<16x16x32xf32> to vector<256x32xf32>
    %c5_201 = arith.constant 5 : index
    %c0_202 = arith.constant 0 : index
    %c0_203 = arith.constant 0 : index
    %170 = vector.load %arg6[%c5_201, %c0_202, %c0_203] : memref<9x32x20xf32, #tpu.memory_space<vmem>>, vector<1x32x20xf32>
    %171 = vector.shape_cast %170 : vector<1x32x20xf32> to vector<32x20xf32>
    %cst_204 = arith.constant dense<0.000000e+00> : vector<256x20xf32>
    %172 = tpu.matmul %169, %171, %cst_204 {dimension_numbers = #tpu.dot_dimension_numbers<[1], [0], [0], [1], [0, 0, 1, 1], [], []>} : vector<256x32xf32>, vector<32x20xf32>, vector<256x20xf32> -> vector<256x20xf32>
    %173 = arith.addf %167, %172 : vector<256x20xf32>
    %c4_205 = arith.constant 4 : index
    %c0_206 = arith.constant 0 : index
    %c0_207 = arith.constant 0 : index
    %174 = vector.load %arg16[%c4_205, %c0_206, %c0_207] : memref<20x20x64xf32, #tpu.memory_space<vmem>>, vector<16x16x32xf32>
    %175 = vector.shape_cast %174 : vector<16x16x32xf32> to vector<256x32xf32>
    %c6_208 = arith.constant 6 : index
    %c0_209 = arith.constant 0 : index
    %c0_210 = arith.constant 0 : index
    %176 = vector.load %arg6[%c6_208, %c0_209, %c0_210] : memref<9x32x20xf32, #tpu.memory_space<vmem>>, vector<1x32x20xf32>
    %177 = vector.shape_cast %176 : vector<1x32x20xf32> to vector<32x20xf32>
    %cst_211 = arith.constant dense<0.000000e+00> : vector<256x20xf32>
    %178 = tpu.matmul %175, %177, %cst_211 {dimension_numbers = #tpu.dot_dimension_numbers<[1], [0], [0], [1], [0, 0, 1, 1], [], []>} : vector<256x32xf32>, vector<32x20xf32>, vector<256x20xf32> -> vector<256x20xf32>
    %179 = arith.addf %173, %178 : vector<256x20xf32>
    %c4_212 = arith.constant 4 : index
    %c2_213 = arith.constant 2 : index
    %c0_214 = arith.constant 0 : index
    %180 = vector.load %arg16[%c4_212, %c2_213, %c0_214] : memref<20x20x64xf32, #tpu.memory_space<vmem>>, vector<16x16x32xf32>
    %181 = vector.shape_cast %180 : vector<16x16x32xf32> to vector<256x32xf32>
    %c7_215 = arith.constant 7 : index
    %c0_216 = arith.constant 0 : index
    %c0_217 = arith.constant 0 : index
    %182 = vector.load %arg6[%c7_215, %c0_216, %c0_217] : memref<9x32x20xf32, #tpu.memory_space<vmem>>, vector<1x32x20xf32>
    %183 = vector.shape_cast %182 : vector<1x32x20xf32> to vector<32x20xf32>
    %cst_218 = arith.constant dense<0.000000e+00> : vector<256x20xf32>
    %184 = tpu.matmul %181, %183, %cst_218 {dimension_numbers = #tpu.dot_dimension_numbers<[1], [0], [0], [1], [0, 0, 1, 1], [], []>} : vector<256x32xf32>, vector<32x20xf32>, vector<256x20xf32> -> vector<256x20xf32>
    %185 = arith.addf %179, %184 : vector<256x20xf32>
    %c4_219 = arith.constant 4 : index
    %c4_220 = arith.constant 4 : index
    %c0_221 = arith.constant 0 : index
    %186 = vector.load %arg16[%c4_219, %c4_220, %c0_221] : memref<20x20x64xf32, #tpu.memory_space<vmem>>, vector<16x16x32xf32>
    %187 = vector.shape_cast %186 : vector<16x16x32xf32> to vector<256x32xf32>
    %c8_222 = arith.constant 8 : index
    %c0_223 = arith.constant 0 : index
    %c0_224 = arith.constant 0 : index
    %188 = vector.load %arg6[%c8_222, %c0_223, %c0_224] : memref<9x32x20xf32, #tpu.memory_space<vmem>>, vector<1x32x20xf32>
    %189 = vector.shape_cast %188 : vector<1x32x20xf32> to vector<32x20xf32>
    %cst_225 = arith.constant dense<0.000000e+00> : vector<256x20xf32>
    %190 = tpu.matmul %187, %189, %cst_225 {dimension_numbers = #tpu.dot_dimension_numbers<[1], [0], [0], [1], [0, 0, 1, 1], [], []>} : vector<256x32xf32>, vector<32x20xf32>, vector<256x20xf32> -> vector<256x20xf32>
    %191 = arith.addf %185, %190 : vector<256x20xf32>
    %192 = vector.broadcast %136 : vector<1x20xf32> to vector<256x20xf32>
    %193 = arith.addf %191, %192 : vector<256x20xf32>
    %cst_226 = arith.constant 0.000000e+00 : f32
    %194 = vector.broadcast %cst_226 : f32 to vector<256x20xf32>
    %195 = arith.maximumf %193, %194 : vector<256x20xf32>
    %196 = vector.extract_strided_slice %73 {offsets = [0, 64], sizes = [256, 32], strides = [1, 1]} : vector<256x96xf32> to vector<256x32xf32>
    %197 = vector.extract_strided_slice %134 {offsets = [0, 32], sizes = [256, 32], strides = [1, 1]} : vector<256x64xf32> to vector<256x32xf32>
    %c0_227 = arith.constant 0 : index
    %c0_228 = arith.constant 0 : index
    %198 = vector.load %arg8[%c0_227, %c0_228] : memref<32x1xf32, #tpu.memory_space<vmem>>, vector<32x1xf32>
    %cst_229 = arith.constant dense<0.000000e+00> : vector<256x1xf32>
    %199 = tpu.matmul %196, %198, %cst_229 {dimension_numbers = #tpu.dot_dimension_numbers<[1], [0], [0], [1], [0, 0, 1, 1], [], []>} : vector<256x32xf32>, vector<32x1xf32>, vector<256x1xf32> -> vector<256x1xf32>
    %c0_230 = arith.constant 0 : index
    %c0_231 = arith.constant 0 : index
    %200 = vector.load %arg9[%c0_230, %c0_231] : memref<32x1xf32, #tpu.memory_space<vmem>>, vector<32x1xf32>
    %cst_232 = arith.constant dense<0.000000e+00> : vector<256x1xf32>
    %201 = tpu.matmul %197, %200, %cst_232 {dimension_numbers = #tpu.dot_dimension_numbers<[1], [0], [0], [1], [0, 0, 1, 1], [], []>} : vector<256x32xf32>, vector<32x1xf32>, vector<256x1xf32> -> vector<256x1xf32>
    %202 = arith.addf %199, %201 : vector<256x1xf32>
    %c0_233 = arith.constant 0 : index
    %c0_234 = arith.constant 0 : index
    %203 = vector.load %arg10[%c0_233, %c0_234] : memref<20x1xf32, #tpu.memory_space<vmem>>, vector<20x1xf32>
    %cst_235 = arith.constant dense<0.000000e+00> : vector<256x1xf32>
    %204 = tpu.matmul %195, %203, %cst_235 {dimension_numbers = #tpu.dot_dimension_numbers<[1], [0], [0], [1], [0, 0, 1, 1], [], []>} : vector<256x20xf32>, vector<20x1xf32>, vector<256x1xf32> -> vector<256x1xf32>
    %205 = arith.addf %202, %204 : vector<256x1xf32>
    %c0_236 = arith.constant 0 : index
    %c0_237 = arith.constant 0 : index
    %206 = vector.load %arg11[%c0_236, %c0_237] : memref<1x1xf32, #tpu.memory_space<vmem>>, vector<1x1xf32>
    %207 = vector.broadcast %206 : vector<1x1xf32> to vector<256x1xf32>
    %208 = arith.addf %205, %207 : vector<256x1xf32>
    %209 = arith.mulf %13, %13 : vector<256x4xf32>
    %cst_238 = arith.constant dense<0.000000e+00> : vector<256xf32>
    %210 = vector.multi_reduction <add>, %209, %cst_238 [1] : vector<256x4xf32> to vector<256xf32>
    %211 = vector.shape_cast %210 : vector<256xf32> to vector<256x1xf32>
    %cst_239 = arith.constant 1.000000e-24 : f32
    %212 = vector.broadcast %cst_239 : f32 to vector<256x1xf32>
    %213 = arith.maximumf %211, %212 : vector<256x1xf32>
    %214 = math.rsqrt %213 : vector<256x1xf32>
    %215 = vector.broadcast %214 : vector<256x1xf32> to vector<256x4xf32>
    %216 = arith.mulf %13, %215 : vector<256x4xf32>
    %c0_240 = arith.constant 0 : index
    %c0_241 = arith.constant 0 : index
    %217 = vector.load %arg12[%c0_240, %c0_241] : memref<4x8xf32, #tpu.memory_space<vmem>>, vector<4x8xf32>
    %cst_242 = arith.constant dense<0.000000e+00> : vector<256x8xf32>
    %218 = tpu.matmul %216, %217, %cst_242 {dimension_numbers = #tpu.dot_dimension_numbers<[1], [0], [0], [1], [0, 0, 1, 1], [], []>} : vector<256x4xf32>, vector<4x8xf32>, vector<256x8xf32> -> vector<256x8xf32>
    %cst_243 = arith.constant dense<0xFF800000> : vector<256xf32>
    %219 = vector.multi_reduction <maximumf>, %218, %cst_243 [1] : vector<256x8xf32> to vector<256xf32>
    %220 = vector.shape_cast %219 : vector<256xf32> to vector<256x1xf32>
    %221 = vector.broadcast %220 : vector<256x1xf32> to vector<256x8xf32>
    %222 = arith.subf %218, %221 : vector<256x8xf32>
    %223 = math.exp %222 : vector<256x8xf32>
    %cst_244 = arith.constant dense<0.000000e+00> : vector<256xf32>
    %224 = vector.multi_reduction <add>, %223, %cst_244 [1] : vector<256x8xf32> to vector<256xf32>
    %225 = vector.shape_cast %224 : vector<256xf32> to vector<256x1xf32>
    %226 = vector.broadcast %225 : vector<256x1xf32> to vector<256x8xf32>
    %227 = arith.divf %223, %226 : vector<256x8xf32>
    %228 = vector.broadcast %208 : vector<256x1xf32> to vector<256x8xf32>
    %229 = arith.mulf %227, %228 : vector<256x8xf32>
    %cst_245 = arith.constant dense<0.000000e+00> : vector<8x4xf32>
    %230 = tpu.matmul %229, %216, %cst_245 {dimension_numbers = #tpu.dot_dimension_numbers<[0], [0], [1], [1], [0, 1, 1, 1], [], []>} : vector<256x8xf32>, vector<256x4xf32>, vector<8x4xf32> -> vector<8x4xf32>
    %cst_246 = arith.constant 1.000000e+00 : f32
    %231 = vector.broadcast %cst_246 : f32 to vector<256x1xf32>
    %cst_247 = arith.constant dense<0.000000e+00> : vector<8x1xf32>
    %232 = tpu.matmul %229, %231, %cst_247 {dimension_numbers = #tpu.dot_dimension_numbers<[0], [0], [1], [1], [0, 1, 1, 1], [], []>} : vector<256x8xf32>, vector<256x1xf32>, vector<8x1xf32> -> vector<8x1xf32>
    %c0_248 = arith.constant 0 : index
    %c0_249 = arith.constant 0 : index
    %233 = vector.load %arg13[%c0_248, %c0_249] : memref<8x4xf32, #tpu.memory_space<vmem>>, vector<8x4xf32>
    %234 = vector.broadcast %232 : vector<8x1xf32> to vector<8x4xf32>
    %235 = arith.mulf %233, %234 : vector<8x4xf32>
    %236 = arith.subf %230, %235 : vector<8x4xf32>
    %237 = arith.mulf %236, %236 : vector<8x4xf32>
    %cst_250 = arith.constant dense<0.000000e+00> : vector<8xf32>
    %238 = vector.multi_reduction <add>, %237, %cst_250 [1] : vector<8x4xf32> to vector<8xf32>
    %239 = vector.shape_cast %238 : vector<8xf32> to vector<8x1xf32>
    %cst_251 = arith.constant 1.000000e-24 : f32
    %240 = vector.broadcast %cst_251 : f32 to vector<8x1xf32>
    %241 = arith.maximumf %239, %240 : vector<8x1xf32>
    %242 = math.rsqrt %241 : vector<8x1xf32>
    %243 = vector.broadcast %242 : vector<8x1xf32> to vector<8x4xf32>
    %244 = arith.mulf %236, %243 : vector<8x4xf32>
    %245 = arith.mulf %244, %244 : vector<8x4xf32>
    %246 = vector.shape_cast %245 : vector<8x4xf32> to vector<1x8x4xf32>
    %cst_252 = arith.constant dense<0.000000e+00> : vector<1xf32>
    %247 = vector.multi_reduction <add>, %246, %cst_252 [1, 2] : vector<1x8x4xf32> to vector<1xf32>
    %248 = vector.shape_cast %247 : vector<1xf32> to vector<1x1x1xf32>
    %249 = vector.extract %248[0, 0, 0] : f32 from vector<1x1x1xf32>
    %cst_253 = arith.constant 1.000000e-24 : f32
    %250 = arith.maximumf %249, %cst_253 : f32
    %251 = math.rsqrt %250 : f32
    %252 = vector.broadcast %251 : f32 to vector<8x4xf32>
    %253 = arith.mulf %244, %252 : vector<8x4xf32>
    %c0_254 = arith.constant 0 : index
    %c0_255 = arith.constant 0 : index
    %c0_256 = arith.constant 0 : index
    %254 = vector.load %arg14[%c0_254, %c0_255, %c0_256] : memref<1x8x4xf32, #tpu.memory_space<vmem>>, vector<1x8x4xf32>
    %255 = vector.shape_cast %254 : vector<1x8x4xf32> to vector<8x4xf32>
    %256 = vector.shape_cast %253 : vector<8x4xf32> to vector<1x8x4xf32>
    tpu.vector_store %arg14[%c0_254, %c0_255, %c0_256], %256 {strides = array<i32>} : memref<1x8x4xf32, #tpu.memory_space<vmem>>, vector<1x8x4xf32>,
    return
  }
  func.func @transform_0(%arg0: i32) -> (i32, i32, i32) {
    %c0_i32 = arith.constant 0 : i32
    %c0_i32_0 = arith.constant 0 : i32
    %c0_i32_1 = arith.constant 0 : i32
    return %arg0, %c0_i32, %c0_i32_0 : i32, i32, i32
  }
  func.func @transform_1(%arg0: i32) -> (i32, i32, i32) {
    %c0_i32 = arith.constant 0 : i32
    %c0_i32_0 = arith.constant 0 : i32
    %c0_i32_1 = arith.constant 0 : i32
    %c0_i32_2 = arith.constant 0 : i32
    return %c0_i32, %c0_i32_0, %c0_i32_1 : i32, i32, i32
  }
  func.func @transform_2(%arg0: i32) -> (i32, i32) {
    %c0_i32 = arith.constant 0 : i32
    %c0_i32_0 = arith.constant 0 : i32
    %c0_i32_1 = arith.constant 0 : i32
    return %c0_i32, %c0_i32_0 : i32, i32
  }
  func.func @transform_3(%arg0: i32) -> (i32, i32, i32) {
    %c0_i32 = arith.constant 0 : i32
    %c0_i32_0 = arith.constant 0 : i32
    %c0_i32_1 = arith.constant 0 : i32
    %c0_i32_2 = arith.constant 0 : i32
    return %c0_i32, %c0_i32_0, %c0_i32_1 : i32, i32, i32
  }
  func.func @transform_4(%arg0: i32) -> (i32, i32) {
    %c0_i32 = arith.constant 0 : i32
    %c0_i32_0 = arith.constant 0 : i32
    %c0_i32_1 = arith.constant 0 : i32
    return %c0_i32, %c0_i32_0 : i32, i32
  }
  func.func @transform_5(%arg0: i32) -> (i32, i32, i32) {
    %c0_i32 = arith.constant 0 : i32
    %c0_i32_0 = arith.constant 0 : i32
    %c0_i32_1 = arith.constant 0 : i32
    %c0_i32_2 = arith.constant 0 : i32
    return %c0_i32, %c0_i32_0, %c0_i32_1 : i32, i32, i32
  }
  func.func @transform_6(%arg0: i32) -> (i32, i32) {
    %c0_i32 = arith.constant 0 : i32
    %c0_i32_0 = arith.constant 0 : i32
    %c0_i32_1 = arith.constant 0 : i32
    return %c0_i32, %c0_i32_0 : i32, i32
  }
  func.func @transform_7(%arg0: i32) -> (i32, i32) {
    %c0_i32 = arith.constant 0 : i32
    %c0_i32_0 = arith.constant 0 : i32
    %c0_i32_1 = arith.constant 0 : i32
    return %c0_i32, %c0_i32_0 : i32, i32
  }
  func.func @transform_8(%arg0: i32) -> (i32, i32) {
    %c0_i32 = arith.constant 0 : i32
    %c0_i32_0 = arith.constant 0 : i32
    %c0_i32_1 = arith.constant 0 : i32
    return %c0_i32, %c0_i32_0 : i32, i32
  }
  func.func @transform_9(%arg0: i32) -> (i32, i32) {
    %c0_i32 = arith.constant 0 : i32
    %c0_i32_0 = arith.constant 0 : i32
    %c0_i32_1 = arith.constant 0 : i32
    return %c0_i32, %c0_i32_0 : i32, i32
  }
  func.func @transform_10(%arg0: i32) -> (i32, i32) {
    %c0_i32 = arith.constant 0 : i32
    %c0_i32_0 = arith.constant 0 : i32
    %c0_i32_1 = arith.constant 0 : i32
    return %c0_i32, %c0_i32_0 : i32, i32
  }
  func.func @transform_11(%arg0: i32) -> (i32, i32) {
    %c0_i32 = arith.constant 0 : i32
    %c0_i32_0 = arith.constant 0 : i32
    %c0_i32_1 = arith.constant 0 : i32
    return %c0_i32, %c0_i32_0 : i32, i32
  }
  func.func @transform_12(%arg0: i32) -> (i32, i32) {
    %c0_i32 = arith.constant 0 : i32
    %c0_i32_0 = arith.constant 0 : i32
    %c0_i32_1 = arith.constant 0 : i32
    return %c0_i32, %c0_i32_0 : i32, i32
  }
  func.func @transform_13(%arg0: i32) -> (i32, i32, i32) {
    %c0_i32 = arith.constant 0 : i32
    %c0_i32_0 = arith.constant 0 : i32
    %c0_i32_1 = arith.constant 0 : i32
    return %arg0, %c0_i32, %c0_i32_0 : i32, i32, i32
  }
}

</mosaic_0001>

<bundles_post_ra>
// kernel: crn_layer_forward.1
= control target key start
LH: loop header
LB: loop body
LE: loop exit
PB: predicated region body
PF: predicated region fallthrough
CT: control target
= control target key end

     0   :  { %s19336_s27 = smov 0   ;;  %s23694_s0 = inlined_call_operand.vmem [shape: f32[2,256,4], index: 0, kind: input, shape index: {}]   ;;  %s23695_s1 = inlined_call_operand.vmem [shape: f32[9,4,96], index: 1, kind: input, shape index: {}]   ;;  %s23696_s2 = inlined_call_operand.vmem [shape: f32[1,96], index: 2, kind: input, shape index: {}]   ;;  %s23697_s3 = inlined_call_operand.vmem [shape: f32[9,64,64], index: 3, kind: input, shape index: {}]   ;;  %s23698_s4 = inlined_call_operand.vmem [shape: f32[1,64], index: 4, kind: input, shape index: {}]   ;;  %s23699_s5 = inlined_call_operand.vmem [shape: f32[9,32,20], index: 5, kind: input, shape index: {}]   ;;  %s23700_s6 = inlined_call_operand.vmem [shape: f32[1,20], index: 6, kind: input, shape index: {}]   ;;  %s23701_s7 = inlined_call_operand.vmem [shape: f32[32,1], index: 7, kind: input, shape index: {}]   ;;  %s23702_s8 = inlined_call_operand.vmem [shape: f32[32,1], index: 8, kind: input, shape index: {}]   ;;  %s23703_s9 = inlined_call_operand.vmem [shape: f32[20,1], index: 9, kind: input, shape index: {}]   ;;  %s23704_s10 = inlined_call_operand.<no memory space> [shape: f32[1,1], index: 10, kind: input, shape index: {}]   ;;  %s23705_s11 = inlined_call_operand.vmem [shape: f32[4,8], index: 11, kind: input, shape index: {}]   ;;  %s23706_s12 = inlined_call_operand.vmem [shape: f32[8,4], index: 12, kind: input, shape index: {}]   ;;  %s23707_s13 = inlined_call_operand.vmem [shape: f32[2,8,4], index: 13, kind: output, shape index: {}]  }
   0x1   :  { %v18_v0 = vstv %s23704_s10 }
   0x2   :  { %19 = vst [vmem:[#allocation4] sm:$0x1] %v18_v0 }
   0x3 LB: > { %s13816_s28 = sadd.s32 4294967295, %s19255_s27   ;;  %p13820_p0 = scmp.ge.s32.totalorder %s19255_s27, 1  ;;  %s19255_s27 = sphi %s19336_s27, %s25_s27  }
   0x4   : > { %p389_p1 = scmp.lt.s32.totalorder %s19255_s27, 3 }
   0x6   : > { %p390_p2 = pnand %p13820_p0, %p389_p1 }
   0x8   : > { %393 = sbr.rel (%p390_p2) target bundleno = 3725 (0xe8d), region = 72 }
   0xf   : > { %vm767_vm0 = vcmask 1043456   ;;  %v13891_v1 = vld [vmem:[%s23695_s1 + $0x8] sm:$0xf]  ;;  %vm441_vm1 = vcmask 31744   ;;  %vm444_vm2 = vcmask 27648   ;;  %v23708_v2 = vmov 0.0  }
  0x10   : > { %16229 = vmatprep.subr.msk.mxu0 %vm767_vm0, %v13891_v1  ;;  %442 = vst.msk [vmem:[#allocation2] sm:$0xff] %vm441_vm1, %v23708_v2  ;;  %443 = vst.msk [vmem:[#allocation2 + $0x8] sm:$0xff] %vm441_vm1, %v23708_v2  ;;  %v19367_v3 = vld [vmem:[%s23695_s1 + $0xc] sm:$0xf]  ;;  %p19375_p3 = scmp.lt.s32.totalorder %s13816_s28, 1  ;;  %vm457_vm3 = vcmask 25600  }
  0x11   : > { %446 = vst.msk [vmem:[#allocation2 + $0x18] sm:$0xff] %vm441_vm1, %v23708_v2  ;;  %447 = vst.msk [vmem:[#allocation2 + $0x20] sm:$0xff] %vm441_vm1, %v23708_v2  ;;  %16230 = vmatpush3.msk.msra.mxu0 %vm767_vm0, %v13891_v1  ;;  %v19470_v7 = vld [vmem:[%s23695_s1 + $0x10] sm:$0xf]  ;;  %vm490_vm4 = vcmask 523264   ;;  %vm493_vm5 = vcmask 519168  }
  0x12   : > { %450 = vst.msk [vmem:[#allocation2 + $0x1b0] sm:$0xff] %vm441_vm1, %v23708_v2  ;;  %451 = vst.msk [vmem:[#allocation2 + $0x1b8] sm:$0xff] %vm441_vm1, %v23708_v2  ;;  %16279 = vmatprep.subr.msk.mxu0 %vm767_vm0, %v19367_v3  ;;  %s24297_s28 = smov (!%p19375_p3, %s13816_s28), 1  ;;  %vm506_vm6 = vcmask 517120   ;;  %vm7707_vm7 = vcmask 261120   ;;  %s19258_s14 = smov 96  }
  0x13   : > { %453 = vst.msk [vmem:[#allocation2 + $0x1c8] sm:$0xff] %vm441_vm1, %v23708_v2  ;;  %454 = vst.msk [vmem:[#allocation2 + $0x1d0] sm:$0xff] %vm441_vm1, %v23708_v2  ;;  %s14937_s16 = sshll.u32 %s24297_s28, 8  ;;  %vm12036_vm8 = vcmask 162816   ;;  %vm12981_vm9 = vcmask 64512  }
  0x14   : > { %445 = vst.msk [vmem:[#allocation2 + $0x10] sm:$0xf] %vm444_vm2, %v23708_v2  ;;  %448 = vst.msk [vmem:[#allocation2 + $0x28] sm:$0xf] %vm444_vm2, %v23708_v2  ;;  %s19456_s19 = scalar_lea.vmem %s23694_s0, %s14937_s16  ;;  %s19259_s16 = smov 64  }
  0x15   : > { %452 = vst.msk [vmem:[#allocation2 + $0x1c0] sm:$0xf] %vm444_vm2, %v23708_v2  ;;  %455 = vst.msk [vmem:[#allocation2 + $0x1d8] sm:$0xf] %vm444_vm2, %v23708_v2  ;;  %v19459_v4 = vld [vmem:[%s19456_s19] sm:$0xff]  ;;  %v19462_v5 = vld [vmem:[%s19456_s19 + $0x8] sm:$0xff] }
  0x16   : > { %474 = vst.msk [vmem:[#allocation2 + $0x42] sm:$0x3] %vm457_vm3, %v23708_v2  ;;  %458 = vst.msk [vmem:[#allocation2 + $0x30] sm:$0x3] %vm457_vm3, %v23708_v2  ;;  %v19465_v6 = vld [vmem:[%s19456_s19 + $0x10] sm:$0xff]  ;;  %v19480_v12 = vld [vmem:[%s19456_s19 + $0x18] sm:$0xff] }
  0x17   : > { %459 = vst.msk [vmem:[#allocation2 + $0x48] sm:$0x3] %vm457_vm3, %v23708_v2  ;;  %460 = vst.msk [vmem:[#allocation2 + $0x60] sm:$0x3] %vm457_vm3, %v23708_v2  ;;  %v1320_v8 = vld [vmem:[#allocation2 + $0x4] sm:$0xff]  ;;  %v19494_v15 = vld [vmem:[%s19456_s19 + $0x30] sm:$0xff] }
  0x18   : > { %461 = vst.msk [vmem:[#allocation2 + $0x78] sm:$0x3] %vm457_vm3, %v23708_v2  ;;  %462 = vst.msk [vmem:[#allocation2 + $0x90] sm:$0x3] %vm457_vm3, %v23708_v2  ;;  %v1322_v10 = vld [vmem:[#allocation2 + $0x1c] sm:$0xff]  ;;  %16231 = vmatprep.mubr.msk.f32.mxu0 %vm441_vm1, %v1320_v8  ;;  %v19489_v14 = vld [vmem:[%s19456_s19 + $0x28] sm:$0xff] }
  0x19   : > { %463 = vst.msk [vmem:[#allocation2 + $0xa8] sm:$0x3] %vm457_vm3, %v23708_v2  ;;  %464 = vst.msk [vmem:[#allocation2 + $0xc0] sm:$0x3] %vm457_vm3, %v23708_v2  ;;  %v19483_v13 = vld [vmem:[%s19456_s19 + $0x20] sm:$0xff]  ;;  %v19497_v16 = vld [vmem:[%s19456_s19 + $0x38] sm:$0xff] }
  0x1a   : > { %465 = vst.msk [vmem:[#allocation2 + $0xd8] sm:$0x3] %vm457_vm3, %v23708_v2  ;;  %466 = vst.msk [vmem:[#allocation2 + $0xf0] sm:$0x3] %vm457_vm3, %v23708_v2  ;;  %v19509_v17 = vld [vmem:[%s19456_s19 + $0x40] sm:$0xff]  ;;  %v19512_v18 = vld [vmem:[%s19456_s19 + $0x48] sm:$0xff] }
  0x1b   : > { %467 = vst.msk [vmem:[#allocation2 + $0x108] sm:$0x3] %vm457_vm3, %v23708_v2  ;;  %468 = vst.msk [vmem:[#allocation2 + $0x120] sm:$0x3] %vm457_vm3, %v23708_v2  ;;  %v1321_v9 = vld [vmem:[#allocation2 + $0xc] sm:$0xff]  ;;  %v1323_v11 = vld [vmem:[#allocation2 + $0x24] sm:$0xff] }
  0x1c   : > { %469 = vst.msk [vmem:[#allocation2 + $0x138] sm:$0x3] %vm457_vm3, %v23708_v2  ;;  %470 = vst.msk [vmem:[#allocation2 + $0x150] sm:$0x3] %vm457_vm3, %v23708_v2  ;;  %16232 = vmatmul.mubr.msk.f32.vlgmr.msra.gmra.mrb[0].mxu0 %vm441_vm1, %v1321_v9  ;;  %v19515_v19 = vld [vmem:[%s19456_s19 + $0x50] sm:$0xff]  ;;  %v19522_v20 = vld [vmem:[%s19456_s19 + $0x58] sm:$0xff] }
  0x1d   : > { %471 = vst.msk [vmem:[#allocation2 + $0x168] sm:$0x3] %vm457_vm3, %v23708_v2  ;;  %472 = vst.msk [vmem:[#allocation2 + $0x180] sm:$0x3] %vm457_vm3, %v23708_v2  ;;  %16280 = vmatpush3.msk.msra.mxu0 %vm767_vm0, %v19367_v3  ;;  %16234 = vmatprep.mubr.msk.f32.mxu0 %vm441_vm1, %v1322_v10  ;;  %v19527_v21 = vld [vmem:[%s19456_s19 + $0x60] sm:$0xff]  ;;  %v19530_v22 = vld [vmem:[%s19456_s19 + $0x68] sm:$0xff] }
  0x1e   : > { %473 = vst.msk [vmem:[#allocation2 + $0x198] sm:$0x3] %vm457_vm3, %v23708_v2  ;;  %475 = vst.msk [vmem:[#allocation2 + $0x5a] sm:$0x3] %vm457_vm3, %v23708_v2  ;;  %16329 = vmatprep.subr.msk.mxu0 %vm767_vm0, %v19470_v7  ;;  %v19541_v23 = vld [vmem:[%s19456_s19 + $0x70] sm:$0xff]  ;;  %v19544_v24 = vld [vmem:[%s19456_s19 + $0x78] sm:$0xff] }
  0x1f   : > { %476 = vst.msk [vmem:[#allocation2 + $0x72] sm:$0x3] %vm457_vm3, %v23708_v2  ;;  %477 = vst.msk [vmem:[#allocation2 + $0x8a] sm:$0x3] %vm457_vm3, %v23708_v2  ;;  %v19547_v25 = vld [vmem:[%s19456_s19 + $0x80] sm:$0xff]  ;;  %v19555_v26 = vld [vmem:[%s19456_s19 + $0x88] sm:$0xff] }
  0x20   : > { %478 = vst.msk [vmem:[#allocation2 + $0xa2] sm:$0x3] %vm457_vm3, %v23708_v2  ;;  %479 = vst.msk [vmem:[#allocation2 + $0xba] sm:$0x3] %vm457_vm3, %v23708_v2  ;;  %16235 = vmatmul.mubr.msk.f32.gmra.mrb[2].mxu0 %vm441_vm1, %v1323_v11  ;;  %v19560_v27 = vld [vmem:[%s19456_s19 + $0x90] sm:$0xff]  ;;  %v19563_v28 = vld [vmem:[%s19456_s19 + $0x98] sm:$0xff] }
  0x21   : > { %480 = vst.msk [vmem:[#allocation2 + $0xd2] sm:$0x3] %vm457_vm3, %v23708_v2  ;;  %481 = vst.msk [vmem:[#allocation2 + $0xea] sm:$0x3] %vm457_vm3, %v23708_v2  ;;  %v19576_v31 = vld [vmem:[%s19456_s19 + $0xa0] sm:$0xff]  ;;  %v19581_v32 = vld [vmem:[%s19456_s19 + $0xa8] sm:$0xff] }
  0x22   : > { %482 = vst.msk [vmem:[#allocation2 + $0x102] sm:$0x3] %vm457_vm3, %v23708_v2  ;;  %483 = vst.msk [vmem:[#allocation2 + $0x11a] sm:$0x3] %vm457_vm3, %v23708_v2  ;;  %v19586_v33 = vld [vmem:[%s19456_s19 + $0xb0] sm:$0xff]  ;;  %v19589_v34 = vld [vmem:[%s19456_s19 + $0xb8] sm:$0xff] }
  0x23   : > { %484 = vst.msk [vmem:[#allocation2 + $0x132] sm:$0x3] %vm457_vm3, %v23708_v2  ;;  %485 = vst.msk [vmem:[#allocation2 + $0x14a] sm:$0x3] %vm457_vm3, %v23708_v2  ;;  %v19600_v36 = vld [vmem:[%s19456_s19 + $0xc0] sm:$0xff]  ;;  %v19619_v40 = vld [vmem:[%s19456_s19 + $0xc8] sm:$0xff] }
  0x24   : > { %486 = vst.msk [vmem:[#allocation2 + $0x162] sm:$0x3] %vm457_vm3, %v23708_v2  ;;  %487 = vst.msk [vmem:[#allocation2 + $0x17a] sm:$0x3] %vm457_vm3, %v23708_v2  ;;  %v19622_v41 = vld [vmem:[%s19456_s19 + $0xd0] sm:$0xff]  ;;  %v19631_v43 = vld [vmem:[%s19456_s19 + $0xd8] sm:$0xff] }
  0x25   : > { %488 = vst.msk [vmem:[#allocation2 + $0x192] sm:$0x3] %vm457_vm3, %v23708_v2  ;;  %489 = vst.msk [vmem:[#allocation2 + $0x1aa] sm:$0x3] %vm457_vm3, %v23708_v2  ;;  %v19660_v50 = vld [vmem:[%s19456_s19 + $0xe0] sm:$0xff]  ;;  %v19663_v51 = vld [vmem:[%s19456_s19 + $0xe8] sm:$0xff] }
  0x26   : > { %23947 = vst [vmem:[#allocation5_spill] sm:$0xff] %v19459_v4  ;;  %23948 = vst [vmem:[#allocation6_spill] sm:$0xff] %v19462_v5  ;;  %v19670_v52 = vld [vmem:[%s19456_s19 + $0xf0] sm:$0xff]  ;;  %v19673_v53 = vld [vmem:[%s19456_s19 + $0xf8] sm:$0xff]  ;;  %s19262_s10 = smov 1e-24  }
  0x27   : > { %23949 = vst [vmem:[#allocation7_spill] sm:$0xff] %v19465_v6  ;;  %572 = vst.msk [vmem:[#allocation2 + $0x32] sm:$0xff] %vm441_vm1, %v19459_v4  ;;  %v637_v4 = vld [vmem:[#allocation2 + $0x2] sm:$0xff] }
  0x28   : > { %573 = vst.msk [vmem:[#allocation2 + $0x3a] sm:$0xff] %vm441_vm1, %v19462_v5  ;;  %574 = vst.msk [vmem:[#allocation2 + $0x4a] sm:$0xff] %vm441_vm1, %v19465_v6  ;;  %v13824_v5 = vld [vmem:[%s23695_s1 + $0x4] sm:$0xf]  ;;  %16131 = vmatprep.mubr.msk.f32.mxu1 %vm441_vm1, %v637_v4 }
  0x29   : > { %23950 = vst [vmem:[#allocation8_spill] sm:$0xff] %v19480_v12  ;;  %23951 = vst [vmem:[#allocation9_spill] sm:$0xff] %v19483_v13  ;;  %16129 = vmatprep.subr.msk.mxu1 %vm767_vm0, %v13824_v5 }
  0x2a   : > { %575 = vst.msk [vmem:[#allocation2 + $0x52] sm:$0xff] %vm441_vm1, %v19480_v12  ;;  %23952 = vst [vmem:[#allocation10_spill] sm:$0xff] %v19489_v14  ;;  %16130 = vmatpush3.msk.msra.mxu1 %vm767_vm0, %v13824_v5 }
  0x2b   : > { %576 = vst.msk [vmem:[#allocation2 + $0x62] sm:$0xff] %vm441_vm1, %v19483_v13  ;;  %23953 = vst [vmem:[#allocation11_spill] sm:$0xff] %v19494_v15 }
  0x2c   : > { %23954 = vst [vmem:[#allocation12_spill] sm:$0xff] %v19497_v16  ;;  %577 = vst.msk [vmem:[#allocation2 + $0x6a] sm:$0xff] %vm441_vm1, %v19489_v14 }
  0x2d   : > { %578 = vst.msk [vmem:[#allocation2 + $0x7a] sm:$0xff] %vm441_vm1, %v19494_v15  ;;  %579 = vst.msk [vmem:[#allocation2 + $0x82] sm:$0xff] %vm441_vm1, %v19497_v16 }
  0x2e   : > { %23955 = vst [vmem:[#allocation13_spill] sm:$0xff] %v19509_v17  ;;  %23956 = vst [vmem:[#allocation14_spill] sm:$0xff] %v19512_v18  ;;  %v19741_v10 = vld [vmem:[#allocation2 + $0x30] sm:$0xff] }
  0x2f   : > { %23957 = vst [vmem:[#allocation15_spill] sm:$0xff] %v19515_v19  ;;  %580 = vst.msk [vmem:[#allocation2 + $0x92] sm:$0xff] %vm441_vm1, %v19509_v17  ;;  %v19565_v29 = vld [vmem:[#allocation2 + $0x34] sm:$0xff]  ;;  %v19567_v30 = vld [vmem:[#allocation2 + $0x3c] sm:$0xff] }
  0x30   : > { %581 = vst.msk [vmem:[#allocation2 + $0x9a] sm:$0xff] %vm441_vm1, %v19512_v18  ;;  %23958 = vst [vmem:[#allocation16_spill] sm:$0xff] %v19522_v20  ;;  %16237 = vmatprep.mubr.msk.f32.mxu0 %vm441_vm1, %v19565_v29  ;;  %v19747_v11 = vld [vmem:[#allocation2 + $0x38] sm:$0xff]  ;;  %v19749_v2 = vld [vmem:[#allocation2 + $0x48] sm:$0xff] }
  0x31   : > { %582 = vst.msk [vmem:[#allocation2 + $0xaa] sm:$0xff] %vm441_vm1, %v19515_v19  ;;  %23959 = vst [vmem:[#allocation17_spill] sm:$0xff] %v19527_v21  ;;  %v19591_v35 = vld [vmem:[#allocation2 + $0x4c] sm:$0xff]  ;;  %16238 = vmatmul.mubr.msk.f32.gmra.mrb[4].mxu0 %vm441_vm1, %v19567_v30  ;;  %v19608_v37 = vld [vmem:[#allocation2 + $0x54] sm:$0xff] }
  0x32   : > { %23960 = vst [vmem:[#allocation18_spill] sm:$0xff] %v19530_v22  ;;  %583 = vst.msk [vmem:[#allocation2 + $0xb2] sm:$0xff] %vm441_vm1, %v19522_v20  ;;  %16240 = vmatprep.mubr.msk.f32.mxu0 %vm441_vm1, %v19591_v35  ;;  %v2100_v6 = vld [vmem:[#allocation2 + $0x32] sm:$0xff]  ;;  %v19897_v5 = vld [vmem:[#allocation2 + $0x62] sm:$0xff] }
  0x33   : > { %584 = vst.msk [vmem:[#allocation2 + $0xc2] sm:$0xff] %vm441_vm1, %v19527_v21  ;;  %585 = vst.msk [vmem:[#allocation2 + $0xca] sm:$0xff] %vm441_vm1, %v19530_v22  ;;  %v19610_v38 = vld [vmem:[#allocation2 + $0x64] sm:$0xff]  ;;  %v19616_v39 = vld [vmem:[#allocation2 + $0x6c] sm:$0xff] }
  0x34   : > { %23961 = vst [vmem:[#allocation19_spill] sm:$0xff] %v19541_v23  ;;  %23962 = vst [vmem:[#allocation20_spill] sm:$0xff] %v19544_v24  ;;  %v19624_v42 = vld [vmem:[#allocation2 + $0x7c] sm:$0xff]  ;;  %v19639_v44 = vld [vmem:[#allocation2 + $0x84] sm:$0xff] }
  0x35   : > { %23963 = vst [vmem:[#allocation21_spill] sm:$0xff] %v19547_v25  ;;  %586 = vst.msk [vmem:[#allocation2 + $0xda] sm:$0xff] %vm441_vm1, %v19541_v23  ;;  %16241 = vmatmul.mubr.msk.f32.gmra.mrb[6].mxu0 %vm441_vm1, %v19608_v37  ;;  %v19907_v4 = vld [vmem:[#allocation2 + $0x6a] sm:$0xff] }
  0x36   : > { %587 = vst.msk [vmem:[#allocation2 + $0xe2] sm:$0xff] %vm441_vm1, %v19544_v24  ;;  %23964 = vst [vmem:[#allocation22_spill] sm:$0xff] %v19555_v26  ;;  %16243 = vmatprep.mubr.msk.f32.mxu0 %vm441_vm1, %v19610_v38 }
  0x37   : > { %588 = vst.msk [vmem:[#allocation2 + $0xf2] sm:$0xff] %vm441_vm1, %v19547_v25  ;;  %23965 = vst [vmem:[#allocation23_spill] sm:$0xff] %v19560_v27  ;;  %v19641_v45 = vld [vmem:[#allocation2 + $0x94] sm:$0xff]  ;;  %v19647_v46 = vld [vmem:[#allocation2 + $0x9c] sm:$0xff] }
  0x38   : > { %23966 = vst [vmem:[#allocation24_spill] sm:$0xff] %v19563_v28  ;;  %589 = vst.msk [vmem:[#allocation2 + $0xfa] sm:$0xff] %vm441_vm1, %v19555_v26 }
  0x39   : > { %590 = vst.msk [vmem:[#allocation2 + $0x10a] sm:$0xff] %vm441_vm1, %v19560_v27  ;;  %591 = vst.msk [vmem:[#allocation2 + $0x112] sm:$0xff] %vm441_vm1, %v19563_v28  ;;  %16244 = vmatmul.mubr.msk.f32.gmra.mrb[8].mxu0 %vm441_vm1, %v19616_v39  ;;  %v19649_v47 = vld [vmem:[#allocation2 + $0xac] sm:$0xff]  ;;  %v19655_v48 = vld [vmem:[#allocation2 + $0xb4] sm:$0xff] }
  0x3a   : > { %23967 = vst [vmem:[#allocation25_spill] sm:$0xff] %v19576_v31  ;;  %23968 = vst [vmem:[#allocation26_spill] sm:$0xff] %v19581_v32  ;;  %16246 = vmatprep.mubr.msk.f32.mxu0 %vm441_vm1, %v19624_v42  ;;  %v19657_v49 = vld [vmem:[#allocation2 + $0xc4] sm:$0xff]  ;;  %v19683_v54 = vld [vmem:[#allocation2 + $0xcc] sm:$0xff] }
  0x3b   : > { %592 = vst.msk [vmem:[#allocation2 + $0x122] sm:$0xff] %vm441_vm1, %v19576_v31  ;;  %23969 = vst [vmem:[#allocation27_spill] sm:$0xff] %v19586_v33 }
  0x3c   : > { %23970 = vst [vmem:[#allocation28_spill] sm:$0xff] %v19589_v34  ;;  %593 = vst.msk [vmem:[#allocation2 + $0x12a] sm:$0xff] %vm441_vm1, %v19581_v32  ;;  %v19798_v32 = vld [vmem:[#allocation2 + $0xc0] sm:$0xff]  ;;  %v19806_v28 = vld [vmem:[#allocation2 + $0xd8] sm:$0xff] }
  0x3d   : > { %594 = vst.msk [vmem:[#allocation2 + $0x13a] sm:$0xff] %vm441_vm1, %v19586_v33  ;;  %595 = vst.msk [vmem:[#allocation2 + $0x142] sm:$0xff] %vm441_vm1, %v19589_v34  ;;  %16247 = vmatmul.mubr.msk.f32.gmra.mrb[10].mxu0 %vm441_vm1, %v19639_v44  ;;  %v19685_v55 = vld [vmem:[#allocation2 + $0xdc] sm:$0xff]  ;;  %v19691_v56 = vld [vmem:[#allocation2 + $0xe4] sm:$0xff] }
  0x3e   : > { %23971 = vst [vmem:[#allocation29_spill] sm:$0xff] %v19600_v36  ;;  %596 = vst.msk [vmem:[#allocation2 + $0x152] sm:$0xff] %vm441_vm1, %v19600_v36  ;;  %16249 = vmatprep.mubr.msk.f32.mxu0 %vm441_vm1, %v19641_v45  ;;  %v19790_v34 = vld [vmem:[#allocation2 + $0xa8] sm:$0xff]  ;;  %v19796_v36 = vld [vmem:[#allocation2 + $0xb0] sm:$0xff] }
  0x3f   : > { %23972 = vst [vmem:[#allocation30_spill] sm:$0xff] %v19619_v40  ;;  %23973 = vst [vmem:[#allocation31_spill] sm:$0xff] %v19622_v41  ;;  %v19693_v57 = vld [vmem:[#allocation2 + $0xf4] sm:$0xff]  ;;  %v19699_v58 = vld [vmem:[#allocation2 + $0xfc] sm:$0xff] }
  0x40   : > { %597 = vst.msk [vmem:[#allocation2 + $0x15a] sm:$0xff] %vm441_vm1, %v19619_v40  ;;  %598 = vst.msk [vmem:[#allocation2 + $0x16a] sm:$0xff] %vm441_vm1, %v19622_v41  ;;  %v19701_v59 = vld [vmem:[#allocation2 + $0x10c] sm:$0xff]  ;;  %v19707_v60 = vld [vmem:[#allocation2 + $0x114] sm:$0xff] }
  0x41   : > { %23974 = vst [vmem:[#allocation32_spill] sm:$0xff] %v19631_v43  ;;  %599 = vst.msk [vmem:[#allocation2 + $0x172] sm:$0xff] %vm441_vm1, %v19631_v43  ;;  %16250 = vmatmul.mubr.msk.f32.gmra.mrb[12].mxu0 %vm441_vm1, %v19647_v46  ;;  %v19772_v43 = vld [vmem:[#allocation2 + $0x68] sm:$0xff]  ;;  %v19782_v40 = vld [vmem:[#allocation2 + $0x90] sm:$0xff] }
  0x42   : > { %16252 = vmatprep.mubr.msk.f32.mxu0 %vm441_vm1, %v19649_v47  ;;  %23975 = vst [vmem:[#allocation33_spill] sm:$0xff] %v19660_v50  ;;  %23976 = vst [vmem:[#allocation34_spill] sm:$0xff] %v19663_v51  ;;  %v19788_v41 = vld [vmem:[#allocation2 + $0x98] sm:$0xff]  ;;  %v19804_v33 = vld [vmem:[#allocation2 + $0xc8] sm:$0xff] }
  0x43   : > { %600 = vst.msk [vmem:[#allocation2 + $0x182] sm:$0xff] %vm441_vm1, %v19660_v50  ;;  %601 = vst.msk [vmem:[#allocation2 + $0x18a] sm:$0xff] %vm441_vm1, %v19663_v51  ;;  %v19709_v61 = vld [vmem:[#allocation2 + $0x124] sm:$0xff]  ;;  %v19715_v62 = vld [vmem:[#allocation2 + $0x12c] sm:$0xff] }
  0x44   : > { %23977 = vst [vmem:[#allocation35_spill] sm:$0xff] %v19670_v52  ;;  %23978 = vst [vmem:[#allocation36_spill] sm:$0xff] %v19673_v53  ;;  %v19717_v63 = vld [vmem:[#allocation2 + $0x13c] sm:$0xff]  ;;  %v19723_v0 = vld [vmem:[#allocation2 + $0x144] sm:$0xff] }
  0x45   : > { %16253 = vmatmul.mubr.msk.f32.gmra.mrb[14].mxu0 %vm441_vm1, %v19655_v48  ;;  %602 = vst.msk [vmem:[#allocation2 + $0x19a] sm:$0xff] %vm441_vm1, %v19670_v52  ;;  %603 = vst.msk [vmem:[#allocation2 + $0x1a2] sm:$0xff] %vm441_vm1, %v19673_v53  ;;  %v19754_v53 = vld [vmem:[%s23695_s1 + $0x14] sm:$0xf]  ;;  %v19764_v52 = vld [vmem:[#allocation2 + $0x60] sm:$0xff] }
  0x46   : > { %16255 = vmatprep.mubr.msk.f32.mxu0 %vm441_vm1, %v19657_v49  ;;  %v19762_v51 = vld [vmem:[#allocation2 + $0x50] sm:$0xff]  ;;  %v19774_v50 = vld [vmem:[#allocation2 + $0x78] sm:$0xff]  ;;  %v19812_v31 = vld [vmem:[#allocation2 + $0xe0] sm:$0xff] }
  0x47   : > { %v19725_v1 = vld [vmem:[#allocation2 + $0x154] sm:$0xff]  ;;  %v19731_v3 = vld [vmem:[#allocation2 + $0x15c] sm:$0xff]  ;;  %v19822_v24 = vld [vmem:[#allocation2 + $0x108] sm:$0xff] }
  0x48   : > { %v19733_v8 = vld [vmem:[#allocation2 + $0x16c] sm:$0xff]  ;;  %v19739_v9 = vld [vmem:[#allocation2 + $0x174] sm:$0xff]  ;;  %v19830_v22 = vld [vmem:[#allocation2 + $0x120] sm:$0xff] }
  0x49   : > { %16256 = vmatmul.mubr.msk.f32.gmra.mrb[16].mxu0 %vm441_vm1, %v19683_v54  ;;  %v19814_v26 = vld [vmem:[#allocation2 + $0xf0] sm:$0xff]  ;;  %v19820_v27 = vld [vmem:[#allocation2 + $0xf8] sm:$0xff]  ;;  %v19836_v23 = vld [vmem:[#allocation2 + $0x128] sm:$0xff] }
  0x4a   : > { %16258 = vmatprep.mubr.msk.f32.mxu0 %vm441_vm1, %v19685_v55  ;;  %v19828_v25 = vld [vmem:[#allocation2 + $0x110] sm:$0xff]  ;;  %v19838_v20 = vld [vmem:[#allocation2 + $0x138] sm:$0xff]  ;;  %v19844_v21 = vld [vmem:[#allocation2 + $0x140] sm:$0xff] }
  0x4b   : > { %v19846_v18 = vld [vmem:[#allocation2 + $0x150] sm:$0xff]  ;;  %v19852_v19 = vld [vmem:[#allocation2 + $0x158] sm:$0xff]  ;;  %v19854_v16 = vld [vmem:[#allocation2 + $0x168] sm:$0xff] }
  0x4c   : > { %23979 = vst [vmem:[#allocation37_spill] sm:$0xff] %v19852_v19  ;;  %23980 = vst [vmem:[#allocation38_spill] sm:$0xff] %v19854_v16  ;;  %v19860_v17 = vld [vmem:[#allocation2 + $0x170] sm:$0xff]  ;;  %v19862_v14 = vld [vmem:[#allocation2 + $0x180] sm:$0xff] }
  0x4d   : > { %16259 = vmatmul.mubr.msk.f32.gmra.mrb[18].mxu0 %vm441_vm1, %v19691_v56  ;;  %23981 = vst [vmem:[#allocation39_spill] sm:$0xff] %v19860_v17  ;;  %23982 = vst [vmem:[#allocation40_spill] sm:$0xff] %v19862_v14  ;;  %v19868_v15 = vld [vmem:[#allocation2 + $0x188] sm:$0xff]  ;;  %v19870_v12 = vld [vmem:[#allocation2 + $0x198] sm:$0xff] }
  0x4e   : > { %16261 = vmatprep.mubr.msk.f32.mxu0 %vm441_vm1, %v19693_v57  ;;  %23983 = vst [vmem:[#allocation41_spill] sm:$0xff] %v19868_v15  ;;  %23984 = vst [vmem:[#allocation42_spill] sm:$0xff] %v19870_v12  ;;  %v19876_v13 = vld [vmem:[#allocation2 + $0x1a0] sm:$0xff] }
  0x4f   : > { %23985 = vst [vmem:[#allocation43_spill] sm:$0xff] %v19876_v13 }
  0x51   : > { %16262 = vmatmul.mubr.msk.f32.gmra.mrb[20].mxu0 %vm441_vm1, %v19699_v58 }
  0x52   : > { %16264 = vmatprep.mubr.msk.f32.mxu0 %vm441_vm1, %v19701_v59 }
  0x55   : > { %16265 = vmatmul.mubr.msk.f32.gmra.mrb[22].mxu0 %vm441_vm1, %v19707_v60 }
  0x56   : > { %16267 = vmatprep.mubr.msk.f32.mxu0 %vm441_vm1, %v19709_v61 }
  0x59   : > { %16268 = vmatmul.mubr.msk.f32.gmra.mrb[24].mxu0 %vm441_vm1, %v19715_v62 }
  0x5a   : > { %16270 = vmatprep.mubr.msk.f32.mxu0 %vm441_vm1, %v19717_v63 }
  0x5d   : > { %16271 = vmatmul.mubr.msk.f32.gmra.mrb[26].mxu0 %vm441_vm1, %v19723_v0 }
  0x5e   : > { %16273 = vmatprep.mubr.msk.f32.mxu0 %vm441_vm1, %v19725_v1 }
  0x61   : > { %16274 = vmatmul.mubr.msk.f32.gmra.mrb[28].mxu0 %vm441_vm1, %v19731_v3 }
  0x62   : > { %16276 = vmatprep.mubr.msk.f32.mxu0 %vm441_vm1, %v19733_v8 }
  0x65   : > { %16277 = vmatmul.mubr.msk.f32.gmra.mrb[30].mxu0 %vm441_vm1, %v19739_v9 }
  0x66   : > { %16281 = vmatprep.mubr.msk.f32.mxu0 %vm441_vm1, %v19741_v10 }
  0x69   : > { %16282 = vmatmul.mubr.msk.f32.vlgmr.msra.gmra.mrb[0].mxu0 %vm441_vm1, %v19747_v11 }
  0x6a   : > { %16330 = vmatpush3.msk.msra.mxu0 %vm767_vm0, %v19470_v7  ;;  %16284 = vmatprep.mubr.msk.f32.mxu0 %vm441_vm1, %v19749_v2  ;;  %v19780_v7 = vld [vmem:[#allocation2 + $0x80] sm:$0xff] }
  0x6b   : > { %16379 = vmatprep.subr.msk.mxu0 %vm767_vm0, %v19754_v53 }
  0x6d   : > { %16285 = vmatmul.mubr.msk.f32.gmra.mrb[2].mxu0 %vm441_vm1, %v19762_v51 }
  0x6e   : > { %16287 = vmatprep.mubr.msk.f32.mxu0 %vm441_vm1, %v19764_v52 }
  0x71   : > { %16288 = vmatmul.mubr.msk.f32.gmra.mrb[4].mxu0 %vm441_vm1, %v19772_v43 }
  0x72   : > { %16290 = vmatprep.mubr.msk.f32.mxu0 %vm441_vm1, %v19774_v50 }
  0x75   : > { %16291 = vmatmul.mubr.msk.f32.gmra.mrb[6].mxu0 %vm441_vm1, %v19780_v7 }
  0x76   : > { %16293 = vmatprep.mubr.msk.f32.mxu0 %vm441_vm1, %v19782_v40 }
  0x79   : > { %16294 = vmatmul.mubr.msk.f32.gmra.mrb[8].mxu0 %vm441_vm1, %v19788_v41 }
  0x7a   : > { %16296 = vmatprep.mubr.msk.f32.mxu0 %vm441_vm1, %v19790_v34 }
  0x7d   : > { %16297 = vmatmul.mubr.msk.f32.gmra.mrb[10].mxu0 %vm441_vm1, %v19796_v36 }
  0x7e   : > { %16299 = vmatprep.mubr.msk.f32.mxu0 %vm441_vm1, %v19798_v32 }
  0x81   : > { %16300 = vmatmul.mubr.msk.f32.gmra.mrb[12].mxu0 %vm441_vm1, %v19804_v33 }
  0x82   : > { %16302 = vmatprep.mubr.msk.f32.mxu0 %vm441_vm1, %v19806_v28 }
  0x85   : > { %16303 = vmatmul.mubr.msk.f32.gmra.mrb[14].mxu0 %vm441_vm1, %v19812_v31 }
  0x86   : > { %16305 = vmatprep.mubr.msk.f32.mxu0 %vm441_vm1, %v19814_v26 }
  0x89   : > { %16306 = vmatmul.mubr.msk.f32.gmra.mrb[16].mxu0 %vm441_vm1, %v19820_v27 }
  0x8a   : > { %16308 = vmatprep.mubr.msk.f32.mxu0 %vm441_vm1, %v19822_v24 }
  0x8d   : > { %16309 = vmatmul.mubr.msk.f32.gmra.mrb[18].mxu0 %vm441_vm1, %v19828_v25 }
  0x8e   : > { %16311 = vmatprep.mubr.msk.f32.mxu0 %vm441_vm1, %v19830_v22 }
  0x91   : > { %16312 = vmatmul.mubr.msk.f32.gmra.mrb[20].mxu0 %vm441_vm1, %v19836_v23 }
  0x92   : > { %16314 = vmatprep.mubr.msk.f32.mxu0 %vm441_vm1, %v19838_v20 }
  0x95   : > { %16315 = vmatmul.mubr.msk.f32.gmra.mrb[22].mxu0 %vm441_vm1, %v19844_v21 }
  0x96   : > { %16317 = vmatprep.mubr.msk.f32.mxu0 %vm441_vm1, %v19846_v18 }
  0x99   : > { %16318 = vmatmul.mubr.msk.f32.gmra.mrb[24].mxu0 %vm441_vm1, %v19852_v19  ;;  %v640_v19 = vld [vmem:[#allocation2 + $0x22] sm:$0xff] }
  0x9a   : > { %16320 = vmatprep.mubr.msk.f32.mxu0 %vm441_vm1, %v19854_v16  ;;  %v639_v16 = vld [vmem:[#allocation2 + $0x1a] sm:$0xff] }
  0x9d   : > { %16321 = vmatmul.mubr.msk.f32.gmra.mrb[26].mxu0 %vm441_vm1, %v19860_v17  ;;  %v2101_v17 = vld [vmem:[#allocation2 + $0x3a] sm:$0xff] }
  0x9e   : > { %16323 = vmatprep.mubr.msk.f32.mxu0 %vm441_vm1, %v19862_v14  ;;  %v638_v14 = vld [vmem:[#allocation2 + $0xa] sm:$0xff] }
  0x9f   : > { %16132 = vmatmul.mubr.msk.f32.vlgmr.msra.gmra.mrb[0].mxu1 %vm441_vm1, %v638_v14  ;;  %v19909_v14 = vld [vmem:[#allocation2 + $0x7a] sm:$0xff] }
  0xa0   : > { %16134 = vmatprep.mubr.msk.f32.mxu1 %vm441_vm1, %v639_v16  ;;  %23986 = vst [vmem:[#allocation44_spill] sm:$0xff] %v19909_v14  ;;  %v19917_v16 = vld [vmem:[#allocation2 + $0x82] sm:$0xff] }
  0xa1   : > { %16324 = vmatmul.mubr.msk.f32.gmra.mrb[28].mxu0 %vm441_vm1, %v19868_v15  ;;  %v2102_v15 = vld [vmem:[#allocation2 + $0x4a] sm:$0xff]  ;;  %23987 = vst [vmem:[#allocation45_spill] sm:$0xff] %v19917_v16 }
  0xa2   : > { %16326 = vmatprep.mubr.msk.f32.mxu0 %vm441_vm1, %v19870_v12  ;;  %v2103_v12 = vld [vmem:[#allocation2 + $0x52] sm:$0xff] }
  0xa3   : > { %16135 = vmatmul.mubr.msk.f32.gmra.mrb[2].mxu1 %vm441_vm1, %v640_v19  ;;  %v19942_v19 = vld [vmem:[#allocation2 + $0xc2] sm:$0xff] }
  0xa4   : > { %16137 = vmatprep.mubr.msk.f32.mxu1 %vm441_vm1, %v2100_v6  ;;  %23992 = vst [vmem:[#allocation50_spill] sm:$0xff] %v19942_v19 }
  0xa5   : > { %16327 = vmatmul.mubr.msk.f32.gmra.mrb[30].mxu0 %vm441_vm1, %v19876_v13  ;;  %v19890_v13 = vld [vmem:[%s23695_s1 + $0x18] sm:$0xf] }
  0xa6   : > { %16331 = vmatprep.mubr.msk.f32.mxu0 %vm441_vm1, %v2100_v6  ;;  %v19919_v6 = vld [vmem:[#allocation2 + $0x92] sm:$0xff] }
  0xa7   : > { %16138 = vmatmul.mubr.msk.f32.gmra.mrb[4].mxu1 %vm441_vm1, %v2101_v17  ;;  %23988 = vst [vmem:[#allocation46_spill] sm:$0xff] %v19919_v6 }
  0xa8   : > { %16140 = vmatprep.mubr.msk.f32.mxu1 %vm441_vm1, %v2102_v15 }
  0xa9   : > { %16332 = vmatmul.mubr.msk.f32.vlgmr.msra.gmra.mrb[0].mxu0 %vm441_vm1, %v2101_v17  ;;  %v19928_v17 = vld [vmem:[#allocation2 + $0x9a] sm:$0xff] }
  0xaa   : > { %16380 = vmatpush3.msk.msra.mxu0 %vm767_vm0, %v19754_v53  ;;  %16334 = vmatprep.mubr.msk.f32.mxu0 %vm441_vm1, %v2102_v15  ;;  %23989 = vst [vmem:[#allocation47_spill] sm:$0xff] %v19928_v17  ;;  %v19930_v15 = vld [vmem:[#allocation2 + $0xaa] sm:$0xff] }
  0xab   : > { %16429 = vmatprep.subr.msk.mxu0 %vm767_vm0, %v19890_v13  ;;  %16141 = vmatmul.mubr.msk.f32.gmra.mrb[6].mxu1 %vm441_vm1, %v2103_v12  ;;  %23990 = vst [vmem:[#allocation48_spill] sm:$0xff] %v19930_v15  ;;  %v19952_v53 = vld [vmem:[#allocation2 + $0xca] sm:$0xff] }
  0xac   : > { %16143 = vmatprep.mubr.msk.f32.mxu1 %vm441_vm1, %v19897_v5  ;;  %23993 = vst [vmem:[#allocation51_spill] sm:$0xff] %v19952_v53 }
  0xad   : > { %16335 = vmatmul.mubr.msk.f32.gmra.mrb[2].mxu0 %vm441_vm1, %v2103_v12  ;;  %v19940_v12 = vld [vmem:[#allocation2 + $0xb2] sm:$0xff] }
  0xae   : > { %16337 = vmatprep.mubr.msk.f32.mxu0 %vm441_vm1, %v19897_v5  ;;  %23991 = vst [vmem:[#allocation49_spill] sm:$0xff] %v19940_v12 }
  0xaf   : > { %16144 = vmatmul.mubr.msk.f32.gmra.mrb[8].mxu1 %vm441_vm1, %v19907_v4 }
  0xb0   : > { %16146 = vmatprep.mubr.msk.f32.mxu1 %vm441_vm1, %v19909_v14 }
  0xb1   : > { %16338 = vmatmul.mubr.msk.f32.gmra.mrb[4].mxu0 %vm441_vm1, %v19907_v4 }
  0xb2   : > { %16340 = vmatprep.mubr.msk.f32.mxu0 %vm441_vm1, %v19909_v14  ;;  %v19954_v14 = vld [vmem:[#allocation2 + $0xda] sm:$0xff] }
  0xb3   : > { %16147 = vmatmul.mubr.msk.f32.gmra.mrb[10].mxu1 %vm441_vm1, %v19917_v16  ;;  %23994 = vst [vmem:[#allocation52_spill] sm:$0xff] %v19954_v14 }
  0xb4   : > { %16149 = vmatprep.mubr.msk.f32.mxu1 %vm441_vm1, %v19919_v6 }
  0xb5   : > { %16341 = vmatmul.mubr.msk.f32.gmra.mrb[6].mxu0 %vm441_vm1, %v19917_v16  ;;  %v19966_v16 = vld [vmem:[#allocation2 + $0xf2] sm:$0xff] }
  0xb6   : > { %16343 = vmatprep.mubr.msk.f32.mxu0 %vm441_vm1, %v19919_v6  ;;  %v19964_v6 = vld [vmem:[#allocation2 + $0xe2] sm:$0xff]  ;;  %23996 = vst [vmem:[#allocation54_spill] sm:$0xff] %v19966_v16 }
  0xb7   : > { %16150 = vmatmul.mubr.msk.f32.gmra.mrb[12].mxu1 %vm441_vm1, %v19928_v17  ;;  %23995 = vst [vmem:[#allocation53_spill] sm:$0xff] %v19964_v6 }
  0xb8   : > { %16152 = vmatprep.mubr.msk.f32.mxu1 %vm441_vm1, %v19930_v15 }
  0xb9   : > { %16344 = vmatmul.mubr.msk.f32.gmra.mrb[8].mxu0 %vm441_vm1, %v19928_v17  ;;  %v19978_v17 = vld [vmem:[#allocation2 + $0x10a] sm:$0xff] }
  0xba   : > { %16346 = vmatprep.mubr.msk.f32.mxu0 %vm441_vm1, %v19930_v15  ;;  %v19976_v15 = vld [vmem:[#allocation2 + $0xfa] sm:$0xff]  ;;  %23998 = vst [vmem:[#allocation56_spill] sm:$0xff] %v19978_v17 }
  0xbb   : > { %16153 = vmatmul.mubr.msk.f32.gmra.mrb[14].mxu1 %vm441_vm1, %v19940_v12  ;;  %23997 = vst [vmem:[#allocation55_spill] sm:$0xff] %v19976_v15 }
  0xbc   : > { %16155 = vmatprep.mubr.msk.f32.mxu1 %vm441_vm1, %v19942_v19 }
  0xbd   : > { %16347 = vmatmul.mubr.msk.f32.gmra.mrb[10].mxu0 %vm441_vm1, %v19940_v12  ;;  %v19990_v12 = vld [vmem:[#allocation2 + $0x122] sm:$0xff] }
  0xbe   : > { %16349 = vmatprep.mubr.msk.f32.mxu0 %vm441_vm1, %v19942_v19  ;;  %v19988_v19 = vld [vmem:[#allocation2 + $0x112] sm:$0xff]  ;;  %24000 = vst [vmem:[#allocation58_spill] sm:$0xff] %v19990_v12 }
  0xbf   : > { %16156 = vmatmul.mubr.msk.f32.gmra.mrb[16].mxu1 %vm441_vm1, %v19952_v53  ;;  %23999 = vst [vmem:[#allocation57_spill] sm:$0xff] %v19988_v19 }
  0xc0   : > { %16158 = vmatprep.mubr.msk.f32.mxu1 %vm441_vm1, %v19954_v14 }
  0xc1   : > { %16350 = vmatmul.mubr.msk.f32.gmra.mrb[12].mxu0 %vm441_vm1, %v19952_v53  ;;  %v20002_v53 = vld [vmem:[#allocation2 + $0x13a] sm:$0xff] }
  0xc2   : > { %16352 = vmatprep.mubr.msk.f32.mxu0 %vm441_vm1, %v19954_v14  ;;  %v20000_v14 = vld [vmem:[#allocation2 + $0x12a] sm:$0xff]  ;;  %24002 = vst [vmem:[#allocation60_spill] sm:$0xff] %v20002_v53 }
  0xc3   : > { %16159 = vmatmul.mubr.msk.f32.gmra.mrb[18].mxu1 %vm441_vm1, %v19964_v6  ;;  %24001 = vst [vmem:[#allocation59_spill] sm:$0xff] %v20000_v14 }
  0xc4   : > { %16161 = vmatprep.mubr.msk.f32.mxu1 %vm441_vm1, %v19966_v16 }
  0xc5   : > { %16353 = vmatmul.mubr.msk.f32.gmra.mrb[14].mxu0 %vm441_vm1, %v19964_v6  ;;  %v20014_v6 = vld [vmem:[#allocation2 + $0x152] sm:$0xff] }
  0xc6   : > { %16355 = vmatprep.mubr.msk.f32.mxu0 %vm441_vm1, %v19966_v16  ;;  %v20012_v16 = vld [vmem:[#allocation2 + $0x142] sm:$0xff]  ;;  %24003 = vst [vmem:[#allocation61_spill] sm:$0xff] %v20014_v6 }
  0xc7   : > { %16162 = vmatmul.mubr.msk.f32.gmra.mrb[20].mxu1 %vm441_vm1, %v19976_v15 }
  0xc8   : > { %16164 = vmatprep.mubr.msk.f32.mxu1 %vm441_vm1, %v19978_v17 }
  0xc9   : > { %16356 = vmatmul.mubr.msk.f32.gmra.mrb[16].mxu0 %vm441_vm1, %v19976_v15  ;;  %v20026_v15 = vld [vmem:[#allocation2 + $0x16a] sm:$0xff] }
  0xca   : > { %16358 = vmatprep.mubr.msk.f32.mxu0 %vm441_vm1, %v19978_v17  ;;  %v20024_v17 = vld [vmem:[#allocation2 + $0x15a] sm:$0xff] }
  0xcb   : > { %16165 = vmatmul.mubr.msk.f32.gmra.mrb[22].mxu1 %vm441_vm1, %v19988_v19  ;;  %24004 = vst [vmem:[#allocation62_spill] sm:$0xff] %v20024_v17 }
  0xcc   : > { %16167 = vmatprep.mubr.msk.f32.mxu1 %vm441_vm1, %v19990_v12 }
  0xcd   : > { %16359 = vmatmul.mubr.msk.f32.gmra.mrb[18].mxu0 %vm441_vm1, %v19988_v19  ;;  %v20038_v19 = vld [vmem:[#allocation2 + $0x182] sm:$0xff] }
  0xce   : > { %16361 = vmatprep.mubr.msk.f32.mxu0 %vm441_vm1, %v19990_v12  ;;  %v20036_v12 = vld [vmem:[#allocation2 + $0x172] sm:$0xff]  ;;  %24005 = vst [vmem:[#allocation63_spill] sm:$0xff] %v20038_v19 }
  0xcf   : > { %16168 = vmatmul.mubr.msk.f32.gmra.mrb[24].mxu1 %vm441_vm1, %v20000_v14 }
  0xd0   : > { %16170 = vmatprep.mubr.msk.f32.mxu1 %vm441_vm1, %v20002_v53 }
  0xd1   : > { %16362 = vmatmul.mubr.msk.f32.gmra.mrb[20].mxu0 %vm441_vm1, %v20000_v14  ;;  %v20050_v14 = vld [vmem:[#allocation2 + $0x19a] sm:$0xff] }
  0xd2   : > { %16364 = vmatprep.mubr.msk.f32.mxu0 %vm441_vm1, %v20002_v53  ;;  %v20048_v53 = vld [vmem:[#allocation2 + $0x18a] sm:$0xff]  ;;  %24007 = vst [vmem:[#allocation65_spill] sm:$0xff] %v20050_v14 }
  0xd3   : > { %16171 = vmatmul.mubr.msk.f32.gmra.mrb[26].mxu1 %vm441_vm1, %v20012_v16  ;;  %24006 = vst [vmem:[#allocation64_spill] sm:$0xff] %v20048_v53 }
  0xd4   : > { %16173 = vmatprep.mubr.msk.f32.mxu1 %vm441_vm1, %v20014_v6 }
  0xd5   : > { %16365 = vmatmul.mubr.msk.f32.gmra.mrb[22].mxu0 %vm441_vm1, %v20012_v16 }
  0xd6   : > { %16367 = vmatprep.mubr.msk.f32.mxu0 %vm441_vm1, %v20014_v6  ;;  %v20060_v6 = vld [vmem:[#allocation2 + $0x1a2] sm:$0xff] }
  0xd7   : > { %16174 = vmatmul.mubr.msk.f32.gmra.mrb[28].mxu1 %vm441_vm1, %v20024_v17 }
  0xd8   : > { %16176 = vmatprep.mubr.msk.f32.mxu1 %vm441_vm1, %v20026_v15 }
  0xd9   : > { %16368 = vmatmul.mubr.msk.f32.gmra.mrb[24].mxu0 %vm441_vm1, %v20024_v17  ;;  %v604_v17 = vld [vmem:[#allocation2] sm:$0xff] }
  0xda   : > { %16370 = vmatprep.mubr.msk.f32.mxu0 %vm441_vm1, %v20026_v15 }
  0xdb   : > { %16177 = vmatmul.mubr.msk.f32.gmra.mrb[30].mxu1 %vm441_vm1, %v20036_v12 }
  0xdc   : > { %16181 = vmatprep.mubr.msk.f32.mxu1 %vm441_vm1, %v604_v17  ;;  %v3663_v17 = vld [vmem:[#allocation2 + $0x7c] sm:$0xff] }
  0xdd   : > { %16371 = vmatmul.mubr.msk.f32.gmra.mrb[26].mxu0 %vm441_vm1, %v20036_v12 }
  0xde   : > { %16373 = vmatprep.mubr.msk.f32.mxu0 %vm441_vm1, %v20038_v19  ;;  %v636_v19 = vld [vmem:[%s23695_s1] sm:$0xf] }
  0xdf   : > { %16179 = vmatprep.subr.msk.mxu1 %vm767_vm0, %v636_v19 }
  0xe0   : > { %16180 = vmatpush3.msk.msra.mxu1 %vm767_vm0, %v636_v19  ;;  %v607_v19 = vld [vmem:[#allocation2 + $0x20] sm:$0xff] }
  0xe1   : > { %16374 = vmatmul.mubr.msk.f32.gmra.mrb[28].mxu0 %vm441_vm1, %v20048_v53  ;;  %v605_v53 = vld [vmem:[#allocation2 + $0x8] sm:$0xff] }
  0xe2   : > { %16376 = vmatprep.mubr.msk.f32.mxu0 %vm441_vm1, %v20050_v14  ;;  %v20077_v14 = vld [vmem:[%s23695_s1 + $0x1c] sm:$0xf]  ;;  %16182 = vmatmul.mubr.msk.f32.vlgmr.msra.gmra.mrb[0].mxu1 %vm441_vm1, %v605_v53  ;;  %v3667_v53 = vld [vmem:[#allocation2 + $0xac] sm:$0xff] }
  0xe5   : > { %16377 = vmatmul.mubr.msk.f32.gmra.mrb[30].mxu0 %vm441_vm1, %v20060_v6 }
  0xe6   : > { %16381 = vmatprep.mubr.msk.f32.mxu0 %vm441_vm1, %v19565_v29  ;;  %v606_v29 = vld [vmem:[#allocation2 + $0x18] sm:$0xff] }
  0xe7   : > { %16184 = vmatprep.mubr.msk.f32.mxu1 %vm441_vm1, %v606_v29  ;;  %v3668_v29 = vld [vmem:[#allocation2 + $0xb4] sm:$0xff] }
  0xe8   : > { %16185 = vmatmul.mubr.msk.f32.gmra.mrb[2].mxu1 %vm441_vm1, %v607_v19  ;;  %v3669_v19 = vld [vmem:[#allocation2 + $0xc4] sm:$0xff] }
  0xe9   : > { %16382 = vmatmul.mubr.msk.f32.vlgmr.msra.gmra.mrb[0].mxu0 %vm441_vm1, %v19567_v30  ;;  %16187 = vmatprep.mubr.msk.f32.mxu1 %vm441_vm1, %v19741_v10  ;;  %v20196_v30 = vld [vmem:[#allocation2 + $0x19c] sm:$0xff] }
  0xea   : > { %16430 = vmatpush3.msk.msra.mxu0 %vm767_vm0, %v19890_v13  ;;  %16384 = vmatprep.mubr.msk.f32.mxu0 %vm441_vm1, %v19591_v35  ;;  %v20194_v13 = vld [vmem:[#allocation2 + $0x18c] sm:$0xff]  ;;  %v24008_v35 = vld [vmem:[#allocation37_spill] sm:$0xff] }
  0xeb   : > { %16479 = vmatprep.subr.msk.mxu0 %vm767_vm0, %v20077_v14  ;;  %v24037_v10 = vld [vmem:[#allocation65_spill] sm:$0xff] }
  0xec   : > { %16188 = vmatmul.mubr.msk.f32.gmra.mrb[4].mxu1 %vm441_vm1, %v19747_v11  ;;  %v3299_v11 = vld [vmem:[#allocation2 + $0x1b2] sm:$0xff] }
  0xed   : > { %16385 = vmatmul.mubr.msk.f32.gmra.mrb[2].mxu0 %vm441_vm1, %v19608_v37  ;;  %16190 = vmatprep.mubr.msk.f32.mxu1 %vm441_vm1, %v19749_v2  ;;  %v20184_v2 = vld [vmem:[#allocation2 + $0x184] sm:$0xff] }
  0xee   : > { %16387 = vmatprep.mubr.msk.f32.mxu0 %vm441_vm1, %v19610_v38  ;;  %v24009_v37 = vld [vmem:[#allocation38_spill] sm:$0xff] }
  0xef   : > { %v20206_v38 = vld [vmem:[#allocation2 + $0x1a4] sm:$0xff] }
  0xf0   : > { %16191 = vmatmul.mubr.msk.f32.gmra.mrb[6].mxu1 %vm441_vm1, %v19762_v51 }
  0xf1   : > { %16388 = vmatmul.mubr.msk.f32.gmra.mrb[4].mxu0 %vm441_vm1, %v19616_v39  ;;  %16193 = vmatprep.mubr.msk.f32.mxu1 %vm441_vm1, %v19764_v52  ;;  %v24010_v39 = vld [vmem:[#allocation39_spill] sm:$0xff] }
  0xf2   : > { %16390 = vmatprep.mubr.msk.f32.mxu0 %vm441_vm1, %v19624_v42  ;;  %v14095_v42 = vld [vmem:[%s23695_s1 + $0x20] sm:$0xf] }
  0xf4   : > { %16194 = vmatmul.mubr.msk.f32.gmra.mrb[8].mxu1 %vm441_vm1, %v19772_v43 }
  0xf5   : > { %16391 = vmatmul.mubr.msk.f32.gmra.mrb[6].mxu0 %vm441_vm1, %v19639_v44  ;;  %16196 = vmatprep.mubr.msk.f32.mxu1 %vm441_vm1, %v19774_v50  ;;  %v24016_v44 = vld [vmem:[#allocation45_spill] sm:$0xff] }
  0xf6   : > { %16393 = vmatprep.mubr.msk.f32.mxu0 %vm441_vm1, %v19641_v45  ;;  %v24017_v45 = vld [vmem:[#allocation46_spill] sm:$0xff] }
  0xf8   : > { %16197 = vmatmul.mubr.msk.f32.gmra.mrb[10].mxu1 %vm441_vm1, %v19780_v7 }
  0xf9   : > { %16394 = vmatmul.mubr.msk.f32.gmra.mrb[8].mxu0 %vm441_vm1, %v19647_v46  ;;  %16199 = vmatprep.mubr.msk.f32.mxu1 %vm441_vm1, %v19782_v40  ;;  %v24018_v46 = vld [vmem:[#allocation47_spill] sm:$0xff] }
  0xfa   : > { %16396 = vmatprep.mubr.msk.f32.mxu0 %vm441_vm1, %v19649_v47  ;;  %v24019_v47 = vld [vmem:[#allocation48_spill] sm:$0xff] }
  0xfc   : > { %16200 = vmatmul.mubr.msk.f32.gmra.mrb[12].mxu1 %vm441_vm1, %v19788_v41 }
  0xfd   : > { %16397 = vmatmul.mubr.msk.f32.gmra.mrb[10].mxu0 %vm441_vm1, %v19655_v48  ;;  %16202 = vmatprep.mubr.msk.f32.mxu1 %vm441_vm1, %v19790_v34  ;;  %v14136_v48 = vld [vmem:[%s23697_s3 + $0x70] sm:$0xff] }
  0xfe   : > { %16399 = vmatprep.mubr.msk.f32.mxu0 %vm441_vm1, %v19657_v49  ;;  %v14137_v49 = vld [vmem:[%s23697_s3 + $0x78] sm:$0xff] }
  0xff   : > { %v17887_v51 = vpack.c.bf16 %v14137_v49, %v14136_v48  ;;  %v3684_v48 = vld [vmem:[#allocation2 + $0x174] sm:$0xff] }
 0x100   : > { %16203 = vmatmul.mubr.msk.f32.gmra.mrb[14].mxu1 %vm441_vm1, %v19796_v36 }
 0x101   : > { %16400 = vmatmul.mubr.msk.f32.gmra.mrb[12].mxu0 %vm441_vm1, %v19683_v54  ;;  %16205 = vmatprep.mubr.msk.f32.mxu1 %vm441_vm1, %v19798_v32  ;;  %v24022_v54 = vld [vmem:[#allocation51_spill] sm:$0xff] }
 0x102   : > { %16402 = vmatprep.mubr.msk.f32.mxu0 %vm441_vm1, %v19685_v55  ;;  %v24023_v55 = vmov 0.0  }
 0x103   : > { %491 = vst.msk [vmem:[#allocation3] sm:$0xff] %vm490_vm4, %v24023_v55  ;;  %492 = vst.msk [vmem:[#allocation3 + $0x8] sm:$0xff] %vm490_vm4, %v24023_v55 }
 0x104   : > { %16206 = vmatmul.mubr.msk.f32.gmra.mrb[16].mxu1 %vm441_vm1, %v19804_v33  ;;  %495 = vst.msk [vmem:[#allocation3 + $0x18] sm:$0xff] %vm490_vm4, %v24023_v55  ;;  %496 = vst.msk [vmem:[#allocation3 + $0x20] sm:$0xff] %vm490_vm4, %v24023_v55 }
 0x105   : > { %16403 = vmatmul.mubr.msk.f32.gmra.mrb[14].mxu0 %vm441_vm1, %v19691_v56  ;;  %16208 = vmatprep.mubr.msk.f32.mxu1 %vm441_vm1, %v19806_v28  ;;  %499 = vst.msk [vmem:[#allocation3 + $0x1b0] sm:$0xff] %vm490_vm4, %v24023_v55  ;;  %500 = vst.msk [vmem:[#allocation3 + $0x1b8] sm:$0xff] %vm490_vm4, %v24023_v55  ;;  %v24024_v56 = vld [vmem:[#allocation52_spill] sm:$0xff] }
 0x106   : > { %16405 = vmatprep.mubr.msk.f32.mxu0 %vm441_vm1, %v19693_v57  ;;  %502 = vst.msk [vmem:[#allocation3 + $0x1c8] sm:$0xff] %vm490_vm4, %v24023_v55  ;;  %503 = vst.msk [vmem:[#allocation3 + $0x1d0] sm:$0xff] %vm490_vm4, %v24023_v55  ;;  %v24025_v57 = vld [vmem:[#allocation53_spill] sm:$0xff] }
 0x107   : > { %494 = vst.msk [vmem:[#allocation3 + $0x10] sm:$0xf] %vm493_vm5, %v24023_v55  ;;  %497 = vst.msk [vmem:[#allocation3 + $0x28] sm:$0xf] %vm493_vm5, %v24023_v55 }
 0x108   : > { %16209 = vmatmul.mubr.msk.f32.gmra.mrb[18].mxu1 %vm441_vm1, %v19812_v31  ;;  %501 = vst.msk [vmem:[#allocation3 + $0x1c0] sm:$0xf] %vm493_vm5, %v24023_v55  ;;  %504 = vst.msk [vmem:[#allocation3 + $0x1d8] sm:$0xf] %vm493_vm5, %v24023_v55 }
 0x109   : > { %16406 = vmatmul.mubr.msk.f32.gmra.mrb[16].mxu0 %vm441_vm1, %v19699_v58  ;;  %16211 = vmatprep.mubr.msk.f32.mxu1 %vm441_vm1, %v19814_v26  ;;  %v24026_v58 = vld [vmem:[#allocation54_spill] sm:$0xff]  ;;  %507 = vst.msk [vmem:[#allocation3 + $0x30] sm:$0x3] %vm506_vm6, %v24023_v55  ;;  %508 = vst.msk [vmem:[#allocation3 + $0x48] sm:$0x3] %vm506_vm6, %v24023_v55 }
 0x10a   : > { %16408 = vmatprep.mubr.msk.f32.mxu0 %vm441_vm1, %v19701_v59  ;;  %v24027_v59 = vld [vmem:[#allocation55_spill] sm:$0xff]  ;;  %509 = vst.msk [vmem:[#allocation3 + $0x60] sm:$0x3] %vm506_vm6, %v24023_v55  ;;  %510 = vst.msk [vmem:[#allocation3 + $0x78] sm:$0x3] %vm506_vm6, %v24023_v55 }
 0x10b   : > { %511 = vst.msk [vmem:[#allocation3 + $0x90] sm:$0x3] %vm506_vm6, %v24023_v55  ;;  %512 = vst.msk [vmem:[#allocation3 + $0xa8] sm:$0x3] %vm506_vm6, %v24023_v55 }
 0x10c   : > { %16212 = vmatmul.mubr.msk.f32.gmra.mrb[20].mxu1 %vm441_vm1, %v19820_v27  ;;  %513 = vst.msk [vmem:[#allocation3 + $0xc0] sm:$0x3] %vm506_vm6, %v24023_v55  ;;  %514 = vst.msk [vmem:[#allocation3 + $0xd8] sm:$0x3] %vm506_vm6, %v24023_v55 }
 0x10d   : > { %16409 = vmatmul.mubr.msk.f32.gmra.mrb[18].mxu0 %vm441_vm1, %v19707_v60  ;;  %16214 = vmatprep.mubr.msk.f32.mxu1 %vm441_vm1, %v19822_v24  ;;  %v24028_v60 = vld [vmem:[#allocation56_spill] sm:$0xff]  ;;  %515 = vst.msk [vmem:[#allocation3 + $0xf0] sm:$0x3] %vm506_vm6, %v24023_v55  ;;  %516 = vst.msk [vmem:[#allocation3 + $0x108] sm:$0x3] %vm506_vm6, %v24023_v55 }
 0x10e   : > { %16411 = vmatprep.mubr.msk.f32.mxu0 %vm441_vm1, %v19709_v61  ;;  %v24029_v61 = vld [vmem:[#allocation57_spill] sm:$0xff]  ;;  %517 = vst.msk [vmem:[#allocation3 + $0x120] sm:$0x3] %vm506_vm6, %v24023_v55  ;;  %518 = vst.msk [vmem:[#allocation3 + $0x138] sm:$0x3] %vm506_vm6, %v24023_v55 }
 0x10f   : > { %519 = vst.msk [vmem:[#allocation3 + $0x150] sm:$0x3] %vm506_vm6, %v24023_v55  ;;  %520 = vst.msk [vmem:[#allocation3 + $0x168] sm:$0x3] %vm506_vm6, %v24023_v55 }
 0x110   : > { %16215 = vmatmul.mubr.msk.f32.gmra.mrb[22].mxu1 %vm441_vm1, %v19828_v25  ;;  %521 = vst.msk [vmem:[#allocation3 + $0x180] sm:$0x3] %vm506_vm6, %v24023_v55  ;;  %522 = vst.msk [vmem:[#allocation3 + $0x198] sm:$0x3] %vm506_vm6, %v24023_v55 }
 0x111   : > { %16412 = vmatmul.mubr.msk.f32.gmra.mrb[20].mxu0 %vm441_vm1, %v19715_v62  ;;  %16217 = vmatprep.mubr.msk.f32.mxu1 %vm441_vm1, %v19830_v22  ;;  %v24030_v62 = vld [vmem:[#allocation58_spill] sm:$0xff]  ;;  %523 = vst.msk [vmem:[#allocation3 + $0x42] sm:$0x3] %vm506_vm6, %v24023_v55  ;;  %524 = vst.msk [vmem:[#allocation3 + $0x5a] sm:$0x3] %vm506_vm6, %v24023_v55 }
 0x112   : > { %16414 = vmatprep.mubr.msk.f32.mxu0 %vm441_vm1, %v19717_v63  ;;  %v24031_v63 = vld [vmem:[#allocation59_spill] sm:$0xff]  ;;  %525 = vst.msk [vmem:[#allocation3 + $0x72] sm:$0x3] %vm506_vm6, %v24023_v55  ;;  %526 = vst.msk [vmem:[#allocation3 + $0x8a] sm:$0x3] %vm506_vm6, %v24023_v55 }
 0x113   : > { %527 = vst.msk [vmem:[#allocation3 + $0xa2] sm:$0x3] %vm506_vm6, %v24023_v55  ;;  %528 = vst.msk [vmem:[#allocation3 + $0xba] sm:$0x3] %vm506_vm6, %v24023_v55 }
 0x114   : > { %16218 = vmatmul.mubr.msk.f32.gmra.mrb[24].mxu1 %vm441_vm1, %v19836_v23  ;;  %529 = vst.msk [vmem:[#allocation3 + $0xd2] sm:$0x3] %vm506_vm6, %v24023_v55  ;;  %530 = vst.msk [vmem:[#allocation3 + $0xea] sm:$0x3] %vm506_vm6, %v24023_v55 }
 0x115   : > { %16415 = vmatmul.mubr.msk.f32.gmra.mrb[22].mxu0 %vm441_vm1, %v19723_v0  ;;  %16220 = vmatprep.mubr.msk.f32.mxu1 %vm441_vm1, %v19838_v20  ;;  %v24032_v0 = vld [vmem:[#allocation60_spill] sm:$0xff]  ;;  %531 = vst.msk [vmem:[#allocation3 + $0x102] sm:$0x3] %vm506_vm6, %v24023_v55  ;;  %532 = vst.msk [vmem:[#allocation3 + $0x11a] sm:$0x3] %vm506_vm6, %v24023_v55 }
 0x116   : > { %16417 = vmatprep.mubr.msk.f32.mxu0 %vm441_vm1, %v19725_v1  ;;  %v24033_v1 = vld [vmem:[#allocation61_spill] sm:$0xff]  ;;  %533 = vst.msk [vmem:[#allocation3 + $0x132] sm:$0x3] %vm506_vm6, %v24023_v55  ;;  %534 = vst.msk [vmem:[#allocation3 + $0x14a] sm:$0x3] %vm506_vm6, %v24023_v55 }
 0x117   : > { %535 = vst.msk [vmem:[#allocation3 + $0x162] sm:$0x3] %vm506_vm6, %v24023_v55  ;;  %536 = vst.msk [vmem:[#allocation3 + $0x17a] sm:$0x3] %vm506_vm6, %v24023_v55 }
 0x118   : > { %16221 = vmatmul.mubr.msk.f32.gmra.mrb[26].mxu1 %vm441_vm1, %v19844_v21  ;;  %537 = vst.msk [vmem:[#allocation3 + $0x192] sm:$0x3] %vm506_vm6, %v24023_v55  ;;  %538 = vst.msk [vmem:[#allocation3 + $0x1aa] sm:$0x3] %vm506_vm6, %v24023_v55 }
 0x119   : > { %16418 = vmatmul.mubr.msk.f32.gmra.mrb[24].mxu0 %vm441_vm1, %v19731_v3  ;;  %16223 = vmatprep.mubr.msk.f32.mxu1 %vm441_vm1, %v19846_v18  ;;  %v24034_v3 = vld [vmem:[#allocation62_spill] sm:$0xff] }
 0x11a   : > { %16420 = vmatprep.mubr.msk.f32.mxu0 %vm441_vm1, %v19733_v8  ;;  %v24035_v8 = vld [vmem:[#allocation63_spill] sm:$0xff] }
 0x11c   : > { %16224 = vmatmul.mubr.msk.f32.gmra.mrb[28].mxu1 %vm441_vm1, %v24008_v35 }
 0x11d   : > { %16421 = vmatmul.mubr.msk.f32.gmra.mrb[26].mxu0 %vm441_vm1, %v19739_v9  ;;  %16226 = vmatprep.mubr.msk.f32.mxu1 %vm441_vm1, %v24009_v37  ;;  %v24036_v9 = vld [vmem:[#allocation64_spill] sm:$0xff] }
 0x11e   : > { %16423 = vmatprep.mubr.msk.f32.mxu0 %vm441_vm1, %v20184_v2 }
 0x120   : > { %16227 = vmatmul.mubr.msk.f32.gmra.mrb[30].mxu1 %vm441_vm1, %v24010_v39 }
 0x121   : > { %16424 = vmatmul.mubr.msk.f32.gmra.mrb[28].mxu0 %vm441_vm1, %v20194_v13 }
 0x122   : > { %16426 = vmatprep.mubr.msk.f32.mxu0 %vm441_vm1, %v20196_v30 }
 0x125   : > { %16427 = vmatmul.mubr.msk.f32.gmra.mrb[30].mxu0 %vm441_vm1, %v20206_v38 }
 0x126   : > { %16431 = vmatprep.mubr.msk.f32.mxu0 %vm441_vm1, %v19764_v52  ;;  %v24021_v52 = vld [vmem:[#allocation50_spill] sm:$0xff] }
 0x129   : > { %16432 = vmatmul.mubr.msk.f32.vlgmr.msra.gmra.mrb[0].mxu0 %vm441_vm1, %v19772_v43 }
 0x12a   : > { %16480 = vmatpush3.msk.msra.mxu0 %vm767_vm0, %v20077_v14  ;;  %16434 = vmatprep.mubr.msk.f32.mxu0 %vm441_vm1, %v19774_v50  ;;  %v24020_v50 = vld [vmem:[#allocation49_spill] sm:$0xff] }
 0x12b   : > { %16529 = vmatprep.subr.msk.mxu0 %vm767_vm0, %v14095_v42  ;;  %v3661_v14 = vld [vmem:[#allocation2 + $0x64] sm:$0xff] }
 0x12d   : > { %16435 = vmatmul.mubr.msk.f32.gmra.mrb[2].mxu0 %vm441_vm1, %v19780_v7  ;;  %v3300_v7 = vld [vmem:[#allocation2 + $0x1ba] sm:$0xff] }
 0x12e   : > { %16437 = vmatprep.mubr.msk.f32.mxu0 %vm441_vm1, %v19782_v40  ;;  %v14135_v40 = vld [vmem:[%s23697_s3 + $0x68] sm:$0xff] }
 0x131   : > { %16438 = vmatmul.mubr.msk.f32.gmra.mrb[4].mxu0 %vm441_vm1, %v19788_v41  ;;  %v24015_v41 = vld [vmem:[#allocation44_spill] sm:$0xff] }
 0x132   : > { %16440 = vmatprep.mubr.msk.f32.mxu0 %vm441_vm1, %v19790_v34 }
 0x135   : > { %16441 = vmatmul.mubr.msk.f32.gmra.mrb[6].mxu0 %vm441_vm1, %v19796_v36  ;;  %v14134_v36 = vld [vmem:[%s23697_s3 + $0x60] sm:$0xff] }
 0x136   : > { %16443 = vmatprep.mubr.msk.f32.mxu0 %vm441_vm1, %v19798_v32  ;;  %v17883_v43 = vpack.c.bf16 %v14135_v40, %v14134_v36  ;;  %v3680_v36 = vld [vmem:[#allocation2 + $0x144] sm:$0xff]  ;;  %v3681_v40 = vld [vmem:[#allocation2 + $0x154] sm:$0xff] }
 0x139   : > { %16444 = vmatmul.mubr.msk.f32.gmra.mrb[8].mxu0 %vm441_vm1, %v19804_v33  ;;  %v14133_v33 = vld [vmem:[%s23697_s3 + $0x58] sm:$0xff] }
 0x13a   : > { %16446 = vmatprep.mubr.msk.f32.mxu0 %vm441_vm1, %v19806_v28  ;;  %v14131_v28 = vld [vmem:[%s23697_s3 + $0x48] sm:$0xff] }
 0x13d   : > { %16447 = vmatmul.mubr.msk.f32.gmra.mrb[10].mxu0 %vm441_vm1, %v19812_v31  ;;  %v14132_v31 = vld [vmem:[%s23697_s3 + $0x50] sm:$0xff] }
 0x13e   : > { %16449 = vmatprep.mubr.msk.f32.mxu0 %vm441_vm1, %v19814_v26  ;;  %v2912_v26 = vld [vmem:[#allocation2 + $0x1d0] sm:$0xff]  ;;  %v17879_v34 = vpack.c.bf16 %v14133_v33, %v14132_v31 }
 0x13f   : > { %v3678_v31 = vld [vmem:[#allocation2 + $0x12c] sm:$0xff] }
 0x141   : > { %16450 = vmatmul.mubr.msk.f32.gmra.mrb[12].mxu0 %vm441_vm1, %v19820_v27  ;;  %v14130_v27 = vld [vmem:[%s23697_s3 + $0x40] sm:$0xff] }
 0x142   : > { %16452 = vmatprep.mubr.msk.f32.mxu0 %vm441_vm1, %v19822_v24  ;;  %v2910_v24 = vld [vmem:[#allocation2 + $0x1b8] sm:$0xff]  ;;  %v17875_v32 = vpack.c.bf16 %v14131_v28, %v14130_v27 }
 0x144   : > { %17876 = vmatprep.subr.bf16.mxu1 %v17875_v32 }
 0x145   : > { %16453 = vmatmul.mubr.msk.f32.gmra.mrb[14].mxu0 %vm441_vm1, %v19828_v25  ;;  %v2911_v25 = vld [vmem:[#allocation2 + $0x1c8] sm:$0xff]  ;;  %17878 = vmatpush3.bf16.msra.mxu1 %v17875_v32  ;;  %v3679_v32 = vld [vmem:[#allocation2 + $0x13c] sm:$0xff] }
 0x146   : > { %16455 = vmatprep.mubr.msk.f32.mxu0 %vm441_vm1, %v19830_v22  ;;  %v24011_v22 = vld [vmem:[#allocation40_spill] sm:$0xff]  ;;  %17880 = vmatprep.subr.bf16.mxu1 %v17879_v34 }
 0x149   : > { %16456 = vmatmul.mubr.msk.f32.gmra.mrb[16].mxu0 %vm441_vm1, %v19836_v23  ;;  %v24012_v23 = vld [vmem:[#allocation41_spill] sm:$0xff]  ;;  %17882 = vmatpush3.bf16.msra.mxu1 %v17879_v34 }
 0x14a   : > { %16458 = vmatprep.mubr.msk.f32.mxu0 %vm441_vm1, %v19838_v20  ;;  %v24013_v20 = vld [vmem:[#allocation42_spill] sm:$0xff]  ;;  %17884 = vmatprep.subr.bf16.mxu1 %v17883_v43 }
 0x14d   : > { %16459 = vmatmul.mubr.msk.f32.gmra.mrb[18].mxu0 %vm441_vm1, %v19844_v21  ;;  %v2909_v21 = vld [vmem:[#allocation2 + $0x1b0] sm:$0xff]  ;;  %17886 = vmatpush3.bf16.msra.mxu1 %v17883_v43 }
 0x14e   : > { %16461 = vmatprep.mubr.msk.f32.mxu0 %vm441_vm1, %v19846_v18  ;;  %v24014_v18 = vld [vmem:[#allocation43_spill] sm:$0xff]  ;;  %17888 = vmatprep.subr.bf16.mxu1 %v17887_v51 }
 0x151   : > { %16462 = vmatmul.mubr.msk.f32.gmra.mrb[20].mxu0 %vm441_vm1, %v24008_v35  ;;  %17890 = vmatpush3.bf16.msra.mxu1 %v17887_v51  ;;  %v3670_v35 = vld [vmem:[#allocation2 + $0xcc] sm:$0xff] }
 0x152   : > { %16464 = vmatprep.mubr.msk.f32.mxu0 %vm441_vm1, %v24009_v37  ;;  %v3671_v37 = vld [vmem:[#allocation2 + $0xdc] sm:$0xff] }
 0x155   : > { %16465 = vmatmul.mubr.msk.f32.gmra.mrb[22].mxu0 %vm441_vm1, %v24010_v39  ;;  %v3672_v39 = vld [vmem:[#allocation2 + $0xe4] sm:$0xff] }
 0x156   : > { %16467 = vmatprep.mubr.msk.f32.mxu0 %vm441_vm1, %v24011_v22 }
 0x159   : > { %16468 = vmatmul.mubr.msk.f32.gmra.mrb[24].mxu0 %vm441_vm1, %v24012_v23 }
 0x15a   : > { %16470 = vmatprep.mubr.msk.f32.mxu0 %vm441_vm1, %v24013_v20  ;;  %v3674_v20 = vld [vmem:[#allocation2 + $0xfc] sm:$0xff] }
 0x15d   : > { %16471 = vmatmul.mubr.msk.f32.gmra.mrb[26].mxu0 %vm441_vm1, %v24014_v18 }
 0x15e   : > { %16473 = vmatprep.mubr.msk.f32.mxu0 %vm441_vm1, %v2909_v21  ;;  %v3675_v21 = vld [vmem:[#allocation2 + $0x10c] sm:$0xff] }
 0x161   : > { %16474 = vmatmul.mubr.msk.f32.gmra.mrb[28].mxu0 %vm441_vm1, %v2910_v24 }
 0x162   : > { %16476 = vmatprep.mubr.msk.f32.mxu0 %vm441_vm1, %v2911_v25  ;;  %v3676_v25 = vld [vmem:[#allocation2 + $0x114] sm:$0xff] }
 0x165   : > { %16477 = vmatmul.mubr.msk.f32.gmra.mrb[30].mxu0 %vm441_vm1, %v2912_v26  ;;  %v3677_v26 = vld [vmem:[#allocation2 + $0x124] sm:$0xff] }
 0x166   : > { %16481 = vmatprep.mubr.msk.f32.mxu0 %vm441_vm1, %v19897_v5  ;;  %v3301_v5 = vld [vmem:[#allocation2 + $0x1ca] sm:$0xff] }
 0x169   : > { %16482 = vmatmul.mubr.msk.f32.vlgmr.msra.gmra.mrb[0].mxu0 %vm441_vm1, %v19907_v4  ;;  %v3302_v4 = vld [vmem:[#allocation2 + $0x1d2] sm:$0xff] }
 0x16a   : > { %16530 = vmatpush3.msk.msra.mxu0 %vm767_vm0, %v14095_v42  ;;  %16484 = vmatprep.mubr.msk.f32.mxu0 %vm441_vm1, %v24015_v41  ;;  %v3673_v42 = vld [vmem:[#allocation2 + $0xf4] sm:$0xff] }
 0x16d   : > { %16485 = vmatmul.mubr.msk.f32.gmra.mrb[2].mxu0 %vm441_vm1, %v24016_v44  ;;  %v3682_v44 = vld [vmem:[#allocation2 + $0x15c] sm:$0xff] }
 0x16e   : > { %16487 = vmatprep.mubr.msk.f32.mxu0 %vm441_vm1, %v24017_v45  ;;  %v3683_v45 = vld [vmem:[#allocation2 + $0x16c] sm:$0xff] }
 0x171   : > { %16488 = vmatmul.mubr.msk.f32.gmra.mrb[4].mxu0 %vm441_vm1, %v24018_v46 }
 0x172   : > { %16490 = vmatprep.mubr.msk.f32.mxu0 %vm441_vm1, %v24019_v47 }
 0x175   : > { %16491 = vmatmul.mubr.msk.f32.gmra.mrb[6].mxu0 %vm441_vm1, %v24020_v50 }
 0x176   : > { %16493 = vmatprep.mubr.msk.f32.mxu0 %vm441_vm1, %v24021_v52 }
 0x179   : > { %16494 = vmatmul.mubr.msk.f32.gmra.mrb[8].mxu0 %vm441_vm1, %v24022_v54  ;;  %v3689_v54 = vld [vmem:[#allocation2 + $0x1b4] sm:$0xff] }
 0x17a   : > { %16496 = vmatprep.mubr.msk.f32.mxu0 %vm441_vm1, %v24024_v56 }
 0x17d   : > { %16497 = vmatmul.mubr.msk.f32.gmra.mrb[10].mxu0 %vm441_vm1, %v24025_v57 }
 0x17e   : > { %16499 = vmatprep.mubr.msk.f32.mxu0 %vm441_vm1, %v24026_v58  ;;  %v3691_v58 = vld [vmem:[#allocation2 + $0x1cc] sm:$0xff] }
 0x181   : > { %16500 = vmatmul.mubr.msk.f32.gmra.mrb[12].mxu0 %vm441_vm1, %v24027_v59 }
 0x182   : > { %16502 = vmatprep.mubr.msk.f32.mxu0 %vm441_vm1, %v24028_v60 }
 0x185   : > { %16503 = vmatmul.mubr.msk.f32.gmra.mrb[14].mxu0 %vm441_vm1, %v24029_v61 }
 0x186   : > { %16505 = vmatprep.mubr.msk.f32.mxu0 %vm441_vm1, %v24030_v62 }
 0x189   : > { %16506 = vmatmul.mubr.msk.f32.gmra.mrb[16].mxu0 %vm441_vm1, %v24031_v63 }
 0x18a   : > { %16508 = vmatprep.mubr.msk.f32.mxu0 %vm441_vm1, %v24032_v0 }
 0x18d   : > { %16509 = vmatmul.mubr.msk.f32.gmra.mrb[18].mxu0 %vm441_vm1, %v20012_v16  ;;  %v3662_v16 = vld [vmem:[#allocation2 + $0x6c] sm:$0xff] }
 0x18e   : > { %16511 = vmatprep.mubr.msk.f32.mxu0 %vm441_vm1, %v24033_v1 }
 0x191   : > { %16512 = vmatmul.mubr.msk.f32.gmra.mrb[20].mxu0 %vm441_vm1, %v24034_v3 }
 0x192   : > { %16514 = vmatprep.mubr.msk.f32.mxu0 %vm441_vm1, %v20026_v15  ;;  %v3665_v15 = vld [vmem:[#allocation2 + $0x94] sm:$0xff] }
 0x195   : > { %16515 = vmatmul.mubr.msk.f32.gmra.mrb[22].mxu0 %vm441_vm1, %v20036_v12  ;;  %v3666_v12 = vld [vmem:[#allocation2 + $0x9c] sm:$0xff] }
 0x196   : > { %16517 = vmatprep.mubr.msk.f32.mxu0 %vm441_vm1, %v24035_v8 }
 0x199   : > { %16518 = vmatmul.mubr.msk.f32.gmra.mrb[24].mxu0 %vm441_vm1, %v24036_v9 }
 0x19a   : > { %16520 = vmatprep.mubr.msk.f32.mxu0 %vm441_vm1, %v24037_v10 }
 0x19d   : > { %16521 = vmatmul.mubr.msk.f32.gmra.mrb[26].mxu0 %vm441_vm1, %v20060_v6  ;;  %v3664_v6 = vld [vmem:[#allocation2 + $0x84] sm:$0xff] }
 0x19e   : > { %16523 = vmatprep.mubr.msk.f32.mxu0 %vm441_vm1, %v3299_v11 }
 0x1a1   : > { %16524 = vmatmul.mubr.msk.f32.gmra.mrb[28].mxu0 %vm441_vm1, %v3300_v7  ;;  %v4194_v7 = vld [vmem:[#allocation3 + $0x2] sm:$0xff] }
 0x1a2   : > { %16526 = vmatprep.mubr.msk.f32.mxu0 %vm441_vm1, %v3301_v5  ;;  %16595 = vmatprep.mubr.msk.f32.mxu1 %vm490_vm4, %v4194_v7  ;;  %v4195_v5 = vld [vmem:[#allocation3 + $0xa] sm:$0xff] }
 0x1a3   : > { %16596 = vmatmul.mubr.msk.f32.vlgmr.msra.gmra.mrb[32].mxu1 %vm490_vm4, %v4195_v5 }
 0x1a5   : > { %16527 = vmatmul.mubr.msk.f32.gmra.mrb[30].mxu0 %vm441_vm1, %v3302_v4  ;;  %v4196_v4 = vld [vmem:[#allocation3 + $0x1a] sm:$0xff] }
 0x1a6   : > { %16531 = vmatprep.mubr.msk.f32.mxu0 %vm441_vm1, %v3661_v14  ;;  %16598 = vmatprep.mubr.msk.f32.mxu1 %vm490_vm4, %v4196_v4  ;;  %v4197_v14 = vld [vmem:[#allocation3 + $0x22] sm:$0xff] }
 0x1a7   : > { %16599 = vmatmul.mubr.msk.f32.gmra.mrb[34].mxu1 %vm490_vm4, %v4197_v14 }
 0x1a9   : > { %16532 = vmatmul.mubr.msk.f32.vlgmr.msra.gmra.mrb[0].mxu0 %vm441_vm1, %v3662_v16  ;;  %v4186_v16 = vld [vmem:[%s23697_s3] sm:$0xff] }
 0x1aa   : > { %16534 = vmatprep.mubr.msk.f32.mxu0 %vm441_vm1, %v3663_v17  ;;  %v4187_v17 = vld [vmem:[%s23697_s3 + $0x8] sm:$0xff] }
 0x1ab   : > { %v17891_v55 = vpack.c.bf16 %v4187_v17, %v4186_v16 }
 0x1ad   : > { %16535 = vmatmul.mubr.msk.f32.gmra.mrb[2].mxu0 %vm441_vm1, %v3664_v6  ;;  %17892 = vmatprep.subr.bf16.mxu1 %v17891_v55  ;;  %v4188_v6 = vld [vmem:[%s23697_s3 + $0x10] sm:$0xff] }
 0x1ae   : > { %16537 = vmatprep.mubr.msk.f32.mxu0 %vm441_vm1, %v3665_v15  ;;  %17894 = vmatpush3.bf16.msra.mxu1 %v17891_v55  ;;  %v4189_v15 = vld [vmem:[%s23697_s3 + $0x18] sm:$0xff] }
 0x1b1   : > { %16538 = vmatmul.mubr.msk.f32.gmra.mrb[4].mxu0 %vm441_vm1, %v3666_v12  ;;  %v17895_v12 = vpack.c.bf16 %v4189_v15, %v4188_v6 }
 0x1b2   : > { %16540 = vmatprep.mubr.msk.f32.mxu0 %vm441_vm1, %v3667_v53  ;;  %v4190_v53 = vld [vmem:[%s23697_s3 + $0x20] sm:$0xff] }
 0x1b3   : > { %17896 = vmatprep.subr.bf16.mxu1 %v17895_v12 }
 0x1b4   : > { %17898 = vmatpush3.bf16.msra.mxu1 %v17895_v12 }
 0x1b5   : > { %16541 = vmatmul.mubr.msk.f32.gmra.mrb[6].mxu0 %vm441_vm1, %v3668_v29  ;;  %v20390_v22 = vpop.f32.mrb[0].mxu1  ;;  %v4191_v29 = vld [vmem:[%s23697_s3 + $0x28] sm:$0xff] }
 0x1b6   : > { %16543 = vmatprep.mubr.msk.f32.mxu0 %vm441_vm1, %v3669_v19  ;;  %v20392_v23 = vpop.f32.mrb[1].mxu1  ;;  %v17899_v19 = vpack.c.bf16 %v4191_v29, %v4190_v53 }
 0x1b8   : > { %17900 = vmatprep.subr.bf16.mxu1 %v17899_v19 }
 0x1b9   : > { %16544 = vmatmul.mubr.msk.f32.gmra.mrb[8].mxu0 %vm441_vm1, %v3670_v35  ;;  %17902 = vmatpush3.bf16.msra.mxu1 %v17899_v19  ;;  %v4192_v35 = vld [vmem:[%s23697_s3 + $0x30] sm:$0xff] }
 0x1ba   : > { %16546 = vmatprep.mubr.msk.f32.mxu0 %vm441_vm1, %v3671_v37  ;;  %v4193_v37 = vld [vmem:[%s23697_s3 + $0x38] sm:$0xff] }
 0x1bb   : > { %v20396_v18 = vpop.f32.mrb[2].mxu1 }
 0x1bc   : > { %v20398_v24 = vpop.f32.mrb[3].mxu1 }
 0x1bd   : > { %16547 = vmatmul.mubr.msk.f32.gmra.mrb[10].mxu0 %vm441_vm1, %v3672_v39  ;;  %v17903_v39 = vpack.c.bf16 %v4193_v37, %v4192_v35 }
 0x1be   : > { %16549 = vmatprep.mubr.msk.f32.mxu0 %vm441_vm1, %v3673_v42  ;;  %v14202_v42 = vld [vmem:[%s23697_s3 + $0x80] sm:$0xff] }
 0x1bf   : > { %v20402_v27 = vpop.f32.mrb[4].mxu1  ;;  %17904 = vmatprep.subr.bf16.mxu1 %v17903_v39 }
 0x1c0   : > { %v20404_v28 = vpop.f32.mrb[5].mxu1  ;;  %17906 = vmatpush3.bf16.msra.mxu1 %v17903_v39 }
 0x1c1   : > { %16550 = vmatmul.mubr.msk.f32.gmra.mrb[12].mxu0 %vm441_vm1, %v3674_v20  ;;  %v14203_v20 = vld [vmem:[%s23697_s3 + $0x88] sm:$0xff] }
 0x1c2   : > { %16552 = vmatprep.mubr.msk.f32.mxu0 %vm441_vm1, %v3675_v21  ;;  %v20581_v21 = vpack.c.bf16 %v14203_v20, %v14202_v42 }
 0x1c3   : > { %v20408_v33 = vpop.f32.mrb[6].mxu1 }
 0x1c4   : > { %v20410_v34 = vpop.f32.mrb[7].mxu1  ;;  %17908 = vmatprep.subr.bf16.mxu1 %v20581_v21 }
 0x1c5   : > { %16553 = vmatmul.mubr.msk.f32.gmra.mrb[14].mxu0 %vm441_vm1, %v3676_v25  ;;  %v20587_v25 = vld [vmem:[%s23696_s2] ss:$0 sm:$0xff] }
 0x1c6   : > { %16555 = vmatprep.mubr.msk.f32.mxu0 %vm441_vm1, %v3677_v26 }
 0x1c7   : > { %v20414_v41 = vpop.f32.mrb[8].mxu1 }
 0x1c8   : > { %v20416_v43 = vpop.f32.mrb[9].mxu1 }
 0x1c9   : > { %16556 = vmatmul.mubr.msk.f32.gmra.mrb[16].mxu0 %vm441_vm1, %v3678_v31 }
 0x1ca   : > { %16558 = vmatprep.mubr.msk.f32.mxu0 %vm441_vm1, %v3679_v32 }
 0x1cb   : > { %v20420_v46 = vpop.f32.mrb[10].mxu1 }
 0x1cc   : > { %v20422_v47 = vpop.f32.mrb[11].mxu1 }
 0x1cd   : > { %16559 = vmatmul.mubr.msk.f32.gmra.mrb[18].mxu0 %vm441_vm1, %v3680_v36 }
 0x1ce   : > { %16561 = vmatprep.mubr.msk.f32.mxu0 %vm441_vm1, %v3681_v40 }
 0x1cf   : > { %v20426_v49 = vpop.f32.mrb[12].mxu1 }
 0x1d0   : > { %v20428_v50 = vpop.f32.mrb[13].mxu1 }
 0x1d1   : > { %16562 = vmatmul.mubr.msk.f32.gmra.mrb[20].mxu0 %vm441_vm1, %v3682_v44 }
 0x1d2   : > { %16564 = vmatprep.mubr.msk.f32.mxu0 %vm441_vm1, %v3683_v45 }
 0x1d3   : > { %v20433_v51 = vpop.f32.mrb[14].mxu1 }
 0x1d4   : > { %v20435_v52 = vpop.f32.mrb[15].mxu1 }
 0x1d5   : > { %16565 = vmatmul.mubr.msk.f32.gmra.mrb[22].mxu0 %vm441_vm1, %v3684_v48 }
 0x1d6   : > { %16567 = vmatprep.mubr.msk.f32.mxu0 %vm441_vm1, %v20184_v2  ;;  %v3690_v2 = vld [vmem:[#allocation2 + $0x1bc] sm:$0xff] }
 0x1d7   : > { %v20441_v56 = vpop.f32.mrb[16].mxu1 }
 0x1d8   : > { %v20443_v57 = vpop.f32.mrb[17].mxu1 }
 0x1d9   : > { %16568 = vmatmul.mubr.msk.f32.gmra.mrb[24].mxu0 %vm441_vm1, %v20194_v13  ;;  %v3692_v13 = vld [vmem:[#allocation2 + $0x1d4] sm:$0xff] }
 0x1da   : > { %16570 = vmatprep.mubr.msk.f32.mxu0 %vm441_vm1, %v20196_v30 }
 0x1db   : > { %v20448_v59 = vpop.f32.mrb[18].mxu1 }
 0x1dc   : > { %v20450_v60 = vpop.f32.mrb[19].mxu1 }
 0x1dd   : > { %16571 = vmatmul.mubr.msk.f32.gmra.mrb[26].mxu0 %vm441_vm1, %v20206_v38 }
 0x1de   : > { %16573 = vmatprep.mubr.msk.f32.mxu0 %vm441_vm1, %v3689_v54 }
 0x1df   : > { %v20454_v30 = vpop.f32.mrb[20].mxu1 }
 0x1e0   : > { %v20456_v61 = vpop.f32.mrb[21].mxu1 }
 0x1e1   : > { %16574 = vmatmul.mubr.msk.f32.gmra.mrb[28].mxu0 %vm441_vm1, %v3690_v2 }
 0x1e2   : > { %16576 = vmatprep.mubr.msk.f32.mxu0 %vm441_vm1, %v3691_v58 }
 0x1e3   : > { %v20459_v38 = vpop.f32.mrb[22].mxu1 }
 0x1e4   : > { %v20461_v62 = vpop.f32.mrb[23].mxu1 }
 0x1e5   : > { %16577 = vmatmul.mubr.msk.f32.gmra.mrb[30].mxu0 %vm441_vm1, %v3692_v13 }
 0x1e7   : > { %v20463_v63 = vpop.f32.mrb[24].mxu1 }
 0x1e8   : > { %v20465_v0 = vpop.f32.mrb[25].mxu1 }
 0x1eb   : > { %v20467_v1 = vpop.f32.mrb[26].mxu1 }
 0x1ec   : > { %v20469_v3 = vpop.f32.mrb[27].mxu1 }
 0x1ef   : > { %v20471_v8 = vpop.f32.mrb[28].mxu1 }
 0x1f0   : > { %v20473_v9 = vpop.f32.mrb[29].mxu1 }
 0x1f3   : > { %v20475_v10 = vpop.f32.mrb[30].mxu1 }
 0x1f4   : > { %v20477_v11 = vpop.f32.mrb[31].mxu1 }
 0x27c   : > { %v16533_v26 = vpop.f32.mrb[0].mxu0 }
 0x27d   : > { %v18163_v31 = vadd.f32 %v16533_v26, %v20390_v22  ;;  %v3860_v32 = vpop.f32.mrb[1].mxu0 }
 0x27e   : > { %v18164_v36 = vadd.f32 %v3860_v32, %v20392_v23 }
 0x27f   : > { %v20592_v40 = vadd.f32 %v18163_v31, %v20587_v25 }
 0x280   : > { %v20595_v44 = vadd.f32 %v18164_v36, %v20587_v25  ;;  %v16536_v45 = vpop.f32.mrb[2].mxu0 }
 0x281   : > { %24038 = vst [vmem:[#allocation37_spill] sm:$0xff] %v20592_v40  ;;  %v23829_v48 = vmax.f32 %v20592_v40, 0.0  ;;  %v18165_v54 = vadd.f32 %v16536_v45, %v20396_v18  ;;  %v3870_v2 = vpop.f32.mrb[3].mxu0 }
 0x282   : > { %24039 = vst [vmem:[#allocation38_spill] sm:$0xff] %v20595_v44  ;;  %v23831_v58 = vmax.f32 %v20595_v44, 0.0  ;;  %v18166_v13 = vadd.f32 %v3870_v2, %v20398_v24  ;;  %v14246_v44 = vld [vmem:[%s23697_s3 + $0xe0] sm:$0xff] }
 0x283   : > { %4123 = vst.msk [vmem:[#allocation3 + $0x3a] sm:$0xff] %vm490_vm4, %v23829_v48  ;;  %v20605_v22 = vadd.f32 %v18165_v54, %v20587_v25 }
 0x284   : > { %4122 = vst.msk [vmem:[#allocation3 + $0x32] sm:$0xff] %vm490_vm4, %v23831_v58  ;;  %v20611_v23 = vadd.f32 %v18166_v13, %v20587_v25  ;;  %v16539_v18 = vpop.f32.mrb[4].mxu0 }
 0x285   : > { %24040 = vst [vmem:[#allocation39_spill] sm:$0xff] %v20605_v22  ;;  %v23825_v7 = vmax.f32 %v20605_v22, 0.0  ;;  %v18167_v5 = vadd.f32 %v16539_v18, %v20402_v27  ;;  %v3880_v24 = vpop.f32.mrb[5].mxu0  ;;  %v4878_v22 = vld [vmem:[#allocation3 + $0xc] sm:$0xff] }
 0x286   : > { %24041 = vst [vmem:[#allocation40_spill] sm:$0xff] %v20611_v23  ;;  %v23827_v4 = vmax.f32 %v20611_v23, 0.0  ;;  %v18168_v14 = vadd.f32 %v3880_v24, %v20404_v28  ;;  %v4879_v23 = vld [vmem:[#allocation3 + $0x1c] sm:$0xff] }
 0x287   : > { %4125 = vst.msk [vmem:[#allocation3 + $0x52] sm:$0xff] %vm490_vm4, %v23825_v7  ;;  %v20621_v16 = vadd.f32 %v18167_v5, %v20587_v25 }
 0x288   : > { %4124 = vst.msk [vmem:[#allocation3 + $0x4a] sm:$0xff] %vm490_vm4, %v23827_v4  ;;  %v20627_v17 = vadd.f32 %v18168_v14, %v20587_v25  ;;  %v16542_v27 = vpop.f32.mrb[6].mxu0 }
 0x289   : > { %24042 = vst [vmem:[#allocation41_spill] sm:$0xff] %v20621_v16  ;;  %v23821_v55 = vmax.f32 %v20621_v16, 0.0  ;;  %v18169_v6 = vadd.f32 %v16542_v27, %v20408_v33  ;;  %v3890_v28 = vpop.f32.mrb[7].mxu0  ;;  %v14244_v16 = vld [vmem:[%s23697_s3 + $0xd0] sm:$0xff] }
 0x28a   : > { %24043 = vst [vmem:[#allocation42_spill] sm:$0xff] %v20627_v17  ;;  %v23823_v15 = vmax.f32 %v20627_v17, 0.0  ;;  %v18170_v12 = vadd.f32 %v3890_v28, %v20410_v34  ;;  %v20649_v34 = vld [vmem:[#allocation3 + $0x3a] sm:$0xff] }
 0x28b   : > { %4127 = vst.msk [vmem:[#allocation3 + $0x6a] sm:$0xff] %vm490_vm4, %v23821_v55  ;;  %v20637_v53 = vadd.f32 %v18169_v6, %v20587_v25  ;;  %v20639_v29 = vld [vmem:[#allocation3 + $0x32] sm:$0xff] }
 0x28c   : > { %4126 = vst.msk [vmem:[#allocation3 + $0x62] sm:$0xff] %vm490_vm4, %v23823_v15  ;;  %v20645_v33 = vadd.f32 %v18170_v12, %v20587_v25  ;;  %v16545_v19 = vpop.f32.mrb[8].mxu0  ;;  %16601 = vmatprep.mubr.msk.f32.mxu1 %vm490_vm4, %v20639_v29  ;;  %v14245_v17 = vld [vmem:[%s23697_s3 + $0xd8] sm:$0xff] }
 0x28d   : > { %24044 = vst [vmem:[#allocation43_spill] sm:$0xff] %v20637_v53  ;;  %v23817_v35 = vmax.f32 %v20637_v53, 0.0  ;;  %v18171_v37 = vadd.f32 %v16545_v19, %v20414_v41  ;;  %v3900_v39 = vpop.f32.mrb[9].mxu0  ;;  %16602 = vmatmul.mubr.msk.f32.gmra.mrb[36].mxu1 %vm490_vm4, %v20649_v34  ;;  %v4877_v53 = vld [vmem:[#allocation3 + $0x4] sm:$0xff]  ;;  %v17927_v40 = vpack.c.bf16 %v14245_v17, %v14244_v16  ;;  %v14248_v16 = vld [vmem:[%s23697_s3 + $0xf0] sm:$0xff]  ;;  %v14249_v17 = vld [vmem:[%s23697_s3 + $0xf8] sm:$0xff] }
 0x28e   : > { %24045 = vst [vmem:[#allocation44_spill] sm:$0xff] %v20645_v33  ;;  %v23819_v42 = vmax.f32 %v20645_v33, 0.0  ;;  %v18172_v20 = vadd.f32 %v3900_v39, %v20416_v43  ;;  %v20673_v43 = vld [vmem:[#allocation3 + $0x52] sm:$0xff] }
 0x28f   : > { %4129 = vst.msk [vmem:[#allocation3 + $0x82] sm:$0xff] %vm490_vm4, %v23817_v35  ;;  %v20661_v26 = vadd.f32 %v18171_v37, %v20587_v25  ;;  %v20663_v31 = vld [vmem:[#allocation3 + $0x4a] sm:$0xff] }
 0x290   : > { %4128 = vst.msk [vmem:[#allocation3 + $0x7a] sm:$0xff] %vm490_vm4, %v23819_v42  ;;  %v20669_v41 = vadd.f32 %v18172_v20, %v20587_v25  ;;  %v16548_v32 = vpop.f32.mrb[10].mxu0  ;;  %16604 = vmatprep.mubr.msk.f32.mxu1 %vm490_vm4, %v20663_v31 }
 0x291   : > { %24046 = vst [vmem:[#allocation45_spill] sm:$0xff] %v20661_v26  ;;  %v23813_v36 = vmax.f32 %v20661_v26, 0.0  ;;  %v18173_v45 = vadd.f32 %v16548_v32, %v20420_v46  ;;  %v3910_v54 = vpop.f32.mrb[11].mxu0  ;;  %16605 = vmatmul.mubr.msk.f32.gmra.mrb[38].mxu1 %vm490_vm4, %v20673_v43 }
 0x292   : > { %24047 = vst [vmem:[#allocation46_spill] sm:$0xff] %v20669_v41  ;;  %v23815_v2 = vmax.f32 %v20669_v41, 0.0  ;;  %v18174_v13 = vadd.f32 %v3910_v54, %v20422_v47  ;;  %v20697_v47 = vld [vmem:[#allocation3 + $0x6a] sm:$0xff] }
 0x293   : > { %4131 = vst.msk [vmem:[#allocation3 + $0x9a] sm:$0xff] %vm490_vm4, %v23813_v36  ;;  %v20685_v18 = vadd.f32 %v18173_v45, %v20587_v25  ;;  %v20687_v5 = vld [vmem:[#allocation3 + $0x62] sm:$0xff] }
 0x294   : > { %4130 = vst.msk [vmem:[#allocation3 + $0x92] sm:$0xff] %vm490_vm4, %v23815_v2  ;;  %v20693_v46 = vadd.f32 %v18174_v13, %v20587_v25  ;;  %v16551_v24 = vpop.f32.mrb[12].mxu0  ;;  %16607 = vmatprep.mubr.msk.f32.mxu1 %vm490_vm4, %v20687_v5 }
 0x295   : > { %24048 = vst [vmem:[#allocation47_spill] sm:$0xff] %v20685_v18  ;;  %v23809_v14 = vmax.f32 %v20685_v18, 0.0  ;;  %v18175_v27 = vadd.f32 %v16551_v24, %v20426_v49  ;;  %v3920_v6 = vpop.f32.mrb[13].mxu0  ;;  %16608 = vmatmul.mubr.msk.f32.gmra.mrb[40].mxu1 %vm490_vm4, %v20697_v47 }
 0x296   : > { %24049 = vst [vmem:[#allocation48_spill] sm:$0xff] %v20693_v46  ;;  %v23811_v28 = vmax.f32 %v20693_v46, 0.0  ;;  %v18176_v12 = vadd.f32 %v3920_v6, %v20428_v50  ;;  %v20721_v50 = vld [vmem:[#allocation3 + $0x82] sm:$0xff] }
 0x297   : > { %4133 = vst.msk [vmem:[#allocation3 + $0xb2] sm:$0xff] %vm490_vm4, %v23809_v14  ;;  %v20709_v19 = vadd.f32 %v18175_v27, %v20587_v25  ;;  %v20711_v37 = vld [vmem:[#allocation3 + $0x7a] sm:$0xff] }
 0x298   : > { %4132 = vst.msk [vmem:[#allocation3 + $0xaa] sm:$0xff] %vm490_vm4, %v23811_v28  ;;  %v20717_v49 = vadd.f32 %v18176_v12, %v20587_v25  ;;  %v16554_v39 = vpop.f32.mrb[14].mxu0  ;;  %16610 = vmatprep.mubr.msk.f32.mxu1 %vm490_vm4, %v20711_v37 }
 0x299   : > { %24050 = vst [vmem:[#allocation49_spill] sm:$0xff] %v20709_v19  ;;  %v23806_v20 = vmax.f32 %v20709_v19, 0.0  ;;  %v18177_v32 = vadd.f32 %v16554_v39, %v20433_v51  ;;  %v3930_v45 = vpop.f32.mrb[15].mxu0  ;;  %16611 = vmatmul.mubr.msk.f32.gmra.mrb[42].mxu1 %vm490_vm4, %v20721_v50 }
 0x29a   : > { %24051 = vst [vmem:[#allocation50_spill] sm:$0xff] %v20717_v49  ;;  %v23807_v54 = vmax.f32 %v20717_v49, 0.0  ;;  %v18178_v13 = vadd.f32 %v3930_v45, %v20435_v52  ;;  %v20745_v52 = vld [vmem:[#allocation3 + $0x9a] sm:$0xff] }
 0x29b   : > { %4135 = vst.msk [vmem:[#allocation3 + $0xca] sm:$0xff] %vm490_vm4, %v23806_v20  ;;  %v20733_v24 = vadd.f32 %v18177_v32, %v20587_v25  ;;  %v20735_v27 = vld [vmem:[#allocation3 + $0x92] sm:$0xff] }
 0x29c   : > { %4134 = vst.msk [vmem:[#allocation3 + $0xc2] sm:$0xff] %vm490_vm4, %v23807_v54  ;;  %v20741_v51 = vadd.f32 %v18178_v13, %v20587_v25  ;;  %v16557_v6 = vpop.f32.mrb[16].mxu0  ;;  %16613 = vmatprep.mubr.msk.f32.mxu1 %vm490_vm4, %v20735_v27 }
 0x29d   : > { %24052 = vst [vmem:[#allocation51_spill] sm:$0xff] %v20733_v24  ;;  %v23808_v12 = vmax.f32 %v20733_v24, 0.0  ;;  %v18179_v39 = vadd.f32 %v16557_v6, %v20441_v56  ;;  %v3940_v32 = vpop.f32.mrb[17].mxu0  ;;  %16614 = vmatmul.mubr.msk.f32.gmra.mrb[44].mxu1 %vm490_vm4, %v20745_v52 }
 0x29e   : > { %24053 = vst [vmem:[#allocation52_spill] sm:$0xff] %v20741_v51  ;;  %v23810_v45 = vmax.f32 %v20741_v51, 0.0  ;;  %v18180_v20 = vadd.f32 %v3940_v32, %v20443_v57  ;;  %v20769_v57 = vld [vmem:[#allocation3 + $0xb2] sm:$0xff] }
 0x29f   : > { %4137 = vst.msk [vmem:[#allocation3 + $0xe2] sm:$0xff] %vm490_vm4, %v23808_v12  ;;  %v20757_v13 = vadd.f32 %v18179_v39, %v20587_v25  ;;  %v20759_v54 = vld [vmem:[#allocation3 + $0xaa] sm:$0xff] }
 0x2a0   : > { %4136 = vst.msk [vmem:[#allocation3 + $0xda] sm:$0xff] %vm490_vm4, %v23810_v45  ;;  %v20765_v56 = vadd.f32 %v18180_v20, %v20587_v25  ;;  %v16560_v6 = vpop.f32.mrb[18].mxu0  ;;  %16616 = vmatprep.mubr.msk.f32.mxu1 %vm490_vm4, %v20759_v54 }
 0x2a1   : > { %24054 = vst [vmem:[#allocation53_spill] sm:$0xff] %v20757_v13  ;;  %v23812_v32 = vmax.f32 %v20757_v13, 0.0  ;;  %v18181_v39 = vadd.f32 %v16560_v6, %v20448_v59  ;;  %v3950_v12 = vpop.f32.mrb[19].mxu0  ;;  %16617 = vmatmul.mubr.msk.f32.gmra.mrb[46].mxu1 %vm490_vm4, %v20769_v57 }
 0x2a2   : > { %24055 = vst [vmem:[#allocation54_spill] sm:$0xff] %v20765_v56  ;;  %v23814_v14 = vmax.f32 %v20765_v56, 0.0  ;;  %v18182_v45 = vadd.f32 %v3950_v12, %v20450_v60  ;;  %v20793_v60 = vld [vmem:[#allocation3 + $0xca] sm:$0xff] }
 0x2a3   : > { %4139 = vst.msk [vmem:[#allocation3 + $0xfa] sm:$0xff] %vm490_vm4, %v23812_v32  ;;  %v20781_v20 = vadd.f32 %v18181_v39, %v20587_v25  ;;  %v20783_v28 = vld [vmem:[#allocation3 + $0xc2] sm:$0xff] }
 0x2a4   : > { %4138 = vst.msk [vmem:[#allocation3 + $0xf2] sm:$0xff] %vm490_vm4, %v23814_v14  ;;  %v20789_v59 = vadd.f32 %v18182_v45, %v20587_v25  ;;  %v16563_v6 = vpop.f32.mrb[20].mxu0  ;;  %16619 = vmatprep.mubr.msk.f32.mxu1 %vm490_vm4, %v20783_v28 }
 0x2a5   : > { %24056 = vst [vmem:[#allocation55_spill] sm:$0xff] %v20781_v20  ;;  %v23816_v12 = vmax.f32 %v20781_v20, 0.0  ;;  %v18183_v39 = vadd.f32 %v16563_v6, %v20454_v30  ;;  %v3960_v32 = vpop.f32.mrb[21].mxu0  ;;  %16620 = vmatmul.mubr.msk.f32.gmra.mrb[48].mxu1 %vm490_vm4, %v20793_v60 }
 0x2a6   : > { %24057 = vst [vmem:[#allocation56_spill] sm:$0xff] %v20789_v59  ;;  %v23818_v36 = vmax.f32 %v20789_v59, 0.0  ;;  %v18184_v14 = vadd.f32 %v3960_v32, %v20456_v61  ;;  %v20817_v61 = vld [vmem:[#allocation3 + $0xe2] sm:$0xff] }
 0x2a7   : > { %4141 = vst.msk [vmem:[#allocation3 + $0x112] sm:$0xff] %vm490_vm4, %v23816_v12  ;;  %v20805_v45 = vadd.f32 %v18183_v39, %v20587_v25  ;;  %v20807_v2 = vld [vmem:[#allocation3 + $0xda] sm:$0xff] }
 0x2a8   : > { %4140 = vst.msk [vmem:[#allocation3 + $0x10a] sm:$0xff] %vm490_vm4, %v23818_v36  ;;  %v20813_v30 = vadd.f32 %v18184_v14, %v20587_v25  ;;  %v16566_v6 = vpop.f32.mrb[22].mxu0  ;;  %16622 = vmatprep.mubr.msk.f32.mxu1 %vm490_vm4, %v20807_v2  ;;  %v21049_v20 = vld [vmem:[#allocation3 + $0xe0] sm:$0xff] }
 0x2a9   : > { %24058 = vst [vmem:[#allocation57_spill] sm:$0xff] %v20805_v45  ;;  %v23820_v32 = vmax.f32 %v20805_v45, 0.0  ;;  %v18185_v39 = vadd.f32 %v16566_v6, %v20459_v38  ;;  %v3970_v12 = vpop.f32.mrb[23].mxu0  ;;  %16623 = vmatmul.mubr.msk.f32.gmra.mrb[50].mxu1 %vm490_vm4, %v20817_v61  ;;  %v21041_v45 = vld [vmem:[#allocation3 + $0xc8] sm:$0xff] }
 0x2aa   : > { %24059 = vst [vmem:[#allocation58_spill] sm:$0xff] %v20813_v30  ;;  %v23822_v35 = vmax.f32 %v20813_v30, 0.0  ;;  %v18186_v36 = vadd.f32 %v3970_v12, %v20461_v62  ;;  %v20841_v62 = vld [vmem:[#allocation3 + $0xfa] sm:$0xff] }
 0x2ab   : > { %4143 = vst.msk [vmem:[#allocation3 + $0x12a] sm:$0xff] %vm490_vm4, %v23820_v32  ;;  %v20829_v14 = vadd.f32 %v18185_v39, %v20587_v25  ;;  %v20831_v42 = vld [vmem:[#allocation3 + $0xf2] sm:$0xff] }
 0x2ac   : > { %4142 = vst.msk [vmem:[#allocation3 + $0x122] sm:$0xff] %vm490_vm4, %v23822_v35  ;;  %v20837_v38 = vadd.f32 %v18186_v36, %v20587_v25  ;;  %v16569_v6 = vpop.f32.mrb[24].mxu0  ;;  %16625 = vmatprep.mubr.msk.f32.mxu1 %vm490_vm4, %v20831_v42  ;;  %v21045_v30 = vld [vmem:[#allocation3 + $0xd8] sm:$0xff]  ;;  %v21053_v59 = vld [vmem:[#allocation3 + $0xf0] sm:$0xff] }
 0x2ad   : > { %24060 = vst [vmem:[#allocation59_spill] sm:$0xff] %v20829_v14  ;;  %v23824_v12 = vmax.f32 %v20829_v14, 0.0  ;;  %v18187_v39 = vadd.f32 %v16569_v6, %v20463_v63  ;;  %v3980_v32 = vpop.f32.mrb[25].mxu0  ;;  %16626 = vmatmul.mubr.msk.f32.gmra.mrb[52].mxu1 %vm490_vm4, %v20841_v62  ;;  %v21033_v14 = vld [vmem:[#allocation3 + $0xb0] sm:$0xff]  ;;  %v21057_v13 = vld [vmem:[#allocation3 + $0xf8] sm:$0xff] }
 0x2ae   : > { %24061 = vst [vmem:[#allocation60_spill] sm:$0xff] %v20837_v38  ;;  %v23826_v55 = vmax.f32 %v20837_v38, 0.0  ;;  %v18188_v35 = vadd.f32 %v3980_v32, %v20465_v0  ;;  %v20865_v0 = vld [vmem:[#allocation3 + $0x112] sm:$0xff]  ;;  %v21037_v38 = vld [vmem:[#allocation3 + $0xc0] sm:$0xff] }
 0x2af   : > { %4145 = vst.msk [vmem:[#allocation3 + $0x142] sm:$0xff] %vm490_vm4, %v23824_v12  ;;  %v20853_v36 = vadd.f32 %v18187_v39, %v20587_v25  ;;  %v20855_v15 = vld [vmem:[#allocation3 + $0x10a] sm:$0xff] }
 0x2b0   : > { %4144 = vst.msk [vmem:[#allocation3 + $0x13a] sm:$0xff] %vm490_vm4, %v23826_v55  ;;  %v20861_v63 = vadd.f32 %v18188_v35, %v20587_v25  ;;  %v16572_v6 = vpop.f32.mrb[26].mxu0  ;;  %16628 = vmatprep.mubr.msk.f32.mxu1 %vm490_vm4, %v20855_v15  ;;  %v21061_v56 = vld [vmem:[#allocation3 + $0x108] sm:$0xff]  ;;  %v21065_v24 = vld [vmem:[#allocation3 + $0x110] sm:$0xff] }
 0x2b1   : > { %24062 = vst [vmem:[#allocation61_spill] sm:$0xff] %v20853_v36  ;;  %v23828_v32 = vmax.f32 %v20853_v36, 0.0  ;;  %v18189_v39 = vadd.f32 %v16572_v6, %v20467_v1  ;;  %v3990_v12 = vpop.f32.mrb[27].mxu0  ;;  %16629 = vmatmul.mubr.msk.f32.gmra.mrb[54].mxu1 %vm490_vm4, %v20865_v0  ;;  %v20980_v36 = vld [vmem:[#allocation3 + $0x30] sm:$0xff] }
 0x2b2   : > { %24063 = vst [vmem:[#allocation62_spill] sm:$0xff] %v20861_v63  ;;  %v23830_v7 = vmax.f32 %v20861_v63, 0.0  ;;  %v18190_v55 = vadd.f32 %v3990_v12, %v20469_v3  ;;  %v20889_v3 = vld [vmem:[#allocation3 + $0x12a] sm:$0xff] }
 0x2b3   : > { %4147 = vst.msk [vmem:[#allocation3 + $0x15a] sm:$0xff] %vm490_vm4, %v23828_v32  ;;  %v20877_v35 = vadd.f32 %v18189_v39, %v20587_v25  ;;  %v20879_v4 = vld [vmem:[#allocation3 + $0x122] sm:$0xff] }
 0x2b4   : > { %4146 = vst.msk [vmem:[#allocation3 + $0x152] sm:$0xff] %vm490_vm4, %v23830_v7  ;;  %v20885_v1 = vadd.f32 %v18190_v55, %v20587_v25  ;;  %v16575_v6 = vpop.f32.mrb[28].mxu0  ;;  %16631 = vmatprep.mubr.msk.f32.mxu1 %vm490_vm4, %v20879_v4  ;;  %v21029_v63 = vld [vmem:[#allocation3 + $0xa8] sm:$0xff]  ;;  %v21069_v51 = vld [vmem:[#allocation3 + $0x120] sm:$0xff] }
 0x2b5   : > { %24064 = vst [vmem:[#allocation63_spill] sm:$0xff] %v20877_v35  ;;  %v23832_v12 = vmax.f32 %v20877_v35, 0.0  ;;  %v18191_v39 = vadd.f32 %v16575_v6, %v20471_v8  ;;  %v4000_v32 = vpop.f32.mrb[29].mxu0  ;;  %16632 = vmatmul.mubr.msk.f32.gmra.mrb[56].mxu1 %vm490_vm4, %v20889_v3  ;;  %v21073_v19 = vld [vmem:[#allocation3 + $0x128] sm:$0xff] }
 0x2b6   : > { %24065 = vst [vmem:[#allocation64_spill] sm:$0xff] %v20885_v1  ;;  %v23834_v48 = vmax.f32 %v20885_v1, 0.0  ;;  %v18192_v7 = vadd.f32 %v4000_v32, %v20473_v9  ;;  %v20913_v9 = vld [vmem:[#allocation3 + $0x142] sm:$0xff] }
 0x2b7   : > { %4149 = vst.msk [vmem:[#allocation3 + $0x172] sm:$0xff] %vm490_vm4, %v23832_v12  ;;  %v20901_v55 = vadd.f32 %v18191_v39, %v20587_v25  ;;  %v20903_v58 = vld [vmem:[#allocation3 + $0x13a] sm:$0xff] }
 0x2b8   : > { %4148 = vst.msk [vmem:[#allocation3 + $0x16a] sm:$0xff] %vm490_vm4, %v23834_v48  ;;  %v20909_v8 = vadd.f32 %v18192_v7, %v20587_v25  ;;  %v16578_v6 = vpop.f32.mrb[30].mxu0  ;;  %16634 = vmatprep.mubr.msk.f32.mxu1 %vm490_vm4, %v20903_v58  ;;  %v21077_v49 = vld [vmem:[#allocation3 + $0x138] sm:$0xff]  ;;  %v21081_v18 = vld [vmem:[#allocation3 + $0x140] sm:$0xff] }
 0x2b9   : > { %24066 = vst [vmem:[#allocation65_spill] sm:$0xff] %v20901_v55  ;;  %v23836_v32 = vmax.f32 %v20901_v55, 0.0  ;;  %v18193_v39 = vadd.f32 %v16578_v6, %v20475_v10  ;;  %v4010_v12 = vpop.f32.mrb[31].mxu0  ;;  %16635 = vmatmul.mubr.msk.f32.gmra.mrb[58].mxu1 %vm490_vm4, %v20913_v9  ;;  %v14207_v55 = vld [vmem:[%s23697_s3 + $0xa8] sm:$0xff] }
 0x2ba   : > { %24067 = vst [vmem:[#allocation66_spill] sm:$0xff] %v20909_v8  ;;  %v23838_v35 = vmax.f32 %v20909_v8, 0.0  ;;  %v18194_v48 = vadd.f32 %v4010_v12, %v20477_v11  ;;  %v20937_v11 = vld [vmem:[#allocation3 + $0x15a] sm:$0xff] }
 0x2bb   : > { %4151 = vst.msk [vmem:[#allocation3 + $0x18a] sm:$0xff] %vm490_vm4, %v23836_v32  ;;  %v20925_v7 = vadd.f32 %v18193_v39, %v20587_v25  ;;  %v20927_v1 = vld [vmem:[#allocation3 + $0x152] sm:$0xff]  ;;  %24070 = vst [vmem:[#allocation69_spill] sm:$0xff] %v20937_v11  ;;  %v4157_v8 = vld [vmem:[#allocation3 + $0x20] sm:$0xff] }
 0x2bc   : > { %4150 = vst.msk [vmem:[#allocation3 + $0x182] sm:$0xff] %vm490_vm4, %v23838_v35  ;;  %v20933_v10 = vadd.f32 %v18194_v48, %v20587_v25  ;;  %16637 = vmatprep.mubr.msk.f32.mxu1 %vm490_vm4, %v20927_v1  ;;  %v4154_v25 = vld [vmem:[#allocation3] sm:$0xff]  ;;  %v14204_v32 = vld [vmem:[%s23697_s3 + $0x90] sm:$0xff]  ;;  %v4155_v35 = vld [vmem:[#allocation3 + $0x8] sm:$0xff] }
 0x2bd   : > { %24068 = vst [vmem:[#allocation67_spill] sm:$0xff] %v20925_v7  ;;  %v23837_v12 = vmax.f32 %v20925_v7, 0.0  ;;  %16638 = vmatmul.mubr.msk.f32.gmra.mrb[60].mxu1 %vm490_vm4, %v20937_v11  ;;  %v21085_v46 = vld [vmem:[#allocation3 + $0x150] sm:$0xff]  ;;  %v21089_v26 = vld [vmem:[#allocation3 + $0x158] sm:$0xff] }
 0x2be   : > { %24069 = vst [vmem:[#allocation68_spill] sm:$0xff] %v20933_v10  ;;  %v23839_v6 = vmax.f32 %v20933_v10, 0.0  ;;  %v20953_v48 = vld [vmem:[#allocation3 + $0x172] sm:$0xff]  ;;  %v14206_v10 = vld [vmem:[%s23697_s3 + $0xa0] sm:$0xff] }
 0x2bf   : > { %4153 = vst.msk [vmem:[#allocation3 + $0x1a2] sm:$0xff] %vm490_vm4, %v23837_v12  ;;  %v20946_v39 = vld [vmem:[#allocation3 + $0x16a] sm:$0xff]  ;;  %24072 = vst [vmem:[#allocation71_spill] sm:$0xff] %v20953_v48  ;;  %v14205_v12 = vld [vmem:[%s23697_s3 + $0x98] sm:$0xff] }
 0x2c0   : > { %24071 = vst [vmem:[#allocation70_spill] sm:$0xff] %v20946_v39  ;;  %4152 = vst.msk [vmem:[#allocation3 + $0x19a] sm:$0xff] %vm490_vm4, %v23839_v6  ;;  %16640 = vmatprep.mubr.msk.f32.mxu1 %vm490_vm4, %v20946_v39  ;;  %v4156_v6 = vld [vmem:[#allocation3 + $0x18] sm:$0xff]  ;;  %v17911_v7 = vpack.c.bf16 %v14205_v12, %v14204_v32  ;;  %v14208_v32 = vld [vmem:[%s23697_s3 + $0xb0] sm:$0xff] }
 0x2c1   : > { %16641 = vmatmul.mubr.msk.f32.gmra.mrb[62].mxu1 %vm490_vm4, %v20953_v48  ;;  %v14209_v12 = vld [vmem:[%s23697_s3 + $0xb8] sm:$0xff]  ;;  %v21093_v41 = vld [vmem:[#allocation3 + $0x168] sm:$0xff]  ;;  %v21097_v33 = vld [vmem:[#allocation3 + $0x170] sm:$0xff] }
 0x2c2   : > { %16659 = vmatprep.mubr.msk.f32.mxu1 %vm490_vm4, %v4154_v25  ;;  %v17915_v25 = vpack.c.bf16 %v14207_v55, %v14206_v10  ;;  %v14242_v55 = vld [vmem:[%s23697_s3 + $0xc0] sm:$0xff]  ;;  %v14243_v10 = vld [vmem:[%s23697_s3 + $0xc8] sm:$0xff]  ;;  %v21124_v11 = vld [vmem:[#allocation3 + $0x34] sm:$0xff] }
 0x2c3   : > { %v14247_v48 = vld [vmem:[%s23697_s3 + $0xe8] sm:$0xff] }
 0x2c4   : > { %v4880_v39 = vld [vmem:[#allocation3 + $0x24] sm:$0xff] }
 0x2c5   : > { %16660 = vmatmul.mubr.msk.f32.vlgmr.msra.gmra.mrb[32].mxu1 %vm490_vm4, %v4155_v35  ;;  %v20984_v35 = vld [vmem:[#allocation3 + $0x38] sm:$0xff] }
 0x2c6   : > { %17910 = vmatpush3.bf16.msra.mxu1 %v20581_v21  ;;  %16662 = vmatprep.mubr.msk.f32.mxu1 %vm490_vm4, %v4156_v6  ;;  %v17919_v21 = vpack.c.bf16 %v14209_v12, %v14208_v32  ;;  %v21000_v6 = vld [vmem:[#allocation3 + $0x50] sm:$0xff]  ;;  %v21004_v32 = vld [vmem:[#allocation3 + $0x60] sm:$0xff]  ;;  %v21009_v12 = vld [vmem:[#allocation3 + $0x68] sm:$0xff] }
 0x2c7   : > { %17912 = vmatprep.subr.bf16.mxu1 %v17911_v7 }
 0x2c9   : > { %16663 = vmatmul.mubr.msk.f32.gmra.mrb[34].mxu1 %vm490_vm4, %v4157_v8  ;;  %v20994_v8 = vld [vmem:[#allocation3 + $0x48] sm:$0xff] }
 0x2ca   : > { %16665 = vmatprep.mubr.msk.f32.mxu1 %vm490_vm4, %v20980_v36  ;;  %17914 = vmatpush3.bf16.msra.mxu1 %v17911_v7  ;;  %v20998_v7 = vpack.c.bf16 %v14243_v10, %v14242_v55  ;;  %v21017_v55 = vld [vmem:[#allocation3 + $0x80] sm:$0xff]  ;;  %v21021_v10 = vld [vmem:[#allocation3 + $0x90] sm:$0xff] }
 0x2cb   : > { %17916 = vmatprep.subr.bf16.mxu1 %v17915_v25 }
 0x2cd   : > { %16666 = vmatmul.mubr.msk.f32.gmra.mrb[36].mxu1 %vm490_vm4, %v20984_v35 }
 0x2ce   : > { %16668 = vmatprep.mubr.msk.f32.mxu1 %vm490_vm4, %v20994_v8  ;;  %17918 = vmatpush3.bf16.msra.mxu1 %v17915_v25  ;;  %v21013_v25 = vld [vmem:[#allocation3 + $0x78] sm:$0xff] }
 0x2cf   : > { %17920 = vmatprep.subr.bf16.mxu1 %v17919_v21 }
 0x2d1   : > { %16669 = vmatmul.mubr.msk.f32.gmra.mrb[38].mxu1 %vm490_vm4, %v21000_v6 }
 0x2d2   : > { %16671 = vmatprep.mubr.msk.f32.mxu1 %vm490_vm4, %v21004_v32  ;;  %17922 = vmatpush3.bf16.msra.mxu1 %v17919_v21  ;;  %v21025_v21 = vld [vmem:[#allocation3 + $0x98] sm:$0xff] }
 0x2d3   : > { %17924 = vmatprep.subr.bf16.mxu1 %v20998_v7 }
 0x2d5   : > { %16672 = vmatmul.mubr.msk.f32.gmra.mrb[40].mxu1 %vm490_vm4, %v21009_v12 }
 0x2d6   : > { %16674 = vmatprep.mubr.msk.f32.mxu1 %vm490_vm4, %v21013_v25 }
 0x2d9   : > { %16675 = vmatmul.mubr.msk.f32.gmra.mrb[42].mxu1 %vm490_vm4, %v21017_v55 }
 0x2da   : > { %16677 = vmatprep.mubr.msk.f32.mxu1 %vm490_vm4, %v21021_v10 }
 0x2dd   : > { %16678 = vmatmul.mubr.msk.f32.gmra.mrb[44].mxu1 %vm490_vm4, %v21025_v21 }
 0x2de   : > { %16680 = vmatprep.mubr.msk.f32.mxu1 %vm490_vm4, %v21029_v63 }
 0x2e1   : > { %16681 = vmatmul.mubr.msk.f32.gmra.mrb[46].mxu1 %vm490_vm4, %v21033_v14 }
 0x2e2   : > { %16683 = vmatprep.mubr.msk.f32.mxu1 %vm490_vm4, %v21037_v38 }
 0x2e5   : > { %16684 = vmatmul.mubr.msk.f32.gmra.mrb[48].mxu1 %vm490_vm4, %v21041_v45 }
 0x2e6   : > { %16686 = vmatprep.mubr.msk.f32.mxu1 %vm490_vm4, %v21045_v30 }
 0x2e9   : > { %16687 = vmatmul.mubr.msk.f32.gmra.mrb[50].mxu1 %vm490_vm4, %v21049_v20 }
 0x2ea   : > { %16689 = vmatprep.mubr.msk.f32.mxu1 %vm490_vm4, %v21053_v59 }
 0x2ed   : > { %16690 = vmatmul.mubr.msk.f32.gmra.mrb[52].mxu1 %vm490_vm4, %v21057_v13 }
 0x2ee   : > { %16692 = vmatprep.mubr.msk.f32.mxu1 %vm490_vm4, %v21061_v56 }
 0x2f1   : > { %16693 = vmatmul.mubr.msk.f32.gmra.mrb[54].mxu1 %vm490_vm4, %v21065_v24 }
 0x2f2   : > { %16695 = vmatprep.mubr.msk.f32.mxu1 %vm490_vm4, %v21069_v51 }
 0x2f5   : > { %16696 = vmatmul.mubr.msk.f32.gmra.mrb[56].mxu1 %vm490_vm4, %v21073_v19 }
 0x2f6   : > { %16698 = vmatprep.mubr.msk.f32.mxu1 %vm490_vm4, %v21077_v49 }
 0x2f9   : > { %16699 = vmatmul.mubr.msk.f32.gmra.mrb[58].mxu1 %vm490_vm4, %v21081_v18 }
 0x2fa   : > { %16701 = vmatprep.mubr.msk.f32.mxu1 %vm490_vm4, %v21085_v46 }
 0x2fd   : > { %16702 = vmatmul.mubr.msk.f32.gmra.mrb[60].mxu1 %vm490_vm4, %v21089_v26 }
 0x2fe   : > { %16704 = vmatprep.mubr.msk.f32.mxu1 %vm490_vm4, %v21093_v41 }
 0x301   : > { %16705 = vmatmul.mubr.msk.f32.gmra.mrb[62].mxu1 %vm490_vm4, %v21097_v33 }
 0x302   : > { %16723 = vmatprep.mubr.msk.f32.mxu1 %vm490_vm4, %v4877_v53  ;;  %v17931_v53 = vpack.c.bf16 %v14247_v48, %v14246_v44  ;;  %v14282_v44 = vld [vmem:[%s23697_s3 + $0x100] sm:$0xff]  ;;  %v14283_v48 = vld [vmem:[%s23697_s3 + $0x108] sm:$0xff] }
 0x305   : > { %16724 = vmatmul.mubr.msk.f32.vlgmr.msra.gmra.mrb[32].mxu1 %vm490_vm4, %v4878_v22  ;;  %v17935_v22 = vpack.c.bf16 %v14249_v17, %v14248_v16  ;;  %v21146_v16 = vld [vmem:[#allocation3 + $0x64] sm:$0xff]  ;;  %v21150_v17 = vld [vmem:[#allocation3 + $0x6c] sm:$0xff] }
 0x306   : > { %17926 = vmatpush3.bf16.msra.mxu1 %v20998_v7  ;;  %16726 = vmatprep.mubr.msk.f32.mxu1 %vm490_vm4, %v4879_v23  ;;  %v21128_v23 = vld [vmem:[#allocation3 + $0x3c] sm:$0xff]  ;;  %v21142_v7 = vld [vmem:[#allocation3 + $0x54] sm:$0xff]  ;;  %24073 = vst [vmem:[#allocation72_spill] sm:$0xff] %v21146_v16  ;;  %24074 = vst [vmem:[#allocation73_spill] sm:$0xff] %v21150_v17 }
 0x307   : > { %17928 = vmatprep.subr.bf16.mxu1 %v17927_v40 }
 0x309   : > { %16727 = vmatmul.mubr.msk.f32.gmra.mrb[34].mxu1 %vm490_vm4, %v4880_v39  ;;  %v21138_v39 = vld [vmem:[#allocation3 + $0x4c] sm:$0xff] }
 0x30a   : > { %16729 = vmatprep.mubr.msk.f32.mxu1 %vm490_vm4, %v21124_v11  ;;  %17930 = vmatpush3.bf16.msra.mxu1 %v17927_v40  ;;  %v17939_v40 = vpack.c.bf16 %v14283_v48, %v14282_v44  ;;  %v21158_v44 = vld [vmem:[#allocation3 + $0x84] sm:$0xff]  ;;  %v21162_v48 = vld [vmem:[#allocation3 + $0x94] sm:$0xff] }
 0x30b   : > { %17932 = vmatprep.subr.bf16.mxu1 %v17931_v53  ;;  %24076 = vst [vmem:[#allocation75_spill] sm:$0xff] %v21158_v44  ;;  %24077 = vst [vmem:[#allocation76_spill] sm:$0xff] %v21162_v48 }
 0x30d   : > { %16730 = vmatmul.mubr.msk.f32.gmra.mrb[36].mxu1 %vm490_vm4, %v21128_v23 }
 0x30e   : > { %16732 = vmatprep.mubr.msk.f32.mxu1 %vm490_vm4, %v21138_v39  ;;  %17934 = vmatpush3.bf16.msra.mxu1 %v17931_v53  ;;  %v21154_v53 = vld [vmem:[#allocation3 + $0x7c] sm:$0xff] }
 0x30f   : > { %17936 = vmatprep.subr.bf16.mxu1 %v17935_v22  ;;  %24075 = vst [vmem:[#allocation74_spill] sm:$0xff] %v21154_v53 }
 0x311   : > { %16733 = vmatmul.mubr.msk.f32.gmra.mrb[38].mxu1 %vm490_vm4, %v21142_v7 }
 0x312   : > { %16735 = vmatprep.mubr.msk.f32.mxu1 %vm490_vm4, %v21146_v16  ;;  %17938 = vmatpush3.bf16.msra.mxu1 %v17935_v22  ;;  %v21166_v22 = vld [vmem:[#allocation3 + $0x9c] sm:$0xff]  ;;  %v14287_v16 = vld [vmem:[%s23697_s3 + $0x128] sm:$0xff] }
 0x313   : > { %17940 = vmatprep.subr.bf16.mxu1 %v17939_v40  ;;  %24078 = vst [vmem:[#allocation77_spill] sm:$0xff] %v21166_v22 }
 0x315   : > { %16736 = vmatmul.mubr.msk.f32.gmra.mrb[40].mxu1 %vm490_vm4, %v21150_v17  ;;  %v21170_v17 = vld [vmem:[#allocation3 + $0xac] sm:$0xff] }
 0x316   : > { %16738 = vmatprep.mubr.msk.f32.mxu1 %vm490_vm4, %v21154_v53  ;;  %24079 = vst [vmem:[#allocation78_spill] sm:$0xff] %v21170_v17  ;;  %v21174_v53 = vld [vmem:[#allocation3 + $0xb4] sm:$0xff] }
 0x317   : > { %24080 = vst [vmem:[#allocation79_spill] sm:$0xff] %v21174_v53 }
 0x319   : > { %16739 = vmatmul.mubr.msk.f32.gmra.mrb[42].mxu1 %vm490_vm4, %v21158_v44  ;;  %v21178_v44 = vld [vmem:[#allocation3 + $0xc4] sm:$0xff] }
 0x31a   : > { %16741 = vmatprep.mubr.msk.f32.mxu1 %vm490_vm4, %v21162_v48  ;;  %24081 = vst [vmem:[#allocation80_spill] sm:$0xff] %v21178_v44  ;;  %v21182_v48 = vld [vmem:[#allocation3 + $0xcc] sm:$0xff] }
 0x31b   : > { %24082 = vst [vmem:[#allocation81_spill] sm:$0xff] %v21182_v48 }
 0x31d   : > { %16742 = vmatmul.mubr.msk.f32.gmra.mrb[44].mxu1 %vm490_vm4, %v21166_v22  ;;  %v21186_v22 = vld [vmem:[#allocation3 + $0xdc] sm:$0xff] }
 0x31e   : > { %16744 = vmatprep.mubr.msk.f32.mxu1 %vm490_vm4, %v21170_v17  ;;  %24083 = vst [vmem:[#allocation82_spill] sm:$0xff] %v21186_v22  ;;  %v21190_v17 = vld [vmem:[#allocation3 + $0xe4] sm:$0xff] }
 0x31f   : > { %24084 = vst [vmem:[#allocation83_spill] sm:$0xff] %v21190_v17 }
 0x321   : > { %16745 = vmatmul.mubr.msk.f32.gmra.mrb[46].mxu1 %vm490_vm4, %v21174_v53  ;;  %v21194_v53 = vld [vmem:[#allocation3 + $0xf4] sm:$0xff] }
 0x322   : > { %16747 = vmatprep.mubr.msk.f32.mxu1 %vm490_vm4, %v21178_v44  ;;  %24085 = vst [vmem:[#allocation84_spill] sm:$0xff] %v21194_v53  ;;  %v21198_v44 = vld [vmem:[#allocation3 + $0xfc] sm:$0xff] }
 0x323   : > { %24086 = vst [vmem:[#allocation85_spill] sm:$0xff] %v21198_v44 }
 0x325   : > { %16748 = vmatmul.mubr.msk.f32.gmra.mrb[48].mxu1 %vm490_vm4, %v21182_v48  ;;  %v21202_v48 = vld [vmem:[#allocation3 + $0x10c] sm:$0xff] }
 0x326   : > { %16750 = vmatprep.mubr.msk.f32.mxu1 %vm490_vm4, %v21186_v22  ;;  %24087 = vst [vmem:[#allocation86_spill] sm:$0xff] %v21202_v48  ;;  %v21206_v22 = vld [vmem:[#allocation3 + $0x114] sm:$0xff] }
 0x327   : > { %24088 = vst [vmem:[#allocation87_spill] sm:$0xff] %v21206_v22 }
 0x329   : > { %16751 = vmatmul.mubr.msk.f32.gmra.mrb[50].mxu1 %vm490_vm4, %v21190_v17  ;;  %v21210_v17 = vld [vmem:[#allocation3 + $0x124] sm:$0xff] }
 0x32a   : > { %16753 = vmatprep.mubr.msk.f32.mxu1 %vm490_vm4, %v21194_v53  ;;  %24089 = vst [vmem:[#allocation88_spill] sm:$0xff] %v21210_v17  ;;  %v21214_v53 = vld [vmem:[#allocation3 + $0x12c] sm:$0xff] }
 0x32b   : > { %24090 = vst [vmem:[#allocation89_spill] sm:$0xff] %v21214_v53 }
 0x32d   : > { %16754 = vmatmul.mubr.msk.f32.gmra.mrb[52].mxu1 %vm490_vm4, %v21198_v44  ;;  %v21218_v44 = vld [vmem:[#allocation3 + $0x13c] sm:$0xff] }
 0x32e   : > { %16756 = vmatprep.mubr.msk.f32.mxu1 %vm490_vm4, %v21202_v48  ;;  %24091 = vst [vmem:[#allocation90_spill] sm:$0xff] %v21218_v44  ;;  %v21222_v48 = vld [vmem:[#allocation3 + $0x144] sm:$0xff] }
 0x32f   : > { %24092 = vst [vmem:[#allocation91_spill] sm:$0xff] %v21222_v48 }
 0x331   : > { %16757 = vmatmul.mubr.msk.f32.gmra.mrb[54].mxu1 %vm490_vm4, %v21206_v22  ;;  %v21226_v22 = vld [vmem:[#allocation3 + $0x154] sm:$0xff] }
 0x332   : > { %16759 = vmatprep.mubr.msk.f32.mxu1 %vm490_vm4, %v21210_v17  ;;  %24093 = vst [vmem:[#allocation92_spill] sm:$0xff] %v21226_v22  ;;  %v21230_v17 = vld [vmem:[#allocation3 + $0x15c] sm:$0xff] }
 0x333   : > { %24094 = vst [vmem:[#allocation93_spill] sm:$0xff] %v21230_v17 }
 0x335   : > { %16760 = vmatmul.mubr.msk.f32.gmra.mrb[56].mxu1 %vm490_vm4, %v21214_v53  ;;  %v21234_v53 = vld [vmem:[#allocation3 + $0x16c] sm:$0xff] }
 0x336   : > { %16762 = vmatprep.mubr.msk.f32.mxu1 %vm490_vm4, %v21218_v44  ;;  %24095 = vst [vmem:[#allocation94_spill] sm:$0xff] %v21234_v53  ;;  %v21238_v44 = vld [vmem:[#allocation3 + $0x174] sm:$0xff] }
 0x337   : > { %24096 = vst [vmem:[#allocation95_spill] sm:$0xff] %v21238_v44 }
 0x339   : > { %16763 = vmatmul.mubr.msk.f32.gmra.mrb[58].mxu1 %vm490_vm4, %v21222_v48  ;;  %v14284_v48 = vld [vmem:[%s23697_s3 + $0x110] sm:$0xff] }
 0x33a   : > { %16765 = vmatprep.mubr.msk.f32.mxu1 %vm490_vm4, %v21226_v22  ;;  %v14285_v22 = vld [vmem:[%s23697_s3 + $0x118] sm:$0xff] }
 0x33d   : > { %16766 = vmatmul.mubr.msk.f32.gmra.mrb[60].mxu1 %vm490_vm4, %v21230_v17  ;;  %v17943_v17 = vpack.c.bf16 %v14285_v22, %v14284_v48  ;;  %v14289_v48 = vld [vmem:[%s23697_s3 + $0x138] sm:$0xff]  ;;  %v14324_v22 = vld [vmem:[%s23697_s3 + $0x150] sm:$0xff] }
 0x33e   : > { %16768 = vmatprep.mubr.msk.f32.mxu1 %vm490_vm4, %v21234_v53  ;;  %v14286_v53 = vld [vmem:[%s23697_s3 + $0x120] sm:$0xff] }
 0x341   : > { %16769 = vmatmul.mubr.msk.f32.gmra.mrb[62].mxu1 %vm490_vm4, %v21238_v44  ;;  %v17947_v44 = vpack.c.bf16 %v14287_v16, %v14286_v53  ;;  %v21322_v16 = vld [vmem:[#allocation3 + $0x180] sm:$0xff]  ;;  %v21330_v53 = vld [vmem:[#allocation3 + $0x198] sm:$0xff] }
 0x342   : > { %16787 = vmatprep.mubr.msk.f32.mxu1 %vm490_vm4, %v20980_v36  ;;  %v14288_v36 = vld [vmem:[%s23697_s3 + $0x130] sm:$0xff] }
 0x345   : > { %16788 = vmatmul.mubr.msk.f32.vlgmr.msra.gmra.mrb[32].mxu1 %vm490_vm4, %v20984_v35  ;;  %v17951_v35 = vpack.c.bf16 %v14289_v48, %v14288_v36  ;;  %v14325_v36 = vld [vmem:[%s23697_s3 + $0x158] sm:$0xff] }
 0x346   : > { %17942 = vmatpush3.bf16.msra.mxu1 %v17939_v40  ;;  %16790 = vmatprep.mubr.msk.f32.mxu1 %vm490_vm4, %v20994_v8  ;;  %v14322_v8 = vld [vmem:[%s23697_s3 + $0x140] sm:$0xff]  ;;  %v14323_v40 = vld [vmem:[%s23697_s3 + $0x148] sm:$0xff]  ;;  %v17959_v48 = vpack.c.bf16 %v14325_v36, %v14324_v22  ;;  %v14329_v22 = vld [vmem:[%s23697_s3 + $0x178] sm:$0xff] }
 0x347   : > { %17944 = vmatprep.subr.bf16.mxu1 %v17943_v17  ;;  %v24106_v36 = vld [vmem:[#allocation78_spill] sm:$0xff] }
 0x349   : > { %16791 = vmatmul.mubr.msk.f32.gmra.mrb[34].mxu1 %vm490_vm4, %v21000_v6  ;;  %v17955_v6 = vpack.c.bf16 %v14323_v40, %v14322_v8  ;;  %v14327_v8 = vld [vmem:[%s23697_s3 + $0x168] sm:$0xff] }
 0x34a   : > { %16793 = vmatprep.mubr.msk.f32.mxu1 %vm490_vm4, %v21004_v32  ;;  %17946 = vmatpush3.bf16.msra.mxu1 %v17943_v17  ;;  %v21326_v17 = vld [vmem:[#allocation3 + $0x188] sm:$0xff] }
 0x34b   : > { %17948 = vmatprep.subr.bf16.mxu1 %v17947_v44 }
 0x34d   : > { %16794 = vmatmul.mubr.msk.f32.gmra.mrb[36].mxu1 %vm490_vm4, %v21009_v12 }
 0x34e   : > { %16796 = vmatprep.mubr.msk.f32.mxu1 %vm490_vm4, %v21013_v25  ;;  %17950 = vmatpush3.bf16.msra.mxu1 %v17947_v44  ;;  %v21334_v44 = vld [vmem:[#allocation3 + $0x1a0] sm:$0xff] }
 0x34f   : > { %17952 = vmatprep.subr.bf16.mxu1 %v17951_v35 }
 0x351   : > { %16797 = vmatmul.mubr.msk.f32.gmra.mrb[38].mxu1 %vm490_vm4, %v21017_v55 }
 0x352   : > { %16799 = vmatprep.mubr.msk.f32.mxu1 %vm490_vm4, %v21021_v10  ;;  %17954 = vmatpush3.bf16.msra.mxu1 %v17951_v35  ;;  %v14326_v35 = vld [vmem:[%s23697_s3 + $0x160] sm:$0xff] }
 0x353   : > { %17956 = vmatprep.subr.bf16.mxu1 %v17955_v6  ;;  %v17963_v40 = vpack.c.bf16 %v14327_v8, %v14326_v35  ;;  %v24108_v35 = vld [vmem:[#allocation80_spill] sm:$0xff]  ;;  %v24109_v8 = vld [vmem:[#allocation81_spill] sm:$0xff] }
 0x355   : > { %16800 = vmatmul.mubr.msk.f32.gmra.mrb[40].mxu1 %vm490_vm4, %v21025_v21 }
 0x356   : > { %16802 = vmatprep.mubr.msk.f32.mxu1 %vm490_vm4, %v21029_v63 }
 0x359   : > { %16803 = vmatmul.mubr.msk.f32.gmra.mrb[42].mxu1 %vm490_vm4, %v21033_v14 }
 0x35a   : > { %16805 = vmatprep.mubr.msk.f32.mxu1 %vm490_vm4, %v21037_v38 }
 0x35d   : > { %16806 = vmatmul.mubr.msk.f32.gmra.mrb[44].mxu1 %vm490_vm4, %v21041_v45 }
 0x35e   : > { %16808 = vmatprep.mubr.msk.f32.mxu1 %vm490_vm4, %v21045_v30 }
 0x361   : > { %16809 = vmatmul.mubr.msk.f32.gmra.mrb[46].mxu1 %vm490_vm4, %v21049_v20 }
 0x362   : > { %16811 = vmatprep.mubr.msk.f32.mxu1 %vm490_vm4, %v21053_v59 }
 0x365   : > { %16812 = vmatmul.mubr.msk.f32.gmra.mrb[48].mxu1 %vm490_vm4, %v21057_v13 }
 0x366   : > { %16814 = vmatprep.mubr.msk.f32.mxu1 %vm490_vm4, %v21061_v56 }
 0x369   : > { %16815 = vmatmul.mubr.msk.f32.gmra.mrb[50].mxu1 %vm490_vm4, %v21065_v24 }
 0x36a   : > { %16817 = vmatprep.mubr.msk.f32.mxu1 %vm490_vm4, %v21069_v51 }
 0x36d   : > { %16818 = vmatmul.mubr.msk.f32.gmra.mrb[52].mxu1 %vm490_vm4, %v21073_v19 }
 0x36e   : > { %16820 = vmatprep.mubr.msk.f32.mxu1 %vm490_vm4, %v21077_v49 }
 0x371   : > { %16821 = vmatmul.mubr.msk.f32.gmra.mrb[54].mxu1 %vm490_vm4, %v21081_v18 }
 0x372   : > { %16823 = vmatprep.mubr.msk.f32.mxu1 %vm490_vm4, %v21085_v46 }
 0x375   : > { %16824 = vmatmul.mubr.msk.f32.gmra.mrb[56].mxu1 %vm490_vm4, %v21089_v26 }
 0x376   : > { %16826 = vmatprep.mubr.msk.f32.mxu1 %vm490_vm4, %v21093_v41 }
 0x379   : > { %16827 = vmatmul.mubr.msk.f32.gmra.mrb[58].mxu1 %vm490_vm4, %v21097_v33 }
 0x37a   : > { %16829 = vmatprep.mubr.msk.f32.mxu1 %vm490_vm4, %v21322_v16 }
 0x37d   : > { %16830 = vmatmul.mubr.msk.f32.gmra.mrb[60].mxu1 %vm490_vm4, %v21326_v17 }
 0x37e   : > { %16832 = vmatprep.mubr.msk.f32.mxu1 %vm490_vm4, %v21330_v53 }
 0x381   : > { %16833 = vmatmul.mubr.msk.f32.gmra.mrb[62].mxu1 %vm490_vm4, %v21334_v44 }
 0x382   : > { %16851 = vmatprep.mubr.msk.f32.mxu1 %vm490_vm4, %v20639_v29  ;;  %v14328_v29 = vld [vmem:[%s23697_s3 + $0x170] sm:$0xff] }
 0x385   : > { %16852 = vmatmul.mubr.msk.f32.vlgmr.msra.gmra.mrb[32].mxu1 %vm490_vm4, %v20649_v34  ;;  %v17967_v34 = vpack.c.bf16 %v14329_v22, %v14328_v29  ;;  %v24111_v29 = vld [vmem:[#allocation83_spill] sm:$0xff]  ;;  %v24112_v22 = vld [vmem:[#allocation84_spill] sm:$0xff] }
 0x386   : > { %17958 = vmatpush3.bf16.msra.mxu1 %v17955_v6  ;;  %16854 = vmatprep.mubr.msk.f32.mxu1 %vm490_vm4, %v20663_v31  ;;  %v14362_v31 = vld [vmem:[%s23697_s3 + $0x180] sm:$0xff]  ;;  %v14363_v6 = vld [vmem:[%s23697_s3 + $0x188] sm:$0xff] }
 0x387   : > { %17960 = vmatprep.subr.bf16.mxu1 %v17959_v48 }
 0x389   : > { %16855 = vmatmul.mubr.msk.f32.gmra.mrb[34].mxu1 %vm490_vm4, %v20673_v43  ;;  %v17971_v43 = vpack.c.bf16 %v14363_v6, %v14362_v31  ;;  %v24114_v31 = vld [vmem:[#allocation86_spill] sm:$0xff]  ;;  %v24115_v6 = vld [vmem:[#allocation87_spill] sm:$0xff] }
 0x38a   : > { %16857 = vmatprep.mubr.msk.f32.mxu1 %vm490_vm4, %v20687_v5  ;;  %17962 = vmatpush3.bf16.msra.mxu1 %v17959_v48  ;;  %v21426_v5 = vld [vmem:[#allocation3 + $0x19a] sm:$0xff]  ;;  %v24107_v48 = vld [vmem:[#allocation79_spill] sm:$0xff] }
 0x38b   : > { %17964 = vmatprep.subr.bf16.mxu1 %v17963_v40 }
 0x38d   : > { %16858 = vmatmul.mubr.msk.f32.gmra.mrb[36].mxu1 %vm490_vm4, %v20697_v47  ;;  %v21430_v47 = vld [vmem:[#allocation3 + $0x1a2] sm:$0xff] }
 0x38e   : > { %16860 = vmatprep.mubr.msk.f32.mxu1 %vm490_vm4, %v20711_v37  ;;  %17966 = vmatpush3.bf16.msra.mxu1 %v17963_v40  ;;  %v14365_v37 = vld [vmem:[%s23697_s3 + $0x198] sm:$0xff]  ;;  %v24110_v40 = vld [vmem:[#allocation82_spill] sm:$0xff] }
 0x38f   : > { %17968 = vmatprep.subr.bf16.mxu1 %v17967_v34 }
 0x391   : > { %16861 = vmatmul.mubr.msk.f32.gmra.mrb[38].mxu1 %vm490_vm4, %v20721_v50 }
 0x392   : > { %16863 = vmatprep.mubr.msk.f32.mxu1 %vm490_vm4, %v20735_v27  ;;  %17970 = vmatpush3.bf16.msra.mxu1 %v17967_v34  ;;  %v14367_v27 = vld [vmem:[%s23697_s3 + $0x1a8] sm:$0xff] }
 0x393   : > { %17972 = vmatprep.subr.bf16.mxu1 %v17971_v43  ;;  %v24113_v34 = vld [vmem:[#allocation85_spill] sm:$0xff] }
 0x395   : > { %16864 = vmatmul.mubr.msk.f32.gmra.mrb[40].mxu1 %vm490_vm4, %v20745_v52 }
 0x396   : > { %16866 = vmatprep.mubr.msk.f32.mxu1 %vm490_vm4, %v20759_v54  ;;  %v14366_v54 = vld [vmem:[%s23697_s3 + $0x1a0] sm:$0xff] }
 0x397   : > { %v17979_v52 = vpack.c.bf16 %v14367_v27, %v14366_v54  ;;  %v24123_v54 = vld [vmem:[#allocation95_spill] sm:$0xff]  ;;  %v21514_v27 = vld [vmem:[#allocation3 + $0x184] sm:$0xff] }
 0x399   : > { %16867 = vmatmul.mubr.msk.f32.gmra.mrb[42].mxu1 %vm490_vm4, %v20769_v57  ;;  %v14368_v57 = vld [vmem:[%s23697_s3 + $0x1b0] sm:$0xff] }
 0x39a   : > { %16869 = vmatprep.mubr.msk.f32.mxu1 %vm490_vm4, %v20783_v28  ;;  %v14364_v28 = vld [vmem:[%s23697_s3 + $0x190] sm:$0xff] }
 0x39b   : > { %v17975_v50 = vpack.c.bf16 %v14365_v37, %v14364_v28  ;;  %v24120_v28 = vld [vmem:[#allocation92_spill] sm:$0xff]  ;;  %v24121_v37 = vld [vmem:[#allocation93_spill] sm:$0xff] }
 0x39d   : > { %16870 = vmatmul.mubr.msk.f32.gmra.mrb[44].mxu1 %vm490_vm4, %v20793_v60  ;;  %v14369_v60 = vld [vmem:[%s23697_s3 + $0x1b8] sm:$0xff] }
 0x39e   : > { %16872 = vmatprep.mubr.msk.f32.mxu1 %vm490_vm4, %v20807_v2  ;;  %v24099_v2 = vld [vmem:[#allocation71_spill] sm:$0xff] }
 0x3a1   : > { %16873 = vmatmul.mubr.msk.f32.gmra.mrb[46].mxu1 %vm490_vm4, %v20817_v61  ;;  %v24100_v61 = vld [vmem:[#allocation72_spill] sm:$0xff] }
 0x3a2   : > { %16875 = vmatprep.mubr.msk.f32.mxu1 %vm490_vm4, %v20831_v42  ;;  %v24097_v42 = vld [vmem:[#allocation69_spill] sm:$0xff] }
 0x3a5   : > { %16876 = vmatmul.mubr.msk.f32.gmra.mrb[48].mxu1 %vm490_vm4, %v20841_v62  ;;  %v17983_v62 = vpack.c.bf16 %v14369_v60, %v14368_v57  ;;  %v21522_v57 = vld [vmem:[#allocation3 + $0x19c] sm:$0xff]  ;;  %v21526_v60 = vld [vmem:[#allocation3 + $0x1a4] sm:$0xff] }
 0x3a6   : > { %16878 = vmatprep.mubr.msk.f32.mxu1 %vm490_vm4, %v20855_v15  ;;  %v24098_v15 = vld [vmem:[#allocation70_spill] sm:$0xff]  ;;  %24126 = vst [vmem:[#allocation71_spill] sm:$0xff] %v21526_v60 }
 0x3a7   : > { %24125 = vst [vmem:[#allocation70_spill] sm:$0xff] %v21522_v57 }
 0x3a9   : > { %16879 = vmatmul.mubr.msk.f32.gmra.mrb[50].mxu1 %vm490_vm4, %v20865_v0  ;;  %v14402_v0 = vld [vmem:[%s23697_s3 + $0x1c0] sm:$0xff] }
 0x3aa   : > { %16881 = vmatprep.mubr.msk.f32.mxu1 %vm490_vm4, %v20879_v4  ;;  %v21418_v4 = vld [vmem:[#allocation3 + $0x182] sm:$0xff] }
 0x3ad   : > { %16882 = vmatmul.mubr.msk.f32.gmra.mrb[52].mxu1 %vm490_vm4, %v20889_v3  ;;  %v24101_v3 = vld [vmem:[#allocation73_spill] sm:$0xff] }
 0x3ae   : > { %16884 = vmatprep.mubr.msk.f32.mxu1 %vm490_vm4, %v20903_v58  ;;  %v21422_v58 = vld [vmem:[#allocation3 + $0x18a] sm:$0xff] }
 0x3b1   : > { %16885 = vmatmul.mubr.msk.f32.gmra.mrb[54].mxu1 %vm490_vm4, %v20913_v9  ;;  %v24102_v9 = vld [vmem:[#allocation74_spill] sm:$0xff] }
 0x3b2   : > { %16887 = vmatprep.mubr.msk.f32.mxu1 %vm490_vm4, %v20927_v1  ;;  %v14403_v1 = vld [vmem:[%s23697_s3 + $0x1c8] sm:$0xff] }
 0x3b5   : > { %16888 = vmatmul.mubr.msk.f32.gmra.mrb[56].mxu1 %vm490_vm4, %v24097_v42  ;;  %v24117_v42 = vld [vmem:[#allocation89_spill] sm:$0xff] }
 0x3b6   : > { %16890 = vmatprep.mubr.msk.f32.mxu1 %vm490_vm4, %v24098_v15  ;;  %v24118_v15 = vld [vmem:[#allocation90_spill] sm:$0xff] }
 0x3b9   : > { %16891 = vmatmul.mubr.msk.f32.gmra.mrb[58].mxu1 %vm490_vm4, %v24099_v2  ;;  %v24119_v2 = vld [vmem:[#allocation91_spill] sm:$0xff] }
 0x3ba   : > { %16893 = vmatprep.mubr.msk.f32.mxu1 %vm490_vm4, %v21418_v4 }
 0x3bd   : > { %16894 = vmatmul.mubr.msk.f32.gmra.mrb[60].mxu1 %vm490_vm4, %v21422_v58 }
 0x3be   : > { %16896 = vmatprep.mubr.msk.f32.mxu1 %vm490_vm4, %v21426_v5 }
 0x3c1   : > { %16897 = vmatmul.mubr.msk.f32.gmra.mrb[62].mxu1 %vm490_vm4, %v21430_v47 }
 0x3c2   : > { %16915 = vmatprep.mubr.msk.f32.mxu1 %vm490_vm4, %v21124_v11  ;;  %v17987_v11 = vpack.c.bf16 %v14403_v1, %v14402_v0  ;;  %v14405_v0 = vld [vmem:[%s23697_s3 + $0x1d8] sm:$0xff] }
 0x3c5   : > { %16916 = vmatmul.mubr.msk.f32.vlgmr.msra.gmra.mrb[32].mxu1 %vm490_vm4, %v21128_v23  ;;  %v24103_v23 = vld [vmem:[#allocation75_spill] sm:$0xff] }
 0x3c6   : > { %17974 = vmatpush3.bf16.msra.mxu1 %v17971_v43  ;;  %16918 = vmatprep.mubr.msk.f32.mxu1 %vm490_vm4, %v21138_v39  ;;  %v24104_v39 = vld [vmem:[#allocation76_spill] sm:$0xff] }
 0x3c7   : > { %17976 = vmatprep.subr.bf16.mxu1 %v17975_v50  ;;  %v24116_v43 = vld [vmem:[#allocation88_spill] sm:$0xff] }
 0x3c9   : > { %16919 = vmatmul.mubr.msk.f32.gmra.mrb[34].mxu1 %vm490_vm4, %v21142_v7  ;;  %v24105_v7 = vld [vmem:[#allocation77_spill] sm:$0xff] }
 0x3ca   : > { %16921 = vmatprep.mubr.msk.f32.mxu1 %vm490_vm4, %v24100_v61  ;;  %17978 = vmatpush3.bf16.msra.mxu1 %v17975_v50  ;;  %v24122_v50 = vld [vmem:[#allocation94_spill] sm:$0xff] }
 0x3cb   : > { %17980 = vmatprep.subr.bf16.mxu1 %v17979_v52 }
 0x3cd   : > { %16922 = vmatmul.mubr.msk.f32.gmra.mrb[36].mxu1 %vm490_vm4, %v24101_v3 }
 0x3ce   : > { %16924 = vmatprep.mubr.msk.f32.mxu1 %vm490_vm4, %v24102_v9  ;;  %17982 = vmatpush3.bf16.msra.mxu1 %v17979_v52  ;;  %v21518_v52 = vld [vmem:[#allocation3 + $0x18c] sm:$0xff] }
 0x3cf   : > { %17984 = vmatprep.subr.bf16.mxu1 %v17983_v62  ;;  %24124 = vst [vmem:[#allocation69_spill] sm:$0xff] %v21518_v52 }
 0x3d1   : > { %16925 = vmatmul.mubr.msk.f32.gmra.mrb[38].mxu1 %vm490_vm4, %v24103_v23 }
 0x3d2   : > { %16927 = vmatprep.mubr.msk.f32.mxu1 %vm490_vm4, %v24104_v39  ;;  %17986 = vmatpush3.bf16.msra.mxu1 %v17983_v62  ;;  %v14404_v62 = vld [vmem:[%s23697_s3 + $0x1d0] sm:$0xff] }
 0x3d3   : > { %17988 = vmatprep.subr.bf16.mxu1 %v17987_v11  ;;  %v17991_v1 = vpack.c.bf16 %v14405_v0, %v14404_v62  ;;  %v14409_v62 = vld [vmem:[%s23697_s3 + $0x1f8] sm:$0xff]  ;;  %v6856_v0 = vld [vmem:[#allocation3 + $0xc2] sm:$0xff] }
 0x3d5   : > { %16928 = vmatmul.mubr.msk.f32.gmra.mrb[40].mxu1 %vm490_vm4, %v24105_v7 }
 0x3d6   : > { %16930 = vmatprep.mubr.msk.f32.mxu1 %vm490_vm4, %v24106_v36 }
 0x3d9   : > { %16931 = vmatmul.mubr.msk.f32.gmra.mrb[42].mxu1 %vm490_vm4, %v24107_v48 }
 0x3da   : > { %16933 = vmatprep.mubr.msk.f32.mxu1 %vm490_vm4, %v24108_v35 }
 0x3dd   : > { %16934 = vmatmul.mubr.msk.f32.gmra.mrb[44].mxu1 %vm490_vm4, %v24109_v8 }
 0x3de   : > { %16936 = vmatprep.mubr.msk.f32.mxu1 %vm490_vm4, %v24110_v40 }
 0x3e1   : > { %16937 = vmatmul.mubr.msk.f32.gmra.mrb[46].mxu1 %vm490_vm4, %v24111_v29 }
 0x3e2   : > { %16939 = vmatprep.mubr.msk.f32.mxu1 %vm490_vm4, %v24112_v22 }
 0x3e5   : > { %16940 = vmatmul.mubr.msk.f32.gmra.mrb[48].mxu1 %vm490_vm4, %v24113_v34 }
 0x3e6   : > { %16942 = vmatprep.mubr.msk.f32.mxu1 %vm490_vm4, %v24114_v31 }
 0x3e9   : > { %16943 = vmatmul.mubr.msk.f32.gmra.mrb[50].mxu1 %vm490_vm4, %v24115_v6 }
 0x3ea   : > { %16945 = vmatprep.mubr.msk.f32.mxu1 %vm490_vm4, %v24116_v43 }
 0x3ed   : > { %16946 = vmatmul.mubr.msk.f32.gmra.mrb[52].mxu1 %vm490_vm4, %v24117_v42 }
 0x3ee   : > { %16948 = vmatprep.mubr.msk.f32.mxu1 %vm490_vm4, %v24118_v15 }
 0x3f1   : > { %16949 = vmatmul.mubr.msk.f32.gmra.mrb[54].mxu1 %vm490_vm4, %v24119_v2 }
 0x3f2   : > { %16951 = vmatprep.mubr.msk.f32.mxu1 %vm490_vm4, %v24120_v28 }
 0x3f5   : > { %16952 = vmatmul.mubr.msk.f32.gmra.mrb[56].mxu1 %vm490_vm4, %v24121_v37 }
 0x3f6   : > { %16954 = vmatprep.mubr.msk.f32.mxu1 %vm490_vm4, %v24122_v50 }
 0x3f9   : > { %16955 = vmatmul.mubr.msk.f32.gmra.mrb[58].mxu1 %vm490_vm4, %v24123_v54 }
 0x3fa   : > { %16957 = vmatprep.mubr.msk.f32.mxu1 %vm490_vm4, %v21514_v27 }
 0x3fd   : > { %16958 = vmatmul.mubr.msk.f32.gmra.mrb[60].mxu1 %vm490_vm4, %v21518_v52  ;;  %v14407_v52 = vld [vmem:[%s23697_s3 + $0x1e8] sm:$0xff] }
 0x3fe   : > { %16960 = vmatprep.mubr.msk.f32.mxu1 %vm490_vm4, %v21522_v57  ;;  %v14406_v57 = vld [vmem:[%s23697_s3 + $0x1e0] sm:$0xff] }
 0x401   : > { %16961 = vmatmul.mubr.msk.f32.gmra.mrb[62].mxu1 %vm490_vm4, %v21526_v60  ;;  %v17995_v60 = vpack.c.bf16 %v14407_v52, %v14406_v57  ;;  %v6853_v52 = vld [vmem:[#allocation3 + $0x9a] sm:$0xff]  ;;  %v6854_v57 = vld [vmem:[#allocation3 + $0xaa] sm:$0xff] }
 0x402   : > { %16979 = vmatprep.mubr.msk.f32.mxu1 %vm490_vm4, %v21004_v32  ;;  %v14408_v32 = vld [vmem:[%s23697_s3 + $0x1f0] sm:$0xff] }
 0x405   : > { %16980 = vmatmul.mubr.msk.f32.vlgmr.msra.gmra.mrb[32].mxu1 %vm490_vm4, %v21009_v12  ;;  %v17999_v12 = vpack.c.bf16 %v14409_v62, %v14408_v32  ;;  %v6858_v32 = vld [vmem:[#allocation3 + $0xda] sm:$0xff]  ;;  %v6859_v62 = vld [vmem:[#allocation3 + $0xe2] sm:$0xff] }
 0x406   : > { %17990 = vmatpush3.bf16.msra.mxu1 %v17987_v11  ;;  %16982 = vmatprep.mubr.msk.f32.mxu1 %vm490_vm4, %v21013_v25  ;;  %v14442_v25 = vld [vmem:[%s23697_s3 + $0x200] sm:$0xff]  ;;  %v14443_v11 = vld [vmem:[%s23697_s3 + $0x208] sm:$0xff] }
 0x407   : > { %17992 = vmatprep.subr.bf16.mxu1 %v17991_v1 }
 0x409   : > { %16983 = vmatmul.mubr.msk.f32.gmra.mrb[34].mxu1 %vm490_vm4, %v21017_v55  ;;  %v18003_v55 = vpack.c.bf16 %v14443_v11, %v14442_v25  ;;  %v6861_v25 = vld [vmem:[#allocation3 + $0xfa] sm:$0xff]  ;;  %v6862_v11 = vld [vmem:[#allocation3 + $0x10a] sm:$0xff] }
 0x40a   : > { %16985 = vmatprep.mubr.msk.f32.mxu1 %vm490_vm4, %v21021_v10  ;;  %17994 = vmatpush3.bf16.msra.mxu1 %v17991_v1  ;;  %v6857_v1 = vld [vmem:[#allocation3 + $0xca] sm:$0xff] }
 0x40b   : > { %17996 = vmatprep.subr.bf16.mxu1 %v17995_v60 }
 0x40d   : > { %16986 = vmatmul.mubr.msk.f32.gmra.mrb[36].mxu1 %vm490_vm4, %v21025_v21  ;;  %v6851_v21 = vld [vmem:[#allocation3 + $0x82] sm:$0xff] }
 0x40e   : > { %16988 = vmatprep.mubr.msk.f32.mxu1 %vm490_vm4, %v21029_v63  ;;  %17998 = vmatpush3.bf16.msra.mxu1 %v17995_v60  ;;  %v6850_v63 = vld [vmem:[#allocation3 + $0x7a] sm:$0xff]  ;;  %v6855_v60 = vld [vmem:[#allocation3 + $0xb2] sm:$0xff] }
 0x40f   : > { %18000 = vmatprep.subr.bf16.mxu1 %v17999_v12 }
 0x411   : > { %16989 = vmatmul.mubr.msk.f32.gmra.mrb[38].mxu1 %vm490_vm4, %v21033_v14  ;;  %v14446_v14 = vld [vmem:[%s23697_s3 + $0x220] sm:$0xff] }
 0x412   : > { %16991 = vmatprep.mubr.msk.f32.mxu1 %vm490_vm4, %v21037_v38  ;;  %18002 = vmatpush3.bf16.msra.mxu1 %v17999_v12  ;;  %v14447_v38 = vld [vmem:[%s23697_s3 + $0x228] sm:$0xff]  ;;  %v6860_v12 = vld [vmem:[#allocation3 + $0xf2] sm:$0xff] }
 0x413   : > { %18004 = vmatprep.subr.bf16.mxu1 %v18003_v55  ;;  %v18011_v10 = vpack.c.bf16 %v14447_v38, %v14446_v14 }
 0x415   : > { %16992 = vmatmul.mubr.msk.f32.gmra.mrb[40].mxu1 %vm490_vm4, %v21041_v45 }
 0x416   : > { %16994 = vmatprep.mubr.msk.f32.mxu1 %vm490_vm4, %v21045_v30  ;;  %v6849_v30 = vld [vmem:[#allocation3 + $0x6a] sm:$0xff] }
 0x419   : > { %16995 = vmatmul.mubr.msk.f32.gmra.mrb[42].mxu1 %vm490_vm4, %v21049_v20  ;;  %v14486_v20 = vld [vmem:[%s23699_s5 + $0x38] sm:$0xff] }
 0x41a   : > { %16997 = vmatprep.mubr.msk.f32.mxu1 %vm490_vm4, %v21053_v59 }
 0x41d   : > { %16998 = vmatmul.mubr.msk.f32.gmra.mrb[44].mxu1 %vm490_vm4, %v21057_v13  ;;  %v14485_v13 = vld [vmem:[%s23699_s5 + $0x30] sm:$0xff] }
 0x41e   : > { %17000 = vmatprep.mubr.msk.f32.mxu1 %vm490_vm4, %v21061_v56  ;;  %v21635_v45 = vpack.c.bf16 %v14486_v20, %v14485_v13  ;;  %v6877_v13 = vld [vmem:[#allocation3 + $0x1ba] sm:$0xff]  ;;  %v6878_v20 = vld [vmem:[#allocation3 + $0x1ca] sm:$0xff] }
 0x421   : > { %17001 = vmatmul.mubr.msk.f32.gmra.mrb[46].mxu1 %vm490_vm4, %v21065_v24  ;;  %v14483_v24 = vld [vmem:[%s23699_s5 + $0x20] sm:$0xff] }
 0x422   : > { %17003 = vmatprep.mubr.msk.f32.mxu1 %vm490_vm4, %v21069_v51  ;;  %v14484_v51 = vld [vmem:[%s23699_s5 + $0x28] sm:$0xff] }
 0x423   : > { %v21630_v56 = vpack.c.bf16 %v14484_v51, %v14483_v24  ;;  %v6871_v24 = vld [vmem:[#allocation3 + $0x172] sm:$0xff] }
 0x424   : > { %v6876_v51 = vld [vmem:[#allocation3 + $0x1b2] sm:$0xff] }
 0x425   : > { %17004 = vmatmul.mubr.msk.f32.gmra.mrb[48].mxu1 %vm490_vm4, %v21073_v19  ;;  %v14444_v19 = vld [vmem:[%s23697_s3 + $0x210] sm:$0xff]  ;;  %18020 = vmatprep.subr.bf16.mxu0 %v21630_v56 }
 0x426   : > { %17006 = vmatprep.mubr.msk.f32.mxu1 %vm490_vm4, %v21077_v49  ;;  %v14445_v49 = vld [vmem:[%s23697_s3 + $0x218] sm:$0xff]  ;;  %18022 = vmatpush3.bf16.msra.mxu0 %v21630_v56 }
 0x427   : > { %v18007_v59 = vpack.c.bf16 %v14445_v49, %v14444_v19  ;;  %18024 = vmatprep.subr.bf16.mxu0 %v21635_v45  ;;  %v6869_v19 = vld [vmem:[#allocation3 + $0x15a] sm:$0xff]  ;;  %v6870_v49 = vld [vmem:[#allocation3 + $0x16a] sm:$0xff] }
 0x429   : > { %17007 = vmatmul.mubr.msk.f32.gmra.mrb[50].mxu1 %vm490_vm4, %v21081_v18  ;;  %v6482_v18 = vld [vmem:[#allocation3 + $0x1b0] sm:$0xff] }
 0x42a   : > { %17009 = vmatprep.mubr.msk.f32.mxu1 %vm490_vm4, %v21085_v46  ;;  %v6848_v46 = vld [vmem:[#allocation3 + $0x62] sm:$0xff]  ;;  %18026 = vmatpush3.bf16.msra.mxu0 %v21635_v45 }
 0x42d   : > { %17010 = vmatmul.mubr.msk.f32.gmra.mrb[52].mxu1 %vm490_vm4, %v21089_v26  ;;  %v6483_v26 = vld [vmem:[#allocation3 + $0x1b8] sm:$0xff] }
 0x42e   : > { %17012 = vmatprep.mubr.msk.f32.mxu1 %vm490_vm4, %v21093_v41  ;;  %v6484_v41 = vld [vmem:[#allocation3 + $0x1c8] sm:$0xff] }
 0x431   : > { %17013 = vmatmul.mubr.msk.f32.gmra.mrb[54].mxu1 %vm490_vm4, %v21097_v33  ;;  %v6485_v33 = vld [vmem:[#allocation3 + $0x1d0] sm:$0xff] }
 0x432   : > { %17015 = vmatprep.mubr.msk.f32.mxu1 %vm490_vm4, %v21322_v16  ;;  %v14448_v16 = vld [vmem:[%s23697_s3 + $0x230] sm:$0xff] }
 0x435   : > { %17016 = vmatmul.mubr.msk.f32.gmra.mrb[56].mxu1 %vm490_vm4, %v21326_v17  ;;  %v14449_v17 = vld [vmem:[%s23697_s3 + $0x238] sm:$0xff] }
 0x436   : > { %17018 = vmatprep.mubr.msk.f32.mxu1 %vm490_vm4, %v21330_v53  ;;  %v6852_v53 = vld [vmem:[#allocation3 + $0x92] sm:$0xff] }
 0x439   : > { %17019 = vmatmul.mubr.msk.f32.gmra.mrb[58].mxu1 %vm490_vm4, %v21334_v44  ;;  %v18015_v44 = vpack.c.bf16 %v14449_v17, %v14448_v16 }
 0x43a   : > { %17021 = vmatprep.mubr.msk.f32.mxu1 %vm490_vm4, %v6482_v18  ;;  %v6864_v18 = vld [vmem:[#allocation3 + $0x122] sm:$0xff] }
 0x43d   : > { %17022 = vmatmul.mubr.msk.f32.gmra.mrb[60].mxu1 %vm490_vm4, %v6483_v26  ;;  %v6865_v26 = vld [vmem:[#allocation3 + $0x12a] sm:$0xff] }
 0x43e   : > { %17024 = vmatprep.mubr.msk.f32.mxu1 %vm490_vm4, %v6484_v41  ;;  %v6866_v41 = vld [vmem:[#allocation3 + $0x13a] sm:$0xff] }
 0x441   : > { %17025 = vmatmul.mubr.msk.f32.gmra.mrb[62].mxu1 %vm490_vm4, %v6485_v33  ;;  %v6867_v33 = vld [vmem:[#allocation3 + $0x142] sm:$0xff] }
 0x442   : > { %17043 = vmatprep.mubr.msk.f32.mxu1 %vm490_vm4, %v6848_v46  ;;  %v6868_v46 = vld [vmem:[#allocation3 + $0x152] sm:$0xff] }
 0x445   : > { %17044 = vmatmul.mubr.msk.f32.vlgmr.msra.gmra.mrb[32].mxu1 %vm490_vm4, %v6849_v30 }
 0x446   : > { %18006 = vmatpush3.bf16.msra.mxu1 %v18003_v55  ;;  %17046 = vmatprep.mubr.msk.f32.mxu1 %vm490_vm4, %v6850_v63  ;;  %v6863_v55 = vld [vmem:[#allocation3 + $0x112] sm:$0xff] }
 0x447   : > { %18008 = vmatprep.subr.bf16.mxu1 %v18007_v59 }
 0x449   : > { %17047 = vmatmul.mubr.msk.f32.gmra.mrb[34].mxu1 %vm490_vm4, %v6851_v21 }
 0x44a   : > { %17049 = vmatprep.mubr.msk.f32.mxu1 %vm490_vm4, %v6852_v53  ;;  %18010 = vmatpush3.bf16.msra.mxu1 %v18007_v59  ;;  %v6879_v59 = vld [vmem:[#allocation3 + $0x1d2] sm:$0xff] }
 0x44b   : > { %18012 = vmatprep.subr.bf16.mxu1 %v18011_v10 }
 0x44d   : > { %17050 = vmatmul.mubr.msk.f32.gmra.mrb[36].mxu1 %vm490_vm4, %v6853_v52 }
 0x44e   : > { %17052 = vmatprep.mubr.msk.f32.mxu1 %vm490_vm4, %v6854_v57  ;;  %18014 = vmatpush3.bf16.msra.mxu1 %v18011_v10 }
 0x44f   : > { %18016 = vmatprep.subr.bf16.mxu1 %v18015_v44 }
 0x451   : > { %17053 = vmatmul.mubr.msk.f32.gmra.mrb[38].mxu1 %vm490_vm4, %v6855_v60 }
 0x452   : > { %17055 = vmatprep.mubr.msk.f32.mxu1 %vm490_vm4, %v6856_v0  ;;  %18018 = vmatpush3.bf16.msra.mxu1 %v18015_v44 }
 0x453   : > { %18159 = vmatprep.subr.bf16.mxu1 %v21630_v56 }
 0x455   : > { %17056 = vmatmul.mubr.msk.f32.gmra.mrb[40].mxu1 %vm490_vm4, %v6857_v1 }
 0x456   : > { %17058 = vmatprep.mubr.msk.f32.mxu1 %vm490_vm4, %v6858_v32 }
 0x459   : > { %17059 = vmatmul.mubr.msk.f32.gmra.mrb[42].mxu1 %vm490_vm4, %v6859_v62 }
 0x45a   : > { %17061 = vmatprep.mubr.msk.f32.mxu1 %vm490_vm4, %v6860_v12 }
 0x45d   : > { %17062 = vmatmul.mubr.msk.f32.gmra.mrb[44].mxu1 %vm490_vm4, %v6861_v25 }
 0x45e   : > { %17064 = vmatprep.mubr.msk.f32.mxu1 %vm490_vm4, %v6862_v11 }
 0x461   : > { %17065 = vmatmul.mubr.msk.f32.gmra.mrb[46].mxu1 %vm490_vm4, %v6863_v55 }
 0x462   : > { %17067 = vmatprep.mubr.msk.f32.mxu1 %vm490_vm4, %v6864_v18 }
 0x465   : > { %17068 = vmatmul.mubr.msk.f32.gmra.mrb[48].mxu1 %vm490_vm4, %v6865_v26 }
 0x466   : > { %17070 = vmatprep.mubr.msk.f32.mxu1 %vm490_vm4, %v6866_v41 }
 0x469   : > { %17071 = vmatmul.mubr.msk.f32.gmra.mrb[50].mxu1 %vm490_vm4, %v6867_v33 }
 0x46a   : > { %17073 = vmatprep.mubr.msk.f32.mxu1 %vm490_vm4, %v6868_v46 }
 0x46d   : > { %17074 = vmatmul.mubr.msk.f32.gmra.mrb[52].mxu1 %vm490_vm4, %v6869_v19 }
 0x46e   : > { %17076 = vmatprep.mubr.msk.f32.mxu1 %vm490_vm4, %v6870_v49 }
 0x471   : > { %17077 = vmatmul.mubr.msk.f32.gmra.mrb[54].mxu1 %vm490_vm4, %v6871_v24 }
 0x472   : > { %17079 = vmatprep.mubr.msk.f32.mxu1 %vm490_vm4, %v21418_v4  ;;  %v24127_v4 = vld [vmem:[#allocation69_spill] sm:$0xff] }
 0x475   : > { %17080 = vmatmul.mubr.msk.f32.gmra.mrb[56].mxu1 %vm490_vm4, %v21422_v58  ;;  %v24128_v58 = vld [vmem:[#allocation70_spill] sm:$0xff] }
 0x476   : > { %17082 = vmatprep.mubr.msk.f32.mxu1 %vm490_vm4, %v21426_v5  ;;  %v7270_v5 = vld [vmem:[#allocation3 + $0x1b4] sm:$0xff] }
 0x479   : > { %17083 = vmatmul.mubr.msk.f32.gmra.mrb[58].mxu1 %vm490_vm4, %v21430_v47  ;;  %v24129_v47 = vld [vmem:[#allocation71_spill] sm:$0xff] }
 0x47a   : > { %17085 = vmatprep.mubr.msk.f32.mxu1 %vm490_vm4, %v6876_v51 }
 0x47d   : > { %17086 = vmatmul.mubr.msk.f32.gmra.mrb[60].mxu1 %vm490_vm4, %v6877_v13 }
 0x47e   : > { %17088 = vmatprep.mubr.msk.f32.mxu1 %vm490_vm4, %v6878_v20 }
 0x481   : > { %17089 = vmatmul.mubr.msk.f32.gmra.mrb[62].mxu1 %vm490_vm4, %v6879_v59 }
 0x482   : > { %17107 = vmatprep.mubr.msk.f32.mxu1 %vm490_vm4, %v24100_v61  ;;  %v7271_v61 = vld [vmem:[#allocation3 + $0x1bc] sm:$0xff] }
 0x485   : > { %17108 = vmatmul.mubr.msk.f32.vlgmr.msra.gmra.mrb[32].mxu1 %vm490_vm4, %v24101_v3  ;;  %v7272_v3 = vld [vmem:[#allocation3 + $0x1cc] sm:$0xff] }
 0x486   : > { %17110 = vmatprep.mubr.msk.f32.mxu1 %vm490_vm4, %v24102_v9  ;;  %18161 = vmatpush3.bf16.msra.mxu1 %v21630_v56  ;;  %v7273_v9 = vld [vmem:[#allocation3 + $0x1d4] sm:$0xff] }
 0x487   : > { %18160 = vmatprep.subr.bf16.mxu1 %v21635_v45 }
 0x489   : > { %17111 = vmatmul.mubr.msk.f32.gmra.mrb[34].mxu1 %vm490_vm4, %v24103_v23  ;;  %v7776_v23 = vld [vmem:[#allocation3 + $0x2] sm:$0xff] }
 0x48a   : > { %17113 = vmatprep.mubr.msk.f32.mxu1 %vm490_vm4, %v24104_v39  ;;  %18162 = vmatpush3.bf16.msra.mxu1 %v21635_v45  ;;  %v7777_v39 = vld [vmem:[#allocation3 + $0xa] sm:$0xff] }
 0x48b   : > { %17163 = vmatprep.mubr.msk.f32.mxu0 %vm7707_vm7, %v7776_v23 }
 0x48c   : > { %17164 = vmatmul.mubr.msk.f32.vlgmr.msra.gmra.mrb[32].mxu0 %vm7707_vm7, %v7777_v39 }
 0x48d   : > { %17114 = vmatmul.mubr.msk.f32.gmra.mrb[36].mxu1 %vm490_vm4, %v24105_v7  ;;  %v7772_v7 = vld [vmem:[%s23699_s5] sm:$0xff] }
 0x48e   : > { %17116 = vmatprep.mubr.msk.f32.mxu1 %vm490_vm4, %v24106_v36  ;;  %v7773_v36 = vld [vmem:[%s23699_s5 + $0x8] sm:$0xff] }
 0x491   : > { %17117 = vmatmul.mubr.msk.f32.gmra.mrb[38].mxu1 %vm490_vm4, %v24107_v48  ;;  %v18027_v48 = vpack.c.bf16 %v7773_v36, %v7772_v7 }
 0x492   : > { %17119 = vmatprep.mubr.msk.f32.mxu1 %vm490_vm4, %v24108_v35  ;;  %v7778_v35 = vld [vmem:[#allocation3 + $0x1a] sm:$0xff] }
 0x493   : > { %18028 = vmatprep.subr.bf16.mxu0 %v18027_v48  ;;  %17166 = vmatprep.mubr.msk.f32.mxu0 %vm7707_vm7, %v7778_v35 }
 0x494   : > { %18030 = vmatpush3.bf16.msra.mxu0 %v18027_v48 }
 0x495   : > { %17120 = vmatmul.mubr.msk.f32.gmra.mrb[40].mxu1 %vm490_vm4, %v24109_v8  ;;  %v7779_v8 = vld [vmem:[#allocation3 + $0x22] sm:$0xff] }
 0x496   : > { %17122 = vmatprep.mubr.msk.f32.mxu1 %vm490_vm4, %v24110_v40  ;;  %17167 = vmatmul.mubr.msk.f32.gmra.mrb[34].mxu0 %vm7707_vm7, %v7779_v8  ;;  %v7774_v40 = vld [vmem:[%s23699_s5 + $0x10] sm:$0xff] }
 0x499   : > { %17123 = vmatmul.mubr.msk.f32.gmra.mrb[42].mxu1 %vm490_vm4, %v24111_v29  ;;  %v7775_v29 = vld [vmem:[%s23699_s5 + $0x18] sm:$0xff] }
 0x49a   : > { %17125 = vmatprep.mubr.msk.f32.mxu1 %vm490_vm4, %v24112_v22  ;;  %v18031_v22 = vpack.c.bf16 %v7775_v29, %v7774_v40 }
 0x49c   : > { %18032 = vmatprep.subr.bf16.mxu0 %v18031_v22 }
 0x49d   : > { %17126 = vmatmul.mubr.msk.f32.gmra.mrb[44].mxu1 %vm490_vm4, %v24113_v34  ;;  %18034 = vmatpush3.bf16.msra.mxu0 %v18031_v22  ;;  %v14551_v34 = vld [vmem:[%s23699_s5 + $0x40] sm:$0xff] }
 0x49e   : > { %17128 = vmatprep.mubr.msk.f32.mxu1 %vm490_vm4, %v24114_v31  ;;  %v14552_v31 = vld [vmem:[%s23699_s5 + $0x48] sm:$0xff] }
 0x4a1   : > { %17129 = vmatmul.mubr.msk.f32.gmra.mrb[46].mxu1 %vm490_vm4, %v24115_v6  ;;  %v21774_v6 = vpack.c.bf16 %v14552_v31, %v14551_v34 }
 0x4a2   : > { %17131 = vmatprep.mubr.msk.f32.mxu1 %vm490_vm4, %v24116_v43  ;;  %v11259_v43 = vld [vmem:[%s23702_s8] sm:$0xff] }
 0x4a3   : > { %18036 = vmatprep.subr.bf16.mxu0 %v21774_v6 }
 0x4a5   : > { %17132 = vmatmul.mubr.msk.f32.gmra.mrb[48].mxu1 %vm490_vm4, %v24117_v42  ;;  %v11260_v42 = vld [vmem:[%s23702_s8 + $0x8] sm:$0xff] }
 0x4a6   : > { %17134 = vmatprep.mubr.msk.f32.mxu1 %vm490_vm4, %v24118_v15  ;;  %v21783_v15 = vpack.c.bf16 %v11260_v42, %v11259_v43 }
 0x4a8   : > { %18092 = vmatprep.subr.bf16.mxu1 %v21783_v15 }
 0x4a9   : > { %17135 = vmatmul.mubr.msk.f32.gmra.mrb[50].mxu1 %vm490_vm4, %v24119_v2  ;;  %v21789_v2 = vld [vmem:[%s23698_s4] ss:$0 sm:$0xff] }
 0x4aa   : > { %17137 = vmatprep.mubr.msk.f32.mxu1 %vm490_vm4, %v24120_v28 }
 0x4ad   : > { %17138 = vmatmul.mubr.msk.f32.gmra.mrb[52].mxu1 %vm490_vm4, %v24121_v37 }
 0x4ae   : > { %17140 = vmatprep.mubr.msk.f32.mxu1 %vm490_vm4, %v24122_v50 }
 0x4b1   : > { %17141 = vmatmul.mubr.msk.f32.gmra.mrb[54].mxu1 %vm490_vm4, %v24123_v54 }
 0x4b2   : > { %17143 = vmatprep.mubr.msk.f32.mxu1 %vm490_vm4, %v21514_v27 }
 0x4b5   : > { %17144 = vmatmul.mubr.msk.f32.gmra.mrb[56].mxu1 %vm490_vm4, %v24127_v4 }
 0x4b6   : > { %17146 = vmatprep.mubr.msk.f32.mxu1 %vm490_vm4, %v24128_v58 }
 0x4b9   : > { %17147 = vmatmul.mubr.msk.f32.gmra.mrb[58].mxu1 %vm490_vm4, %v24129_v47 }
 0x4ba   : > { %17149 = vmatprep.mubr.msk.f32.mxu1 %vm490_vm4, %v7270_v5 }
 0x4bd   : > { %17150 = vmatmul.mubr.msk.f32.gmra.mrb[60].mxu1 %vm490_vm4, %v7271_v61 }
 0x4be   : > { %17152 = vmatprep.mubr.msk.f32.mxu1 %vm490_vm4, %v7272_v3 }
 0x4c1   : > { %17153 = vmatmul.mubr.msk.f32.gmra.mrb[62].mxu1 %vm490_vm4, %v7273_v9 }
 0x558   : > { %v17109_v28 = vpop.f32.mrb[32].mxu1 }
 0x559   : > { %v7643_v37 = vadd.f32 %v17109_v28, %v21789_v2  ;;  %v7445_v50 = vpop.f32.mrb[33].mxu1 }
 0x55a   : > { %v7642_v54 = vadd.f32 %v21789_v2, %v7445_v50 }
 0x55b   : > { %v7675_v27 = vmax.f32 %v7643_v37, 0.0 }
 0x55c   : > { %v7674_v56 = vmax.f32 %v7642_v54, 0.0  ;;  %v17112_v45 = vpop.f32.mrb[34].mxu1 }
 0x55d   : > { %v7645_v30 = vadd.f32 %v17112_v45, %v21789_v2  ;;  %v7455_v14 = vpop.f32.mrb[35].mxu1  ;;  %7709 = vst.msk [vmem:[#allocation3 + $0x3a] sm:$0xff] %vm7707_vm7, %v7675_v27 }
 0x55e   : > { %v7644_v38 = vadd.f32 %v21789_v2, %v7455_v14  ;;  %7708 = vst.msk [vmem:[#allocation3 + $0x32] sm:$0xff] %vm7707_vm7, %v7674_v56  ;;  %11295 = vrot.lane.b32.xlu0 %v7674_v56, %s19258_s14 }
 0x55f   : > { %v7677_v63 = vmax.f32 %v7645_v30, 0.0 }
 0x560   : > { %v7676_v10 = vmax.f32 %v7644_v38, 0.0  ;;  %v17115_v21 = vpop.f32.mrb[36].mxu1 }
 0x561   : > { %7711 = vst.msk [vmem:[#allocation3 + $0x52] sm:$0xff] %vm7707_vm7, %v7677_v63  ;;  %v7647_v16 = vadd.f32 %v17115_v21, %v21789_v2  ;;  %v7465_v17 = vpop.f32.mrb[37].mxu1 }
 0x562   : > { %7710 = vst.msk [vmem:[#allocation3 + $0x4a] sm:$0xff] %vm7707_vm7, %v7676_v10  ;;  %v7646_v53 = vadd.f32 %v21789_v2, %v7465_v17  ;;  %11297 = vrot.lane.b32.xlu0 %v7675_v27, %s19258_s14  ;;  %11299 = vrot.lane.b32.xlu1 %v7676_v10, %s19258_s14 }
 0x563   : > { %v7679_v44 = vmax.f32 %v7647_v16, 0.0 }
 0x564   : > { %v7678_v52 = vmax.f32 %v7646_v53, 0.0  ;;  %v17118_v57 = vpop.f32.mrb[38].mxu1  ;;  %v7781_v62 = vld [vmem:[#allocation3 + $0x3a] sm:$0xff] }
 0x565   : > { %7713 = vst.msk [vmem:[#allocation3 + $0x6a] sm:$0xff] %vm7707_vm7, %v7679_v44  ;;  %v7649_v60 = vadd.f32 %v17118_v57, %v21789_v2  ;;  %v7475_v0 = vpop.f32.mrb[39].mxu1  ;;  %v7780_v1 = vld [vmem:[#allocation3 + $0x32] sm:$0xff] }
 0x566   : > { %7712 = vst.msk [vmem:[#allocation3 + $0x62] sm:$0xff] %vm7707_vm7, %v7678_v52  ;;  %v7648_v32 = vadd.f32 %v21789_v2, %v7475_v0  ;;  %17169 = vmatprep.mubr.msk.f32.mxu0 %vm7707_vm7, %v7780_v1  ;;  %11301 = vrot.lane.b32.xlu1 %v7677_v63, %s19258_s14 }
 0x567   : > { %v7681_v12 = vmax.f32 %v7649_v60, 0.0  ;;  %11303 = vrot.lane.b32.xlu0 %v7678_v52, %s19258_s14  ;;  %17170 = vmatmul.mubr.msk.f32.gmra.mrb[36].mxu0 %vm7707_vm7, %v7781_v62 }
 0x568   : > { %v7680_v25 = vmax.f32 %v7648_v32, 0.0  ;;  %v17121_v11 = vpop.f32.mrb[40].mxu1  ;;  %v7783_v33 = vld [vmem:[#allocation3 + $0x52] sm:$0xff] }
 0x569   : > { %7715 = vst.msk [vmem:[#allocation3 + $0x82] sm:$0xff] %vm7707_vm7, %v7681_v12  ;;  %v7651_v55 = vadd.f32 %v17121_v11, %v21789_v2  ;;  %v7485_v18 = vpop.f32.mrb[41].mxu1  ;;  %v7782_v26 = vld [vmem:[#allocation3 + $0x4a] sm:$0xff] }
 0x56a   : > { %7714 = vst.msk [vmem:[#allocation3 + $0x7a] sm:$0xff] %vm7707_vm7, %v7680_v25  ;;  %v7650_v41 = vadd.f32 %v21789_v2, %v7485_v18  ;;  %17172 = vmatprep.mubr.msk.f32.mxu0 %vm7707_vm7, %v7782_v26  ;;  %11305 = vrot.lane.b32.xlu1 %v7679_v44, %s19258_s14 }
 0x56b   : > { %v7683_v46 = vmax.f32 %v7651_v55, 0.0  ;;  %11307 = vrot.lane.b32.xlu0 %v7680_v25, %s19258_s14  ;;  %17173 = vmatmul.mubr.msk.f32.gmra.mrb[38].mxu0 %vm7707_vm7, %v7783_v33 }
 0x56c   : > { %v7682_v19 = vmax.f32 %v7650_v41, 0.0  ;;  %v17124_v49 = vpop.f32.mrb[42].mxu1  ;;  %v7785_v59 = vld [vmem:[#allocation3 + $0x6a] sm:$0xff] }
 0x56d   : > { %7717 = vst.msk [vmem:[#allocation3 + $0x9a] sm:$0xff] %vm7707_vm7, %v7683_v46  ;;  %v7653_v24 = vadd.f32 %v17124_v49, %v21789_v2  ;;  %v7495_v51 = vpop.f32.mrb[43].mxu1  ;;  %v7784_v13 = vld [vmem:[#allocation3 + $0x62] sm:$0xff] }
 0x56e   : > { %7716 = vst.msk [vmem:[#allocation3 + $0x92] sm:$0xff] %vm7707_vm7, %v7682_v19  ;;  %v7652_v20 = vadd.f32 %v21789_v2, %v7495_v51  ;;  %17175 = vmatprep.mubr.msk.f32.mxu0 %vm7707_vm7, %v7784_v13  ;;  %11309 = vrot.lane.b32.xlu1 %v7681_v12, %s19258_s14 }
 0x56f   : > { %v7685_v4 = vmax.f32 %v7653_v24, 0.0  ;;  %11311 = vrot.lane.b32.xlu0 %v7682_v19, %s19258_s14  ;;  %17176 = vmatmul.mubr.msk.f32.gmra.mrb[40].mxu0 %vm7707_vm7, %v7785_v59 }
 0x570   : > { %v7684_v58 = vmax.f32 %v7652_v20, 0.0  ;;  %v17127_v5 = vpop.f32.mrb[44].mxu1  ;;  %v7787_v23 = vld [vmem:[#allocation3 + $0x82] sm:$0xff] }
 0x571   : > { %7719 = vst.msk [vmem:[#allocation3 + $0xb2] sm:$0xff] %vm7707_vm7, %v7685_v4  ;;  %v7655_v47 = vadd.f32 %v17127_v5, %v21789_v2  ;;  %v7505_v61 = vpop.f32.mrb[45].mxu1  ;;  %v7786_v3 = vld [vmem:[#allocation3 + $0x7a] sm:$0xff] }
 0x572   : > { %7718 = vst.msk [vmem:[#allocation3 + $0xaa] sm:$0xff] %vm7707_vm7, %v7684_v58  ;;  %v7654_v9 = vadd.f32 %v21789_v2, %v7505_v61  ;;  %17178 = vmatprep.mubr.msk.f32.mxu0 %vm7707_vm7, %v7786_v3  ;;  %11313 = vrot.lane.b32.xlu1 %v7683_v46, %s19258_s14 }
 0x573   : > { %v7687_v39 = vmax.f32 %v7655_v47, 0.0  ;;  %11315 = vrot.lane.b32.xlu0 %v7684_v58, %s19258_s14  ;;  %17179 = vmatmul.mubr.msk.f32.gmra.mrb[42].mxu0 %vm7707_vm7, %v7787_v23  ;;  %v7740_v58 = vld [vmem:[#allocation3] sm:$0xff]  ;;  %v7741_v23 = vld [vmem:[#allocation3 + $0x8] sm:$0xff] }
 0x574   : > { %v7686_v7 = vmax.f32 %v7654_v9, 0.0  ;;  %v17130_v36 = vpop.f32.mrb[46].mxu1  ;;  %v7789_v29 = vld [vmem:[#allocation3 + $0x9a] sm:$0xff] }
 0x575   : > { %7721 = vst.msk [vmem:[#allocation3 + $0xca] sm:$0xff] %vm7707_vm7, %v7687_v39  ;;  %v7657_v48 = vadd.f32 %v17130_v36, %v21789_v2  ;;  %v7515_v35 = vpop.f32.mrb[47].mxu1  ;;  %v7788_v8 = vld [vmem:[#allocation3 + $0x92] sm:$0xff] }
 0x576   : > { %7720 = vst.msk [vmem:[#allocation3 + $0xc2] sm:$0xff] %vm7707_vm7, %v7686_v7  ;;  %v7656_v40 = vadd.f32 %v21789_v2, %v7515_v35  ;;  %17181 = vmatprep.mubr.msk.f32.mxu0 %vm7707_vm7, %v7788_v8  ;;  %11317 = vrot.lane.b32.xlu1 %v7685_v4, %s19258_s14  ;;  %v14554_v35 = vld [vmem:[%s23699_s5 + $0x58] sm:$0xff] }
 0x577   : > { %v7689_v22 = vmax.f32 %v7657_v48, 0.0  ;;  %11319 = vrot.lane.b32.xlu0 %v7686_v7, %s19258_s14  ;;  %17182 = vmatmul.mubr.msk.f32.gmra.mrb[44].mxu0 %vm7707_vm7, %v7789_v29  ;;  %v14553_v48 = vld [vmem:[%s23699_s5 + $0x50] sm:$0xff]  ;;  %v7742_v29 = vld [vmem:[#allocation3 + $0x18] sm:$0xff] }
 0x578   : > { %v7688_v34 = vmax.f32 %v7656_v40, 0.0  ;;  %v17133_v31 = vpop.f32.mrb[48].mxu1  ;;  %v7791_v50 = vld [vmem:[#allocation3 + $0xb2] sm:$0xff] }
 0x579   : > { %7723 = vst.msk [vmem:[#allocation3 + $0xe2] sm:$0xff] %vm7707_vm7, %v7689_v22  ;;  %v7659_v43 = vadd.f32 %v17133_v31, %v21789_v2  ;;  %v7525_v42 = vpop.f32.mrb[49].mxu1  ;;  %v7790_v28 = vld [vmem:[#allocation3 + $0xaa] sm:$0xff] }
 0x57a   : > { %7722 = vst.msk [vmem:[#allocation3 + $0xda] sm:$0xff] %vm7707_vm7, %v7688_v34  ;;  %v7658_v37 = vadd.f32 %v21789_v2, %v7525_v42  ;;  %17184 = vmatprep.mubr.msk.f32.mxu0 %vm7707_vm7, %v7790_v28  ;;  %11321 = vrot.lane.b32.xlu1 %v7687_v39, %s19258_s14  ;;  %v18039_v42 = vpack.c.bf16 %v14554_v35, %v14553_v48  ;;  %v24150_v35 = vld [vmem:[#allocation48_spill] sm:$0xff] }
 0x57b   : > { %v7691_v54 = vmax.f32 %v7659_v43, 0.0  ;;  %11323 = vrot.lane.b32.xlu0 %v7688_v34, %s19258_s14  ;;  %17185 = vmatmul.mubr.msk.f32.gmra.mrb[46].mxu0 %vm7707_vm7, %v7791_v50  ;;  %v7743_v43 = vld [vmem:[#allocation3 + $0x20] sm:$0xff] }
 0x57c   : > { %v7690_v27 = vmax.f32 %v7658_v37, 0.0  ;;  %v17136_v56 = vpop.f32.mrb[50].mxu1  ;;  %v7793_v63 = vld [vmem:[#allocation3 + $0xca] sm:$0xff] }
 0x57d   : > { %7725 = vst.msk [vmem:[#allocation3 + $0xfa] sm:$0xff] %vm7707_vm7, %v7691_v54  ;;  %v7661_v45 = vadd.f32 %v17136_v56, %v21789_v2  ;;  %v7535_v30 = vpop.f32.mrb[51].mxu1  ;;  %v7792_v14 = vld [vmem:[#allocation3 + $0xc2] sm:$0xff] }
 0x57e   : > { %7724 = vst.msk [vmem:[#allocation3 + $0xf2] sm:$0xff] %vm7707_vm7, %v7690_v27  ;;  %v7660_v38 = vadd.f32 %v21789_v2, %v7535_v30  ;;  %17187 = vmatprep.mubr.msk.f32.mxu0 %vm7707_vm7, %v7792_v14  ;;  %11325 = vrot.lane.b32.xlu1 %v7689_v22, %s19258_s14  ;;  %v14587_v56 = vld [vmem:[%s23699_s5 + $0x60] sm:$0xff]  ;;  %v21953_v14 = vld [vmem:[#allocation3 + $0x30] sm:$0xff] }
 0x57f   : > { %v7693_v10 = vmax.f32 %v7661_v45, 0.0  ;;  %11327 = vrot.lane.b32.xlu0 %v7690_v27, %s19258_s14  ;;  %17188 = vmatmul.mubr.msk.f32.gmra.mrb[48].mxu0 %vm7707_vm7, %v7793_v63  ;;  %v11262_v27 = vld [vmem:[%s23702_s8 + $0x18] sm:$0xff]  ;;  %v14588_v45 = vld [vmem:[%s23699_s5 + $0x68] sm:$0xff]  ;;  %v11255_v63 = vld [vmem:[%s23701_s7] sm:$0xff] }
 0x580   : > { %v7692_v21 = vmax.f32 %v7660_v38, 0.0  ;;  %v17139_v16 = vpop.f32.mrb[52].mxu1  ;;  %v7795_v57 = vld [vmem:[#allocation3 + $0xe2] sm:$0xff] }
 0x581   : > { %7727 = vst.msk [vmem:[#allocation3 + $0x112] sm:$0xff] %vm7707_vm7, %v7693_v10  ;;  %v7663_v17 = vadd.f32 %v17139_v16, %v21789_v2  ;;  %v7545_v53 = vpop.f32.mrb[53].mxu1  ;;  %v7794_v44 = vld [vmem:[#allocation3 + $0xda] sm:$0xff]  ;;  %v21966_v16 = vpack.c.bf16 %v14588_v45, %v14587_v56 }
 0x582   : > { %7726 = vst.msk [vmem:[#allocation3 + $0x10a] sm:$0xff] %vm7707_vm7, %v7692_v21  ;;  %v7662_v52 = vadd.f32 %v21789_v2, %v7545_v53  ;;  %17190 = vmatprep.mubr.msk.f32.mxu0 %vm7707_vm7, %v7794_v44  ;;  %11329 = vrot.lane.b32.xlu1 %v7691_v54, %s19258_s14  ;;  %v11261_v54 = vld [vmem:[%s23702_s8 + $0x10] sm:$0xff]  ;;  %v21977_v53 = vld [vmem:[#allocation3 + $0x38] sm:$0xff] }
 0x583   : > { %v7695_v60 = vmax.f32 %v7663_v17, 0.0  ;;  %11331 = vrot.lane.b32.xlu0 %v7692_v21, %s19258_s14  ;;  %17191 = vmatmul.mubr.msk.f32.gmra.mrb[50].mxu0 %vm7707_vm7, %v7795_v57  ;;  %v18095_v38 = vpack.c.bf16 %v11262_v27, %v11261_v54  ;;  %v24130_v57 = vld [vmem:[#allocation38_spill] sm:$0xff]  ;;  %v24156_v54 = vld [vmem:[#allocation49_spill] sm:$0xff] }
 0x584   : > { %v7694_v0 = vmax.f32 %v7662_v52, 0.0  ;;  %v17142_v1 = vpop.f32.mrb[54].mxu1  ;;  %v7797_v11 = vld [vmem:[#allocation3 + $0xfa] sm:$0xff]  ;;  %v21983_v52 = vld [vmem:[#allocation3 + $0x48] sm:$0xff]  ;;  %v24157_v27 = vmax.f32 %v24156_v54, 0.0 }
 0x585   : > { %7729 = vst.msk [vmem:[#allocation3 + $0x12a] sm:$0xff] %vm7707_vm7, %v7695_v60  ;;  %v7665_v32 = vadd.f32 %v17142_v1, %v21789_v2  ;;  %v7555_v62 = vpop.f32.mrb[55].mxu1  ;;  %v7796_v12 = vld [vmem:[#allocation3 + $0xf2] sm:$0xff]  ;;  %v21997_v1 = vld [vmem:[#allocation3 + $0x60] sm:$0xff] }
 0x586   : > { %7728 = vst.msk [vmem:[#allocation3 + $0x122] sm:$0xff] %vm7707_vm7, %v7694_v0  ;;  %v7664_v25 = vadd.f32 %v21789_v2, %v7555_v62  ;;  %17193 = vmatprep.mubr.msk.f32.mxu0 %vm7707_vm7, %v7796_v12  ;;  %11333 = vrot.lane.b32.xlu1 %v7693_v10, %s19258_s14  ;;  %v11256_v10 = vld [vmem:[%s23701_s7 + $0x8] sm:$0xff]  ;;  %v24134_v12 = vld [vmem:[#allocation40_spill] sm:$0xff] }
 0x587   : > { %v7697_v55 = vmax.f32 %v7665_v32, 0.0  ;;  %11335 = vrot.lane.b32.xlu0 %v7694_v0, %s19258_s14  ;;  %17194 = vmatmul.mubr.msk.f32.gmra.mrb[52].mxu0 %vm7707_vm7, %v7797_v11  ;;  %v21979_v44 = vpack.c.bf16 %v11256_v10, %v11255_v63  ;;  %v21992_v0 = vld [vmem:[#allocation3 + $0x50] sm:$0xff]  ;;  %v24132_v32 = vld [vmem:[#allocation37_spill] sm:$0xff]  ;;  %v22091_v45 = vld [vmem:[#allocation3 + $0xf8] sm:$0xff] }
 0x588   : > { %v7696_v18 = vmax.f32 %v7664_v25, 0.0  ;;  %v17145_v26 = vpop.f32.mrb[56].mxu1  ;;  %v21882_v49 = vld [vmem:[#allocation3 + $0x112] sm:$0xff]  ;;  %v24133_v62 = vmax.f32 %v24132_v32, 0.0  ;;  %v24135_v25 = vmax.f32 %v24134_v12, 0.0  ;;  %v22007_v11 = vld [vmem:[#allocation3 + $0x68] sm:$0xff] }
 0x589   : > { %7731 = vst.msk [vmem:[#allocation3 + $0x142] sm:$0xff] %vm7707_vm7, %v7697_v55  ;;  %v7667_v41 = vadd.f32 %v17145_v26, %v21789_v2  ;;  %v7565_v33 = vpop.f32.mrb[57].mxu1  ;;  %v7798_v46 = vld [vmem:[#allocation3 + $0x10a] sm:$0xff]  ;;  %v24164_v32 = vld [vmem:[#allocation53_spill] sm:$0xff]  ;;  %v24166_v12 = vld [vmem:[#allocation56_spill] sm:$0xff] }
 0x58a   : > { %7730 = vst.msk [vmem:[#allocation3 + $0x13a] sm:$0xff] %vm7707_vm7, %v7696_v18  ;;  %v7666_v19 = vadd.f32 %v21789_v2, %v7565_v33  ;;  %17196 = vmatprep.mubr.msk.f32.mxu0 %vm7707_vm7, %v7798_v46  ;;  %11337 = vrot.lane.b32.xlu1 %v7695_v60, %s19258_s14  ;;  %v24131_v60 = vmax.f32 %v24130_v57, 0.0  ;;  %v22021_v46 = vld [vmem:[#allocation3 + $0x80] sm:$0xff]  ;;  %v24162_v63 = vld [vmem:[#allocation54_spill] sm:$0xff] }
 0x58b   : > { %v7699_v24 = vmax.f32 %v7667_v41, 0.0  ;;  %11339 = vrot.lane.b32.xlu0 %v7696_v18, %s19258_s14  ;;  %17197 = vmatmul.mubr.msk.f32.gmra.mrb[54].mxu0 %vm7707_vm7, %v21882_v49  ;;  %v24136_v18 = vld [vmem:[#allocation39_spill] sm:$0xff]  ;;  %v24138_v41 = vld [vmem:[#allocation42_spill] sm:$0xff]  ;;  %v24163_v10 = vmax.f32 %v24162_v63, 0.0  ;;  %v24182_v63 = vld [vmem:[#allocation64_spill] sm:$0xff] }
 0x58c   : > { %v7698_v51 = vmax.f32 %v7666_v19, 0.0  ;;  %v17148_v13 = vpop.f32.mrb[58].mxu1  ;;  %v21896_v47 = vld [vmem:[#allocation3 + $0x12a] sm:$0xff]  ;;  %v24137_v26 = vmax.f32 %v24136_v18, 0.0  ;;  %v24139_v33 = vmax.f32 %v24138_v41, 0.0 }
 0x58d   : > { %7733 = vst.msk [vmem:[#allocation3 + $0x15a] sm:$0xff] %vm7707_vm7, %v7699_v24  ;;  %v7669_v20 = vadd.f32 %v17148_v13, %v21789_v2  ;;  %v7575_v59 = vpop.f32.mrb[59].mxu1  ;;  %v21889_v4 = vld [vmem:[#allocation3 + $0x122] sm:$0xff]  ;;  %v22025_v19 = vld [vmem:[#allocation3 + $0x90] sm:$0xff]  ;;  %v24142_v13 = vld [vmem:[#allocation44_spill] sm:$0xff] }
 0x58e   : > { %7732 = vst.msk [vmem:[#allocation3 + $0x152] sm:$0xff] %vm7707_vm7, %v7698_v51  ;;  %v7668_v5 = vadd.f32 %v21789_v2, %v7575_v59  ;;  %17199 = vmatprep.mubr.msk.f32.mxu0 %vm7707_vm7, %v21889_v4  ;;  %11341 = vrot.lane.b32.xlu1 %v7697_v55, %s19258_s14  ;;  %v22011_v55 = vld [vmem:[#allocation3 + $0x78] sm:$0xff]  ;;  %v22105_v57 = vld [vmem:[#allocation3 + $0x110] sm:$0xff]  ;;  %v22119_v18 = vld [vmem:[#allocation3 + $0x128] sm:$0xff] }
 0x58f   : > { %v7701_v61 = vmax.f32 %v7669_v20, 0.0  ;;  %11343 = vrot.lane.b32.xlu0 %v7698_v51, %s19258_s14  ;;  %17200 = vmatmul.mubr.msk.f32.gmra.mrb[56].mxu0 %vm7707_vm7, %v21896_v47  ;;  %v24143_v20 = vmax.f32 %v24142_v13, 0.0  ;;  %v22035_v59 = vld [vmem:[#allocation3 + $0x98] sm:$0xff] }
 0x590   : > { %v7700_v3 = vmax.f32 %v7668_v5, 0.0  ;;  %v17151_v9 = vpop.f32.mrb[60].mxu1  ;;  %17219 = vmatprep.mubr.msk.f32.mxu0 %vm7707_vm7, %v7740_v58  ;;  %v21917_v40 = vld [vmem:[#allocation3 + $0x142] sm:$0xff]  ;;  %v24144_v5 = vld [vmem:[#allocation43_spill] sm:$0xff] }
 0x591   : > { %7735 = vst.msk [vmem:[#allocation3 + $0x172] sm:$0xff] %vm7707_vm7, %v7701_v61  ;;  %v7671_v39 = vadd.f32 %v17151_v9, %v21789_v2  ;;  %v7585_v7 = vpop.f32.mrb[61].mxu1  ;;  %v21904_v36 = vld [vmem:[#allocation3 + $0x13a] sm:$0xff]  ;;  %v22039_v58 = vld [vmem:[#allocation3 + $0xa8] sm:$0xff]  ;;  %v24168_v41 = vld [vmem:[#allocation55_spill] sm:$0xff] }
 0x592   : > { %7734 = vst.msk [vmem:[#allocation3 + $0x16a] sm:$0xff] %vm7707_vm7, %v7700_v3  ;;  %v7670_v8 = vadd.f32 %v21789_v2, %v7585_v7  ;;  %17202 = vmatprep.mubr.msk.f32.mxu1 %vm7707_vm7, %v21904_v36  ;;  %11345 = vrot.lane.b32.xlu1 %v7699_v24, %s19258_s14  ;;  %v24140_v24 = vld [vmem:[#allocation41_spill] sm:$0xff] }
 0x593   : > { %v7703_v22 = vmax.f32 %v7671_v39, 0.0  ;;  %11347 = vrot.lane.b32.xlu0 %v7700_v3, %s19258_s14  ;;  %17203 = vmatmul.mubr.msk.f32.vlgmr.msra.gmra.mrb[64].mxu1 %vm7707_vm7, %v21917_v40  ;;  %v24141_v51 = vmax.f32 %v24140_v24, 0.0  ;;  %v24146_v3 = vld [vmem:[#allocation46_spill] sm:$0xff]  ;;  %v22053_v39 = vld [vmem:[#allocation3 + $0xc0] sm:$0xff] }
 0x594   : > { %v7702_v34 = vmax.f32 %v7670_v8, 0.0  ;;  %17220 = vmatmul.mubr.msk.f32.vlgmr.msra.gmra.mrb[32].mxu0 %vm7707_vm7, %v7741_v23  ;;  %v17154_v31 = vpop.f32.mrb[62].mxu1  ;;  %18094 = vmatpush3.bf16.msra.mxu1 %v21783_v15  ;;  %v24147_v9 = vmax.f32 %v24146_v3, 0.0  ;;  %v22049_v23 = vld [vmem:[#allocation3 + $0xb0] sm:$0xff]  ;;  %v24148_v7 = vld [vmem:[#allocation45_spill] sm:$0xff]  ;;  %v24151_v8 = vmax.f32 %v24150_v35, 0.0 }
 0x595   : > { %7737 = vst.msk [vmem:[#allocation3 + $0x18a] sm:$0xff] %vm7707_vm7, %v7703_v22  ;;  %18038 = vmatpush3.bf16.msra.mxu0 %v21774_v6  ;;  %v7673_v28 = vadd.f32 %v17154_v31, %v21789_v2  ;;  %v7595_v37 = vpop.f32.mrb[63].mxu1  ;;  %v21927_v50 = vld [vmem:[#allocation3 + $0x152] sm:$0xff]  ;;  %17222 = vmatprep.mubr.msk.f32.mxu0 %vm7707_vm7, %v7742_v29  ;;  %v21941_v6 = vld [vmem:[#allocation3 + $0x15a] sm:$0xff]  ;;  %v24149_v48 = vmax.f32 %v24148_v7, 0.0  ;;  %v22063_v29 = vld [vmem:[#allocation3 + $0xc8] sm:$0xff] }
 0x596   : > { %7736 = vst.msk [vmem:[#allocation3 + $0x182] sm:$0xff] %vm7707_vm7, %v7702_v34  ;;  %v7672_v15 = vadd.f32 %v21789_v2, %v7595_v37  ;;  %17205 = vmatprep.mubr.msk.f32.mxu1 %vm7707_vm7, %v21927_v50  ;;  %11349 = vrot.lane.b32.xlu1 %v7701_v61, %s19258_s14  ;;  %v24145_v61 = vmax.f32 %v24144_v5, 0.0  ;;  %v22081_v37 = vld [vmem:[#allocation3 + $0xf0] sm:$0xff]  ;;  %v22133_v13 = vld [vmem:[#allocation3 + $0x140] sm:$0xff]  ;;  %v22147_v7 = vld [vmem:[#allocation3 + $0x158] sm:$0xff] }
 0x597   : > { %v7705_v30 = vmax.f32 %v7673_v28, 0.0  ;;  %11351 = vrot.lane.b32.xlu0 %v7702_v34, %s19258_s14  ;;  %17206 = vmatmul.mubr.msk.f32.gmra.mrb[66].mxu1 %vm7707_vm7, %v21941_v6  ;;  %v24152_v34 = vld [vmem:[#allocation47_spill] sm:$0xff]  ;;  %v22077_v28 = vld [vmem:[#allocation3 + $0xe0] sm:$0xff]  ;;  %v24170_v24 = vld [vmem:[#allocation58_spill] sm:$0xff] }
 0x598   : > { %v7704_v2 = vmax.f32 %v7672_v15, 0.0  ;;  %17223 = vmatmul.mubr.msk.f32.gmra.mrb[34].mxu0 %vm7707_vm7, %v7743_v43  ;;  %18040 = vmatprep.subr.bf16.mxu0 %v18039_v42  ;;  %v21972_v17 = vld [vmem:[#allocation3 + $0x172] sm:$0xff]  ;;  %v24153_v31 = vmax.f32 %v24152_v34, 0.0  ;;  %v24154_v43 = vld [vmem:[#allocation50_spill] sm:$0xff]  ;;  %v24172_v5 = vld [vmem:[#allocation57_spill] sm:$0xff] }
 0x599   : > { %7739 = vst.msk [vmem:[#allocation3 + $0x1a2] sm:$0xff] %vm7707_vm7, %v7705_v30  ;;  %17225 = vmatprep.mubr.msk.f32.mxu0 %vm7707_vm7, %v21953_v14  ;;  %v21964_v21 = vld [vmem:[#allocation3 + $0x16a] sm:$0xff]  ;;  %18042 = vmatpush3.bf16.msra.mxu0 %v18039_v42  ;;  %v24155_v42 = vmax.f32 %v24154_v43, 0.0  ;;  %v24158_v15 = vld [vmem:[#allocation52_spill] sm:$0xff] }
 0x59a   : > { %7738 = vst.msk [vmem:[#allocation3 + $0x19a] sm:$0xff] %vm7707_vm7, %v7704_v2  ;;  %17208 = vmatprep.mubr.msk.f32.mxu1 %vm7707_vm7, %v21964_v21  ;;  %11353 = vrot.lane.b32.xlu1 %v7703_v22, %s19258_s14  ;;  %v22067_v22 = vld [vmem:[#allocation3 + $0xd8] sm:$0xff]  ;;  %v24159_v56 = vmax.f32 %v24158_v15, 0.0  ;;  %v8455_v34 = vld [vmem:[#allocation3 + $0x4] sm:$0xff]  ;;  %v14589_v15 = vld [vmem:[%s23699_s5 + $0x70] sm:$0xff] }
 0x59b   : > { %11355 = vrot.lane.b32.xlu0 %v7704_v2, %s19258_s14  ;;  %17209 = vmatmul.mubr.msk.f32.gmra.mrb[68].mxu1 %vm7707_vm7, %v21972_v17  ;;  %v24160_v2 = vld [vmem:[#allocation51_spill] sm:$0xff]  ;;  %v24174_v3 = vld [vmem:[#allocation60_spill] sm:$0xff] }
 0x59c   : > { %17226 = vmatmul.mubr.msk.f32.gmra.mrb[36].mxu0 %vm7707_vm7, %v21977_v53  ;;  %18096 = vmatprep.subr.bf16.mxu1 %v18095_v38  ;;  %v24176_v35 = vld [vmem:[#allocation59_spill] sm:$0xff] }
 0x59d   : > { %17228 = vmatprep.mubr.msk.f32.mxu0 %vm7707_vm7, %v21983_v52  ;;  %18044 = vmatprep.subr.bf16.mxu0 %v21966_v16 }
 0x59e   : > { %11357 = vrot.lane.b32.xlu1 %v7705_v30, %s19258_s14  ;;  %18098 = vmatpush3.bf16.msra.mxu1 %v18095_v38  ;;  %v22095_v30 = vld [vmem:[#allocation3 + $0x108] sm:$0xff]  ;;  %v24161_v38 = vmax.f32 %v24160_v2, 0.0 }
 0x59f   : > { %11680 = vrot.lane.b32.xlu0 %v24131_v60, %s19259_s16  ;;  %18100 = vmatprep.subr.bf16.mxu1 %v21979_v44  ;;  %v22109_v60 = vld [vmem:[#allocation3 + $0x120] sm:$0xff] }
 0x5a0   : > { %17229 = vmatmul.mubr.msk.f32.gmra.mrb[38].mxu0 %vm7707_vm7, %v21992_v0  ;;  %v24180_v2 = vld [vmem:[#allocation61_spill] sm:$0xff] }
 0x5a1   : > { %17231 = vmatprep.mubr.msk.f32.mxu0 %vm7707_vm7, %v21997_v1 }
 0x5a2   : > { %11682 = vrot.lane.b32.xlu1 %v24133_v62, %s19259_s16  ;;  %v24165_v62 = vmax.f32 %v24164_v32, 0.0  ;;  %v8457_v32 = vld [vmem:[#allocation3 + $0x1c] sm:$0xff] }
 0x5a3   : > { %11684 = vrot.lane.b32.xlu0 %v24135_v25, %s19259_s16  ;;  %v24167_v25 = vmax.f32 %v24166_v12, 0.0 }
 0x5a4   : > { %17232 = vmatmul.mubr.msk.f32.gmra.mrb[40].mxu0 %vm7707_vm7, %v22007_v11 }
 0x5a5   : > { %17234 = vmatprep.mubr.msk.f32.mxu0 %vm7707_vm7, %v22011_v55 }
 0x5a6   : > { %11686 = vrot.lane.b32.xlu1 %v24137_v26, %s19259_s16  ;;  %v22123_v26 = vld [vmem:[#allocation3 + $0x138] sm:$0xff] }
 0x5a7   : > { %11688 = vrot.lane.b32.xlu0 %v24139_v33, %s19259_s16  ;;  %v24169_v33 = vmax.f32 %v24168_v41, 0.0  ;;  %v8458_v41 = vld [vmem:[#allocation3 + $0x24] sm:$0xff] }
 0x5a8   : > { %17235 = vmatmul.mubr.msk.f32.gmra.mrb[42].mxu0 %vm7707_vm7, %v22021_v46 }
 0x5a9   : > { %17237 = vmatprep.mubr.msk.f32.mxu0 %vm7707_vm7, %v22025_v19 }
 0x5aa   : > { %11690 = vrot.lane.b32.xlu1 %v24141_v51, %s19259_s16  ;;  %v24171_v51 = vmax.f32 %v24170_v24, 0.0 }
 0x5ab   : > { %11692 = vrot.lane.b32.xlu0 %v24143_v20, %s19259_s16  ;;  %v22137_v20 = vld [vmem:[#allocation3 + $0x150] sm:$0xff] }
 0x5ac   : > { %17238 = vmatmul.mubr.msk.f32.gmra.mrb[44].mxu0 %vm7707_vm7, %v22035_v59 }
 0x5ad   : > { %17240 = vmatprep.mubr.msk.f32.mxu0 %vm7707_vm7, %v22039_v58 }
 0x5ae   : > { %11694 = vrot.lane.b32.xlu1 %v24145_v61, %s19259_s16  ;;  %v24173_v61 = vmax.f32 %v24172_v5, 0.0 }
 0x5af   : > { %11696 = vrot.lane.b32.xlu0 %v24147_v9, %s19259_s16  ;;  %v24175_v9 = vmax.f32 %v24174_v3, 0.0 }
 0x5b0   : > { %17241 = vmatmul.mubr.msk.f32.gmra.mrb[46].mxu0 %vm7707_vm7, %v22049_v23 }
 0x5b1   : > { %17243 = vmatprep.mubr.msk.f32.mxu0 %vm7707_vm7, %v22053_v39 }
 0x5b2   : > { %11698 = vrot.lane.b32.xlu1 %v24149_v48, %s19259_s16  ;;  %v22151_v48 = vld [vmem:[#allocation3 + $0x168] sm:$0xff] }
 0x5b3   : > { %11700 = vrot.lane.b32.xlu0 %v24151_v8, %s19259_s16  ;;  %v24177_v8 = vmax.f32 %v24176_v35, 0.0  ;;  %v14623_v35 = vld [vmem:[%s23699_s5 + $0x80] sm:$0xff] }
 0x5b4   : > { %17244 = vmatmul.mubr.msk.f32.gmra.mrb[48].mxu0 %vm7707_vm7, %v22063_v29 }
 0x5b5   : > { %17246 = vmatprep.mubr.msk.f32.mxu0 %vm7707_vm7, %v22067_v22 }
 0x5b6   : > { %11702 = vrot.lane.b32.xlu1 %v24153_v31, %s19259_s16  ;;  %v24178_v31 = vld [vmem:[#allocation62_spill] sm:$0xff] }
 0x5b7   : > { %11704 = vrot.lane.b32.xlu0 %v24155_v42, %s19259_s16  ;;  %v24179_v43 = vmax.f32 %v24178_v31, 0.0  ;;  %v22161_v42 = vld [vmem:[#allocation3 + $0x170] sm:$0xff] }
 0x5b8   : > { %17247 = vmatmul.mubr.msk.f32.gmra.mrb[50].mxu0 %vm7707_vm7, %v22077_v28 }
 0x5b9   : > { %17249 = vmatprep.mubr.msk.f32.mxu0 %vm7707_vm7, %v22081_v37 }
 0x5ba   : > { %11706 = vrot.lane.b32.xlu1 %v24157_v27, %s19259_s16  ;;  %v8456_v27 = vld [vmem:[#allocation3 + $0xc] sm:$0xff] }
 0x5bb   : > { %11708 = vrot.lane.b32.xlu0 %v24159_v56, %s19259_s16  ;;  %v14590_v56 = vld [vmem:[%s23699_s5 + $0x78] sm:$0xff] }
 0x5bc   : > { %17250 = vmatmul.mubr.msk.f32.gmra.mrb[52].mxu0 %vm7707_vm7, %v22091_v45 }
 0x5bd   : > { %17252 = vmatprep.mubr.msk.f32.mxu0 %vm7707_vm7, %v22095_v30 }
 0x5be   : > { %11710 = vrot.lane.b32.xlu1 %v24161_v38, %s19259_s16  ;;  %v24181_v38 = vmax.f32 %v24180_v2, 0.0 }
 0x5bf   : > { %11712 = vrot.lane.b32.xlu0 %v24163_v10, %s19259_s16  ;;  %v24183_v10 = vmax.f32 %v24182_v63, 0.0  ;;  %v22221_v63 = vld [vmem:[#allocation3 + $0x4c] sm:$0xff] }
 0x5c0   : > { %17253 = vmatmul.mubr.msk.f32.gmra.mrb[54].mxu0 %vm7707_vm7, %v22105_v57 }
 0x5c1   : > { %17255 = vmatprep.mubr.msk.f32.mxu0 %vm7707_vm7, %v22109_v60 }
 0x5c2   : > { %11714 = vrot.lane.b32.xlu1 %v24165_v62, %s19259_s16 }
 0x5c3   : > { %11716 = vrot.lane.b32.xlu0 %v24167_v25, %s19259_s16  ;;  %v18047_v25 = vpack.c.bf16 %v14590_v56, %v14589_v15  ;;  %v22215_v56 = vld [vmem:[#allocation3 + $0x3c] sm:$0xff] }
 0x5c4   : > { %17256 = vmatmul.mubr.msk.f32.gmra.mrb[56].mxu0 %vm7707_vm7, %v22119_v18 }
 0x5c5   : > { %17258 = vmatprep.mubr.msk.f32.mxu0 %vm7707_vm7, %v22123_v26 }
 0x5c6   : > { %11718 = vrot.lane.b32.xlu1 %v24169_v33, %s19259_s16  ;;  %v24184_v33 = vld [vmem:[#allocation63_spill] sm:$0xff] }
 0x5c7   : > { %11720 = vrot.lane.b32.xlu0 %v24171_v51, %s19259_s16  ;;  %v24185_v24 = vmax.f32 %v24184_v33, 0.0  ;;  %v24186_v51 = vld [vmem:[#allocation66_spill] sm:$0xff] }
 0x5c8   : > { %17259 = vmatmul.mubr.msk.f32.gmra.mrb[58].mxu0 %vm7707_vm7, %v22133_v13  ;;  %v24187_v5 = vmax.f32 %v24186_v51, 0.0  ;;  %v22242_v33 = vld [vmem:[#allocation3 + $0x6c] sm:$0xff]  ;;  %v22246_v51 = vld [vmem:[#allocation3 + $0x7c] sm:$0xff] }
 0x5c9   : > { %17261 = vmatprep.mubr.msk.f32.mxu0 %vm7707_vm7, %v22137_v20 }
 0x5ca   : > { %11722 = vrot.lane.b32.xlu1 %v24173_v61, %s19259_s16  ;;  %v11257_v61 = vld [vmem:[%s23701_s7 + $0x10] sm:$0xff] }
 0x5cb   : > { %11724 = vrot.lane.b32.xlu0 %v24175_v9, %s19259_s16  ;;  %v22197_v9 = vld [vmem:[#allocation3 + $0x34] sm:$0xff] }
 0x5cc   : > { %17262 = vmatmul.mubr.msk.f32.gmra.mrb[60].mxu0 %vm7707_vm7, %v22147_v7 }
 0x5cd   : > { %17264 = vmatprep.mubr.msk.f32.mxu0 %vm7707_vm7, %v22151_v48 }
 0x5ce   : > { %11726 = vrot.lane.b32.xlu1 %v24177_v8, %s19259_s16  ;;  %v14624_v8 = vld [vmem:[%s23699_s5 + $0x88] sm:$0xff] }
 0x5cf   : > { %11728 = vrot.lane.b32.xlu0 %v24179_v43, %s19259_s16  ;;  %v24188_v43 = vld [vmem:[#allocation65_spill] sm:$0xff]  ;;  %v22217_v2 = vpack.c.bf16 %v14624_v8, %v14623_v35 }
 0x5d0   : > { %17265 = vmatmul.mubr.msk.f32.gmra.mrb[62].mxu0 %vm7707_vm7, %v22161_v42  ;;  %v11296_v54 = vpop.permute.xlu0 %11295  ;;  %v22262_v8 = vld [vmem:[#allocation3 + $0x9c] sm:$0xff] }
 0x5d1   : > { %17667 = vmatprep.mubr.msk.f32.mxu1 %vm7707_vm7, %v11296_v54  ;;  %17275 = vmatprep.mubr.msk.f32.mxu0 %vm7707_vm7, %v8455_v34  ;;  %v24189_v54 = vmax.f32 %v24188_v43, 0.0 }
 0x5d2   : > { %11730 = vrot.lane.b32.xlu1 %v24181_v38, %s19259_s16 }
 0x5d3   : > { %11732 = vrot.lane.b32.xlu0 %v24183_v10, %s19259_s16 }
 0x5d4   : > { %17276 = vmatmul.mubr.msk.f32.vlgmr.msra.gmra.mrb[32].mxu0 %vm7707_vm7, %v8456_v27  ;;  %v11298_v62 = vpop.permute.xlu0 %11297  ;;  %v11300_v12 = vpop.permute.xlu1 %11299  ;;  %v24190_v27 = vld [vmem:[#allocation68_spill] sm:$0xff] }
 0x5d5   : > { %18046 = vmatpush3.bf16.msra.mxu0 %v21966_v16  ;;  %17668 = vmatmul.mubr.msk.f32.vlgmr.msra.gmra.mrb[70].mxu1 %vm7707_vm7, %v11298_v62  ;;  %v11258_v16 = vld [vmem:[%s23701_s7 + $0x18] sm:$0xff]  ;;  %v24191_v15 = vmax.f32 %v24190_v27, 0.0 }
 0x5d6   : > { %17278 = vmatprep.mubr.msk.f32.mxu0 %vm7707_vm7, %v8457_v32  ;;  %17670 = vmatprep.mubr.msk.f32.mxu1 %vm7707_vm7, %v11300_v12  ;;  %v18103_v31 = vpack.c.bf16 %v11258_v16, %v11257_v61  ;;  %v24192_v32 = vld [vmem:[#allocation67_spill] sm:$0xff]  ;;  %v22252_v61 = vld [vmem:[#allocation3 + $0x84] sm:$0xff] }
 0x5d7   : > { %11734 = vrot.lane.b32.xlu1 %v24185_v24, %s19259_s16  ;;  %11736 = vrot.lane.b32.xlu0 %v24187_v5, %s19259_s16  ;;  %v24193_v62 = vmax.f32 %v24192_v32, 0.0  ;;  %v22231_v12 = vld [vmem:[#allocation3 + $0x54] sm:$0xff] }
 0x5d8   : > { %17279 = vmatmul.mubr.msk.f32.gmra.mrb[34].mxu0 %vm7707_vm7, %v8458_v41  ;;  %v11302_v3 = vpop.permute.xlu1 %11301  ;;  %18048 = vmatprep.subr.bf16.mxu0 %v18047_v25 }
 0x5d9   : > { %v11304_v34 = vpop.permute.xlu0 %11303  ;;  %17281 = vmatprep.mubr.msk.f32.mxu0 %vm7707_vm7, %v22197_v9  ;;  %17671 = vmatmul.mubr.msk.f32.gmra.mrb[72].mxu1 %vm7707_vm7, %v11302_v3  ;;  %v22256_v3 = vld [vmem:[#allocation3 + $0x94] sm:$0xff] }
 0x5da   : > { %17673 = vmatprep.mubr.msk.f32.mxu1 %vm7707_vm7, %v11304_v34  ;;  %18050 = vmatpush3.bf16.msra.mxu0 %v18047_v25  ;;  %v22236_v25 = vld [vmem:[#allocation3 + $0x64] sm:$0xff] }
 0x5db   : > { %11738 = vrot.lane.b32.xlu1 %v24189_v54, %s19259_s16  ;;  %11740 = vrot.lane.b32.xlu0 %v24191_v15, %s19259_s16  ;;  %v22272_v54 = vld [vmem:[#allocation3 + $0xb4] sm:$0xff]  ;;  %v22276_v15 = vld [vmem:[#allocation3 + $0xc4] sm:$0xff] }
 0x5dc   : > { %17282 = vmatmul.mubr.msk.f32.gmra.mrb[36].mxu0 %vm7707_vm7, %v22215_v56  ;;  %v11306_v38 = vpop.permute.xlu1 %11305  ;;  %18102 = vmatpush3.bf16.msra.mxu1 %v21979_v44 }
 0x5dd   : > { %v11308_v10 = vpop.permute.xlu0 %11307  ;;  %17284 = vmatprep.mubr.msk.f32.mxu0 %vm7707_vm7, %v22221_v63  ;;  %17674 = vmatmul.mubr.msk.f32.gmra.mrb[74].mxu1 %vm7707_vm7, %v11306_v38 }
 0x5de   : > { %17676 = vmatprep.mubr.msk.f32.mxu1 %vm7707_vm7, %v11308_v10  ;;  %18104 = vmatprep.subr.bf16.mxu1 %v18103_v31  ;;  %v22282_v10 = vld [vmem:[#allocation3 + $0xcc] sm:$0xff] }
 0x5df   : > { %11742 = vrot.lane.b32.xlu1 %v24193_v62, %s19259_s16  ;;  %18052 = vmatprep.subr.bf16.mxu0 %v22217_v2  ;;  %v22286_v62 = vld [vmem:[#allocation3 + $0xdc] sm:$0xff]  ;;  %s13823_s16 = sshll.u32 %s24297_s28, 3 }
 0x5e0   : > { %17285 = vmatmul.mubr.msk.f32.gmra.mrb[38].mxu0 %vm7707_vm7, %v22231_v12  ;;  %v11310_v44 = vpop.permute.xlu1 %11309  ;;  %18106 = vmatpush3.bf16.msra.mxu1 %v18103_v31  ;;  %v22266_v31 = vld [vmem:[#allocation3 + $0xac] sm:$0xff]  ;;  %s440_s19 = scalar_lea.vmem %s23707_s13, %s13823_s16 }
 0x5e1   : > { %v11312_v41 = vpop.permute.xlu0 %11311  ;;  %17287 = vmatprep.mubr.msk.f32.mxu0 %vm7707_vm7, %v22236_v25  ;;  %17677 = vmatmul.mubr.msk.f32.gmra.mrb[76].mxu1 %vm7707_vm7, %v11310_v44 }
 0x5e2   : > { %17679 = vmatprep.mubr.msk.f32.mxu1 %vm7707_vm7, %v11312_v41  ;;  %v22292_v41 = vld [vmem:[#allocation3 + $0xe4] sm:$0xff] }
 0x5e4   : > { %17288 = vmatmul.mubr.msk.f32.gmra.mrb[40].mxu0 %vm7707_vm7, %v22242_v33  ;;  %v11314_v24 = vpop.permute.xlu1 %11313 }
 0x5e5   : > { %v11316_v5 = vpop.permute.xlu0 %11315  ;;  %17290 = vmatprep.mubr.msk.f32.mxu0 %vm7707_vm7, %v22246_v51  ;;  %17680 = vmatmul.mubr.msk.f32.gmra.mrb[78].mxu1 %vm7707_vm7, %v11314_v24 }
 0x5e6   : > { %17682 = vmatprep.mubr.msk.f32.mxu1 %vm7707_vm7, %v11316_v5  ;;  %v22296_v5 = vld [vmem:[#allocation3 + $0xf4] sm:$0xff] }
 0x5e8   : > { %17291 = vmatmul.mubr.msk.f32.gmra.mrb[42].mxu0 %vm7707_vm7, %v22252_v61  ;;  %v11318_v16 = vpop.permute.xlu1 %11317 }
 0x5e9   : > { %v11320_v35 = vpop.permute.xlu0 %11319  ;;  %17293 = vmatprep.mubr.msk.f32.mxu0 %vm7707_vm7, %v22256_v3  ;;  %17683 = vmatmul.mubr.msk.f32.gmra.mrb[80].mxu1 %vm7707_vm7, %v11318_v16 }
 0x5ea   : > { %17685 = vmatprep.mubr.msk.f32.mxu1 %vm7707_vm7, %v11320_v35  ;;  %v22302_v35 = vld [vmem:[#allocation3 + $0xfc] sm:$0xff] }
 0x5ec   : > { %17294 = vmatmul.mubr.msk.f32.gmra.mrb[44].mxu0 %vm7707_vm7, %v22262_v8  ;;  %v11322_v34 = vpop.permute.xlu1 %11321 }
 0x5ed   : > { %v11324_v43 = vpop.permute.xlu0 %11323  ;;  %17296 = vmatprep.mubr.msk.f32.mxu0 %vm7707_vm7, %v22266_v31  ;;  %17686 = vmatmul.mubr.msk.f32.gmra.mrb[82].mxu1 %vm7707_vm7, %v11322_v34 }
 0x5ee   : > { %17688 = vmatprep.mubr.msk.f32.mxu1 %vm7707_vm7, %v11324_v43  ;;  %v22306_v43 = vld [vmem:[#allocation3 + $0x10c] sm:$0xff] }
 0x5ef   : > { %24194 = vst [vmem:[#allocation72_spill] sm:$0xff] %v22306_v43 }
 0x5f0   : > { %17297 = vmatmul.mubr.msk.f32.gmra.mrb[46].mxu0 %vm7707_vm7, %v22272_v54  ;;  %v11326_v27 = vpop.permute.xlu1 %11325 }
 0x5f1   : > { %v11328_v38 = vpop.permute.xlu0 %11327  ;;  %17299 = vmatprep.mubr.msk.f32.mxu0 %vm7707_vm7, %v22276_v15  ;;  %17689 = vmatmul.mubr.msk.f32.gmra.mrb[84].mxu1 %vm7707_vm7, %v11326_v27 }
 0x5f2   : > { %17691 = vmatprep.mubr.msk.f32.mxu1 %vm7707_vm7, %v11328_v38  ;;  %v22312_v38 = vld [vmem:[#allocation3 + $0x114] sm:$0xff] }
 0x5f3   : > { %24195 = vst [vmem:[#allocation73_spill] sm:$0xff] %v22312_v38 }
 0x5f4   : > { %17300 = vmatmul.mubr.msk.f32.gmra.mrb[48].mxu0 %vm7707_vm7, %v22282_v10  ;;  %v11330_v32 = vpop.permute.xlu1 %11329 }
 0x5f5   : > { %v11332_v44 = vpop.permute.xlu0 %11331  ;;  %17302 = vmatprep.mubr.msk.f32.mxu0 %vm7707_vm7, %v22286_v62  ;;  %17692 = vmatmul.mubr.msk.f32.gmra.mrb[86].mxu1 %vm7707_vm7, %v11330_v32 }
 0x5f6   : > { %17694 = vmatprep.mubr.msk.f32.mxu1 %vm7707_vm7, %v11332_v44  ;;  %v22316_v44 = vld [vmem:[#allocation3 + $0x124] sm:$0xff] }
 0x5f7   : > { %24196 = vst [vmem:[#allocation74_spill] sm:$0xff] %v22316_v44 }
 0x5f8   : > { %17303 = vmatmul.mubr.msk.f32.gmra.mrb[50].mxu0 %vm7707_vm7, %v22292_v41  ;;  %v11334_v24 = vpop.permute.xlu1 %11333 }
 0x5f9   : > { %v11336_v16 = vpop.permute.xlu0 %11335  ;;  %17305 = vmatprep.mubr.msk.f32.mxu0 %vm7707_vm7, %v22296_v5  ;;  %17695 = vmatmul.mubr.msk.f32.gmra.mrb[88].mxu1 %vm7707_vm7, %v11334_v24 }
 0x5fa   : > { %17697 = vmatprep.mubr.msk.f32.mxu1 %vm7707_vm7, %v11336_v16  ;;  %v22322_v16 = vld [vmem:[#allocation3 + $0x12c] sm:$0xff] }
 0x5fb   : > { %24197 = vst [vmem:[#allocation75_spill] sm:$0xff] %v22322_v16 }
 0x5fc   : > { %17306 = vmatmul.mubr.msk.f32.gmra.mrb[52].mxu0 %vm7707_vm7, %v22302_v35  ;;  %v11338_v34 = vpop.permute.xlu1 %11337 }
 0x5fd   : > { %v11340_v27 = vpop.permute.xlu0 %11339  ;;  %17308 = vmatprep.mubr.msk.f32.mxu0 %vm7707_vm7, %v22306_v43  ;;  %17698 = vmatmul.mubr.msk.f32.gmra.mrb[90].mxu1 %vm7707_vm7, %v11338_v34  ;;  %v14660_v43 = vld [vmem:[%s23699_s5 + $0xa8] sm:$0xff] }
 0x5fe   : > { %17700 = vmatprep.mubr.msk.f32.mxu1 %vm7707_vm7, %v11340_v27  ;;  %v22326_v27 = vld [vmem:[#allocation3 + $0x13c] sm:$0xff] }
 0x5ff   : > { %24198 = vst [vmem:[#allocation76_spill] sm:$0xff] %v22326_v27 }
 0x600   : > { %17309 = vmatmul.mubr.msk.f32.gmra.mrb[54].mxu0 %vm7707_vm7, %v22312_v38  ;;  %v11342_v32 = vpop.permute.xlu1 %11341 }
 0x601   : > { %v11344_v24 = vpop.permute.xlu0 %11343  ;;  %17311 = vmatprep.mubr.msk.f32.mxu0 %vm7707_vm7, %v22316_v44  ;;  %17701 = vmatmul.mubr.msk.f32.gmra.mrb[92].mxu1 %vm7707_vm7, %v11342_v32  ;;  %v22332_v44 = vld [vmem:[#allocation3 + $0x144] sm:$0xff] }
 0x602   : > { %17703 = vmatprep.mubr.msk.f32.mxu1 %vm7707_vm7, %v11344_v24  ;;  %24199 = vst [vmem:[#allocation77_spill] sm:$0xff] %v22332_v44  ;;  %v22336_v24 = vld [vmem:[#allocation3 + $0x154] sm:$0xff] }
 0x603   : > { %24200 = vst [vmem:[#allocation78_spill] sm:$0xff] %v22336_v24 }
 0x604   : > { %17312 = vmatmul.mubr.msk.f32.gmra.mrb[56].mxu0 %vm7707_vm7, %v22322_v16  ;;  %v11346_v34 = vpop.permute.xlu1 %11345 }
 0x605   : > { %v11348_v38 = vpop.permute.xlu0 %11347  ;;  %17314 = vmatprep.mubr.msk.f32.mxu0 %vm7707_vm7, %v22326_v27  ;;  %17704 = vmatmul.mubr.msk.f32.gmra.mrb[94].mxu1 %vm7707_vm7, %v11346_v34  ;;  %v22342_v27 = vld [vmem:[#allocation3 + $0x15c] sm:$0xff] }
 0x606   : > { %17706 = vmatprep.mubr.msk.f32.mxu1 %vm7707_vm7, %v11348_v38  ;;  %24201 = vst [vmem:[#allocation79_spill] sm:$0xff] %v22342_v27  ;;  %v22346_v38 = vld [vmem:[#allocation3 + $0x16c] sm:$0xff] }
 0x607   : > { %24202 = vst [vmem:[#allocation80_spill] sm:$0xff] %v22346_v38 }
 0x608   : > { %17315 = vmatmul.mubr.msk.f32.gmra.mrb[58].mxu0 %vm7707_vm7, %v22332_v44  ;;  %v11350_v32 = vpop.permute.xlu1 %11349 }
 0x609   : > { %17317 = vmatprep.mubr.msk.f32.mxu0 %vm7707_vm7, %v22336_v24  ;;  %v11352_v16 = vpop.permute.xlu0 %11351  ;;  %17707 = vmatmul.mubr.msk.f32.gmra.mrb[96].mxu1 %vm7707_vm7, %v11350_v32  ;;  %v22352_v24 = vld [vmem:[#allocation3 + $0x174] sm:$0xff] }
 0x60a   : > { %17709 = vmatprep.mubr.msk.f32.mxu1 %vm7707_vm7, %v11352_v16  ;;  %24203 = vst [vmem:[#allocation81_spill] sm:$0xff] %v22352_v24  ;;  %v14625_v16 = vld [vmem:[%s23699_s5 + $0x90] sm:$0xff]  ;;  %v14626_v32 = vld [vmem:[%s23699_s5 + $0x98] sm:$0xff] }
 0x60c   : > { %17318 = vmatmul.mubr.msk.f32.gmra.mrb[60].mxu0 %vm7707_vm7, %v22342_v27  ;;  %v11354_v34 = vpop.permute.xlu1 %11353 }
 0x60d   : > { %17320 = vmatprep.mubr.msk.f32.mxu0 %vm7707_vm7, %v22346_v38  ;;  %v11356_v44 = vpop.permute.xlu0 %11355  ;;  %17710 = vmatmul.mubr.msk.f32.gmra.mrb[98].mxu1 %vm7707_vm7, %v11354_v34  ;;  %v14659_v38 = vld [vmem:[%s23699_s5 + $0xa0] sm:$0xff] }
 0x60e   : > { %17712 = vmatprep.mubr.msk.f32.mxu1 %vm7707_vm7, %v11356_v44  ;;  %v18055_v44 = vpack.c.bf16 %v14626_v32, %v14625_v16  ;;  %v22472_v32 = vld [vmem:[#allocation3 + $0x1a0] sm:$0xff] }
 0x610   : > { %17321 = vmatmul.mubr.msk.f32.gmra.mrb[62].mxu0 %vm7707_vm7, %v22352_v24  ;;  %v11358_v27 = vpop.permute.xlu1 %11357 }
 0x611   : > { %17331 = vmatprep.mubr.msk.f32.mxu0 %vm7707_vm7, %v21953_v14  ;;  %v11681_v34 = vpop.permute.xlu0 %11680  ;;  %17713 = vmatmul.mubr.msk.f32.gmra.mrb[100].mxu1 %vm7707_vm7, %v11358_v27  ;;  %v22378_v27 = vpack.c.bf16 %v14660_v43, %v14659_v38 }
 0x612   : > { %17723 = vmatprep.mubr.msk.f32.mxu1 %vm7707_vm7, %v11681_v34  ;;  %v14661_v34 = vld [vmem:[%s23699_s5 + $0xb0] sm:$0xff] }
 0x614   : > { %17332 = vmatmul.mubr.msk.f32.vlgmr.msra.gmra.mrb[32].mxu0 %vm7707_vm7, %v21977_v53  ;;  %v11683_v24 = vpop.permute.xlu1 %11682 }
 0x615   : > { %18054 = vmatpush3.bf16.msra.mxu0 %v22217_v2  ;;  %17334 = vmatprep.mubr.msk.f32.mxu0 %vm7707_vm7, %v21983_v52  ;;  %v11685_v14 = vpop.permute.xlu0 %11684 }
 0x616   : > { %17724 = vmatmul.mubr.msk.f32.vlgmr.msra.gmra.mrb[70].mxu1 %vm7707_vm7, %v11683_v24  ;;  %18056 = vmatprep.subr.bf16.mxu0 %v18055_v44 }
 0x617   : > { %17726 = vmatprep.mubr.msk.f32.mxu1 %vm7707_vm7, %v11685_v14  ;;  %v9235_v14 = vld [vmem:[#allocation3 + $0x32] sm:$0xff] }
 0x618   : > { %17335 = vmatmul.mubr.msk.f32.gmra.mrb[34].mxu0 %vm7707_vm7, %v21992_v0  ;;  %v11687_v16 = vpop.permute.xlu1 %11686 }
 0x619   : > { %17337 = vmatprep.mubr.msk.f32.mxu0 %vm7707_vm7, %v21997_v1  ;;  %v11689_v53 = vpop.permute.xlu0 %11688  ;;  %18058 = vmatpush3.bf16.msra.mxu0 %v18055_v44  ;;  %v14662_v44 = vld [vmem:[%s23699_s5 + $0xb8] sm:$0xff] }
 0x61a   : > { %17727 = vmatmul.mubr.msk.f32.gmra.mrb[72].mxu1 %vm7707_vm7, %v11687_v16  ;;  %18060 = vmatprep.subr.bf16.mxu0 %v22378_v27 }
 0x61b   : > { %17729 = vmatprep.mubr.msk.f32.mxu1 %vm7707_vm7, %v11689_v53  ;;  %v18063_v53 = vpack.c.bf16 %v14662_v44, %v14661_v34  ;;  %v10016_v44 = vld [vmem:[#allocation3 + $0x68] sm:$0xff] }
 0x61c   : > { %17338 = vmatmul.mubr.msk.f32.gmra.mrb[36].mxu0 %vm7707_vm7, %v22007_v11  ;;  %v11691_v52 = vpop.permute.xlu1 %11690 }
 0x61d   : > { %17340 = vmatprep.mubr.msk.f32.mxu0 %vm7707_vm7, %v22011_v55  ;;  %v11693_v0 = vpop.permute.xlu0 %11692 }
 0x61e   : > { %17730 = vmatmul.mubr.msk.f32.gmra.mrb[74].mxu1 %vm7707_vm7, %v11691_v52  ;;  %v9236_v52 = vld [vmem:[#allocation3 + $0x3a] sm:$0xff] }
 0x61f   : > { %17732 = vmatprep.mubr.msk.f32.mxu1 %vm7707_vm7, %v11693_v0  ;;  %v14695_v0 = vld [vmem:[%s23699_s5 + $0xc0] sm:$0xff] }
 0x620   : > { %17341 = vmatmul.mubr.msk.f32.gmra.mrb[38].mxu0 %vm7707_vm7, %v22021_v46  ;;  %v11695_v1 = vpop.permute.xlu1 %11694 }
 0x621   : > { %17343 = vmatprep.mubr.msk.f32.mxu0 %vm7707_vm7, %v22025_v19  ;;  %v11697_v2 = vpop.permute.xlu0 %11696 }
 0x622   : > { %17733 = vmatmul.mubr.msk.f32.gmra.mrb[76].mxu1 %vm7707_vm7, %v11695_v1  ;;  %v14696_v1 = vld [vmem:[%s23699_s5 + $0xc8] sm:$0xff] }
 0x623   : > { %17735 = vmatprep.mubr.msk.f32.mxu1 %vm7707_vm7, %v11697_v2  ;;  %v9237_v2 = vld [vmem:[#allocation3 + $0x4a] sm:$0xff] }
 0x624   : > { %17344 = vmatmul.mubr.msk.f32.gmra.mrb[40].mxu0 %vm7707_vm7, %v22035_v59  ;;  %v11699_v11 = vpop.permute.xlu1 %11698 }
 0x625   : > { %17346 = vmatprep.mubr.msk.f32.mxu0 %vm7707_vm7, %v22039_v58  ;;  %v11701_v55 = vpop.permute.xlu0 %11700 }
 0x626   : > { %17736 = vmatmul.mubr.msk.f32.gmra.mrb[78].mxu1 %vm7707_vm7, %v11699_v11  ;;  %v22493_v11 = vpack.c.bf16 %v14696_v1, %v14695_v0  ;;  %v10018_v0 = vld [vmem:[#allocation3 + $0x80] sm:$0xff]  ;;  %v10019_v1 = vld [vmem:[#allocation3 + $0x90] sm:$0xff] }
 0x627   : > { %17738 = vmatprep.mubr.msk.f32.mxu1 %vm7707_vm7, %v11701_v55  ;;  %v9238_v55 = vld [vmem:[#allocation3 + $0x52] sm:$0xff] }
 0x628   : > { %17347 = vmatmul.mubr.msk.f32.gmra.mrb[42].mxu0 %vm7707_vm7, %v22049_v23  ;;  %v11703_v46 = vpop.permute.xlu1 %11702 }
 0x629   : > { %17349 = vmatprep.mubr.msk.f32.mxu0 %vm7707_vm7, %v22053_v39  ;;  %v11705_v19 = vpop.permute.xlu0 %11704 }
 0x62a   : > { %17739 = vmatmul.mubr.msk.f32.gmra.mrb[80].mxu1 %vm7707_vm7, %v11703_v46  ;;  %v22496_v46 = vld [vmem:[#allocation3 + $0x62] sm:$0xff] }
 0x62b   : > { %17741 = vmatprep.mubr.msk.f32.mxu1 %vm7707_vm7, %v11705_v19  ;;  %v22501_v19 = vld [vmem:[#allocation3 + $0x6a] sm:$0xff] }
 0x62c   : > { %17350 = vmatmul.mubr.msk.f32.gmra.mrb[44].mxu0 %vm7707_vm7, %v22063_v29  ;;  %v11707_v59 = vpop.permute.xlu1 %11706 }
 0x62d   : > { %17352 = vmatprep.mubr.msk.f32.mxu0 %vm7707_vm7, %v22067_v22  ;;  %v11709_v58 = vpop.permute.xlu0 %11708 }
 0x62e   : > { %17742 = vmatmul.mubr.msk.f32.gmra.mrb[82].mxu1 %vm7707_vm7, %v11707_v59  ;;  %v22509_v59 = vld [vmem:[#allocation3 + $0x82] sm:$0xff] }
 0x62f   : > { %17744 = vmatprep.mubr.msk.f32.mxu1 %vm7707_vm7, %v11709_v58  ;;  %v22513_v58 = vld [vmem:[#allocation3 + $0x92] sm:$0xff] }
 0x630   : > { %17353 = vmatmul.mubr.msk.f32.gmra.mrb[46].mxu0 %vm7707_vm7, %v22077_v28  ;;  %v11711_v23 = vpop.permute.xlu1 %11710 }
 0x631   : > { %17355 = vmatprep.mubr.msk.f32.mxu0 %vm7707_vm7, %v22081_v37  ;;  %v11713_v39 = vpop.permute.xlu0 %11712 }
 0x632   : > { %17745 = vmatmul.mubr.msk.f32.gmra.mrb[84].mxu1 %vm7707_vm7, %v11711_v23  ;;  %v22517_v23 = vld [vmem:[#allocation3 + $0x9a] sm:$0xff] }
 0x633   : > { %17747 = vmatprep.mubr.msk.f32.mxu1 %vm7707_vm7, %v11713_v39  ;;  %v22521_v39 = vld [vmem:[#allocation3 + $0xaa] sm:$0xff] }
 0x634   : > { %17356 = vmatmul.mubr.msk.f32.gmra.mrb[48].mxu0 %vm7707_vm7, %v22091_v45  ;;  %v11715_v29 = vpop.permute.xlu1 %11714 }
 0x635   : > { %17358 = vmatprep.mubr.msk.f32.mxu0 %vm7707_vm7, %v22095_v30  ;;  %v11717_v22 = vpop.permute.xlu0 %11716 }
 0x636   : > { %17748 = vmatmul.mubr.msk.f32.gmra.mrb[86].mxu1 %vm7707_vm7, %v11715_v29 }
 0x637   : > { %17750 = vmatprep.mubr.msk.f32.mxu1 %vm7707_vm7, %v11717_v22 }
 0x638   : > { %17359 = vmatmul.mubr.msk.f32.gmra.mrb[50].mxu0 %vm7707_vm7, %v22105_v57  ;;  %v11719_v28 = vpop.permute.xlu1 %11718 }
 0x639   : > { %17361 = vmatprep.mubr.msk.f32.mxu0 %vm7707_vm7, %v22109_v60  ;;  %v11721_v37 = vpop.permute.xlu0 %11720 }
 0x63a   : > { %17751 = vmatmul.mubr.msk.f32.gmra.mrb[88].mxu1 %vm7707_vm7, %v11719_v28  ;;  %v22529_v28 = vld [vmem:[#allocation3 + $0xb2] sm:$0xff] }
 0x63b   : > { %17753 = vmatprep.mubr.msk.f32.mxu1 %vm7707_vm7, %v11721_v37  ;;  %v22533_v37 = vld [vmem:[#allocation3 + $0xc2] sm:$0xff] }
 0x63c   : > { %17362 = vmatmul.mubr.msk.f32.gmra.mrb[52].mxu0 %vm7707_vm7, %v22119_v18  ;;  %v11723_v45 = vpop.permute.xlu1 %11722 }
 0x63d   : > { %17364 = vmatprep.mubr.msk.f32.mxu0 %vm7707_vm7, %v22123_v26  ;;  %v11725_v30 = vpop.permute.xlu0 %11724 }
 0x63e   : > { %17754 = vmatmul.mubr.msk.f32.gmra.mrb[90].mxu1 %vm7707_vm7, %v11723_v45 }
 0x63f   : > { %17756 = vmatprep.mubr.msk.f32.mxu1 %vm7707_vm7, %v11725_v30 }
 0x640   : > { %17365 = vmatmul.mubr.msk.f32.gmra.mrb[54].mxu0 %vm7707_vm7, %v22133_v13  ;;  %v11727_v57 = vpop.permute.xlu1 %11726  ;;  %v22456_v13 = vld [vmem:[#allocation3 + $0x180] sm:$0xff] }
 0x641   : > { %17367 = vmatprep.mubr.msk.f32.mxu0 %vm7707_vm7, %v22137_v20  ;;  %v11729_v60 = vpop.permute.xlu0 %11728 }
 0x642   : > { %17757 = vmatmul.mubr.msk.f32.gmra.mrb[92].mxu1 %vm7707_vm7, %v11727_v57  ;;  %v22541_v57 = vld [vmem:[#allocation3 + $0xca] sm:$0xff] }
 0x643   : > { %17759 = vmatprep.mubr.msk.f32.mxu1 %vm7707_vm7, %v11729_v60  ;;  %v22545_v60 = vld [vmem:[#allocation3 + $0xda] sm:$0xff] }
 0x644   : > { %17368 = vmatmul.mubr.msk.f32.gmra.mrb[56].mxu0 %vm7707_vm7, %v22147_v7  ;;  %v11731_v18 = vpop.permute.xlu1 %11730  ;;  %v22462_v7 = vld [vmem:[#allocation3 + $0x188] sm:$0xff] }
 0x645   : > { %17370 = vmatprep.mubr.msk.f32.mxu0 %vm7707_vm7, %v22151_v48  ;;  %v11733_v26 = vpop.permute.xlu0 %11732  ;;  %v22466_v48 = vld [vmem:[#allocation3 + $0x198] sm:$0xff] }
 0x646   : > { %17760 = vmatmul.mubr.msk.f32.gmra.mrb[94].mxu1 %vm7707_vm7, %v11731_v18 }
 0x647   : > { %17762 = vmatprep.mubr.msk.f32.mxu1 %vm7707_vm7, %v11733_v26 }
 0x648   : > { %17371 = vmatmul.mubr.msk.f32.gmra.mrb[58].mxu0 %vm7707_vm7, %v22161_v42 }
 0x649   : > { %17373 = vmatprep.mubr.msk.f32.mxu0 %vm7707_vm7, %v22456_v13  ;;  %v11735_v20 = vpop.permute.xlu1 %11734  ;;  %v11737_v43 = vpop.permute.xlu0 %11736 }
 0x64a   : > { %17763 = vmatmul.mubr.msk.f32.gmra.mrb[96].mxu1 %vm7707_vm7, %v11735_v20  ;;  %v22553_v20 = vld [vmem:[#allocation3 + $0xe2] sm:$0xff] }
 0x64b   : > { %17765 = vmatprep.mubr.msk.f32.mxu1 %vm7707_vm7, %v11737_v43  ;;  %v22557_v43 = vld [vmem:[#allocation3 + $0xf2] sm:$0xff] }
 0x64c   : > { %17374 = vmatmul.mubr.msk.f32.gmra.mrb[60].mxu0 %vm7707_vm7, %v22462_v7 }
 0x64d   : > { %v11739_v24 = vpop.permute.xlu1 %11738  ;;  %v11741_v38 = vpop.permute.xlu0 %11740  ;;  %17376 = vmatprep.mubr.msk.f32.mxu0 %vm7707_vm7, %v22466_v48 }
 0x64e   : > { %17766 = vmatmul.mubr.msk.f32.gmra.mrb[98].mxu1 %vm7707_vm7, %v11739_v24  ;;  %v22561_v24 = vld [vmem:[#allocation3 + $0xfa] sm:$0xff] }
 0x64f   : > { %17768 = vmatprep.mubr.msk.f32.mxu1 %vm7707_vm7, %v11741_v38  ;;  %v22565_v38 = vld [vmem:[#allocation3 + $0x10a] sm:$0xff] }
 0x650   : > { %17377 = vmatmul.mubr.msk.f32.gmra.mrb[62].mxu0 %vm7707_vm7, %v22472_v32 }
 0x651   : > { %v11743_v16 = vpop.permute.xlu1 %11742  ;;  %17387 = vmatprep.mubr.msk.f32.mxu0 %vm7707_vm7, %v9235_v14  ;;  %v14767_v14 = vld [vmem:[%s23699_s5 + $0x100] sm:$0xff] }
 0x652   : > { %17769 = vmatmul.mubr.msk.f32.gmra.mrb[100].mxu1 %vm7707_vm7, %v11743_v16  ;;  %v14768_v16 = vld [vmem:[%s23699_s5 + $0x108] sm:$0xff] }
 0x654   : > { %17388 = vmatmul.mubr.msk.f32.vlgmr.msra.gmra.mrb[32].mxu0 %vm7707_vm7, %v9236_v52  ;;  %v22703_v52 = vpack.c.bf16 %v14768_v16, %v14767_v14  ;;  %v10043_v14 = vld [vmem:[#allocation3 + $0x1b0] sm:$0xff]  ;;  %v10044_v16 = vld [vmem:[#allocation3 + $0x1b8] sm:$0xff] }
 0x655   : > { %18062 = vmatpush3.bf16.msra.mxu0 %v22378_v27  ;;  %17390 = vmatprep.mubr.msk.f32.mxu0 %vm7707_vm7, %v9237_v2  ;;  %v22505_v27 = vld [vmem:[#allocation3 + $0x7a] sm:$0xff] }
 0x656   : > { %18064 = vmatprep.subr.bf16.mxu0 %v18063_v53  ;;  %v10020_v2 = vld [vmem:[#allocation3 + $0x98] sm:$0xff] }
 0x658   : > { %17391 = vmatmul.mubr.msk.f32.gmra.mrb[34].mxu0 %vm7707_vm7, %v9238_v55  ;;  %v10022_v55 = vld [vmem:[#allocation3 + $0xb0] sm:$0xff] }
 0x659   : > { %17393 = vmatprep.mubr.msk.f32.mxu0 %vm7707_vm7, %v22496_v46  ;;  %18066 = vmatpush3.bf16.msra.mxu0 %v18063_v53  ;;  %v10017_v53 = vld [vmem:[#allocation3 + $0x78] sm:$0xff] }
 0x65a   : > { %18068 = vmatprep.subr.bf16.mxu0 %v22493_v11 }
 0x65c   : > { %17394 = vmatmul.mubr.msk.f32.gmra.mrb[36].mxu0 %vm7707_vm7, %v22501_v19 }
 0x65d   : > { %17396 = vmatprep.mubr.msk.f32.mxu0 %vm7707_vm7, %v22505_v27 }
 0x660   : > { %17397 = vmatmul.mubr.msk.f32.gmra.mrb[38].mxu0 %vm7707_vm7, %v22509_v59 }
 0x661   : > { %17399 = vmatprep.mubr.msk.f32.mxu0 %vm7707_vm7, %v22513_v58 }
 0x664   : > { %17400 = vmatmul.mubr.msk.f32.gmra.mrb[40].mxu0 %vm7707_vm7, %v22517_v23 }
 0x665   : > { %17402 = vmatprep.mubr.msk.f32.mxu0 %vm7707_vm7, %v22521_v39 }
 0x666   : > { %v22525_v29 = vpop.f32.mrb[64].mxu1 }
 0x667   : > { %v22527_v22 = vpop.f32.mrb[65].mxu1 }
 0x668   : > { %17403 = vmatmul.mubr.msk.f32.gmra.mrb[42].mxu0 %vm7707_vm7, %v22529_v28 }
 0x669   : > { %17405 = vmatprep.mubr.msk.f32.mxu0 %vm7707_vm7, %v22533_v37 }
 0x66a   : > { %v22537_v45 = vpop.f32.mrb[66].mxu1 }
 0x66b   : > { %v22539_v30 = vpop.f32.mrb[67].mxu1 }
 0x66c   : > { %17406 = vmatmul.mubr.msk.f32.gmra.mrb[44].mxu0 %vm7707_vm7, %v22541_v57 }
 0x66d   : > { %17408 = vmatprep.mubr.msk.f32.mxu0 %vm7707_vm7, %v22545_v60 }
 0x66e   : > { %v22549_v18 = vpop.f32.mrb[68].mxu1 }
 0x66f   : > { %v22551_v26 = vpop.f32.mrb[69].mxu1 }
 0x670   : > { %17409 = vmatmul.mubr.msk.f32.gmra.mrb[46].mxu0 %vm7707_vm7, %v22553_v20 }
 0x671   : > { %17411 = vmatprep.mubr.msk.f32.mxu0 %vm7707_vm7, %v22557_v43 }
 0x674   : > { %17412 = vmatmul.mubr.msk.f32.gmra.mrb[48].mxu0 %vm7707_vm7, %v22561_v24 }
 0x675   : > { %17414 = vmatprep.mubr.msk.f32.mxu0 %vm7707_vm7, %v22565_v38 }
 0x678   : > { %17415 = vmatmul.mubr.msk.f32.gmra.mrb[50].mxu0 %vm7707_vm7, %v21882_v49  ;;  %v22587_v49 = vld [vmem:[#allocation3 + $0x182] sm:$0xff] }
 0x679   : > { %17417 = vmatprep.mubr.msk.f32.mxu0 %vm7707_vm7, %v21889_v4  ;;  %v22591_v4 = vld [vmem:[#allocation3 + $0x18a] sm:$0xff] }
 0x67c   : > { %17418 = vmatmul.mubr.msk.f32.gmra.mrb[52].mxu0 %vm7707_vm7, %v21896_v47  ;;  %v22595_v47 = vld [vmem:[#allocation3 + $0x19a] sm:$0xff] }
 0x67d   : > { %17420 = vmatprep.mubr.msk.f32.mxu0 %vm7707_vm7, %v21904_v36  ;;  %v22599_v36 = vld [vmem:[#allocation3 + $0x1a2] sm:$0xff] }
 0x680   : > { %17421 = vmatmul.mubr.msk.f32.gmra.mrb[54].mxu0 %vm7707_vm7, %v21917_v40  ;;  %v14697_v40 = vld [vmem:[%s23699_s5 + $0xd0] sm:$0xff] }
 0x681   : > { %17423 = vmatprep.mubr.msk.f32.mxu0 %vm7707_vm7, %v21927_v50  ;;  %v14698_v50 = vld [vmem:[%s23699_s5 + $0xd8] sm:$0xff] }
 0x684   : > { %17424 = vmatmul.mubr.msk.f32.gmra.mrb[56].mxu0 %vm7707_vm7, %v21941_v6  ;;  %v18071_v6 = vpack.c.bf16 %v14698_v50, %v14697_v40  ;;  %v10023_v40 = vld [vmem:[#allocation3 + $0xc0] sm:$0xff]  ;;  %v10024_v50 = vld [vmem:[#allocation3 + $0xc8] sm:$0xff] }
 0x685   : > { %17426 = vmatprep.mubr.msk.f32.mxu0 %vm7707_vm7, %v21964_v21  ;;  %v14731_v21 = vld [vmem:[%s23699_s5 + $0xe0] sm:$0xff] }
 0x688   : > { %17427 = vmatmul.mubr.msk.f32.gmra.mrb[58].mxu0 %vm7707_vm7, %v21972_v17  ;;  %v14732_v17 = vld [vmem:[%s23699_s5 + $0xe8] sm:$0xff] }
 0x689   : > { %17429 = vmatprep.mubr.msk.f32.mxu0 %vm7707_vm7, %v22587_v49  ;;  %v18075_v34 = vpack.c.bf16 %v14732_v17, %v14731_v21  ;;  %v10026_v21 = vld [vmem:[#allocation3 + $0xe0] sm:$0xff]  ;;  %v10027_v17 = vld [vmem:[#allocation3 + $0xf0] sm:$0xff] }
 0x68c   : > { %17430 = vmatmul.mubr.msk.f32.gmra.mrb[60].mxu0 %vm7707_vm7, %v22591_v4 }
 0x68d   : > { %17432 = vmatprep.mubr.msk.f32.mxu0 %vm7707_vm7, %v22595_v47 }
 0x690   : > { %17433 = vmatmul.mubr.msk.f32.gmra.mrb[62].mxu0 %vm7707_vm7, %v22599_v36 }
 0x691   : > { %17443 = vmatprep.mubr.msk.f32.mxu0 %vm7707_vm7, %v22197_v9  ;;  %v24204_v9 = vld [vmem:[#allocation72_spill] sm:$0xff] }
 0x694   : > { %17444 = vmatmul.mubr.msk.f32.vlgmr.msra.gmra.mrb[32].mxu0 %vm7707_vm7, %v22215_v56  ;;  %v24205_v56 = vld [vmem:[#allocation73_spill] sm:$0xff] }
 0x695   : > { %18070 = vmatpush3.bf16.msra.mxu0 %v22493_v11  ;;  %17446 = vmatprep.mubr.msk.f32.mxu0 %vm7707_vm7, %v22221_v63  ;;  %v24206_v63 = vld [vmem:[#allocation74_spill] sm:$0xff] }
 0x696   : > { %18072 = vmatprep.subr.bf16.mxu0 %v18071_v6  ;;  %v10021_v11 = vld [vmem:[#allocation3 + $0xa8] sm:$0xff] }
 0x698   : > { %17447 = vmatmul.mubr.msk.f32.gmra.mrb[34].mxu0 %vm7707_vm7, %v22231_v12  ;;  %v24207_v12 = vld [vmem:[#allocation75_spill] sm:$0xff] }
 0x699   : > { %17449 = vmatprep.mubr.msk.f32.mxu0 %vm7707_vm7, %v22236_v25  ;;  %18074 = vmatpush3.bf16.msra.mxu0 %v18071_v6  ;;  %v24208_v25 = vld [vmem:[#allocation76_spill] sm:$0xff] }
 0x69a   : > { %18076 = vmatprep.subr.bf16.mxu0 %v18075_v34  ;;  %v10025_v6 = vld [vmem:[#allocation3 + $0xd8] sm:$0xff] }
 0x69c   : > { %17450 = vmatmul.mubr.msk.f32.gmra.mrb[36].mxu0 %vm7707_vm7, %v22242_v33  ;;  %v24209_v33 = vld [vmem:[#allocation77_spill] sm:$0xff] }
 0x69d   : > { %17452 = vmatprep.mubr.msk.f32.mxu0 %vm7707_vm7, %v22246_v51  ;;  %v24210_v51 = vld [vmem:[#allocation78_spill] sm:$0xff] }
 0x6a0   : > { %17453 = vmatmul.mubr.msk.f32.gmra.mrb[38].mxu0 %vm7707_vm7, %v22252_v61  ;;  %v24211_v61 = vld [vmem:[#allocation79_spill] sm:$0xff] }
 0x6a1   : > { %17455 = vmatprep.mubr.msk.f32.mxu0 %vm7707_vm7, %v22256_v3  ;;  %v24212_v3 = vld [vmem:[#allocation80_spill] sm:$0xff] }
 0x6a4   : > { %17456 = vmatmul.mubr.msk.f32.gmra.mrb[40].mxu0 %vm7707_vm7, %v22262_v8  ;;  %v24213_v8 = vld [vmem:[#allocation81_spill] sm:$0xff] }
 0x6a5   : > { %17458 = vmatprep.mubr.msk.f32.mxu0 %vm7707_vm7, %v22266_v31  ;;  %v22672_v31 = vld [vmem:[#allocation3 + $0x184] sm:$0xff] }
 0x6a8   : > { %17459 = vmatmul.mubr.msk.f32.gmra.mrb[42].mxu0 %vm7707_vm7, %v22272_v54  ;;  %v22676_v54 = vld [vmem:[#allocation3 + $0x18c] sm:$0xff] }
 0x6a9   : > { %17461 = vmatprep.mubr.msk.f32.mxu0 %vm7707_vm7, %v22276_v15  ;;  %v22680_v15 = vld [vmem:[#allocation3 + $0x19c] sm:$0xff] }
 0x6ac   : > { %17462 = vmatmul.mubr.msk.f32.gmra.mrb[44].mxu0 %vm7707_vm7, %v22282_v10  ;;  %v22684_v10 = vld [vmem:[#allocation3 + $0x1a4] sm:$0xff] }
 0x6ad   : > { %17464 = vmatprep.mubr.msk.f32.mxu0 %vm7707_vm7, %v22286_v62  ;;  %v14733_v62 = vld [vmem:[%s23699_s5 + $0xf0] sm:$0xff] }
 0x6b0   : > { %17465 = vmatmul.mubr.msk.f32.gmra.mrb[46].mxu0 %vm7707_vm7, %v22292_v41  ;;  %v14734_v41 = vld [vmem:[%s23699_s5 + $0xf8] sm:$0xff] }
 0x6b1   : > { %17467 = vmatprep.mubr.msk.f32.mxu0 %vm7707_vm7, %v22296_v5  ;;  %v10015_v5 = vld [vmem:[#allocation3 + $0x60] sm:$0xff] }
 0x6b4   : > { %17468 = vmatmul.mubr.msk.f32.gmra.mrb[48].mxu0 %vm7707_vm7, %v22302_v35  ;;  %v18079_v35 = vpack.c.bf16 %v14734_v41, %v14733_v62  ;;  %v10033_v62 = vld [vmem:[#allocation3 + $0x138] sm:$0xff]  ;;  %v10034_v41 = vld [vmem:[#allocation3 + $0x140] sm:$0xff] }
 0x6b5   : > { %17470 = vmatprep.mubr.msk.f32.mxu0 %vm7707_vm7, %v24204_v9  ;;  %v10029_v9 = vld [vmem:[#allocation3 + $0x108] sm:$0xff] }
 0x6b8   : > { %17471 = vmatmul.mubr.msk.f32.gmra.mrb[50].mxu0 %vm7707_vm7, %v24205_v56  ;;  %v10030_v56 = vld [vmem:[#allocation3 + $0x110] sm:$0xff] }
 0x6b9   : > { %17473 = vmatprep.mubr.msk.f32.mxu0 %vm7707_vm7, %v24206_v63  ;;  %v10031_v63 = vld [vmem:[#allocation3 + $0x120] sm:$0xff] }
 0x6bc   : > { %17474 = vmatmul.mubr.msk.f32.gmra.mrb[52].mxu0 %vm7707_vm7, %v24207_v12  ;;  %v10032_v12 = vld [vmem:[#allocation3 + $0x128] sm:$0xff] }
 0x6bd   : > { %17476 = vmatprep.mubr.msk.f32.mxu0 %vm7707_vm7, %v24208_v25 }
 0x6c0   : > { %17477 = vmatmul.mubr.msk.f32.gmra.mrb[54].mxu0 %vm7707_vm7, %v24209_v33 }
 0x6c1   : > { %17479 = vmatprep.mubr.msk.f32.mxu0 %vm7707_vm7, %v24210_v51 }
 0x6c4   : > { %17480 = vmatmul.mubr.msk.f32.gmra.mrb[56].mxu0 %vm7707_vm7, %v24211_v61 }
 0x6c5   : > { %17482 = vmatprep.mubr.msk.f32.mxu0 %vm7707_vm7, %v24212_v3 }
 0x6c8   : > { %17483 = vmatmul.mubr.msk.f32.gmra.mrb[58].mxu0 %vm7707_vm7, %v24213_v8 }
 0x6c9   : > { %17485 = vmatprep.mubr.msk.f32.mxu0 %vm7707_vm7, %v22672_v31 }
 0x6cc   : > { %17486 = vmatmul.mubr.msk.f32.gmra.mrb[60].mxu0 %vm7707_vm7, %v22676_v54 }
 0x6cd   : > { %17488 = vmatprep.mubr.msk.f32.mxu0 %vm7707_vm7, %v22680_v15 }
 0x6d0   : > { %17489 = vmatmul.mubr.msk.f32.gmra.mrb[62].mxu0 %vm7707_vm7, %v22684_v10 }
 0x6d1   : > { %17499 = vmatprep.mubr.msk.f32.mxu0 %vm7707_vm7, %v10015_v5  ;;  %v10035_v5 = vld [vmem:[#allocation3 + $0x150] sm:$0xff] }
 0x6d4   : > { %17500 = vmatmul.mubr.msk.f32.vlgmr.msra.gmra.mrb[32].mxu0 %vm7707_vm7, %v10016_v44  ;;  %v10037_v44 = vld [vmem:[#allocation3 + $0x168] sm:$0xff] }
 0x6d5   : > { %18078 = vmatpush3.bf16.msra.mxu0 %v18075_v34  ;;  %17502 = vmatprep.mubr.msk.f32.mxu0 %vm7707_vm7, %v10017_v53  ;;  %v10028_v34 = vld [vmem:[#allocation3 + $0xf8] sm:$0xff]  ;;  %v10045_v53 = vld [vmem:[#allocation3 + $0x1c8] sm:$0xff] }
 0x6d6   : > { %18080 = vmatprep.subr.bf16.mxu0 %v18079_v35 }
 0x6d8   : > { %17503 = vmatmul.mubr.msk.f32.gmra.mrb[34].mxu0 %vm7707_vm7, %v10018_v0  ;;  %v24215_v0 = vld [vmem:[#allocation6_spill] sm:$0xff] }
 0x6d9   : > { %17505 = vmatprep.mubr.msk.f32.mxu0 %vm7707_vm7, %v10019_v1  ;;  %18082 = vmatpush3.bf16.msra.mxu0 %v18079_v35  ;;  %v10036_v35 = vld [vmem:[#allocation3 + $0x158] sm:$0xff]  ;;  %v12433_v1 = vmul.f32 %v24215_v0, %v24215_v0 }
 0x6da   : > { %18084 = vmatprep.subr.bf16.mxu0 %v22703_v52 }
 0x6dc   : > { %17506 = vmatmul.mubr.msk.f32.gmra.mrb[36].mxu0 %vm7707_vm7, %v10020_v2  ;;  %v24216_v2 = vld [vmem:[#allocation7_spill] sm:$0xff] }
 0x6dd   : > { %17508 = vmatprep.mubr.msk.f32.mxu0 %vm7707_vm7, %v10021_v11  ;;  %v12434_v11 = vmul.f32 %v24216_v2, %v24216_v2 }
 0x6e0   : > { %17509 = vmatmul.mubr.msk.f32.gmra.mrb[38].mxu0 %vm7707_vm7, %v10022_v55  ;;  %v24217_v55 = vld [vmem:[#allocation9_spill] sm:$0xff] }
 0x6e1   : > { %17511 = vmatprep.mubr.msk.f32.mxu0 %vm7707_vm7, %v10023_v40  ;;  %v12436_v40 = vmul.f32 %v24217_v55, %v24217_v55 }
 0x6e4   : > { %17512 = vmatmul.mubr.msk.f32.gmra.mrb[40].mxu0 %vm7707_vm7, %v10024_v50 }
 0x6e5   : > { %17514 = vmatprep.mubr.msk.f32.mxu0 %vm7707_vm7, %v10025_v6 }
 0x6e8   : > { %17515 = vmatmul.mubr.msk.f32.gmra.mrb[42].mxu0 %vm7707_vm7, %v10026_v21  ;;  %v12467_v21 = vsel %vm441_vm1, %v12433_v1, 0.0 }
 0x6e9   : > { %17517 = vmatprep.mubr.msk.f32.mxu0 %vm7707_vm7, %v10027_v17  ;;  %v12033_v17 = vld [vmem:[%s23703_s9] sm:$0xff]  ;;  %12468 = vadd.xlane.f32.xlu1 %v12467_v21  ;;  %v24227_v21 = vld [vmem:[#allocation19_spill] sm:$0xff] }
 0x6ec   : > { %17518 = vmatmul.mubr.msk.f32.gmra.mrb[44].mxu0 %vm7707_vm7, %v10028_v34  ;;  %v12034_v34 = vld [vmem:[%s23703_s9 + $0x8] sm:$0xff] }
 0x6ed   : > { %17520 = vmatprep.mubr.msk.f32.mxu0 %vm7707_vm7, %v10029_v9  ;;  %v24218_v9 = vld [vmem:[#allocation8_spill] sm:$0xff] }
 0x6f0   : > { %17521 = vmatmul.mubr.msk.f32.gmra.mrb[46].mxu0 %vm7707_vm7, %v10030_v56  ;;  %v12435_v56 = vmul.f32 %v24218_v9, %v24218_v9 }
 0x6f1   : > { %17523 = vmatprep.mubr.msk.f32.mxu0 %vm7707_vm7, %v10031_v63  ;;  %v12476_v63 = vsel %vm441_vm1, %v12436_v40, 0.0 }
 0x6f2   : > { %12477 = vadd.xlane.f32.xlu1 %v12476_v63 }
 0x6f4   : > { %17524 = vmatmul.mubr.msk.f32.gmra.mrb[48].mxu0 %vm7707_vm7, %v10032_v12  ;;  %v24219_v12 = vld [vmem:[#allocation11_spill] sm:$0xff] }
 0x6f5   : > { %17526 = vmatprep.mubr.msk.f32.mxu0 %vm7707_vm7, %v10033_v62  ;;  %v12438_v62 = vmul.f32 %v24219_v12, %v24219_v12 }
 0x6f8   : > { %17527 = vmatmul.mubr.msk.f32.gmra.mrb[50].mxu0 %vm7707_vm7, %v10034_v41  ;;  %v18107_v41 = vpack.c.bf16 %v12034_v34, %v12033_v17  ;;  %v12446_v17 = vmul.f32 %v24227_v21, %v24227_v21 }
 0x6f9   : > { %17529 = vmatprep.mubr.msk.f32.mxu0 %vm7707_vm7, %v10035_v5  ;;  %v24220_v5 = vld [vmem:[#allocation10_spill] sm:$0xff] }
 0x6fa   : > { %18108 = vmatprep.subr.bf16.mxu1 %v18107_v41 }
 0x6fb   : > { %18110 = vmatpush3.bf16.msra.mxu1 %v18107_v41 }
 0x6fc   : > { %17530 = vmatmul.mubr.msk.f32.gmra.mrb[52].mxu0 %vm7707_vm7, %v10036_v35  ;;  %v12437_v35 = vmul.f32 %v24220_v5, %v24220_v5 }
 0x6fd   : > { %17532 = vmatprep.mubr.msk.f32.mxu0 %vm7707_vm7, %v10037_v44  ;;  %v12482_v44 = vsel %vm441_vm1, %v12438_v62, 0.0 }
 0x6fe   : > { %12483 = vadd.xlane.f32.xlu1 %v12482_v44  ;;  %v10420_v44 = vld [vmem:[#allocation3 + $0x112] sm:$0xff] }
 0x700   : > { %17533 = vmatmul.mubr.msk.f32.gmra.mrb[54].mxu0 %vm7707_vm7, %v22161_v42  ;;  %v10046_v42 = vld [vmem:[#allocation3 + $0x1d0] sm:$0xff] }
 0x701   : > { %17535 = vmatprep.mubr.msk.f32.mxu0 %vm7707_vm7, %v22456_v13  ;;  %v14769_v13 = vld [vmem:[%s23699_s5 + $0x110] sm:$0xff] }
 0x704   : > { %17536 = vmatmul.mubr.msk.f32.gmra.mrb[56].mxu0 %vm7707_vm7, %v22462_v7  ;;  %v14770_v7 = vld [vmem:[%s23699_s5 + $0x118] sm:$0xff] }
 0x705   : > { %17538 = vmatprep.mubr.msk.f32.mxu0 %vm7707_vm7, %v22466_v48  ;;  %v24214_v48 = vld [vmem:[#allocation5_spill] sm:$0xff]  ;;  %v18087_v50 = vpack.c.bf16 %v14770_v7, %v14769_v13  ;;  %v24223_v13 = vld [vmem:[#allocation15_spill] sm:$0xff]  ;;  %v24224_v7 = vld [vmem:[#allocation14_spill] sm:$0xff] }
 0x708   : > { %17539 = vmatmul.mubr.msk.f32.gmra.mrb[58].mxu0 %vm7707_vm7, %v22472_v32  ;;  %v12432_v32 = vmul.f32 %v24214_v48, %v24214_v48 }
 0x709   : > { %17541 = vmatprep.mubr.msk.f32.mxu0 %vm7707_vm7, %v10043_v14  ;;  %v24221_v14 = vld [vmem:[#allocation13_spill] sm:$0xff] }
 0x70a   : > { %v12464_v6 = vsel %vm441_vm1, %v12432_v32, 0.0  ;;  %v12441_v32 = vmul.f32 %v24224_v7, %v24224_v7 }
 0x70b   : > { %12465 = vadd.xlane.f32.xlu0 %v12464_v6 }
 0x70c   : > { %17542 = vmatmul.mubr.msk.f32.gmra.mrb[60].mxu0 %vm7707_vm7, %v10044_v16  ;;  %v24222_v16 = vld [vmem:[#allocation12_spill] sm:$0xff] }
 0x70d   : > { %17544 = vmatprep.mubr.msk.f32.mxu0 %vm7707_vm7, %v10045_v53  ;;  %v12439_v53 = vmul.f32 %v24222_v16, %v24222_v16 }
 0x710   : > { %17545 = vmatmul.mubr.msk.f32.gmra.mrb[62].mxu0 %vm7707_vm7, %v10046_v42 }
 0x711   : > { %17555 = vmatprep.mubr.msk.f32.mxu0 %vm7707_vm7, %v22496_v46  ;;  %v12470_v46 = vsel %vm441_vm1, %v12434_v11, 0.0  ;;  %v24225_v11 = vld [vmem:[#allocation17_spill] sm:$0xff] }
 0x712   : > { %12471 = vadd.xlane.f32.xlu0 %v12470_v46  ;;  %v12444_v40 = vmul.f32 %v24225_v11, %v24225_v11  ;;  %v12506_v46 = vsel %vm441_vm1, %v12446_v17, 0.0  ;;  %v10425_v17 = vld [vmem:[#allocation3 + $0x152] sm:$0xff] }
 0x714   : > { %17556 = vmatmul.mubr.msk.f32.vlgmr.msra.gmra.mrb[32].mxu0 %vm7707_vm7, %v22501_v19  ;;  %v12473_v19 = vsel %vm441_vm1, %v12435_v56, 0.0  ;;  %v12500_v6 = vsel %vm441_vm1, %v12444_v40, 0.0  ;;  %v24229_v56 = vld [vmem:[#allocation21_spill] sm:$0xff] }
 0x715   : > { %18086 = vmatpush3.bf16.msra.mxu0 %v22703_v52  ;;  %17558 = vmatprep.mubr.msk.f32.mxu0 %vm7707_vm7, %v22505_v27  ;;  %v12440_v52 = vmul.f32 %v24221_v14, %v24221_v14  ;;  %v12035_v27 = vld [vmem:[%s23703_s9 + $0x10] sm:$0xf]  ;;  %v12448_v63 = vmul.f32 %v24229_v56, %v24229_v56 }
 0x716   : > { %18088 = vmatprep.subr.bf16.mxu0 %v18087_v50  ;;  %12474 = vadd.xlane.f32.xlu0 %v12473_v19  ;;  %v24231_v19 = vld [vmem:[#allocation23_spill] sm:$0xff] }
 0x717   : > { %v12488_v42 = vsel %vm441_vm1, %v12440_v52, 0.0  ;;  %17775 = vmatprep.subr.msk.mxu1 %vm767_vm0, %v12035_v27  ;;  %v12512_v41 = vsel %vm441_vm1, %v12448_v63, 0.0  ;;  %v24232_v52 = vld [vmem:[#allocation22_spill] sm:$0xff] }
 0x718   : > { %17559 = vmatmul.mubr.msk.f32.gmra.mrb[34].mxu0 %vm7707_vm7, %v22509_v59  ;;  %v12479_v59 = vsel %vm441_vm1, %v12437_v35, 0.0  ;;  %17776 = vmatpush3.msk.msra.mxu1 %vm767_vm0, %v12035_v27  ;;  %v12450_v35 = vmul.f32 %v24231_v19, %v24231_v19  ;;  %v12449_v27 = vmul.f32 %v24232_v52, %v24232_v52 }
 0x719   : > { %17561 = vmatprep.mubr.msk.f32.mxu0 %vm7707_vm7, %v22513_v58  ;;  %18090 = vmatpush3.bf16.msra.mxu0 %v18087_v50  ;;  %v12442_v58 = vmul.f32 %v24223_v13, %v24223_v13 }
 0x71a   : > { %12480 = vadd.xlane.f32.xlu0 %v12479_v59  ;;  %12489 = vadd.xlane.f32.xlu1 %v12488_v42  ;;  %v12518_v59 = vsel %vm441_vm1, %v12450_v35, 0.0  ;;  %v10427_v35 = vld [vmem:[#allocation3 + $0x16a] sm:$0xff] }
 0x71b   : > { %v12494_v1 = vsel %vm441_vm1, %v12442_v58, 0.0  ;;  %v10422_v58 = vld [vmem:[#allocation3 + $0x12a] sm:$0xff] }
 0x71c   : > { %17562 = vmatmul.mubr.msk.f32.gmra.mrb[36].mxu0 %vm7707_vm7, %v22517_v23  ;;  %v12485_v23 = vsel %vm441_vm1, %v12439_v53, 0.0  ;;  %v24233_v53 = vld [vmem:[#allocation25_spill] sm:$0xff] }
 0x71d   : > { %17564 = vmatprep.mubr.msk.f32.mxu0 %vm7707_vm7, %v22521_v39  ;;  %v12491_v39 = vsel %vm441_vm1, %v12441_v32, 0.0  ;;  %v12452_v42 = vmul.f32 %v24233_v53, %v24233_v53  ;;  %v24234_v32 = vld [vmem:[#allocation24_spill] sm:$0xff] }
 0x71e   : > { %12486 = vadd.xlane.f32.xlu0 %v12485_v23  ;;  %12495 = vadd.xlane.f32.xlu1 %v12494_v1  ;;  %v12515_v23 = vsel %vm441_vm1, %v12449_v27, 0.0  ;;  %v12451_v1 = vmul.f32 %v24234_v32, %v24234_v32 }
 0x71f   : > { %v12524_v40 = vsel %vm441_vm1, %v12452_v42, 0.0 }
 0x720   : > { %17565 = vmatmul.mubr.msk.f32.gmra.mrb[38].mxu0 %vm7707_vm7, %v22529_v28  ;;  %v24226_v28 = vld [vmem:[#allocation16_spill] sm:$0xff] }
 0x721   : > { %17567 = vmatprep.mubr.msk.f32.mxu0 %vm7707_vm7, %v22533_v37  ;;  %v12443_v50 = vmul.f32 %v24226_v28, %v24226_v28 }
 0x722   : > { %12492 = vadd.xlane.f32.xlu0 %v12491_v39  ;;  %12501 = vadd.xlane.f32.xlu1 %v12500_v6  ;;  %v24235_v39 = vld [vmem:[#allocation27_spill] sm:$0xff]  ;;  %v10424_v6 = vld [vmem:[#allocation3 + $0x142] sm:$0xff] }
 0x723   : > { %v12497_v37 = vsel %vm441_vm1, %v12443_v50, 0.0  ;;  %v12454_v50 = vmul.f32 %v24235_v39, %v24235_v39 }
 0x724   : > { %17568 = vmatmul.mubr.msk.f32.gmra.mrb[40].mxu0 %vm7707_vm7, %v22541_v57  ;;  %v24228_v57 = vld [vmem:[#allocation18_spill] sm:$0xff] }
 0x725   : > { %17570 = vmatprep.mubr.msk.f32.mxu0 %vm7707_vm7, %v22545_v60  ;;  %v12445_v34 = vmul.f32 %v24228_v57, %v24228_v57  ;;  %v12530_v63 = vsel %vm441_vm1, %v12454_v50, 0.0  ;;  %v24241_v50 = vld [vmem:[#allocation33_spill] sm:$0xff] }
 0x726   : > { %12498 = vadd.xlane.f32.xlu0 %v12497_v37  ;;  %12507 = vadd.xlane.f32.xlu1 %v12506_v46  ;;  %v12521_v37 = vsel %vm441_vm1, %v12451_v1, 0.0 }
 0x727   : > { %v12503_v60 = vsel %vm441_vm1, %v12445_v34, 0.0  ;;  %v24236_v34 = vld [vmem:[#allocation26_spill] sm:$0xff] }
 0x728   : > { %17571 = vmatmul.mubr.msk.f32.gmra.mrb[42].mxu0 %vm7707_vm7, %v22553_v20  ;;  %v24230_v20 = vld [vmem:[#allocation20_spill] sm:$0xff]  ;;  %v12453_v46 = vmul.f32 %v24236_v34, %v24236_v34 }
 0x729   : > { %17573 = vmatprep.mubr.msk.f32.mxu0 %vm7707_vm7, %v22557_v43  ;;  %v12447_v62 = vmul.f32 %v24230_v20, %v24230_v20  ;;  %v10421_v43 = vld [vmem:[#allocation3 + $0x122] sm:$0xff] }
 0x72a   : > { %12504 = vadd.xlane.f32.xlu0 %v12503_v60  ;;  %12513 = vadd.xlane.f32.xlu1 %v12512_v41  ;;  %v24237_v60 = vld [vmem:[#allocation29_spill] sm:$0xff] }
 0x72b   : > { %v10426_v41 = vld [vmem:[#allocation3 + $0x15a] sm:$0xff] }
 0x72c   : > { %17574 = vmatmul.mubr.msk.f32.gmra.mrb[44].mxu0 %vm7707_vm7, %v22561_v24  ;;  %v12509_v24 = vsel %vm441_vm1, %v12447_v62, 0.0  ;;  %v12456_v62 = vmul.f32 %v24237_v60, %v24237_v60 }
 0x72d   : > { %17576 = vmatprep.mubr.msk.f32.mxu0 %vm7707_vm7, %v22565_v38  ;;  %v10423_v38 = vld [vmem:[#allocation3 + $0x13a] sm:$0xff] }
 0x72e   : > { %12510 = vadd.xlane.f32.xlu0 %v12509_v24  ;;  %12519 = vadd.xlane.f32.xlu1 %v12518_v59  ;;  %v12536_v27 = vsel %vm441_vm1, %v12456_v62, 0.0  ;;  %v24239_v59 = vld [vmem:[#allocation31_spill] sm:$0xff] }
 0x72f   : > { %v12458_v42 = vmul.f32 %v24239_v59, %v24239_v59  ;;  %v24243_v62 = vld [vmem:[#allocation35_spill] sm:$0xff] }
 0x730   : > { %17577 = vmatmul.mubr.msk.f32.gmra.mrb[46].mxu0 %vm7707_vm7, %v10420_v44  ;;  %v12527_v44 = vsel %vm441_vm1, %v12453_v46, 0.0 }
 0x731   : > { %17579 = vmatprep.mubr.msk.f32.mxu0 %vm7707_vm7, %v10421_v43  ;;  %v24238_v43 = vld [vmem:[#allocation28_spill] sm:$0xff] }
 0x732   : > { %12516 = vadd.xlane.f32.xlu0 %v12515_v23  ;;  %12525 = vadd.xlane.f32.xlu1 %v12524_v40  ;;  %v12455_v24 = vmul.f32 %v24238_v43, %v24238_v43  ;;  %v24240_v23 = vld [vmem:[#allocation30_spill] sm:$0xff]  ;;  %v12542_v40 = vsel %vm441_vm1, %v12458_v42, 0.0 }
 0x733   : > { %v12457_v1 = vmul.f32 %v24240_v23, %v24240_v23  ;;  %v10435_v42 = vld [vmem:[#allocation3 + $0x1ca] sm:$0xff] }
 0x734   : > { %17580 = vmatmul.mubr.msk.f32.gmra.mrb[48].mxu0 %vm7707_vm7, %v10422_v58  ;;  %v10428_v58 = vld [vmem:[#allocation3 + $0x172] sm:$0xff] }
 0x735   : > { %17582 = vmatprep.mubr.msk.f32.mxu0 %vm7707_vm7, %v10423_v38  ;;  %v12533_v38 = vsel %vm441_vm1, %v12455_v24, 0.0 }
 0x736   : > { %12522 = vadd.xlane.f32.xlu0 %v12521_v37  ;;  %12531 = vadd.xlane.f32.xlu1 %v12530_v63  ;;  %v24242_v37 = vld [vmem:[#allocation32_spill] sm:$0xff] }
 0x737   : > { %v12459_v46 = vmul.f32 %v24242_v37, %v24242_v37 }
 0x738   : > { %17583 = vmatmul.mubr.msk.f32.gmra.mrb[50].mxu0 %vm7707_vm7, %v10424_v6  ;;  %v12460_v6 = vmul.f32 %v24241_v50, %v24241_v50 }
 0x739   : > { %17585 = vmatprep.mubr.msk.f32.mxu0 %vm7707_vm7, %v10425_v17  ;;  %v12539_v17 = vsel %vm441_vm1, %v12457_v1, 0.0  ;;  %v10795_v1 = vld [vmem:[#allocation3 + $0x64] sm:$0xff] }
 0x73a   : > { %12528 = vadd.xlane.f32.xlu0 %v12527_v44  ;;  %12537 = vadd.xlane.f32.xlu1 %v12536_v27  ;;  %v12548_v63 = vsel %vm441_vm1, %v12460_v6, 0.0  ;;  %v10434_v27 = vld [vmem:[#allocation3 + $0x1ba] sm:$0xff]  ;;  %v10796_v6 = vld [vmem:[#allocation3 + $0x6c] sm:$0xff] }
 0x73c   : > { %17586 = vmatmul.mubr.msk.f32.gmra.mrb[52].mxu0 %vm7707_vm7, %v10426_v41  ;;  %v12462_v41 = vmul.f32 %v24243_v62, %v24243_v62 }
 0x73d   : > { %17588 = vmatprep.mubr.msk.f32.mxu0 %vm7707_vm7, %v10427_v35  ;;  %v10433_v35 = vld [vmem:[#allocation3 + $0x1b2] sm:$0xff] }
 0x73e   : > { %12534 = vadd.xlane.f32.xlu0 %v12533_v38  ;;  %12543 = vadd.xlane.f32.xlu1 %v12542_v40  ;;  %v12554_v24 = vsel %vm441_vm1, %v12462_v41, 0.0  ;;  %v10436_v38 = vld [vmem:[#allocation3 + $0x1d2] sm:$0xff]  ;;  %v10800_v41 = vld [vmem:[#allocation3 + $0x9c] sm:$0xff] }
 0x740   : > { %17589 = vmatmul.mubr.msk.f32.gmra.mrb[54].mxu0 %vm7707_vm7, %v10428_v58  ;;  %v24245_v58 = vld [vmem:[#allocation36_spill] sm:$0xff] }
 0x741   : > { %17591 = vmatprep.mubr.msk.f32.mxu0 %vm7707_vm7, %v22587_v49  ;;  %v12545_v49 = vsel %vm441_vm1, %v12459_v46, 0.0  ;;  %v10798_v46 = vld [vmem:[#allocation3 + $0x84] sm:$0xff] }
 0x742   : > { %12540 = vadd.xlane.f32.xlu0 %v12539_v17  ;;  %12549 = vadd.xlane.f32.xlu1 %v12548_v63  ;;  %v10797_v17 = vld [vmem:[#allocation3 + $0x7c] sm:$0xff]  ;;  %v10799_v63 = vld [vmem:[#allocation3 + $0x94] sm:$0xff] }
 0x744   : > { %17592 = vmatmul.mubr.msk.f32.gmra.mrb[56].mxu0 %vm7707_vm7, %v22591_v4  ;;  %v24244_v4 = vld [vmem:[#allocation34_spill] sm:$0xff] }
 0x745   : > { %17594 = vmatprep.mubr.msk.f32.mxu0 %vm7707_vm7, %v22595_v47  ;;  %v12461_v44 = vmul.f32 %v24244_v4, %v24244_v4 }
 0x746   : > { %12546 = vadd.xlane.f32.xlu0 %v12545_v49  ;;  %12555 = vadd.xlane.f32.xlu1 %v12554_v24  ;;  %v10802_v49 = vld [vmem:[#allocation3 + $0xb4] sm:$0xff]  ;;  %v10804_v24 = vld [vmem:[#allocation3 + $0xcc] sm:$0xff] }
 0x747   : > { %v12551_v47 = vsel %vm441_vm1, %v12461_v44, 0.0  ;;  %v10803_v44 = vld [vmem:[#allocation3 + $0xc4] sm:$0xff] }
 0x748   : > { %17595 = vmatmul.mubr.msk.f32.gmra.mrb[58].mxu0 %vm7707_vm7, %v22599_v36  ;;  %v12463_v36 = vmul.f32 %v24245_v58, %v24245_v58 }
 0x749   : > { %17597 = vmatprep.mubr.msk.f32.mxu0 %vm7707_vm7, %v10433_v35  ;;  %v10801_v35 = vld [vmem:[#allocation3 + $0xac] sm:$0xff] }
 0x74a   : > { %12552 = vadd.xlane.f32.xlu0 %v12551_v47  ;;  %v12557_v40 = vsel %vm441_vm1, %v12463_v36, 0.0  ;;  %v10807_v47 = vld [vmem:[#allocation3 + $0xf4] sm:$0xff]  ;;  %v10808_v36 = vld [vmem:[#allocation3 + $0xfc] sm:$0xff] }
 0x74c   : > { %17598 = vmatmul.mubr.msk.f32.gmra.mrb[60].mxu0 %vm7707_vm7, %v10434_v27  ;;  %v10805_v27 = vld [vmem:[#allocation3 + $0xdc] sm:$0xff] }
 0x74d   : > { %17600 = vmatprep.mubr.msk.f32.mxu0 %vm7707_vm7, %v10435_v42  ;;  %v10806_v42 = vld [vmem:[#allocation3 + $0xe4] sm:$0xff] }
 0x74e   : > { %12558 = vadd.xlane.f32.xlu0 %v12557_v40  ;;  %v10811_v40 = vld [vmem:[#allocation3 + $0x124] sm:$0xff] }
 0x750   : > { %17601 = vmatmul.mubr.msk.f32.gmra.mrb[62].mxu0 %vm7707_vm7, %v10436_v38  ;;  %v10809_v38 = vld [vmem:[#allocation3 + $0x10c] sm:$0xff] }
 0x751   : > { %17611 = vmatprep.mubr.msk.f32.mxu0 %vm7707_vm7, %v10795_v1  ;;  %v10810_v1 = vld [vmem:[#allocation3 + $0x114] sm:$0xff] }
 0x754   : > { %17612 = vmatmul.mubr.msk.f32.vlgmr.msra.gmra.mrb[32].mxu0 %vm7707_vm7, %v10796_v6  ;;  %v19248_v6 = vld [vmem:[#allocation3 + $0x12c] sm:$0xff] }
 0x755   : > { %17614 = vmatprep.mubr.msk.f32.mxu0 %vm7707_vm7, %v10797_v17 }
 0x758   : > { %17615 = vmatmul.mubr.msk.f32.gmra.mrb[34].mxu0 %vm7707_vm7, %v10798_v46 }
 0x759   : > { %17617 = vmatprep.mubr.msk.f32.mxu0 %vm7707_vm7, %v10799_v63 }
 0x75c   : > { %17618 = vmatmul.mubr.msk.f32.gmra.mrb[36].mxu0 %vm7707_vm7, %v10800_v41 }
 0x75d   : > { %17620 = vmatprep.mubr.msk.f32.mxu0 %vm7707_vm7, %v10801_v35 }
 0x760   : > { %17621 = vmatmul.mubr.msk.f32.gmra.mrb[38].mxu0 %vm7707_vm7, %v10802_v49 }
 0x761   : > { %17623 = vmatprep.mubr.msk.f32.mxu0 %vm7707_vm7, %v10803_v44 }
 0x764   : > { %17624 = vmatmul.mubr.msk.f32.gmra.mrb[40].mxu0 %vm7707_vm7, %v10804_v24 }
 0x765   : > { %17626 = vmatprep.mubr.msk.f32.mxu0 %vm7707_vm7, %v10805_v27 }
 0x768   : > { %17627 = vmatmul.mubr.msk.f32.gmra.mrb[42].mxu0 %vm7707_vm7, %v10806_v42 }
 0x769   : > { %17629 = vmatprep.mubr.msk.f32.mxu0 %vm7707_vm7, %v10807_v47 }
 0x76c   : > { %17630 = vmatmul.mubr.msk.f32.gmra.mrb[44].mxu0 %vm7707_vm7, %v10808_v36 }
 0x76d   : > { %17632 = vmatprep.mubr.msk.f32.mxu0 %vm7707_vm7, %v10809_v38 }
 0x770   : > { %17633 = vmatmul.mubr.msk.f32.gmra.mrb[46].mxu0 %vm7707_vm7, %v10810_v1 }
 0x771   : > { %17635 = vmatprep.mubr.msk.f32.mxu0 %vm7707_vm7, %v10811_v40 }
 0x774   : > { %17636 = vmatmul.mubr.msk.f32.gmra.mrb[48].mxu0 %vm7707_vm7, %v19248_v6 }
 0x775   : > { %17638 = vmatprep.mubr.msk.f32.mxu0 %vm7707_vm7, %v24208_v25  ;;  %v10823_v25 = vld [vmem:[#allocation3 + $0x1b4] sm:$0xff] }
 0x778   : > { %17639 = vmatmul.mubr.msk.f32.gmra.mrb[50].mxu0 %vm7707_vm7, %v24209_v33  ;;  %v10824_v33 = vld [vmem:[#allocation3 + $0x1bc] sm:$0xff] }
 0x779   : > { %17641 = vmatprep.mubr.msk.f32.mxu0 %vm7707_vm7, %v24210_v51  ;;  %v10825_v51 = vld [vmem:[#allocation3 + $0x1cc] sm:$0xff] }
 0x77c   : > { %17642 = vmatmul.mubr.msk.f32.gmra.mrb[52].mxu0 %vm7707_vm7, %v24211_v61  ;;  %v10826_v61 = vld [vmem:[#allocation3 + $0x1d4] sm:$0xff] }
 0x77d   : > { %17644 = vmatprep.mubr.msk.f32.mxu0 %vm7707_vm7, %v24212_v3  ;;  %v12656_v3 = vld [vmem:[%s23705_s11] sm:$0xf] }
 0x77e   : > { %17825 = vmatprep.subr.msk.mxu1 %vm767_vm0, %v12656_v3 }
 0x780   : > { %17645 = vmatmul.mubr.msk.f32.gmra.mrb[54].mxu0 %vm7707_vm7, %v24213_v8 }
 0x781   : > { %17647 = vmatprep.mubr.msk.f32.mxu0 %vm7707_vm7, %v22672_v31 }
 0x784   : > { %17648 = vmatmul.mubr.msk.f32.gmra.mrb[56].mxu0 %vm7707_vm7, %v22676_v54 }
 0x785   : > { %17650 = vmatprep.mubr.msk.f32.mxu0 %vm7707_vm7, %v22680_v15  ;;  %v22957_v15 = vpop.xlane.xlu1 %12468 }
 0x788   : > { %17651 = vmatmul.mubr.msk.f32.gmra.mrb[58].mxu0 %vm7707_vm7, %v22684_v10 }
 0x789   : > { %17653 = vmatprep.mubr.msk.f32.mxu0 %vm7707_vm7, %v10823_v25  ;;  %v22961_v17 = vpop.xlane.xlu1 %12477  ;;  %v22986_v25 = vld [vmem:[%s23700_s6] ss:$0 sm:$0xff] }
 0x78c   : > { %17654 = vmatmul.mubr.msk.f32.gmra.mrb[60].mxu0 %vm7707_vm7, %v10824_v33 }
 0x78d   : > { %17656 = vmatprep.mubr.msk.f32.mxu0 %vm7707_vm7, %v10825_v51  ;;  %v22965_v63 = vpop.xlane.xlu1 %12483 }
 0x790   : > { %17657 = vmatmul.mubr.msk.f32.gmra.mrb[62].mxu0 %vm7707_vm7, %v10826_v61 }
 0x798   : > { %v22951_v8 = vpop.xlane.xlu0 %12465 }
 0x79f   : > { %v22953_v31 = vpop.xlane.xlu0 %12471 }
 0x7a3   : > { %v22955_v54 = vpop.xlane.xlu0 %12474 }
 0x7a7   : > { %v22959_v10 = vpop.xlane.xlu0 %12480  ;;  %v22969_v35 = vpop.xlane.xlu1 %12489 }
 0x7ab   : > { %v22963_v46 = vpop.xlane.xlu0 %12486  ;;  %v22973_v44 = vpop.xlane.xlu1 %12495 }
 0x7af   : > { %v22967_v41 = vpop.xlane.xlu0 %12492  ;;  %v22977_v27 = vpop.xlane.xlu1 %12501 }
 0x7b3   : > { %v22971_v49 = vpop.xlane.xlu0 %12498  ;;  %v22981_v47 = vpop.xlane.xlu1 %12507 }
 0x7b7   : > { %v22975_v24 = vpop.xlane.xlu0 %12504  ;;  %v12514_v38 = vpop.xlane.xlu1 %12513 }
 0x7b8   : > { %v12576_v40 = vmax.f32 %v12514_v38, 1e-24 }
 0x7bb   : > { %v22979_v42 = vpop.xlane.xlu0 %12510 }
 0x7bf   : > { %v12517_v36 = vpop.xlane.xlu0 %12516 }
 0x7c0   : > { %v12577_v1 = vmax.f32 %v12517_v36, 1e-24 }
 0x7c2   : > { %19052 = vrsqrt.f32 %v12577_v1 }
 0x7c3   : > { %19054 = vrsqrt.f32 %v12576_v40 }
 0x7cc   : > { %v19053_v6 = vpop.eup %19052 }
 0x7cd   : > { %v19055_v33 = vpop.eup %19054  ;;  %v22990_v21 = vmul.f32 %v19053_v6, %v24232_v52 }
 0x7ce   : > { %v22994_v36 = vmul.f32 %v19055_v33, %v24229_v56 }
 0x7cf   : > { %24246 = vst [vmem:[#allocation82_spill] sm:$0xff] %v22990_v21 }
 0x7d0   : > { %24247 = vst [vmem:[#allocation83_spill] sm:$0xff] %v22994_v36  ;;  %v18111_v11 = vpack.c.bf16 %v22990_v21, %v22994_v36 }
 0x827   : > { %v17613_v51 = vpop.f32.mrb[32].mxu0 }
 0x828   : > { %v11192_v61 = vadd.f32 %v17613_v51, %v22986_v25  ;;  %v10994_v20 = vpop.f32.mrb[33].mxu0 }
 0x829   : > { %v11191_v57 = vadd.f32 %v22986_v25, %v10994_v20 }
 0x82a   : > { %v11224_v40 = vmax.f32 %v11192_v61, 0.0 }
 0x82b   : > { %v11223_v38 = vmax.f32 %v11191_v57, 0.0  ;;  %v17616_v1 = vpop.f32.mrb[34].mxu0 }
 0x82c   : > { %v11194_v58 = vadd.f32 %v17616_v1, %v22986_v25  ;;  %v11004_v62 = vpop.f32.mrb[35].mxu0 }
 0x82d   : > { %v11193_v51 = vadd.f32 %v22986_v25, %v11004_v62  ;;  %17777 = vmatprep.mubr.msk.f32.mxu1 %vm12036_vm8, %v11223_v38 }
 0x82e   : > { %17778 = vmatmul.mubr.msk.f32.vlgmr.msra.gmra.mrb[70].mxu1 %vm12036_vm8, %v11224_v40  ;;  %v11226_v56 = vmax.f32 %v11194_v58, 0.0 }
 0x82f   : > { %v11225_v20 = vmax.f32 %v11193_v51, 0.0  ;;  %v17619_v52 = vpop.f32.mrb[36].mxu0  ;;  %17826 = vmatpush3.msk.msra.mxu1 %vm767_vm0, %v12656_v3 }
 0x830   : > { %v11196_v57 = vadd.f32 %v17619_v52, %v22986_v25  ;;  %v11014_v6 = vpop.f32.mrb[37].mxu0  ;;  %18112 = vmatprep.subr.bf16.mxu1 %v18111_v11 }
 0x831   : > { %v11195_v33 = vadd.f32 %v22986_v25, %v11014_v6  ;;  %17780 = vmatprep.mubr.msk.f32.mxu1 %vm12036_vm8, %v11225_v20 }
 0x832   : > { %17781 = vmatmul.mubr.msk.f32.gmra.mrb[72].mxu1 %vm12036_vm8, %v11226_v56  ;;  %v11228_v38 = vmax.f32 %v11196_v57, 0.0 }
 0x833   : > { %v11227_v62 = vmax.f32 %v11195_v33, 0.0  ;;  %v17622_v61 = vpop.f32.mrb[38].mxu0 }
 0x834   : > { %v11198_v1 = vadd.f32 %v17622_v61, %v22986_v25  ;;  %v11024_v40 = vpop.f32.mrb[39].mxu0 }
 0x835   : > { %v11197_v51 = vadd.f32 %v22986_v25, %v11024_v40  ;;  %17783 = vmatprep.mubr.msk.f32.mxu1 %vm12036_vm8, %v11227_v62 }
 0x836   : > { %17784 = vmatmul.mubr.msk.f32.gmra.mrb[74].mxu1 %vm12036_vm8, %v11228_v38  ;;  %v11230_v3 = vmax.f32 %v11198_v1, 0.0 }
 0x837   : > { %v11229_v58 = vmax.f32 %v11197_v51, 0.0  ;;  %v17625_v11 = vpop.f32.mrb[40].mxu0 }
 0x838   : > { %v11200_v52 = vadd.f32 %v17625_v11, %v22986_v25  ;;  %v11034_v20 = vpop.f32.mrb[41].mxu0 }
 0x839   : > { %v11199_v56 = vadd.f32 %v22986_v25, %v11034_v20  ;;  %17786 = vmatprep.mubr.msk.f32.mxu1 %vm12036_vm8, %v11229_v58 }
 0x83a   : > { %17787 = vmatmul.mubr.msk.f32.gmra.mrb[76].mxu1 %vm12036_vm8, %v11230_v3  ;;  %v11232_v33 = vmax.f32 %v11200_v52, 0.0 }
 0x83b   : > { %v11231_v57 = vmax.f32 %v11199_v56, 0.0  ;;  %v17628_v6 = vpop.f32.mrb[42].mxu0 }
 0x83c   : > { %v11202_v61 = vadd.f32 %v17628_v6, %v22986_v25  ;;  %v11044_v62 = vpop.f32.mrb[43].mxu0 }
 0x83d   : > { %v11201_v38 = vadd.f32 %v22986_v25, %v11044_v62  ;;  %17789 = vmatprep.mubr.msk.f32.mxu1 %vm12036_vm8, %v11231_v57 }
 0x83e   : > { %17790 = vmatmul.mubr.msk.f32.gmra.mrb[78].mxu1 %vm12036_vm8, %v11232_v33  ;;  %v11234_v51 = vmax.f32 %v11202_v61, 0.0 }
 0x83f   : > { %v11233_v1 = vmax.f32 %v11201_v38, 0.0  ;;  %v17631_v40 = vpop.f32.mrb[44].mxu0 }
 0x840   : > { %v11204_v11 = vadd.f32 %v17631_v40, %v22986_v25  ;;  %v11054_v58 = vpop.f32.mrb[45].mxu0 }
 0x841   : > { %v11203_v3 = vadd.f32 %v22986_v25, %v11054_v58  ;;  %17792 = vmatprep.mubr.msk.f32.mxu1 %vm12036_vm8, %v11233_v1 }
 0x842   : > { %17793 = vmatmul.mubr.msk.f32.gmra.mrb[80].mxu1 %vm12036_vm8, %v11234_v51  ;;  %v11236_v56 = vmax.f32 %v11204_v11, 0.0 }
 0x843   : > { %v11235_v52 = vmax.f32 %v11203_v3, 0.0  ;;  %v17634_v20 = vpop.f32.mrb[46].mxu0 }
 0x844   : > { %v11206_v6 = vadd.f32 %v17634_v20, %v22986_v25  ;;  %v11064_v57 = vpop.f32.mrb[47].mxu0 }
 0x845   : > { %v11205_v33 = vadd.f32 %v22986_v25, %v11064_v57  ;;  %17795 = vmatprep.mubr.msk.f32.mxu1 %vm12036_vm8, %v11235_v52 }
 0x846   : > { %17796 = vmatmul.mubr.msk.f32.gmra.mrb[82].mxu1 %vm12036_vm8, %v11236_v56  ;;  %v11238_v38 = vmax.f32 %v11206_v6, 0.0 }
 0x847   : > { %v11237_v61 = vmax.f32 %v11205_v33, 0.0  ;;  %v17637_v62 = vpop.f32.mrb[48].mxu0 }
 0x848   : > { %v11208_v40 = vadd.f32 %v17637_v62, %v22986_v25  ;;  %v11074_v1 = vpop.f32.mrb[49].mxu0 }
 0x849   : > { %v11207_v51 = vadd.f32 %v22986_v25, %v11074_v1  ;;  %17798 = vmatprep.mubr.msk.f32.mxu1 %vm12036_vm8, %v11237_v61  ;;  %v12523_v1 = vpop.xlane.xlu0 %12522 }
 0x84a   : > { %17799 = vmatmul.mubr.msk.f32.gmra.mrb[84].mxu1 %vm12036_vm8, %v11238_v38  ;;  %v11240_v3 = vmax.f32 %v11208_v40, 0.0  ;;  %v12520_v40 = vpop.xlane.xlu1 %12519 }
 0x84b   : > { %v11239_v11 = vmax.f32 %v11207_v51, 0.0  ;;  %v17640_v58 = vpop.f32.mrb[50].mxu0 }
 0x84c   : > { %v11210_v20 = vadd.f32 %v17640_v58, %v22986_v25  ;;  %v11084_v52 = vpop.f32.mrb[51].mxu0 }
 0x84d   : > { %v11209_v56 = vadd.f32 %v22986_v25, %v11084_v52  ;;  %17801 = vmatprep.mubr.msk.f32.mxu1 %vm12036_vm8, %v11239_v11 }
 0x84e   : > { %17802 = vmatmul.mubr.msk.f32.gmra.mrb[86].mxu1 %vm12036_vm8, %v11240_v3  ;;  %v11242_v33 = vmax.f32 %v11210_v20, 0.0 }
 0x84f   : > { %v11241_v6 = vmax.f32 %v11209_v56, 0.0  ;;  %v17643_v57 = vpop.f32.mrb[52].mxu0  ;;  %v12529_v56 = vpop.xlane.xlu0 %12528 }
 0x850   : > { %v11212_v62 = vadd.f32 %v17643_v57, %v22986_v25  ;;  %v11094_v61 = vpop.f32.mrb[53].mxu0  ;;  %v12526_v57 = vpop.xlane.xlu1 %12525 }
 0x851   : > { %v11211_v38 = vadd.f32 %v22986_v25, %v11094_v61  ;;  %17804 = vmatprep.mubr.msk.f32.mxu1 %vm12036_vm8, %v11241_v6  ;;  %v12560_v61 = vmax.f32 %v22951_v8, 1e-24  ;;  %v12562_v8 = vmax.f32 %v22953_v31, 1e-24 }
 0x852   : > { %17805 = vmatmul.mubr.msk.f32.gmra.mrb[88].mxu1 %vm12036_vm8, %v11242_v33  ;;  %v11244_v52 = vmax.f32 %v11212_v62, 0.0  ;;  %v12561_v33 = vmax.f32 %v22957_v15, 1e-24 }
 0x853   : > { %v11243_v51 = vmax.f32 %v11211_v38, 0.0  ;;  %v17646_v58 = vpop.f32.mrb[54].mxu0  ;;  %v12535_v28 = vpop.xlane.xlu0 %12534  ;;  %19056 = vrsqrt.f32 %v12560_v61  ;;  %v12581_v61 = vmax.f32 %v12529_v56, 1e-24  ;;  %v12566_v56 = vmax.f32 %v22965_v63, 1e-24 }
 0x854   : > { %v11214_v11 = vadd.f32 %v17646_v58, %v22986_v25  ;;  %v11104_v3 = vpop.f32.mrb[55].mxu0  ;;  %v12578_v58 = vmax.f32 %v12520_v40, 1e-24  ;;  %19058 = vrsqrt.f32 %v12561_v33  ;;  %v12580_v33 = vmax.f32 %v12526_v57, 1e-24 }
 0x855   : > { %v11213_v20 = vadd.f32 %v22986_v25, %v11104_v3  ;;  %17807 = vmatprep.mubr.msk.f32.mxu1 %vm12036_vm8, %v11243_v51  ;;  %v12579_v51 = vmax.f32 %v12523_v1, 1e-24  ;;  %v23048_v3 = vpop.xlane.xlu1 %12531 }
 0x856   : > { %17808 = vmatmul.mubr.msk.f32.gmra.mrb[90].mxu1 %vm12036_vm8, %v11244_v52  ;;  %v11246_v38 = vmax.f32 %v11214_v11, 0.0  ;;  %19060 = vrsqrt.f32 %v12578_v58  ;;  %v12582_v63 = vmax.f32 %v23048_v3, 1e-24 }
 0x857   : > { %v11245_v6 = vmax.f32 %v11213_v20, 0.0  ;;  %v17649_v21 = vpop.f32.mrb[56].mxu0  ;;  %v12541_v1 = vpop.xlane.xlu0 %12540  ;;  %19062 = vrsqrt.f32 %v12579_v51  ;;  %v12583_v51 = vmax.f32 %v12535_v28, 1e-24 }
 0x858   : > { %v11216_v62 = vadd.f32 %v17649_v21, %v22986_v25  ;;  %v11114_v36 = vpop.f32.mrb[57].mxu0  ;;  %v12563_v21 = vmax.f32 %v22955_v54, 1e-24  ;;  %19064 = vrsqrt.f32 %v12562_v8 }
 0x859   : > { %v11215_v4 = vadd.f32 %v22986_v25, %v11114_v36  ;;  %17810 = vmatprep.mubr.msk.f32.mxu1 %vm12036_vm8, %v11245_v6  ;;  %v12564_v36 = vmax.f32 %v22961_v17, 1e-24  ;;  %v23057_v31 = vpop.xlane.xlu1 %12537 }
 0x85a   : > { %17811 = vmatmul.mubr.msk.f32.gmra.mrb[92].mxu1 %vm12036_vm8, %v11246_v38  ;;  %v11248_v11 = vmax.f32 %v11216_v62, 0.0  ;;  %19066 = vrsqrt.f32 %v12563_v21 }
 0x85b   : > { %v11247_v52 = vmax.f32 %v11215_v4, 0.0  ;;  %v17652_v15 = vpop.f32.mrb[58].mxu0  ;;  %19068 = vrsqrt.f32 %v12564_v36  ;;  %v12547_v21 = vpop.xlane.xlu0 %12546 }
 0x85c   : > { %v18195_v40 = vadd.f32 %v17652_v15, %v22525_v29  ;;  %v11124_v20 = vpop.f32.mrb[59].mxu0  ;;  %v12565_v29 = vmax.f32 %v22959_v10, 1e-24  ;;  %19070 = vrsqrt.f32 %v12581_v61  ;;  %v12567_v15 = vmax.f32 %v22963_v46, 1e-24 }
 0x85d   : > { %v18196_v6 = vadd.f32 %v11124_v20, %v22527_v22  ;;  %17813 = vmatprep.mubr.msk.f32.mxu1 %vm12036_vm8, %v11247_v52  ;;  %v12544_v52 = vpop.xlane.xlu1 %12543 }
 0x85e   : > { %v11218_v4 = vadd.f32 %v18195_v40, %v22986_v25  ;;  %17814 = vmatmul.mubr.msk.f32.gmra.mrb[94].mxu1 %vm12036_vm8, %v11248_v11  ;;  %19072 = vrsqrt.f32 %v12565_v29  ;;  %v19057_v11 = vpop.eup %19056  ;;  %v12568_v40 = vmax.f32 %v22969_v35, 1e-24 }
 0x85f   : > { %v11217_v54 = vadd.f32 %v18196_v6, %v22986_v25  ;;  %v17655_v17 = vpop.f32.mrb[60].mxu0  ;;  %19074 = vrsqrt.f32 %v12580_v33  ;;  %v19059_v20 = vpop.eup %19058  ;;  %v12585_v6 = vmax.f32 %v12541_v1, 1e-24 }
 0x860   : > { %v18197_v22 = vadd.f32 %v17655_v17, %v22537_v45  ;;  %v11134_v38 = vpop.f32.mrb[61].mxu0  ;;  %v11250_v8 = vmax.f32 %v11218_v4, 0.0  ;;  %19076 = vrsqrt.f32 %v12566_v56  ;;  %v19061_v61 = vpop.eup %19060  ;;  %v12587_v56 = vmax.f32 %v12547_v21, 1e-24 }
 0x861   : > { %v11249_v62 = vmax.f32 %v11217_v54, 0.0  ;;  %v18198_v58 = vadd.f32 %v11134_v38, %v22539_v30  ;;  %19078 = vrsqrt.f32 %v12583_v51  ;;  %v19063_v3 = vpop.eup %19062  ;;  %v12584_v54 = vmax.f32 %v23057_v31, 1e-24  ;;  %v12550_v35 = vpop.xlane.xlu1 %12549 }
 0x862   : > { %v11220_v10 = vadd.f32 %v18197_v22, %v22986_v25  ;;  %19080 = vrsqrt.f32 %v12567_v15  ;;  %v19065_v17 = vpop.eup %19064  ;;  %v12553_v1 = vpop.xlane.xlu0 %12552  ;;  %v12624_v38 = vmul.f32 %v19057_v11, %v24214_v48  ;;  %v23083_v51 = vmul.f32 %v19061_v61, %v24231_v19 }
 0x863   : > { %v11219_v57 = vadd.f32 %v18198_v58, %v22986_v25  ;;  %v17658_v45 = vpop.f32.mrb[62].mxu0  ;;  %17816 = vmatprep.mubr.msk.f32.mxu1 %vm12036_vm8, %v11249_v62  ;;  %19082 = vrsqrt.f32 %v12582_v63  ;;  %v12569_v58 = vmax.f32 %v22967_v41, 1e-24  ;;  %v23086_v31 = vmul.f32 %v19063_v3, %v24234_v32 }
 0x864   : > { %v18199_v30 = vadd.f32 %v17658_v45, %v22549_v18  ;;  %v11144_v28 = vpop.f32.mrb[63].mxu0  ;;  %17817 = vmatmul.mubr.msk.f32.gmra.mrb[96].mxu1 %vm12036_vm8, %v11250_v8  ;;  %v11252_v4 = vmax.f32 %v11220_v10, 0.0  ;;  %19084 = vrsqrt.f32 %v12568_v40  ;;  %v19067_v33 = vpop.eup %19066  ;;  %v12570_v10 = vmax.f32 %v22973_v44, 1e-24 }
 0x865   : > { %v11251_v46 = vmax.f32 %v11219_v57, 0.0  ;;  %v18200_v36 = vadd.f32 %v11144_v28, %v22551_v26  ;;  %v12586_v26 = vmax.f32 %v12544_v52, 1e-24  ;;  %19086 = vrsqrt.f32 %v12585_v6  ;;  %v19069_v62 = vpop.eup %19068  ;;  %v12556_v57 = vpop.xlane.xlu1 %12555 }
 0x866   : > { %v11222_v29 = vadd.f32 %v18199_v30, %v22986_v25  ;;  %v19071_v8 = vpop.eup %19070  ;;  %v12625_v52 = vmul.f32 %v19059_v20, %v24215_v0  ;;  %19088 = vrsqrt.f32 %v12584_v54  ;;  %v12588_v15 = vmax.f32 %v12550_v35, 1e-24  ;;  %v12559_v11 = vpop.xlane.xlu0 %12558 }
 0x867   : > { %v11221_v18 = vadd.f32 %v18200_v36, %v22986_v25  ;;  %17819 = vmatprep.mubr.msk.f32.mxu1 %vm12036_vm8, %v11251_v46  ;;  %19090 = vrsqrt.f32 %v12586_v26  ;;  %v12626_v19 = vmul.f32 %v19065_v17, %v24216_v2  ;;  %v12589_v21 = vmax.f32 %v12553_v1, 1e-24 }
 0x868   : > { %17820 = vmatmul.mubr.msk.f32.gmra.mrb[98].mxu1 %vm12036_vm8, %v11252_v4  ;;  %v11254_v25 = vmax.f32 %v11222_v29, 0.0  ;;  %v19073_v48 = vpop.eup %19072  ;;  %v18113_v32 = vpack.c.bf16 %v12625_v52, %v12624_v38  ;;  %19092 = vrsqrt.f32 %v12587_v56  ;;  %v12571_v45 = vmax.f32 %v22971_v49, 1e-24 }
 0x869   : > { %v11253_v22 = vmax.f32 %v11221_v18, 0.0  ;;  %v19075_v41 = vpop.eup %19074  ;;  %19094 = vrsqrt.f32 %v12569_v58  ;;  %v18115_v44 = vpack.c.bf16 %v23086_v31, %v23083_v51  ;;  %v23098_v63 = vmul.f32 %v19071_v8, %v24236_v34 }
 0x86a   : > { %v19077_v0 = vpop.eup %19076  ;;  %19096 = vrsqrt.f32 %v12570_v10  ;;  %v12627_v28 = vmul.f32 %v19067_v33, %v24218_v9  ;;  %v12572_v2 = vmax.f32 %v22977_v27, 1e-24  ;;  %v23104_v20 = vmul.f32 %v19075_v41, %v24233_v53  ;;  %v24248_v10 = vld [vmem:[#allocation34_spill] sm:$0xff] }
 0x86b   : > { %17822 = vmatprep.mubr.msk.f32.mxu1 %vm12036_vm8, %v11253_v22  ;;  %v19079_v30 = vpop.eup %19078  ;;  %19098 = vrsqrt.f32 %v12588_v15  ;;  %v12590_v49 = vmax.f32 %v12556_v57, 1e-24  ;;  %v12628_v34 = vmul.f32 %v19069_v62, %v24217_v55  ;;  %v12591_v6 = vmax.f32 %v12559_v11, 1e-24  ;;  %v24249_v15 = vld [vmem:[#allocation16_spill] sm:$0xff]  ;;  %v24253_v11 = vld [vmem:[#allocation18_spill] sm:$0xff] }
 0x86c   : > { %17823 = vmatmul.mubr.msk.f32.gmra.mrb[100].mxu1 %vm12036_vm8, %v11254_v25  ;;  %v19081_v40 = vpop.eup %19080  ;;  %v18117_v36 = vpack.c.bf16 %v12627_v28, %v12626_v19  ;;  %19100 = vrsqrt.f32 %v12589_v21  ;;  %v12573_v27 = vmax.f32 %v22975_v24, 1e-24  ;;  %v18119_v53 = vpack.c.bf16 %v23098_v63, %v23104_v20 }
 0x86d   : > { %17827 = vmatprep.mubr.msk.f32.mxu1 %vm441_vm1, %v12624_v38  ;;  %v19083_v46 = vpop.eup %19082  ;;  %19102 = vrsqrt.f32 %v12571_v45  ;;  %v23112_v61 = vmul.f32 %v19079_v30, %v24238_v43  ;;  %v12629_v29 = vmul.f32 %v19073_v48, %v24220_v5  ;;  %v12574_v55 = vmax.f32 %v22981_v47, 1e-24 }
 0x86e   : > { %v19085_v9 = vpop.eup %19084  ;;  %19104 = vrsqrt.f32 %v12572_v2  ;;  %v23118_v3 = vmul.f32 %v19083_v46, %v24235_v39  ;;  %v12630_v18 = vmul.f32 %v19077_v0, %v24219_v12  ;;  %v12575_v5 = vmax.f32 %v22979_v42, 1e-24  ;;  %v24251_v0 = vld [vmem:[#allocation35_spill] sm:$0xff] }
 0x86f   : > { %v19087_v4 = vpop.eup %19086  ;;  %19106 = vrsqrt.f32 %v12590_v49  ;;  %v18121_v43 = vpack.c.bf16 %v12629_v29, %v12628_v34  ;;  %v12631_v17 = vmul.f32 %v19081_v40, %v24222_v16  ;;  %v12632_v42 = vmul.f32 %v19085_v9, %v24221_v14  ;;  %v24254_v40 = vld [vmem:[#allocation19_spill] sm:$0xff] }
 0x870   : > { %17828 = vmatmul.mubr.msk.f32.vlgmr.msra.gmra.mrb[102].mxu1 %vm441_vm1, %v12625_v52  ;;  %v19089_v24 = vpop.eup %19088  ;;  %19108 = vrsqrt.f32 %v12591_v6  ;;  %v18123_v47 = vpack.c.bf16 %v23112_v61, %v23118_v3  ;;  %v23126_v39 = vmul.f32 %v19087_v4, %v24240_v23  ;;  %v19260_v2 = vmov 0  }
 0x871   : > { %17830 = vmatprep.mubr.msk.f32.mxu1 %vm441_vm1, %v12626_v19  ;;  %18114 = vmatpush3.bf16.msra.mxu1 %v18113_v32  ;;  %v19091_v54 = vpop.eup %19090  ;;  %19110 = vrsqrt.f32 %v12573_v27  ;;  %v23131_v12 = vmul.f32 %v19089_v24, %v24237_v60  ;;  %v18125_v33 = vpack.c.bf16 %v12631_v17, %v12630_v18  ;;  %v24250_v19 = vld [vmem:[#allocation17_spill] sm:$0xff]  ;;  %v24256_v27 = vld [vmem:[#allocation83_spill] sm:$0xff] }
 0x872   : > { %18116 = vmatprep.subr.bf16.mxu1 %v18115_v44  ;;  %v19093_v35 = vpop.eup %19092  ;;  %19112 = vrsqrt.f32 %v12574_v55  ;;  %v12650_v23 = vmul.f32 %v19091_v54, %v24239_v59  ;;  %19013 = vset.pattern.permute.xlu1 %v19260_v2 }
 0x873   : > { %v19095_v26 = vpop.eup %19094  ;;  %19114 = vrsqrt.f32 %v12575_v5  ;;  %v18127_v16 = vpack.c.bf16 %v23126_v39, %v23131_v12  ;;  %v12651_v38 = vmul.f32 %v19093_v35, %v24242_v37  ;;  %19014 = vset.pattern.permute.xlu0 %v19260_v2 }
 0x874   : > { %17831 = vmatmul.mubr.msk.f32.gmra.mrb[104].mxu1 %vm441_vm1, %v12627_v28  ;;  %v19097_v1 = vpop.eup %19096  ;;  %v12633_v60 = vmul.f32 %v19095_v26, %v24224_v7 }
 0x875   : > { %17833 = vmatprep.mubr.msk.f32.mxu1 %vm441_vm1, %v12628_v34  ;;  %18118 = vmatpush3.bf16.msra.mxu1 %v18117_v36  ;;  %v19099_v22 = vpop.eup %19098  ;;  %v12634_v14 = vmul.f32 %v19097_v1, %v24223_v13  ;;  %v18131_v52 = vpack.c.bf16 %v12651_v38, %v12650_v23  ;;  %v24255_v36 = vld [vmem:[#allocation20_spill] sm:$0xff] }
 0x876   : > { %18120 = vmatprep.subr.bf16.mxu1 %v18119_v53  ;;  %v19101_v56 = vpop.eup %19100  ;;  %v18129_v58 = vpack.c.bf16 %v12633_v60, %v12632_v42  ;;  %v12652_v59 = vmul.f32 %v19099_v22, %v24241_v50  ;;  %v24252_v50 = vld [vmem:[#allocation36_spill] sm:$0xff]  ;;  %v24257_v53 = vld [vmem:[#allocation82_spill] sm:$0xff] }
 0x877   : > { %v19103_v62 = vpop.eup %19102  ;;  %v12653_v37 = vmul.f32 %v19101_v56, %v24248_v10 }
 0x878   : > { %17834 = vmatmul.mubr.msk.f32.gmra.mrb[106].mxu1 %vm441_vm1, %v12629_v29  ;;  %v19105_v25 = vpop.eup %19104  ;;  %v12635_v7 = vmul.f32 %v19103_v62, %v24249_v15 }
 0x879   : > { %17836 = vmatprep.mubr.msk.f32.mxu1 %vm441_vm1, %v12630_v18  ;;  %18122 = vmatpush3.bf16.msra.mxu1 %v18121_v43  ;;  %v19107_v8 = vpop.eup %19106  ;;  %v12636_v32 = vmul.f32 %v19105_v25, %v24250_v19  ;;  %v18135_v57 = vpack.c.bf16 %v12653_v37, %v12652_v59 }
 0x87a   : > { %18124 = vmatprep.subr.bf16.mxu1 %v18123_v47  ;;  %v19109_v48 = vpop.eup %19108  ;;  %v18133_v13 = vpack.c.bf16 %v12635_v7, %v12634_v14  ;;  %v12654_v45 = vmul.f32 %v19107_v8, %v24251_v0 }
 0x87b   : > { %v19111_v41 = vpop.eup %19110  ;;  %v12655_v44 = vmul.f32 %v19109_v48, %v24252_v50 }
 0x87c   : > { %17837 = vmatmul.mubr.msk.f32.gmra.mrb[108].mxu1 %vm441_vm1, %v12631_v17  ;;  %v19113_v21 = vpop.eup %19112  ;;  %v12637_v30 = vmul.f32 %v19111_v41, %v24253_v11 }
 0x87d   : > { %17839 = vmatprep.mubr.msk.f32.mxu1 %vm441_vm1, %v12632_v42  ;;  %18126 = vmatpush3.bf16.msra.mxu1 %v18125_v33  ;;  %v19115_v28 = vpop.eup %19114  ;;  %v12638_v49 = vmul.f32 %v19113_v21, %v24254_v40  ;;  %v18139_v34 = vpack.c.bf16 %v12655_v44, %v12654_v45 }
 0x87e   : > { %18128 = vmatprep.subr.bf16.mxu1 %v18127_v16  ;;  %v18137_v46 = vpack.c.bf16 %v12637_v30, %v12636_v32  ;;  %v12639_v6 = vmul.f32 %v19115_v28, %v24255_v36 }
 0x880   : > { %17840 = vmatmul.mubr.msk.f32.gmra.mrb[110].mxu1 %vm441_vm1, %v12633_v60  ;;  %v18141_v9 = vpack.c.bf16 %v12639_v6, %v12638_v49 }
 0x881   : > { %17842 = vmatprep.mubr.msk.f32.mxu1 %vm441_vm1, %v12634_v14  ;;  %18130 = vmatpush3.bf16.msra.mxu1 %v18129_v58 }
 0x882   : > { %18132 = vmatprep.subr.bf16.mxu1 %v18131_v52 }
 0x884   : > { %17843 = vmatmul.mubr.msk.f32.gmra.mrb[112].mxu1 %vm441_vm1, %v12635_v7 }
 0x885   : > { %17845 = vmatprep.mubr.msk.f32.mxu1 %vm441_vm1, %v12636_v32  ;;  %18134 = vmatpush3.bf16.msra.mxu1 %v18133_v13 }
 0x886   : > { %18136 = vmatprep.subr.bf16.mxu1 %v18135_v57 }
 0x888   : > { %17846 = vmatmul.mubr.msk.f32.gmra.mrb[114].mxu1 %vm441_vm1, %v12637_v30 }
 0x889   : > { %17848 = vmatprep.mubr.msk.f32.mxu1 %vm441_vm1, %v12638_v49  ;;  %18138 = vmatpush3.bf16.msra.mxu1 %v18137_v46 }
 0x88a   : > { %18140 = vmatprep.subr.bf16.mxu1 %v18139_v34 }
 0x88c   : > { %17849 = vmatmul.mubr.msk.f32.gmra.mrb[116].mxu1 %vm441_vm1, %v12639_v6 }
 0x88d   : > { %17851 = vmatprep.mubr.msk.f32.mxu1 %vm441_vm1, %v24256_v27  ;;  %18142 = vmatpush3.bf16.msra.mxu1 %v18141_v9 }
 0x890   : > { %17852 = vmatmul.mubr.msk.f32.gmra.mrb[118].mxu1 %vm441_vm1, %v24257_v53 }
 0x891   : > { %17854 = vmatprep.mubr.msk.f32.mxu1 %vm441_vm1, %v23083_v51  ;;  %v23185_v51 = vld [vmem:[#allocation4] ss:$0 sm:$0xff] }
 0x894   : > { %17855 = vmatmul.mubr.msk.f32.gmra.mrb[120].mxu1 %vm441_vm1, %v23086_v31 }
 0x895   : > { %17857 = vmatprep.mubr.msk.f32.mxu1 %vm441_vm1, %v23104_v20 }
 0x898   : > { %17858 = vmatmul.mubr.msk.f32.gmra.mrb[122].mxu1 %vm441_vm1, %v23098_v63 }
 0x899   : > { %17860 = vmatprep.mubr.msk.f32.mxu1 %vm441_vm1, %v23118_v3 }
 0x89c   : > { %17861 = vmatmul.mubr.msk.f32.gmra.mrb[124].mxu1 %vm441_vm1, %v23112_v61 }
 0x89d   : > { %17863 = vmatprep.mubr.msk.f32.mxu1 %vm441_vm1, %v23131_v12 }
 0x8a0   : > { %17864 = vmatmul.mubr.msk.f32.gmra.mrb[126].mxu1 %vm441_vm1, %v23126_v39 }
 0x8a1   : > { %17866 = vmatprep.mubr.msk.f32.mxu1 %vm441_vm1, %v12650_v23 }
 0x8a4   : > { %17867 = vmatmul.mubr.msk.f32.gmra.mrb[128].mxu1 %vm441_vm1, %v12651_v38 }
 0x8a5   : > { %17869 = vmatprep.mubr.msk.f32.mxu1 %vm441_vm1, %v12652_v59 }
 0x8a8   : > { %17870 = vmatmul.mubr.msk.f32.gmra.mrb[130].mxu1 %vm441_vm1, %v12653_v37 }
 0x8a9   : > { %17872 = vmatprep.mubr.msk.f32.mxu1 %vm441_vm1, %v12654_v45 }
 0x8ac   : > { %17873 = vmatmul.mubr.msk.f32.gmra.mrb[132].mxu1 %vm441_vm1, %v12655_v44 }
 0x901   : > { %v17779_v31 = vpop.f32.mrb[70].mxu1 }
 0x902   : > { %v12401_v63 = vadd.f32 %v17779_v31, %v23185_v51  ;;  %v12202_v20 = vpop.f32.mrb[71].mxu1 }
 0x903   : > { %v12400_v4 = vadd.f32 %v23185_v51, %v12202_v20 }
 0x904   : > { %13341 = vperm.xlu1 %19013, %v12401_v63  }
 0x905   : > { %v17782_v61 = vpop.f32.mrb[72].mxu1 }
 0x906   : > { %v12212_v29 = vpop.f32.mrb[73].mxu1  ;;  %v12403_v3 = vadd.f32 %v17782_v61, %v23185_v51 }
 0x907   : > { %v12402_v43 = vadd.f32 %v23185_v51, %v12212_v29 }
 0x908   : > { %13336 = vperm.xlu1 %19013, %v12400_v4  }
 0x909   : > { %v17785_v55 = vpop.f32.mrb[74].mxu1 }
 0x90a   : > { %v12222_v24 = vpop.f32.mrb[75].mxu1  ;;  %v12405_v39 = vadd.f32 %v17785_v55, %v23185_v51 }
 0x90b   : > { %v12404_v26 = vadd.f32 %v23185_v51, %v12222_v24 }
 0x90c   : > { %13351 = vperm.xlu1 %19013, %v12403_v3  }
 0x90d   : > { %v17788_v18 = vpop.f32.mrb[76].mxu1 }
 0x90e   : > { %v12232_v54 = vpop.f32.mrb[77].mxu1  ;;  %v12407_v42 = vadd.f32 %v17788_v18, %v23185_v51 }
 0x90f   : > { %v12406_v5 = vadd.f32 %v23185_v51, %v12232_v54 }
 0x910   : > { %13346 = vperm.xlu1 %19013, %v12402_v43  }
 0x911   : > { %13366 = vperm.xlu0 %19014, %v12406_v5   ;;  %v17791_v47 = vpop.f32.mrb[78].mxu1 }
 0x912   : > { %v12242_v35 = vpop.f32.mrb[79].mxu1  ;;  %v12409_v16 = vadd.f32 %v17791_v47, %v23185_v51 }
 0x913   : > { %v12408_v62 = vadd.f32 %v23185_v51, %v12242_v35 }
 0x914   : > { %13361 = vperm.xlu1 %19013, %v12405_v39  }
 0x915   : > { %v17794_v17 = vpop.f32.mrb[80].mxu1 }
 0x916   : > { %v12252_v12 = vpop.f32.mrb[81].mxu1  ;;  %v12411_v8 = vadd.f32 %v17794_v17, %v23185_v51 }
 0x917   : > { %v12410_v37 = vadd.f32 %v23185_v51, %v12252_v12 }
 0x918   : > { %13356 = vperm.xlu1 %19013, %v12404_v26  }
 0x919   : > { %v17797_v1 = vpop.f32.mrb[82].mxu1 }
 0x91a   : > { %v12262_v33 = vpop.f32.mrb[83].mxu1  ;;  %v12413_v41 = vadd.f32 %v17797_v1, %v23185_v51 }
 0x91b   : > { %v12412_v21 = vadd.f32 %v23185_v51, %v12262_v33 }
 0x91c   : > { %13371 = vperm.xlu1 %19013, %v12407_v42  }
 0x91d   : > { %v17800_v22 = vpop.f32.mrb[84].mxu1 }
 0x91e   : > { %v23197_v23 = vadd.f32 %v17800_v22, %v23185_v51  ;;  %v12272_v38 = vpop.f32.mrb[85].mxu1 }
 0x91f   : > { %v23200_v56 = vadd.f32 %v23185_v51, %v12272_v38 }
 0x920   : > { %13381 = vperm.xlu1 %19013, %v12409_v16  }
 0x921   : > { %v17803_v60 = vpop.f32.mrb[86].mxu1 }
 0x922   : > { %v12417_v25 = vadd.f32 %v17803_v60, %v23185_v51  ;;  %v12282_v14 = vpop.f32.mrb[87].mxu1 }
 0x923   : > { %v12416_v52 = vadd.f32 %v23185_v51, %v12282_v14 }
 0x924   : > { %13376 = vperm.xlu1 %19013, %v12408_v62   ;;  %13421 = vperm.xlu0 %19014, %v12417_v25  }
 0x925   : > { %v17806_v58 = vpop.f32.mrb[88].mxu1 }
 0x926   : > { %v12292_v59 = vpop.f32.mrb[89].mxu1  ;;  %v12419_v48 = vadd.f32 %v17806_v58, %v23185_v51 }
 0x927   : > { %v12418_v19 = vadd.f32 %v23185_v51, %v12292_v59 }
 0x928   : > { %13391 = vperm.xlu1 %19013, %v12411_v8   ;;  %13416 = vperm.xlu0 %19014, %v12416_v52  }
 0x929   : > { %v17809_v10 = vpop.f32.mrb[90].mxu1 }
 0x92a   : > { %v12302_v15 = vpop.f32.mrb[91].mxu1  ;;  %v12421_v57 = vadd.f32 %v17809_v10, %v23185_v51 }
 0x92b   : > { %v12420_v50 = vadd.f32 %v23185_v51, %v12302_v15 }
 0x92c   : > { %13386 = vperm.xlu1 %19013, %v12410_v37   ;;  %13431 = vperm.xlu0 %19014, %v12419_v48  }
 0x92d   : > { %v17812_v7 = vpop.f32.mrb[92].mxu1 }
 0x92e   : > { %v12312_v32 = vpop.f32.mrb[93].mxu1  ;;  %v12423_v44 = vadd.f32 %v17812_v7, %v23185_v51 }
 0x92f   : > { %v12422_v28 = vadd.f32 %v23185_v51, %v12312_v32 }
 0x930   : > { %13401 = vperm.xlu1 %19013, %v12413_v41   ;;  %13426 = vperm.xlu0 %19014, %v12418_v19  }
 0x931   : > { %v17815_v13 = vpop.f32.mrb[94].mxu1 }
 0x932   : > { %v12322_v0 = vpop.f32.mrb[95].mxu1  ;;  %v12425_v36 = vadd.f32 %v17815_v13, %v23185_v51 }
 0x933   : > { %v12424_v45 = vadd.f32 %v23185_v51, %v12322_v0 }
 0x934   : > { %13396 = vperm.xlu1 %19013, %v12412_v21   ;;  %13441 = vperm.xlu0 %19014, %v12421_v57  }
 0x937   : > { %v17818_v11 = vpop.f32.mrb[96].mxu1 }
 0x938   : > { %13436 = vperm.xlu0 %19014, %v12420_v50   ;;  %13451 = vperm.xlu1 %19013, %v12423_v44   ;;  %v12332_v30 = vpop.f32.mrb[97].mxu1  ;;  %v12427_v2 = vadd.f32 %v17818_v11, %v23185_v51 }
 0x939   : > { %v12426_v6 = vadd.f32 %v23185_v51, %v12332_v30 }
 0x93b   : > { %v17821_v40 = vpop.f32.mrb[98].mxu1 }
 0x93c   : > { %v12429_v49 = vadd.f32 %v17821_v40, %v23185_v51  ;;  %13446 = vperm.xlu1 %19013, %v12422_v28   ;;  %13471 = vperm.xlu0 %19014, %v12427_v2   ;;  %v12342_v46 = vpop.f32.mrb[99].mxu1 }
 0x93d   : > { %v12428_v34 = vadd.f32 %v23185_v51, %v12342_v46 }
 0x93f   : > { %v17824_v9 = vpop.f32.mrb[100].mxu1 }
 0x940   : > { %v23222_v27 = vadd.f32 %v17824_v9, %v23185_v51  ;;  %13461 = vperm.xlu1 %19013, %v12425_v36   ;;  %13466 = vperm.xlu0 %19014, %v12426_v6   ;;  %v12352_v53 = vpop.f32.mrb[101].mxu1 }
 0x941   : > { %v12430_v31 = vadd.f32 %v23185_v51, %v12352_v53 }
 0x943   : > { %v23225_v63 = vpop.f32.mrb[102].mxu1 }
 0x944   : > { %13456 = vperm.xlu1 %19013, %v12424_v45   ;;  %13481 = vperm.xlu0 %19014, %v12429_v49   ;;  %v23227_v20 = vpop.f32.mrb[103].mxu1  ;;  %v12985_v42 = vsel %vm12981_vm9, %v23225_v63, -inf }
 0x945   : > { %v12982_v62 = vsel %vm12981_vm9, %v23227_v20, -inf }
 0x947   : > { %v23229_v61 = vpop.f32.mrb[104].mxu1 }
 0x948   : > { %13476 = vperm.xlu0 %19014, %v12428_v34   ;;  %v23231_v4 = vpop.f32.mrb[105].mxu1  ;;  %v12991_v14 = vsel %vm12981_vm9, %v23229_v61, -inf }
 0x949   : > { %v12988_v37 = vsel %vm12981_vm9, %v23231_v4, -inf }
 0x94b   : > { %v23233_v29 = vpop.f32.mrb[106].mxu1 }
 0x94c   : > { %13486 = vperm.xlu0 %19014, %v12430_v31   ;;  %v23235_v55 = vpop.f32.mrb[107].mxu1  ;;  %v12997_v15 = vsel %vm12981_vm9, %v23233_v29, -inf }
 0x94d   : > { %v12994_v21 = vsel %vm12981_vm9, %v23235_v55, -inf }
 0x94f   : > { %v23237_v3 = vpop.f32.mrb[108].mxu1 }
 0x950   : > { %v23239_v24 = vpop.f32.mrb[109].mxu1  ;;  %v13003_v0 = vsel %vm12981_vm9, %v23237_v3, -inf }
 0x951   : > { %v13000_v11 = vsel %vm12981_vm9, %v23239_v24, -inf }
 0x953   : > { %v23241_v51 = vpop.f32.mrb[110].mxu1 }
 0x954   : > { %v23243_v18 = vpop.f32.mrb[111].mxu1  ;;  %v13009_v30 = vsel %vm12981_vm9, %v23241_v51, -inf }
 0x955   : > { %v13006_v40 = vsel %vm12981_vm9, %v23243_v18, -inf }
 0x957   : > { %v23245_v43 = vpop.f32.mrb[112].mxu1 }
 0x958   : > { %v23247_v54 = vpop.f32.mrb[113].mxu1  ;;  %v13015_v46 = vsel %vm12981_vm9, %v23245_v43, -inf }
 0x959   : > { %v13012_v36 = vsel %vm12981_vm9, %v23247_v54, -inf }
 0x95b   : > { %v23249_v5 = vpop.f32.mrb[114].mxu1 }
 0x95c   : > { %v23251_v47 = vpop.f32.mrb[115].mxu1  ;;  %v13021_v9 = vsel %vm12981_vm9, %v23249_v5, -inf }
 0x95f   : > { %v23253_v39 = vpop.f32.mrb[116].mxu1 }
 0x960   : > { %v23255_v35 = vpop.f32.mrb[117].mxu1 }
 0x963   : > { %v23257_v17 = vpop.f32.mrb[118].mxu1 }
 0x964   : > { %v23259_v26 = vpop.f32.mrb[119].mxu1  ;;  %v13033_v12 = vsel %vm12981_vm9, %v23257_v17, -inf }
 0x965   : > { %v13030_v22 = vsel %vm12981_vm9, %v23259_v26, -inf }
 0x967   : > { %v23263_v1 = vpop.f32.mrb[120].mxu1 }
 0x968   : > { %13034 = vmax.xlane.f32.xlu1 %v13033_v12  ;;  %v23267_v33 = vpop.f32.mrb[121].mxu1  ;;  %v13039_v60 = vsel %vm12981_vm9, %v23263_v1, -inf  ;;  %v13018_v12 = vsel %vm12981_vm9, %v23251_v47, -inf }
 0x969   : > { %v13036_v8 = vsel %vm12981_vm9, %v23267_v33, -inf }
 0x96b   : > { %12986 = vmax.xlane.f32.xlu0 %v12985_v42  ;;  %v23271_v16 = vpop.f32.mrb[122].mxu1 }
 0x96c   : > { %13031 = vmax.xlane.f32.xlu1 %v13030_v22  ;;  %v23273_v38 = vpop.f32.mrb[123].mxu1  ;;  %v13045_v10 = vsel %vm12981_vm9, %v23271_v16, -inf  ;;  %v13027_v22 = vsel %vm12981_vm9, %v23253_v39, -inf }
 0x96d   : > { %v13042_v41 = vsel %vm12981_vm9, %v23273_v38, -inf }
 0x96f   : > { %12983 = vmax.xlane.f32.xlu0 %v12982_v62  ;;  %v23279_v25 = vpop.f32.mrb[124].mxu1  ;;  %v13024_v62 = vsel %vm12981_vm9, %v23255_v35, -inf }
 0x970   : > { %13040 = vmax.xlane.f32.xlu1 %v13039_v60  ;;  %v23283_v58 = vpop.f32.mrb[125].mxu1  ;;  %v13051_v13 = vsel %vm12981_vm9, %v23279_v25, -inf }
 0x971   : > { %v13048_v50 = vsel %vm12981_vm9, %v23283_v58, -inf }
 0x973   : > { %12992 = vmax.xlane.f32.xlu0 %v12991_v14  ;;  %v23287_v52 = vpop.f32.mrb[126].mxu1 }
 0x974   : > { %13037 = vmax.xlane.f32.xlu1 %v13036_v8  ;;  %v23289_v59 = vpop.f32.mrb[127].mxu1  ;;  %v13057_v44 = vsel %vm12981_vm9, %v23287_v52, -inf }
 0x975   : > { %v13054_v28 = vsel %vm12981_vm9, %v23289_v59, -inf }
 0x977   : > { %12989 = vmax.xlane.f32.xlu0 %v12988_v37  ;;  %v23295_v48 = vpop.f32.mrb[128].mxu1 }
 0x978   : > { %13046 = vmax.xlane.f32.xlu1 %v13045_v10  ;;  %v23299_v7 = vpop.f32.mrb[129].mxu1  ;;  %v13063_v2 = vsel %vm12981_vm9, %v23295_v48, -inf }
 0x979   : > { %v13060_v49 = vsel %vm12981_vm9, %v23299_v7, -inf }
 0x97b   : > { %12998 = vmax.xlane.f32.xlu0 %v12997_v15  ;;  %v23303_v19 = vpop.f32.mrb[130].mxu1 }
 0x97c   : > { %13043 = vmax.xlane.f32.xlu1 %v13042_v41  ;;  %v23305_v32 = vpop.f32.mrb[131].mxu1  ;;  %v13069_v34 = vsel %vm12981_vm9, %v23303_v19, -inf }
 0x97d   : > { %v13066_v6 = vsel %vm12981_vm9, %v23305_v32, -inf }
 0x97f   : > { %12995 = vmax.xlane.f32.xlu0 %v12994_v21  ;;  %v23311_v57 = vpop.f32.mrb[132].mxu1 }
 0x980   : > { %13052 = vmax.xlane.f32.xlu1 %v13051_v13  ;;  %v23315_v45 = vpop.f32.mrb[133].mxu1  ;;  %v13075_v53 = vsel %vm12981_vm9, %v23311_v57, -inf }
 0x981   : > { %v13072_v42 = vsel %vm12981_vm9, %v23315_v45, -inf }
 0x983   : > { %13004 = vmax.xlane.f32.xlu0 %v13003_v0  ;;  %v23345_v31 = vpop.permute.xlu1 %13341 }
 0x984   : > { %13049 = vmax.xlane.f32.xlu1 %v13048_v50 }
 0x987   : > { %13001 = vmax.xlane.f32.xlu0 %v13000_v11  ;;  %v23353_v60 = vpop.permute.xlu1 %13336 }
 0x988   : > { %13058 = vmax.xlane.f32.xlu1 %v13057_v44 }
 0x98b   : > { %13010 = vmax.xlane.f32.xlu0 %v13009_v30  ;;  %v23357_v14 = vpop.permute.xlu1 %13351 }
 0x98c   : > { %13055 = vmax.xlane.f32.xlu1 %v13054_v28 }
 0x98f   : > { %13007 = vmax.xlane.f32.xlu0 %v13006_v40  ;;  %v23359_v8 = vpop.permute.xlu1 %13346 }
 0x990   : > { %13064 = vmax.xlane.f32.xlu1 %v13063_v2  ;;  %v23361_v10 = vpop.permute.xlu0 %13366 }
 0x993   : > { %13016 = vmax.xlane.f32.xlu0 %v13015_v46  ;;  %v23364_v37 = vpop.permute.xlu1 %13361 }
 0x994   : > { %13061 = vmax.xlane.f32.xlu1 %v13060_v49 }
 0x997   : > { %13013 = vmax.xlane.f32.xlu0 %v13012_v36  ;;  %v23368_v41 = vpop.permute.xlu1 %13356 }
 0x998   : > { %13070 = vmax.xlane.f32.xlu1 %v13069_v34 }
 0x99b   : > { %13022 = vmax.xlane.f32.xlu0 %v13021_v9  ;;  %v23373_v21 = vpop.permute.xlu1 %13371 }
 0x99c   : > { %13067 = vmax.xlane.f32.xlu1 %v13066_v6 }
 0x99f   : > { %13019 = vmax.xlane.f32.xlu0 %v13018_v12  ;;  %v23377_v50 = vpop.permute.xlu1 %13381 }
 0x9a0   : > { %13076 = vmax.xlane.f32.xlu1 %v13075_v53  ;;  %24258 = vst [vmem:[#allocation84_spill] sm:$0xff] %v23377_v50 }
 0x9a3   : > { %13028 = vmax.xlane.f32.xlu0 %v13027_v22  ;;  %v23366_v15 = vpop.permute.xlu0 %13421  ;;  %v23381_v11 = vpop.permute.xlu1 %13376 }
 0x9a4   : > { %13073 = vmax.xlane.f32.xlu1 %v13072_v42  ;;  %24259 = vst [vmem:[#allocation85_spill] sm:$0xff] %v23381_v11 }
 0x9a7   : > { %13025 = vmax.xlane.f32.xlu0 %v13024_v62  ;;  %v23371_v13 = vpop.permute.xlu0 %13416  ;;  %v23385_v30 = vpop.permute.xlu1 %13391 }
 0x9a8   : > { %24260 = vst [vmem:[#allocation86_spill] sm:$0xff] %v23385_v30 }
 0x9ab   : > { %v23375_v0 = vpop.permute.xlu0 %13431  ;;  %v23389_v2 = vpop.permute.xlu1 %13386 }
 0x9ac   : > { %24261 = vst [vmem:[#allocation87_spill] sm:$0xff] %v23389_v2 }
 0x9af   : > { %v23379_v44 = vpop.permute.xlu0 %13426  ;;  %v23393_v40 = vpop.permute.xlu1 %13401 }
 0x9b0   : > { %24263 = vst [vmem:[#allocation89_spill] sm:$0xff] %v23393_v40 }
 0x9b3   : > { %v23397_v46 = vpop.permute.xlu1 %13396 }
 0x9b4   : > { %24265 = vst [vmem:[#allocation91_spill] sm:$0xff] %v23397_v46 }
 0x9b5   : > { %13406 = vperm.xlu1 %19013, %v23200_v56   ;;  %v23383_v56 = vpop.permute.xlu0 %13441 }
 0x9b7   : > { %v23401_v36 = vpop.permute.xlu1 %13451 }
 0x9b9   : > { %v23387_v28 = vpop.permute.xlu0 %13436 }
 0x9bb   : > { %v23405_v9 = vpop.permute.xlu1 %13446 }
 0x9bd   : > { %13491 = vperm.xlu0 %19014, %v23222_v27   ;;  %v23391_v27 = vpop.permute.xlu0 %13471 }
 0x9be   : > { %24262 = vst [vmem:[#allocation88_spill] sm:$0xff] %v23391_v27 }
 0x9bf   : > { %v23409_v12 = vpop.permute.xlu1 %13461 }
 0x9c0   : > { %24269 = vst [vmem:[#allocation95_spill] sm:$0xff] %v23409_v12 }
 0x9c1   : > { %v23395_v49 = vpop.permute.xlu0 %13466 }
 0x9c2   : > { %24264 = vst [vmem:[#allocation90_spill] sm:$0xff] %v23395_v49 }
 0x9c3   : > { %v23413_v30 = vpop.permute.xlu1 %13456 }
 0x9c4   : > { %24270 = vst [vmem:[#allocation69_spill] sm:$0xff] %v23413_v30 }
 0x9c5   : > { %v23399_v34 = vpop.permute.xlu0 %13481 }
 0x9c6   : > { %24266 = vst [vmem:[#allocation92_spill] sm:$0xff] %v23399_v34 }
 0x9c9   : > { %v23403_v6 = vpop.permute.xlu0 %13476 }
 0x9ca   : > { %24267 = vst [vmem:[#allocation93_spill] sm:$0xff] %v23403_v6 }
 0x9cd   : > { %v23407_v53 = vpop.permute.xlu0 %13486 }
 0x9ce   : > { %24268 = vst [vmem:[#allocation94_spill] sm:$0xff] %v23407_v53 }
 0x9f5   : > { %v23416_v49 = vpop.xlane.xlu1 %13034 }
 0x9f8   : > { %v12987_v42 = vpop.xlane.xlu0 %12986 }
 0x9f9   : > { %v13079_v22 = vsub.f32 %v23225_v63, %v12987_v42 }
 0x9fb   : > { %v13112_v62 = vmul.f32 1.442695, %v13079_v22  ;;  %v23421_v22 = vpop.xlane.xlu1 %13031 }
 0x9fc   : > { %v12984_v40 = vpop.xlane.xlu0 %12983 }
 0x9fd   : > { %19116 = vpow2.f32 %v13112_v62  ;;  %v13078_v46 = vsub.f32 %v23227_v20, %v12984_v40 }
 0x9ff   : > { %v13110_v34 = vmul.f32 1.442695, %v13078_v46 }
 0xa00   : > { %v12993_v27 = vpop.xlane.xlu0 %12992 }
 0xa01   : > { %19118 = vpow2.f32 %v13110_v34  ;;  %v13081_v6 = vsub.f32 %v23229_v61, %v12993_v27 }
 0xa03   : > { %v13116_v53 = vmul.f32 1.442695, %v13081_v6 }
 0xa04   : > { %v12990_v2 = vpop.xlane.xlu0 %12989 }
 0xa05   : > { %19120 = vpow2.f32 %v13116_v53  ;;  %v13080_v50 = vsub.f32 %v23231_v4, %v12990_v2  ;;  %v23431_v2 = vpop.xlane.xlu1 %13040 }
 0xa07   : > { %v23419_v63 = vpop.eup %19116  ;;  %v13114_v42 = vmul.f32 1.442695, %v13080_v50 }
 0xa08   : > { %v12999_v20 = vpop.xlane.xlu0 %12998  ;;  %v13177_v40 = vsel %vm12981_vm9, %v23419_v63, 0.0 }
 0xa09   : > { %19122 = vpow2.f32 %v13114_v42  ;;  %v13083_v46 = vsub.f32 %v23233_v29, %v12999_v20  ;;  %13178 = vadd.xlane.f32.xlu0 %v13177_v40 }
 0xa0b   : > { %v23426_v61 = vpop.eup %19118  ;;  %v13120_v27 = vmul.f32 1.442695, %v13083_v46  ;;  %v23440_v46 = vpop.xlane.xlu1 %13037 }
 0xa0c   : > { %v12996_v34 = vpop.xlane.xlu0 %12995  ;;  %v13174_v4 = vsel %vm12981_vm9, %v23426_v61, 0.0 }
 0xa0d   : > { %19124 = vpow2.f32 %v13120_v27  ;;  %v13082_v50 = vsub.f32 %v23235_v55, %v12996_v34  ;;  %13175 = vadd.xlane.f32.xlu0 %v13174_v4 }
 0xa0f   : > { %v23433_v6 = vpop.eup %19120  ;;  %v13118_v53 = vmul.f32 1.442695, %v13082_v50 }
 0xa10   : > { %v13005_v62 = vpop.xlane.xlu0 %13004  ;;  %v13183_v29 = vsel %vm12981_vm9, %v23433_v6, 0.0 }
 0xa11   : > { %19126 = vpow2.f32 %v13118_v53  ;;  %v13085_v42 = vsub.f32 %v23237_v3, %v13005_v62  ;;  %13184 = vadd.xlane.f32.xlu0 %v13183_v29  ;;  %v23450_v29 = vpop.xlane.xlu1 %13046 }
 0xa13   : > { %v23438_v20 = vpop.eup %19122  ;;  %v13124_v40 = vmul.f32 1.442695, %v13085_v42 }
 0xa14   : > { %v13002_v55 = vpop.xlane.xlu0 %13001  ;;  %v13180_v27 = vsel %vm12981_vm9, %v23438_v20, 0.0 }
 0xa15   : > { %19128 = vpow2.f32 %v13124_v40  ;;  %v13084_v34 = vsub.f32 %v23239_v24, %v13002_v55  ;;  %13181 = vadd.xlane.f32.xlu0 %v13180_v27 }
 0xa17   : > { %v23445_v4 = vpop.eup %19124  ;;  %v13122_v50 = vmul.f32 1.442695, %v13084_v34 }
 0xa18   : > { %v13011_v53 = vpop.xlane.xlu0 %13010  ;;  %v13189_v3 = vsel %vm12981_vm9, %v23445_v4, 0.0 }
 0xa19   : > { %19130 = vpow2.f32 %v13122_v50  ;;  %v13087_v62 = vsub.f32 %v23241_v51, %v13011_v53  ;;  %13190 = vadd.xlane.f32.xlu0 %v13189_v3  ;;  %v23459_v50 = vpop.xlane.xlu1 %13043 }
 0xa1b   : > { %v23452_v42 = vpop.eup %19126  ;;  %v13128_v12 = vmul.f32 1.442695, %v13087_v62 }
 0xa1c   : > { %v13008_v40 = vpop.xlane.xlu0 %13007  ;;  %v13186_v24 = vsel %vm12981_vm9, %v23452_v42, 0.0 }
 0xa1d   : > { %19132 = vpow2.f32 %v13128_v12  ;;  %v13086_v55 = vsub.f32 %v23243_v18, %v13008_v40  ;;  %13187 = vadd.xlane.f32.xlu0 %v13186_v24  ;;  %v13095_v12 = vsub.f32 %v23257_v17, %v23416_v49  ;;  %v23471_v30 = vpop.xlane.xlu1 %13052 }
 0xa1f   : > { %v23457_v27 = vpop.eup %19128  ;;  %v13126_v34 = vmul.f32 1.442695, %v13086_v55 }
 0xa20   : > { %v13017_v51 = vpop.xlane.xlu0 %13016  ;;  %v13195_v53 = vsel %vm12981_vm9, %v23457_v27, 0.0 }
 0xa21   : > { %19134 = vpow2.f32 %v13126_v34  ;;  %v13089_v3 = vsub.f32 %v23245_v43, %v13017_v51  ;;  %13196 = vadd.xlane.f32.xlu0 %v13195_v53  ;;  %v13144_v43 = vmul.f32 1.442695, %v13095_v12  ;;  %v13094_v51 = vsub.f32 %v23259_v26, %v23421_v22 }
 0xa23   : > { %v23464_v62 = vpop.eup %19130  ;;  %v13132_v18 = vmul.f32 1.442695, %v13089_v3 }
 0xa24   : > { %v13014_v40 = vpop.xlane.xlu0 %13013  ;;  %v13192_v24 = vsel %vm12981_vm9, %v23464_v62, 0.0 }
 0xa25   : > { %19136 = vpow2.f32 %v13132_v18  ;;  %v13088_v55 = vsub.f32 %v23247_v54, %v13014_v40  ;;  %13193 = vadd.xlane.f32.xlu0 %v13192_v24  ;;  %v13142_v54 = vmul.f32 1.442695, %v13094_v51  ;;  %v13097_v18 = vsub.f32 %v23263_v1, %v23431_v2  ;;  %v13050_v40 = vpop.xlane.xlu1 %13049 }
 0xa27   : > { %v23473_v34 = vpop.eup %19132  ;;  %v13130_v53 = vmul.f32 1.442695, %v13088_v55 }
 0xa28   : > { %v13023_v11 = vpop.xlane.xlu0 %13022  ;;  %v13201_v17 = vsel %vm12981_vm9, %v23473_v34, 0.0 }
 0xa29   : > { %19138 = vpow2.f32 %v13130_v53  ;;  %v13091_v49 = vsub.f32 %v23249_v5, %v13023_v11  ;;  %13202 = vadd.xlane.f32.xlu0 %v13201_v17  ;;  %v13148_v5 = vmul.f32 1.442695, %v13097_v18  ;;  %v13096_v11 = vsub.f32 %v23267_v33, %v23440_v46  ;;  %v13059_v53 = vpop.xlane.xlu1 %13058 }
 0xa2a   : > { %19140 = vpow2.f32 %v13144_v43 }
 0xa2b   : > { %v23480_v3 = vpop.eup %19134  ;;  %v13136_v12 = vmul.f32 1.442695, %v13091_v49  ;;  %v13099_v49 = vsub.f32 %v23271_v16, %v23450_v29 }
 0xa2c   : > { %v13020_v24 = vpop.xlane.xlu0 %13019  ;;  %v13198_v26 = vsel %vm12981_vm9, %v23480_v3, 0.0 }
 0xa2d   : > { %19142 = vpow2.f32 %v13136_v12  ;;  %v13090_v22 = vsub.f32 %v23251_v47, %v13020_v24  ;;  %13199 = vadd.xlane.f32.xlu0 %v13198_v26  ;;  %v13146_v47 = vmul.f32 1.442695, %v13096_v11  ;;  %v13152_v24 = vmul.f32 1.442695, %v13099_v49  ;;  %v13056_v16 = vpop.xlane.xlu1 %13055 }
 0xa2e   : > { %19144 = vpow2.f32 %v13142_v54  ;;  %v13098_v26 = vsub.f32 %v23273_v38, %v23459_v50  ;;  %v13101_v38 = vsub.f32 %v23279_v25, %v23471_v30 }
 0xa2f   : > { %v23487_v55 = vpop.eup %19136  ;;  %v13134_v43 = vmul.f32 1.442695, %v13090_v22 }
 0xa30   : > { %v13029_v51 = vpop.xlane.xlu0 %13028  ;;  %v13207_v1 = vsel %vm12981_vm9, %v23487_v55, 0.0  ;;  %v13156_v49 = vmul.f32 1.442695, %v13101_v38 }
 0xa31   : > { %19146 = vpow2.f32 %v13134_v43  ;;  %v13093_v2 = vsub.f32 %v23253_v39, %v13029_v51  ;;  %13208 = vadd.xlane.f32.xlu0 %v13207_v1  ;;  %v13150_v43 = vmul.f32 1.442695, %v13098_v26 }
 0xa32   : > { %19148 = vpow2.f32 %v13148_v5 }
 0xa33   : > { %v23494_v17 = vpop.eup %19138  ;;  %v13140_v54 = vmul.f32 1.442695, %v13093_v2  ;;  %v13065_v2 = vpop.xlane.xlu1 %13064 }
 0xa34   : > { %v13026_v18 = vpop.xlane.xlu0 %13025  ;;  %v13204_v33 = vsel %vm12981_vm9, %v23494_v17, 0.0  ;;  %v23500_v46 = vpop.eup %19140 }
 0xa35   : > { %19150 = vpow2.f32 %v13140_v54  ;;  %v13092_v12 = vsub.f32 %v23255_v35, %v13026_v18  ;;  %13205 = vadd.xlane.f32.xlu1 %v13204_v33  ;;  %v13225_v29 = vsel %vm12981_vm9, %v23500_v46, 0.0  ;;  %v13100_v54 = vsub.f32 %v23283_v58, %v13050_v40 }
 0xa36   : > { %19152 = vpow2.f32 %v13146_v47 }
 0xa37   : > { %v23503_v39 = vpop.eup %19142  ;;  %v13138_v22 = vmul.f32 1.442695, %v13092_v12  ;;  %v13154_v12 = vmul.f32 1.442695, %v13100_v54  ;;  %v13062_v26 = vpop.xlane.xlu1 %13061 }
 0xa38   : > { %v13213_v5 = vsel %vm12981_vm9, %v23503_v39, 0.0  ;;  %v23511_v11 = vpop.eup %19144 }
 0xa39   : > { %19154 = vpow2.f32 %v13138_v22  ;;  %13226 = vadd.xlane.f32.xlu1 %v13225_v29  ;;  %13214 = vadd.xlane.f32.xlu0 %v13213_v5  ;;  %v13222_v50 = vsel %vm12981_vm9, %v23511_v11, 0.0  ;;  %v13102_v5 = vsub.f32 %v23289_v59, %v13056_v16  ;;  %v13104_v59 = vsub.f32 %v23299_v7, %v13062_v26 }
 0xa3a   : > { %19156 = vpow2.f32 %v13152_v24  ;;  %v13103_v24 = vsub.f32 %v23287_v52, %v13059_v53 }
 0xa3b   : > { %v23513_v35 = vpop.eup %19146  ;;  %19158 = vpow2.f32 %v13150_v43  ;;  %v13071_v52 = vpop.xlane.xlu1 %13070  ;;  %v13158_v53 = vmul.f32 1.442695, %v13102_v5 }
 0xa3c   : > { %v13210_v51 = vsel %vm12981_vm9, %v23513_v35, 0.0  ;;  %v23521_v1 = vpop.eup %19148  ;;  %19160 = vpow2.f32 %v13156_v49  ;;  %v13160_v29 = vmul.f32 1.442695, %v13103_v24 }
 0xa3d   : > { %13223 = vadd.xlane.f32.xlu1 %v13222_v50  ;;  %13211 = vadd.xlane.f32.xlu0 %v13210_v51  ;;  %v13231_v25 = vsel %vm12981_vm9, %v23521_v1, 0.0  ;;  %19162 = vpow2.f32 %v13154_v12  ;;  %v13105_v50 = vsub.f32 %v23295_v48, %v13065_v2  ;;  %v13162_v12 = vmul.f32 1.442695, %v13104_v59 }
 0xa3e   : > { %19164 = vpow2.f32 %v13160_v29  ;;  %v13107_v48 = vsub.f32 %v23303_v19, %v13071_v52 }
 0xa3f   : > { %v23523_v47 = vpop.eup %19150  ;;  %19166 = vpow2.f32 %v13158_v53  ;;  %v13164_v54 = vmul.f32 1.442695, %v13105_v50  ;;  %v13068_v16 = vpop.xlane.xlu1 %13067 }
 0xa40   : > { %24271 = vst [vmem:[#allocation70_spill] sm:$0xff] %v23523_v47  ;;  %v13219_v30 = vsel %vm12981_vm9, %v23523_v47, 0.0  ;;  %v23530_v18 = vpop.eup %19152  ;;  %v13168_v7 = vmul.f32 1.442695, %v13107_v48  ;;  %v13106_v26 = vsub.f32 %v23305_v32, %v13068_v16 }
 0xa41   : > { %13232 = vadd.xlane.f32.xlu1 %v13231_v25  ;;  %13220 = vadd.xlane.f32.xlu0 %v13219_v30  ;;  %v13228_v58 = vsel %vm12981_vm9, %v23530_v18, 0.0  ;;  %19168 = vpow2.f32 %v13164_v54 }
 0xa42   : > { %19170 = vpow2.f32 %v13162_v12  ;;  %v13166_v5 = vmul.f32 1.442695, %v13106_v26  ;;  %v23595_v26 = vpop.permute.xlu0 %13491 }
 0xa43   : > { %v23532_v33 = vpop.eup %19154  ;;  %19172 = vpow2.f32 %v13168_v7  ;;  %24275 = vst [vmem:[#allocation40_spill] sm:$0xff] %v23595_v26 }
 0xa44   : > { %24272 = vst [vmem:[#allocation71_spill] sm:$0xff] %v23532_v33  ;;  %v13216_v40 = vsel %vm12981_vm9, %v23532_v33, 0.0  ;;  %v23539_v22 = vpop.eup %19156  ;;  %19174 = vpow2.f32 %v13166_v5 }
 0xa45   : > { %13229 = vadd.xlane.f32.xlu1 %v13228_v58  ;;  %13217 = vadd.xlane.f32.xlu0 %v13216_v40  ;;  %v13237_v43 = vsel %vm12981_vm9, %v23539_v22, 0.0  ;;  %v23544_v38 = vpop.eup %19158  ;;  %v13077_v58 = vpop.xlane.xlu1 %13076 }
 0xa46   : > { %v13234_v51 = vsel %vm12981_vm9, %v23544_v38, 0.0  ;;  %v23549_v49 = vpop.eup %19160  ;;  %v13109_v19 = vsub.f32 %v23311_v57, %v13077_v58 }
 0xa47   : > { %v13243_v25 = vsel %vm12981_vm9, %v23549_v49, 0.0  ;;  %v23554_v30 = vpop.eup %19162 }
 0xa48   : > { %v13240_v2 = vsel %vm12981_vm9, %v23554_v30, 0.0  ;;  %v23559_v24 = vpop.eup %19164  ;;  %v13172_v50 = vmul.f32 1.442695, %v13109_v19 }
 0xa49   : > { %13238 = vadd.xlane.f32.xlu1 %v13237_v43  ;;  %v13249_v40 = vsel %vm12981_vm9, %v23559_v24, 0.0  ;;  %v23564_v29 = vpop.eup %19166  ;;  %v13074_v43 = vpop.xlane.xlu1 %13073 }
 0xa4a   : > { %v13246_v52 = vsel %vm12981_vm9, %v23564_v29, 0.0  ;;  %v13108_v32 = vsub.f32 %v23315_v45, %v13074_v43  ;;  %19176 = vpow2.f32 %v13172_v50 }
 0xa4b   : > { %v23569_v53 = vpop.eup %19168 }
 0xa4c   : > { %v23574_v54 = vpop.eup %19170  ;;  %v13170_v59 = vmul.f32 1.442695, %v13108_v32 }
 0xa4d   : > { %13235 = vadd.xlane.f32.xlu1 %v13234_v51  ;;  %v13255_v51 = vsel %vm12981_vm9, %v23569_v53, 0.0  ;;  %v13252_v57 = vsel %vm12981_vm9, %v23574_v54, 0.0  ;;  %v23578_v16 = vpop.eup %19172 }
 0xa4e   : > { %19178 = vpow2.f32 %v13170_v59  ;;  %v23582_v12 = vpop.eup %19174 }
 0xa4f   : > { %v13258_v45 = vsel %vm12981_vm9, %v23582_v12, 0.0 }
 0xa51   : > { %13244 = vadd.xlane.f32.xlu1 %v13243_v25  ;;  %v13261_v25 = vsel %vm12981_vm9, %v23578_v16, 0.0 }
 0xa54   : > { %v23586_v48 = vpop.eup %19176 }
 0xa55   : > { %13241 = vadd.xlane.f32.xlu1 %v13240_v2  ;;  %24273 = vst [vmem:[#allocation38_spill] sm:$0xff] %v23586_v48  ;;  %v13267_v2 = vsel %vm12981_vm9, %v23586_v48, 0.0 }
 0xa58   : > { %v23590_v58 = vpop.eup %19178 }
 0xa59   : > { %13250 = vadd.xlane.f32.xlu1 %v13249_v40  ;;  %24274 = vst [vmem:[#allocation37_spill] sm:$0xff] %v23590_v58  ;;  %v13264_v7 = vsel %vm12981_vm9, %v23590_v58, 0.0 }
 0xa5d   : > { %13247 = vadd.xlane.f32.xlu1 %v13246_v52  ;;  %v23597_v52 = vpop.permute.xlu1 %13406 }
 0xa5e   : > { %24276 = vst [vmem:[#allocation39_spill] sm:$0xff] %v23597_v52 }
 0xa61   : > { %13256 = vadd.xlane.f32.xlu1 %v13255_v51 }
 0xa65   : > { %13253 = vadd.xlane.f32.xlu1 %v13252_v57 }
 0xa69   : > { %13262 = vadd.xlane.f32.xlu1 %v13261_v25 }
 0xa6d   : > { %13259 = vadd.xlane.f32.xlu1 %v13258_v45 }
 0xa71   : > { %13268 = vadd.xlane.f32.xlu1 %v13267_v2 }
 0xa75   : > { %13265 = vadd.xlane.f32.xlu1 %v13264_v7 }
 0xa86   : > { %13411 = vperm.xlu1 %19013, %v23197_v23  }
 0xa96   : > { %v13179_v40 = vpop.xlane.xlu0 %13178 }
 0xa9a   : > { %v13176_v5 = vpop.xlane.xlu0 %13175 }
 0xa9b   : > { %19180 = vrcp.f32 %v13176_v5 }
 0xa9e   : > { %v13185_v19 = vpop.xlane.xlu0 %13184 }
 0xaa2   : > { %v13182_v43 = vpop.xlane.xlu0 %13181 }
 0xaa5   : > { %v19181_v45 = vpop.eup %19180 }
 0xaa6   : > { %v13191_v50 = vpop.xlane.xlu0 %13190  ;;  %v13271_v52 = vmul.f32 %v19181_v45, %v23426_v61 }
 0xaaa   : > { %v13188_v59 = vpop.xlane.xlu0 %13187 }
 0xaae   : > { %v13197_v25 = vpop.xlane.xlu0 %13196 }
 0xab2   : > { %v13194_v47 = vpop.xlane.xlu0 %13193 }
 0xac2   : > { %v23599_v32 = vpop.xlane.xlu1 %13205 }
 0xac6   : > { %v13227_v51 = vpop.xlane.xlu1 %13226 }
 0xac7   : > { %19182 = vrcp.f32 %v13227_v51 }
 0xac8   : > { %19184 = vrcp.f32 %v13179_v40 }
 0xaca   : > { %v13224_v57 = vpop.xlane.xlu1 %13223 }
 0xacb   : > { %19186 = vrcp.f32 %v13224_v57  ;;  %v13494_v57 = vmul.f32 %v23353_v60, %v13271_v52 }
 0xacc   : > { %19188 = vrcp.f32 %v13182_v43 }
 0xace   : > { %v13233_v23 = vpop.xlane.xlu1 %13232 }
 0xacf   : > { %19190 = vrcp.f32 %v13233_v23 }
 0xad0   : > { %19192 = vrcp.f32 %v13185_v19 }
 0xad1   : > { %v19183_v7 = vpop.eup %19182 }
 0xad2   : > { %v13230_v2 = vpop.xlane.xlu1 %13229  ;;  %v19185_v26 = vpop.eup %19184  ;;  %v13305_v40 = vmul.f32 %v19183_v7, %v23500_v46 }
 0xad3   : > { %19194 = vrcp.f32 %v13230_v2  ;;  %v13273_v19 = vmul.f32 %v19185_v26, %v23419_v63  ;;  %v13203_v2 = vpop.xlane.xlu0 %13202 }
 0xad4   : > { %19196 = vrcp.f32 %v13188_v59  ;;  %v13511_v61 = vmul.f32 %v23366_v15, %v13305_v40  ;;  %v19261_v59 = vmov 1.0|1.0  }
 0xad5   : > { %v19187_v58 = vpop.eup %19186  ;;  %v13495_v46 = vmul.f32 %v23345_v31, %v13273_v19  ;;  %18143 = vmatprep.subr.bf16.mxu1 %v19261_v59 }
 0xad6   : > { %v13239_v5 = vpop.xlane.xlu1 %13238  ;;  %v13303_v51 = vmul.f32 %v19187_v58, %v23511_v11  ;;  %v19189_v23 = vpop.eup %19188 }
 0xad7   : > { %19198 = vrcp.f32 %v13239_v5  ;;  %v13275_v60 = vmul.f32 %v19189_v23, %v23438_v20  ;;  %v19017_v52 = vpack.i.bf16 %v13495_v46, %v13511_v61 }
 0xad8   : > { %v13510_v43 = vmul.f32 %v23371_v13, %v13303_v51  ;;  %19200 = vrcp.f32 %v13191_v50  ;;  %v13200_v50 = vpop.xlane.xlu0 %13199 }
 0xad9   : > { %v19191_v45 = vpop.eup %19190  ;;  %v13496_v15 = vmul.f32 %v23359_v8, %v13275_v60 }
 0xada   : > { %v13236_v48 = vpop.xlane.xlu1 %13235  ;;  %v19015_v33 = vpack.i.bf16 %v13494_v57, %v13510_v43  ;;  %v19193_v11 = vpop.eup %19192  ;;  %v13309_v26 = vmul.f32 %v19191_v45, %v23521_v1 }
 0xadb   : > { %19202 = vrcp.f32 %v13236_v48 }
 0xadc   : > { %19016 = vxpose.xlu0.b32.start [1/16] (narrow) %v19015_v33, 8  ;;  %19204 = vrcp.f32 %v13194_v47  ;;  %v13277_v33 = vmul.f32 %v19193_v11, %v23433_v6  ;;  %v13209_v6 = vpop.xlane.xlu0 %13208 }
 0xadd   : > { %v19195_v58 = vpop.eup %19194 }
 0xade   : > { %v13245_v13 = vpop.xlane.xlu1 %13244  ;;  %v13307_v63 = vmul.f32 %v19195_v58, %v23530_v18  ;;  %v19197_v31 = vpop.eup %19196  ;;  %v13513_v18 = vmul.f32 %v23375_v0, %v13309_v26  ;;  %v13497_v8 = vmul.f32 %v23357_v14, %v13277_v33 }
 0xadf   : > { %19206 = vrcp.f32 %v13245_v13 }
 0xae0   : > { %19018 = vxpose.xlu0.b32.cont [2/16] (narrow) %v19017_v52, 8  ;;  %v13512_v48 = vmul.f32 %v23379_v44, %v13307_v63  ;;  %19208 = vrcp.f32 %v13197_v25  ;;  %v13279_v44 = vmul.f32 %v19197_v31, %v23452_v42  ;;  %v19021_v40 = vpack.i.bf16 %v13497_v8, %v13513_v18  ;;  %v13215_v14 = vpop.xlane.xlu0 %13214  ;;  %v24277_v31 = vld [vmem:[#allocation85_spill] sm:$0xff] }
 0xae1   : > { %v19199_v1 = vpop.eup %19198 }
 0xae2   : > { %v13242_v20 = vpop.xlane.xlu1 %13241  ;;  %v19019_v7 = vpack.i.bf16 %v13496_v15, %v13512_v48  ;;  %v19201_v47 = vpop.eup %19200  ;;  %v13313_v25 = vmul.f32 %v19199_v1, %v23539_v22  ;;  %v13498_v0 = vmul.f32 %v23368_v41, %v13279_v44 }
 0xae3   : > { %19210 = vrcp.f32 %v13242_v20  ;;  %v13281_v19 = vmul.f32 %v19201_v47, %v23445_v4  ;;  %v24278_v20 = vld [vmem:[#allocation69_spill] sm:$0xff]  ;;  %v24279_v47 = vld [vmem:[#allocation95_spill] sm:$0xff] }
 0xae4   : > { %19020 = vxpose.xlu0.b32.cont [3/16] (narrow) %v19019_v7, 8  ;;  %19212 = vrcp.f32 %v13200_v50  ;;  %v13515_v45 = vmul.f32 %v23383_v56, %v13313_v25  ;;  %v13212_v58 = vpop.xlane.xlu0 %13211 }
 0xae5   : > { %v19203_v5 = vpop.eup %19202  ;;  %v13499_v22 = vmul.f32 %v23364_v37, %v13281_v19 }
 0xae6   : > { %v13251_v51 = vpop.xlane.xlu1 %13250  ;;  %v13311_v57 = vmul.f32 %v19203_v5, %v23544_v38  ;;  %v19205_v23 = vpop.eup %19204 }
 0xae7   : > { %19214 = vrcp.f32 %v13251_v51  ;;  %v13283_v41 = vmul.f32 %v19205_v23, %v23464_v62  ;;  %v19025_v60 = vpack.i.bf16 %v13499_v22, %v13515_v45  ;;  %v24282_v23 = vld [vmem:[#allocation90_spill] sm:$0xff] }
 0xae8   : > { %19022 = vxpose.xlu0.b32.cont [4/16] (narrow) %v19021_v40, 8  ;;  %v13514_v43 = vmul.f32 %v23387_v28, %v13311_v57  ;;  %19216 = vrcp.f32 %v13203_v2  ;;  %v13221_v15 = vpop.xlane.xlu0 %13220 }
 0xae9   : > { %v19207_v11 = vpop.eup %19206  ;;  %v13500_v56 = vmul.f32 %v23361_v10, %v13283_v41 }
 0xaea   : > { %v13248_v42 = vpop.xlane.xlu1 %13247  ;;  %v19023_v61 = vpack.i.bf16 %v13498_v0, %v13514_v43  ;;  %v19209_v38 = vpop.eup %19208  ;;  %v13317_v2 = vmul.f32 %v19207_v11, %v23549_v49  ;;  %v24281_v43 = vld [vmem:[#allocation87_spill] sm:$0xff] }
 0xaeb   : > { %19218 = vrcp.f32 %v13248_v42  ;;  %v13285_v52 = vmul.f32 %v19209_v38, %v23457_v27 }
 0xaec   : > { %19024 = vxpose.xlu0.b32.cont [5/16] (narrow) %v19023_v61, 8  ;;  %19220 = vrcp.f32 %v23599_v32  ;;  %v13517_v26 = vmul.f32 %v23401_v36, %v13317_v2  ;;  %v13218_v5 = vpop.xlane.xlu0 %13217  ;;  %v24285_v2 = vld [vmem:[#allocation91_spill] sm:$0xff] }
 0xaed   : > { %v19211_v46 = vpop.eup %19210  ;;  %v13501_v32 = vmul.f32 %v23373_v21, %v13285_v52 }
 0xaee   : > { %v13257_v28 = vpop.xlane.xlu1 %13256  ;;  %v13315_v4 = vmul.f32 %v19211_v46, %v23554_v30  ;;  %v19213_v37 = vpop.eup %19212 }
 0xaef   : > { %19222 = vrcp.f32 %v13257_v28  ;;  %v13287_v50 = vmul.f32 %v19213_v37, %v23480_v3  ;;  %v19029_v48 = vpack.i.bf16 %v13501_v32, %v13517_v26  ;;  %v24289_v32 = vld [vmem:[#allocation71_spill] sm:$0xff] }
 0xaf0   : > { %19026 = vxpose.xlu0.b32.cont [6/16] (narrow) %v19025_v60, 8  ;;  %v13516_v13 = vmul.f32 %v23405_v9, %v13315_v4  ;;  %19224 = vrcp.f32 %v13209_v6 }
 0xaf1   : > { %v19215_v30 = vpop.eup %19214  ;;  %v13502_v36 = vmul.f32 %v24277_v31, %v13287_v50  ;;  %v24293_v31 = vld [vmem:[#allocation94_spill] sm:$0xff] }
 0xaf2   : > { %v13254_v62 = vpop.xlane.xlu1 %13253  ;;  %v19027_v63 = vpack.i.bf16 %v13500_v56, %v13516_v13  ;;  %v19217_v49 = vpop.eup %19216  ;;  %v13321_v33 = vmul.f32 %v19215_v30, %v23559_v24  ;;  %v24280_v24 = vld [vmem:[#allocation84_spill] sm:$0xff]  ;;  %v24286_v56 = vld [vmem:[#allocation93_spill] sm:$0xff] }
 0xaf3   : > { %19226 = vrcp.f32 %v13254_v62  ;;  %v13289_v18 = vmul.f32 %v19217_v49, %v23473_v34 }
 0xaf4   : > { %19028 = vxpose.xlu0.b32.cont [7/16] (narrow) %v19027_v63, 8  ;;  %19228 = vrcp.f32 %v13212_v58  ;;  %v13519_v8 = vmul.f32 %v24279_v47, %v13321_v33  ;;  %v24287_v63 = vld [vmem:[#allocation92_spill] sm:$0xff]  ;;  %v24292_v33 = vld [vmem:[#allocation39_spill] sm:$0xff] }
 0xaf5   : > { %v19219_v10 = vpop.eup %19218  ;;  %v13503_v6 = vmul.f32 %v24280_v24, %v13289_v18 }
 0xaf6   : > { %v13263_v9 = vpop.xlane.xlu1 %13262  ;;  %v13319_v27 = vmul.f32 %v19219_v10, %v23564_v29  ;;  %v19221_v1 = vpop.eup %19220  ;;  %v24290_v10 = vld [vmem:[#allocation38_spill] sm:$0xff] }
 0xaf7   : > { %19230 = vrcp.f32 %v13263_v9  ;;  %v13291_v51 = vmul.f32 %v19221_v1, %v23494_v17  ;;  %v19033_v25 = vpack.i.bf16 %v13503_v6, %v13519_v8  ;;  %v24283_v17 = vld [vmem:[#allocation88_spill] sm:$0xff]  ;;  %v24291_v9 = vld [vmem:[#allocation37_spill] sm:$0xff] }
 0xaf8   : > { %19030 = vxpose.xlu0.b32.cont [8/16] (narrow) %v19029_v48, 8  ;;  %v13518_v7 = vmul.f32 %v24278_v20, %v13319_v27  ;;  %19232 = vrcp.f32 %v13215_v14  ;;  %v24295_v1 = vld [vmem:[#allocation40_spill] sm:$0xff] }
 0xaf9   : > { %v19223_v44 = vpop.eup %19222  ;;  %v13504_v19 = vmul.f32 %v24281_v43, %v13291_v51 }
 0xafa   : > { %v13260_v21 = vpop.xlane.xlu1 %13259  ;;  %v19031_v3 = vpack.i.bf16 %v13502_v36, %v13518_v7  ;;  %v19225_v29 = vpop.eup %19224  ;;  %v13325_v0 = vmul.f32 %v19223_v44, %v23569_v53  ;;  %v24294_v7 = vld [vmem:[#allocation70_spill] sm:$0xff] }
 0xafb   : > { %19234 = vrcp.f32 %v13260_v21  ;;  %v13293_v42 = vmul.f32 %v19225_v29, %v23487_v55 }
 0xafc   : > { %19032 = vxpose.xlu0.b32.cont [9/16] (narrow) %v19031_v3, 8  ;;  %19236 = vrcp.f32 %v13218_v5  ;;  %v13521_v38 = vmul.f32 %v24283_v17, %v13325_v0 }
 0xafd   : > { %v19227_v40 = vpop.eup %19226 }
 0xafe   : > { %v13269_v57 = vpop.xlane.xlu1 %13268  ;;  %v13323_v34 = vmul.f32 %v19227_v40, %v23574_v54  ;;  %v19229_v61 = vpop.eup %19228  ;;  %v24284_v54 = vld [vmem:[#allocation86_spill] sm:$0xff] }
 0xaff   : > { %19238 = vrcp.f32 %v13269_v57  ;;  %v13505_v53 = vmul.f32 %v24284_v54, %v13293_v42  ;;  %v13295_v46 = vmul.f32 %v19229_v61, %v23513_v35  ;;  %v24288_v35 = vld [vmem:[#allocation89_spill] sm:$0xff] }
 0xb00   : > { %19034 = vxpose.xlu0.b32.cont [10/16] (narrow) %v19033_v25, 8  ;;  %v13520_v14 = vmul.f32 %v24282_v23, %v13323_v34  ;;  %v13730_v34 = vld [vmem:[%s23706_s12] sm:$0xff] }
 0xb01   : > { %v19231_v22 = vpop.eup %19230  ;;  %v19037_v60 = vpack.i.bf16 %v13505_v53, %v13521_v38  ;;  %v13506_v58 = vmul.f32 %v24285_v2, %v13295_v46 }
 0xb02   : > { %v13266_v45 = vpop.xlane.xlu1 %13265  ;;  %v19035_v11 = vpack.i.bf16 %v13504_v19, %v13520_v14  ;;  %v19233_v41 = vpop.eup %19232  ;;  %v13329_v55 = vmul.f32 %v19231_v22, %v23578_v16 }
 0xb03   : > { %19240 = vrcp.f32 %v13266_v45  ;;  %v13297_v52 = vmul.f32 %v19233_v41, %v23503_v39 }
 0xb04   : > { %19036 = vxpose.xlu0.b32.cont [11/16] (narrow) %v19035_v11, 8  ;;  %19242 = vrcp.f32 %v13221_v15  ;;  %v13523_v26 = vmul.f32 %v24287_v63, %v13329_v55 }
 0xb05   : > { %v19235_v28 = vpop.eup %19234  ;;  %v13507_v49 = vmul.f32 %v24288_v35, %v13297_v52 }
 0xb06   : > { %v13327_v4 = vmul.f32 %v19235_v28, %v23582_v12  ;;  %v19237_v37 = vpop.eup %19236  ;;  %v13412_v20 = vpop.permute.xlu1 %13411 }
 0xb07   : > { %v13299_v50 = vmul.f32 %v19237_v37, %v24289_v32  ;;  %v19041_v15 = vpack.i.bf16 %v13507_v49, %v13523_v26 }
 0xb08   : > { %19038 = vxpose.xlu0.b32.cont [12/16] (narrow) %v19037_v60, 8  ;;  %v13522_v13 = vmul.f32 %v24286_v56, %v13327_v4 }
 0xb09   : > { %v19239_v30 = vpop.eup %19238  ;;  %v13508_v39 = vmul.f32 %v24292_v33, %v13299_v50 }
 0xb0a   : > { %v19039_v62 = vpack.i.bf16 %v13506_v58, %v13522_v13  ;;  %v13333_v16 = vmul.f32 %v19239_v30, %v24290_v10 }
 0xb0c   : > { %19040 = vxpose.xlu0.b32.cont [13/16] (narrow) %v19039_v62, 8  ;;  %v13525_v21 = vmul.f32 %v24295_v1, %v13333_v16 }
 0xb0d   : > { %v19241_v12 = vpop.eup %19240 }
 0xb0e   : > { %v13331_v48 = vmul.f32 %v19241_v12, %v24291_v9  ;;  %v19243_v27 = vpop.eup %19242 }
 0xb0f   : > { %v13301_v18 = vmul.f32 %v19243_v27, %v24294_v7 }
 0xb10   : > { %19042 = vxpose.xlu0.b32.cont [14/16] (narrow) %v19041_v15, 8  ;;  %v13524_v36 = vmul.f32 %v24293_v31, %v13331_v48 }
 0xb11   : > { %v13509_v47 = vmul.f32 %v13412_v20, %v13301_v18 }
 0xb12   : > { %v19043_v3 = vpack.i.bf16 %v13508_v39, %v13524_v36 }
 0xb13   : > { %v19045_v8 = vpack.i.bf16 %v13509_v47, %v13525_v21 }
 0xb14   : > { %19044 = vxpose.xlu0.b32.cont [15/16] (narrow) %v19043_v3, 8 }
 0xb18   : > { %19046 = vxpose.xlu0.b32.end [16/16] (narrow) %v19045_v8, 8 }
 0xb5c   : > { %v19047_v44 = vpop.trf.xlu0 }
 0xb5d   : > { %v19051_v29 = vunpack.i.h.bf16 %v19047_v44  ;;  %v19048_v5 = vunpack.i.l.bf16 %v19047_v44 }
 0xb5f   : > { %13654 = vmatprep.mubr.f32.mxu1 %v19048_v5 }
 0xb60   : > { %13655 = vmatmul.mubr.f32.vlgmr.msra.gmra.mrb[134].mxu1 %v19051_v29 }
 0xb61   : > { %18144 = vmatpush3.bf16.msra.mxu1 %v19261_v59  ;;  %13724 = vmatprep.mubr.f32.mxu1 %v19048_v5 }
 0xb62   : > { %18145 = vmatprep.subr.bf16.mxu1 %v19261_v59 }
 0xb65   : > { %18146 = vmatpush3.bf16.msra.mxu1 %v19261_v59 }
 0xb66   : > { %18147 = vmatprep.subr.bf16.mxu1 %v19261_v59 }
 0xb69   : > { %18148 = vmatpush3.bf16.msra.mxu1 %v19261_v59 }
 0xb6a   : > { %18149 = vmatprep.subr.bf16.mxu1 %v19261_v59 }
 0xb6d   : > { %18150 = vmatpush3.bf16.msra.mxu1 %v19261_v59 }
 0xb6e   : > { %18151 = vmatprep.subr.bf16.mxu1 %v19261_v59 }
 0xb71   : > { %18152 = vmatpush3.bf16.msra.mxu1 %v19261_v59 }
 0xb72   : > { %18153 = vmatprep.subr.bf16.mxu1 %v19261_v59 }
 0xb75   : > { %18154 = vmatpush3.bf16.msra.mxu1 %v19261_v59 }
 0xb76   : > { %18155 = vmatprep.subr.bf16.mxu1 %v19261_v59 }
 0xb79   : > { %18156 = vmatpush3.bf16.msra.mxu1 %v19261_v59 }
 0xb7a   : > { %18157 = vmatprep.subr.bf16.mxu1 %v19261_v59 }
 0xb7d   : > { %18158 = vmatpush3.bf16.msra.mxu1 %v19261_v59 }
 0xb80   : > { %13725 = vmatmul.mubr.f32.vlgmr.msra.gmra.mrb[136].mxu1 %v19051_v29 }
 0xc33   : > { %v16091_v24 = vpop.f32.mrb[134].mxu1 }
 0xc34   : > { %v16092_v6 = vpop.f32.mrb[135].mxu1 }
 0xc35   : > { %v16093_v51 = vadd.f32 %v16092_v6, %v16091_v24 }
 0xc53   : > { %v16126_v40 = vpop.f32.mrb[136].mxu1 }
 0xc54   : > { %v16127_v57 = vpop.f32.mrb[137].mxu1 }
 0xc55   : > { %v16128_v25 = vadd.f32 %v16127_v57, %v16126_v40 }
 0xc57   : > { %13733 = vperm.xlu1 %19013, %v16128_v25  }
 0xcd6   : > { %v13734_v0 = vpop.permute.xlu1 %13733 }
 0xcd7   : > { %v13736_v43 = vmul.f32 %v13734_v0, %v13730_v34 }
 0xcd9   : > { %v13737_v19 = vsub.f32 %v16093_v51, %v13736_v43 }
 0xcdb   : > { %v13738_v23 = vmul.f32 %v13737_v19, %v13737_v19 }
 0xcdd   : > { %v13739_v14 = vsel %vm441_vm1, %v13738_v23, 0.0 }
 0xcde   : > { %13740 = vadd.xlane.f32.xlu1 %v13739_v14 }
 0xd6b   : > { %v13741_v59 = vpop.xlane.xlu1 %13740 }
 0xd6c   : > { %v13742_v42 = vmax.f32 %v13741_v59, 1e-24 }
 0xd6e   : > { %19244 = vrsqrt.f32 %v13742_v42 }
 0xd78   : > { %v19245_v61 = vpop.eup %19244 }
 0xd79   : > { %v13744_v45 = vmul.f32 %v19245_v61, %v13737_v19 }
 0xd7b   : > { %v13745_v11 = vmul.f32 %v13744_v45, %v13744_v45 }
 0xd7d   : > { %v13746_v17 = vsel %vm441_vm1, %v13745_v11, 0.0 }
 0xd7e   : > { %13747 = vadd.xlane.f32.xlu1 %v13746_v17 }
 0xe0b   : > { %v13748_v38 = vpop.xlane.xlu1 %13747 }
 0xe0c   : > { %v13749_v22 = vrot.slane %v13748_v38, 4 }
 0xe0e   : > { %v13750_v41 = vadd.f32 %v13749_v22, %v13748_v38 }
 0xe10   : > { %v13751_v54 = vrot.slane %v13750_v41, 2 }
 0xe12   : > { %v13752_v53 = vadd.f32 %v13751_v54, %v13750_v41 }
 0xe14   : > { %v13753_v46 = vrot.slane %v13752_v53, 1 }
 0xe16   : > { %v13754_v28 = vadd.f32 %v13753_v46, %v13752_v53 }
 0xe18   : > { %18995 = vpush %v13754_v28 }
 0xe49   : > { %s18996_s30 = spop %18995 }
 0xe4a   : > { %s13756_s15 = smax.f32 %s19262_s10, %s18996_s30 }
 0xe4b   : > { %v13757_v60 = vstv %s13756_s15 }
 0xe4c   : > { %19246 = vrsqrt.f32 %v13757_v60 }
 0xe56   : > { %v19247_v4 = vpop.eup %19246 }
 0xe57   : > { %18997 = vpush %v19247_v4 }
 0xe88   : > { %s18998_s14 = spop %18997 }
 0xe89   : > { %v13760_v55 = vstv %s18998_s14 }
 0xe8a   : > { %v13761_v2 = vmul.f32 %v13760_v55, %v13744_v45 }
 0xe8c   : > { %13762 = vst.msk [vmem:[%s440_s19] sm:$0xff] %vm441_vm1, %v13761_v2 }
 0xe8d PF: > { %s25_s27 = sadd.s32 1, %s19255_s27  }
 0xe8e   : > { %p22_p4 = scmp.ge.s32.totalorder %s25_s27, 4  }
 0xe90   :  { %24 = sbr.rel (!%p22_p4) target bundleno = 3 (0x3), region = 132 }

</bundles_post_ra>
